<compile_context>
chip_gen: v5e
topology: v5e:2x2
jax: 0.10.0
libtpu: 0.0.40
codegen_flags: <defaults>
</compile_context>

<pallas_src>
import jax
import jax.numpy as jnp
from jax.experimental import pallas as pl
from jax.experimental.pallas import tpu as pltpu

NUM_CLASSES = 4   # len(train_dataset.classes) is data-dependent; fixed to 4 here
HIDDEN = 128
IMG = 16          # small spatial size -> flatten size 64*2*2 = 256
OUT_PAD = 128     # fc2 output padded to a full 128-lane slab (unmasked stores)


# --------------------------- in-kernel building blocks ------------------------

def _conv3x3_relu(x, w_ref, b_ref):
    """3x3 'valid' conv + ReLU.  x: (B, H, W, Cin) NHWC value, w_ref: (9, Cin, Cout)."""
    B, H, W, Cin = x.shape
    Cout = w_ref.shape[-1]
    Ho, Wo = H - 2, W - 2
    acc = None
    for t in range(9):                                   # 9 accumulated tap matmuls
        a, bb = divmod(t, 3)
        xs = x[:, a:a + Ho, bb:bb + Wo, :].reshape(B * Ho, Wo, Cin)
        wb = jnp.broadcast_to(w_ref[t], (B * Ho, Cin, Cout))
        y = jnp.einsum('nwc,nco->nwo', xs, wb, preferred_element_type=jnp.float32)
        acc = y if acc is None else acc + y
    acc = jnp.maximum(acc + b_ref[...], 0.0)             # bias (1, Cout) broadcasts
    return acc.reshape(B, Ho, Wo, Cout)


def _maxpool2x2(x, sel_ref):
    """MaxPool2d(2,2) with floor.  x: (B, H, W, C); sel_ref: (2, W//2, W) 0/1 selectors."""
    B, H, W, C = x.shape
    P, Q = H // 2, W // 2
    xr = x[:, :2 * P].reshape(B, P, 2, W, C)             # pair rows (major dims only)
    hm = jnp.maximum(xr[:, :, 0], xr[:, :, 1]).reshape(B * P, W, C)
    # column (sublane) pooling via exact selection matmuls: picks cols 2j / 2j+1
    se = jnp.broadcast_to(sel_ref[0], (B * P, Q, W))
    so = jnp.broadcast_to(sel_ref[1], (B * P, Q, W))
    even = jnp.einsum('njw,nwc->njc', se, hm, preferred_element_type=jnp.float32)
    odd = jnp.einsum('njw,nwc->njc', so, hm, preferred_element_type=jnp.float32)
    return jnp.maximum(even, odd).reshape(B, P, Q, C)


# --------------------------- the fused forward kernel -------------------------

def _fused_forward_kernel(x_ref, w1_ref, b1_ref, w2_ref, b2_ref, s1_ref, s2_ref,
                          wih_ref, bl_ref, f1w_ref, f1b_ref, f2w_ref, f2b_ref,
                          out_ref):
    # conv / pool feature extractor (all VMEM-resident)
    x = _conv3x3_relu(x_ref[...], w1_ref, b1_ref)        # (B, 14, 14, 32)
    x = _maxpool2x2(x, s1_ref)                           # (B,  7,  7, 32)
    x = _conv3x3_relu(x, w2_ref, b2_ref)                 # (B,  5,  5, 64)
    x = _maxpool2x2(x, s2_ref)                           # (B,  2,  2, 64)

    B, Ph, Pw, C = x.shape
    G = wih_ref.shape[-1]                                # 3 * HIDDEN  (i, g, o blocks)
    H = G // 3

    # LSTM, single step, zero initial state.  The torch NCHW flatten is folded
    # into the weight layout: wih_ref[p] holds the W_ih rows of spatial position
    # p, so gates = sum_p x[:, p] @ wih[p] + b with no in-kernel flatten.
    acc = None
    for p in range(Ph * Pw):
        hh, ww = divmod(p, Pw)
        xi = x[:, hh][:, ww:ww + 1, :]                   # (B, 1, C)
        wb = jnp.broadcast_to(wih_ref[p], (B, C, G))
        y = jnp.einsum('bkc,bcg->bkg', xi, wb, preferred_element_type=jnp.float32)
        acc = y if acc is None else acc + y
    gates = acc + bl_ref[...]                            # (B, 1, 3H), bias = b_ih + b_hh

    def sigmoid(z):
        # reciprocal goes to the EUP slot instead of a VALU divide
        return pl.reciprocal(1.0 + jnp.exp(-z), approx=True)

    i_g = sigmoid(gates[:, :, 0:H])
    g_g = jnp.tanh(gates[:, :, H:2 * H])
    o_g = sigmoid(gates[:, :, 2 * H:3 * H])
    c = i_g * g_g                                        # f * c0 == 0 (zero init state)
    h = o_g * jnp.tanh(c)                                # (B, 1, H)  == hn[-1]

    # fc1 (+ReLU) and fc2 (zero-padded to 128 lanes -> unmasked stores)
    f1w = jnp.broadcast_to(f1w_ref[...], (B,) + tuple(f1w_ref.shape))
    z = jnp.einsum('bkc,bco->bko', h, f1w, preferred_element_type=jnp.float32)
    z = jnp.maximum(z + f1b_ref[...], 0.0)
    f2w = jnp.broadcast_to(f2w_ref[...], (B,) + tuple(f2w_ref.shape))
    out = jnp.einsum('bkc,bco->bko', z, f2w, preferred_element_type=jnp.float32)
    out_ref[...] = out + f2b_ref[...]                    # (B, 1, 128)


# --------------------------- params (PyTorch layout) --------------------------

def init_params(key):
    ks = jax.random.split(key, 12)

    def rnd(k, shape, scale=0.05):
        return scale * jax.random.normal(k, shape, dtype=jnp.float32)

    # flatten size after conv/pool stack for IMG=16: 16->14->7->5->2 => 64*2*2
    P2 = (((IMG - 2) // 2) - 2) // 2
    F = 64 * P2 * P2
    return dict(
        conv1_w=rnd(ks[0], (32, 3, 3, 3)),   conv1_b=rnd(ks[1], (32,)),
        conv2_w=rnd(ks[2], (64, 32, 3, 3)),  conv2_b=rnd(ks[3], (64,)),
        lstm_w_ih=rnd(ks[4], (4 * HIDDEN, F)),
        lstm_w_hh=rnd(ks[5], (4 * HIDDEN, HIDDEN)),   # dead: seq_len=1, h0=0
        lstm_b_ih=rnd(ks[6], (4 * HIDDEN,)),
        lstm_b_hh=rnd(ks[7], (4 * HIDDEN,)),
        fc1_w=rnd(ks[8], (128, HIDDEN)),     fc1_b=rnd(ks[9], (128,)),
        fc2_w=rnd(ks[10], (NUM_CLASSES, 128)), fc2_b=rnd(ks[11], (NUM_CLASSES,)),
    )


def _pool_selectors(width):
    q = width // 2
    rows = jnp.arange(q)[:, None]
    cols = jnp.arange(width)[None, :]
    even = (cols == 2 * rows).astype(jnp.float32)
    odd = (cols == 2 * rows + 1).astype(jnp.float32)
    return jnp.stack([even, odd], axis=0)                # (2, q, width)


def prepare_params(p):
    """One-time layout conversion from PyTorch weights to the fused-kernel layout."""
    assert NUM_CLASSES <= OUT_PAD
    Hh = HIDDEN
    P2 = (((IMG - 2) // 2) - 2) // 2                     # spatial size after stack (=2)
    C2 = 64

    # conv taps: (Cout, Cin, KH, KW) -> (KH*KW, Cin, Cout)
    w1 = jnp.transpose(p["conv1_w"], (2, 3, 1, 0)).reshape(9, 3, 32)
    w2 = jnp.transpose(p["conv2_w"], (2, 3, 1, 0)).reshape(9, 32, 64)

    # LSTM: keep only i, g, o gate blocks (f is dead for zero c0); bias summed once.
    W_ih = p["lstm_w_ih"]
    bias = p["lstm_b_ih"] + p["lstm_b_hh"]
    W_igo = jnp.concatenate([W_ih[0:Hh], W_ih[2 * Hh:3 * Hh], W_ih[3 * Hh:4 * Hh]], axis=0)
    b_igo = jnp.concatenate([bias[0:Hh], bias[2 * Hh:3 * Hh], bias[3 * Hh:4 * Hh]], axis=0)
    # torch flatten of NCHW features: f = c*P2*P2 + hh*P2 + ww  ->  per-position blocks
    Wt = W_igo.T.reshape(C2, P2, P2, 3 * Hh)
    wblk = jnp.transpose(Wt, (1, 2, 0, 3)).reshape(P2 * P2, C2, 3 * Hh)   # (4, 64, 384)

    # FC weights as (in, out); fc2 zero-padded to a 128-lane output slab.
    fc2_wp = jnp.zeros((HIDDEN, OUT_PAD), jnp.float32).at[:, :NUM_CLASSES].set(p["fc2_w"].T)
    fc2_bp = jnp.zeros((OUT_PAD,), jnp.float32).at[:NUM_CLASSES].set(p["fc2_b"])

    return dict(
        w1=w1, b1=p["conv1_b"].reshape(1, 32),
        w2=w2, b2=p["conv2_b"].reshape(1, 64),
        s1=_pool_selectors(IMG - 2),                     # (2, 7, 14)
        s2=_pool_selectors((IMG - 2) // 2 - 2),          # (2, 2, 5)
        w_ih=wblk, b_lstm=b_igo.reshape(1, 3 * Hh),
        fc1_w=p["fc1_w"].T, fc1_b=p["fc1_b"].reshape(1, 128),
        fc2_w=fc2_wp, fc2_b=fc2_bp.reshape(1, OUT_PAD),
    )


# --------------------------- public forward -----------------------------------

def lstm_model_forward(kparams, x_nchw):
    """Forward pass matching the PyTorch LSTM module (use prepare_params(init_params(...)))."""
    x = jnp.transpose(x_nchw, (0, 2, 3, 1)).astype(jnp.float32)   # NCHW -> NHWC
    B = x.shape[0]
    out = pl.pallas_call(
        _fused_forward_kernel,
        out_shape=jax.ShapeDtypeStruct((B, 1, OUT_PAD), jnp.float32),
        in_specs=[pl.BlockSpec(memory_space=pltpu.MemorySpace.VMEM) for _ in range(13)],
        out_specs=pl.BlockSpec(memory_space=pltpu.MemorySpace.VMEM),
    )(x, kparams["w1"], kparams["b1"], kparams["w2"], kparams["b2"],
      kparams["s1"], kparams["s2"], kparams["w_ih"], kparams["b_lstm"],
      kparams["fc1_w"], kparams["fc1_b"], kparams["fc2_w"], kparams["fc2_b"])
    return out.reshape(B, OUT_PAD)[:, :NUM_CLASSES]


if __name__ == "__main__":
    key = jax.random.PRNGKey(0)
    pkey, xkey = jax.random.split(key)
    params = init_params(pkey)
    kparams = prepare_params(params)
    x = jax.random.normal(xkey, (2, 3, IMG, IMG), dtype=jnp.float32)
    fwd = jax.jit(lstm_model_forward)
    out = fwd(kparams, x)
    out = jax.block_until_ready(out)
    assert out.shape == (2, NUM_CLASSES) and out.dtype == jnp.float32
    print("KERNEL_OK")
</pallas_src>

<mosaic_0001>
module attributes {stable_mosaic.version = 11 : i64} {
  func.func @_fused_forward_kernel(%arg0: memref<2x16x16x3xf32, #tpu.memory_space<vmem>>, %arg1: memref<9x3x32xf32, #tpu.memory_space<vmem>>, %arg2: memref<1x32xf32, #tpu.memory_space<vmem>>, %arg3: memref<9x32x64xf32, #tpu.memory_space<vmem>>, %arg4: memref<1x64xf32, #tpu.memory_space<vmem>>, %arg5: memref<2x7x14xf32, #tpu.memory_space<vmem>>, %arg6: memref<2x2x5xf32, #tpu.memory_space<vmem>>, %arg7: memref<4x64x384xf32, #tpu.memory_space<vmem>>, %arg8: memref<1x384xf32, #tpu.memory_space<vmem>>, %arg9: memref<128x128xf32, #tpu.memory_space<vmem>>, %arg10: memref<1x128xf32, #tpu.memory_space<vmem>>, %arg11: memref<128x128xf32, #tpu.memory_space<vmem>>, %arg12: memref<1x128xf32, #tpu.memory_space<vmem>>, %arg13: memref<2x1x128xf32, #tpu.memory_space<vmem>>) attributes {dimension_semantics = [], scalar_prefetch = 0 : i64, scratch_operands = 0 : i64, tpu.core_type = #tpu.core_type<tc>} {
    %c0 = arith.constant 0 : index
    %c0_0 = arith.constant 0 : index
    %c0_1 = arith.constant 0 : index
    %c0_2 = arith.constant 0 : index
    %0 = vector.load %arg0[%c0, %c0_0, %c0_1, %c0_2] : memref<2x16x16x3xf32, #tpu.memory_space<vmem>>, vector<2x16x16x3xf32>
    %1 = vector.extract_strided_slice %0 {offsets = [0, 0, 0, 0], sizes = [2, 14, 14, 3], strides = [1, 1, 1, 1]} : vector<2x16x16x3xf32> to vector<2x14x14x3xf32>
    %2 = vector.shape_cast %1 : vector<2x14x14x3xf32> to vector<28x14x3xf32>
    %c0_3 = arith.constant 0 : index
    %c0_4 = arith.constant 0 : index
    %c0_5 = arith.constant 0 : index
    %3 = vector.load %arg1[%c0_3, %c0_4, %c0_5] : memref<9x3x32xf32, #tpu.memory_space<vmem>>, vector<1x3x32xf32>
    %4 = vector.shape_cast %3 : vector<1x3x32xf32> to vector<3x32xf32>
    %5 = vector.shape_cast %4 : vector<3x32xf32> to vector<1x3x32xf32>
    %6 = vector.broadcast %5 : vector<1x3x32xf32> to vector<28x3x32xf32>
    "tpu.trace_start"() <{level = 10 : i32, message = "nwc,nco->nwo"}> : () -> ()
    %cst = arith.constant dense<0.000000e+00> : vector<28x14x32xf32>
    %7 = tpu.matmul %2, %6, %cst {dimension_numbers = #tpu.dot_dimension_numbers<[2], [1], [1], [2], [0, 0, 0, 1, 1, 2], [0], [0]>} : vector<28x14x3xf32>, vector<28x3x32xf32>, vector<28x14x32xf32> -> vector<28x14x32xf32>
    "tpu.trace_stop"() : () -> ()
    %8 = vector.extract_strided_slice %0 {offsets = [0, 0, 1, 0], sizes = [2, 14, 14, 3], strides = [1, 1, 1, 1]} : vector<2x16x16x3xf32> to vector<2x14x14x3xf32>
    %9 = vector.shape_cast %8 : vector<2x14x14x3xf32> to vector<28x14x3xf32>
    %c1 = arith.constant 1 : index
    %c0_6 = arith.constant 0 : index
    %c0_7 = arith.constant 0 : index
    %10 = vector.load %arg1[%c1, %c0_6, %c0_7] : memref<9x3x32xf32, #tpu.memory_space<vmem>>, vector<1x3x32xf32>
    %11 = vector.shape_cast %10 : vector<1x3x32xf32> to vector<3x32xf32>
    %12 = vector.shape_cast %11 : vector<3x32xf32> to vector<1x3x32xf32>
    %13 = vector.broadcast %12 : vector<1x3x32xf32> to vector<28x3x32xf32>
    "tpu.trace_start"() <{level = 10 : i32, message = "nwc,nco->nwo"}> : () -> ()
    %cst_8 = arith.constant dense<0.000000e+00> : vector<28x14x32xf32>
    %14 = tpu.matmul %9, %13, %cst_8 {dimension_numbers = #tpu.dot_dimension_numbers<[2], [1], [1], [2], [0, 0, 0, 1, 1, 2], [0], [0]>} : vector<28x14x3xf32>, vector<28x3x32xf32>, vector<28x14x32xf32> -> vector<28x14x32xf32>
    "tpu.trace_stop"() : () -> ()
    %15 = arith.addf %7, %14 : vector<28x14x32xf32>
    %16 = vector.extract_strided_slice %0 {offsets = [0, 0, 2, 0], sizes = [2, 14, 14, 3], strides = [1, 1, 1, 1]} : vector<2x16x16x3xf32> to vector<2x14x14x3xf32>
    %17 = vector.shape_cast %16 : vector<2x14x14x3xf32> to vector<28x14x3xf32>
    %c2 = arith.constant 2 : index
    %c0_9 = arith.constant 0 : index
    %c0_10 = arith.constant 0 : index
    %18 = vector.load %arg1[%c2, %c0_9, %c0_10] : memref<9x3x32xf32, #tpu.memory_space<vmem>>, vector<1x3x32xf32>
    %19 = vector.shape_cast %18 : vector<1x3x32xf32> to vector<3x32xf32>
    %20 = vector.shape_cast %19 : vector<3x32xf32> to vector<1x3x32xf32>
    %21 = vector.broadcast %20 : vector<1x3x32xf32> to vector<28x3x32xf32>
    "tpu.trace_start"() <{level = 10 : i32, message = "nwc,nco->nwo"}> : () -> ()
    %cst_11 = arith.constant dense<0.000000e+00> : vector<28x14x32xf32>
    %22 = tpu.matmul %17, %21, %cst_11 {dimension_numbers = #tpu.dot_dimension_numbers<[2], [1], [1], [2], [0, 0, 0, 1, 1, 2], [0], [0]>} : vector<28x14x3xf32>, vector<28x3x32xf32>, vector<28x14x32xf32> -> vector<28x14x32xf32>
    "tpu.trace_stop"() : () -> ()
    %23 = arith.addf %15, %22 : vector<28x14x32xf32>
    %24 = vector.extract_strided_slice %0 {offsets = [0, 1, 0, 0], sizes = [2, 14, 14, 3], strides = [1, 1, 1, 1]} : vector<2x16x16x3xf32> to vector<2x14x14x3xf32>
    %25 = vector.shape_cast %24 : vector<2x14x14x3xf32> to vector<28x14x3xf32>
    %c3 = arith.constant 3 : index
    %c0_12 = arith.constant 0 : index
    %c0_13 = arith.constant 0 : index
    %26 = vector.load %arg1[%c3, %c0_12, %c0_13] : memref<9x3x32xf32, #tpu.memory_space<vmem>>, vector<1x3x32xf32>
    %27 = vector.shape_cast %26 : vector<1x3x32xf32> to vector<3x32xf32>
    %28 = vector.shape_cast %27 : vector<3x32xf32> to vector<1x3x32xf32>
    %29 = vector.broadcast %28 : vector<1x3x32xf32> to vector<28x3x32xf32>
    "tpu.trace_start"() <{level = 10 : i32, message = "nwc,nco->nwo"}> : () -> ()
    %cst_14 = arith.constant dense<0.000000e+00> : vector<28x14x32xf32>
    %30 = tpu.matmul %25, %29, %cst_14 {dimension_numbers = #tpu.dot_dimension_numbers<[2], [1], [1], [2], [0, 0, 0, 1, 1, 2], [0], [0]>} : vector<28x14x3xf32>, vector<28x3x32xf32>, vector<28x14x32xf32> -> vector<28x14x32xf32>
    "tpu.trace_stop"() : () -> ()
    %31 = arith.addf %23, %30 : vector<28x14x32xf32>
    %32 = vector.extract_strided_slice %0 {offsets = [0, 1, 1, 0], sizes = [2, 14, 14, 3], strides = [1, 1, 1, 1]} : vector<2x16x16x3xf32> to vector<2x14x14x3xf32>
    %33 = vector.shape_cast %32 : vector<2x14x14x3xf32> to vector<28x14x3xf32>
    %c4 = arith.constant 4 : index
    %c0_15 = arith.constant 0 : index
    %c0_16 = arith.constant 0 : index
    %34 = vector.load %arg1[%c4, %c0_15, %c0_16] : memref<9x3x32xf32, #tpu.memory_space<vmem>>, vector<1x3x32xf32>
    %35 = vector.shape_cast %34 : vector<1x3x32xf32> to vector<3x32xf32>
    %36 = vector.shape_cast %35 : vector<3x32xf32> to vector<1x3x32xf32>
    %37 = vector.broadcast %36 : vector<1x3x32xf32> to vector<28x3x32xf32>
    "tpu.trace_start"() <{level = 10 : i32, message = "nwc,nco->nwo"}> : () -> ()
    %cst_17 = arith.constant dense<0.000000e+00> : vector<28x14x32xf32>
    %38 = tpu.matmul %33, %37, %cst_17 {dimension_numbers = #tpu.dot_dimension_numbers<[2], [1], [1], [2], [0, 0, 0, 1, 1, 2], [0], [0]>} : vector<28x14x3xf32>, vector<28x3x32xf32>, vector<28x14x32xf32> -> vector<28x14x32xf32>
    "tpu.trace_stop"() : () -> ()
    %39 = arith.addf %31, %38 : vector<28x14x32xf32>
    %40 = vector.extract_strided_slice %0 {offsets = [0, 1, 2, 0], sizes = [2, 14, 14, 3], strides = [1, 1, 1, 1]} : vector<2x16x16x3xf32> to vector<2x14x14x3xf32>
    %41 = vector.shape_cast %40 : vector<2x14x14x3xf32> to vector<28x14x3xf32>
    %c5 = arith.constant 5 : index
    %c0_18 = arith.constant 0 : index
    %c0_19 = arith.constant 0 : index
    %42 = vector.load %arg1[%c5, %c0_18, %c0_19] : memref<9x3x32xf32, #tpu.memory_space<vmem>>, vector<1x3x32xf32>
    %43 = vector.shape_cast %42 : vector<1x3x32xf32> to vector<3x32xf32>
    %44 = vector.shape_cast %43 : vector<3x32xf32> to vector<1x3x32xf32>
    %45 = vector.broadcast %44 : vector<1x3x32xf32> to vector<28x3x32xf32>
    "tpu.trace_start"() <{level = 10 : i32, message = "nwc,nco->nwo"}> : () -> ()
    %cst_20 = arith.constant dense<0.000000e+00> : vector<28x14x32xf32>
    %46 = tpu.matmul %41, %45, %cst_20 {dimension_numbers = #tpu.dot_dimension_numbers<[2], [1], [1], [2], [0, 0, 0, 1, 1, 2], [0], [0]>} : vector<28x14x3xf32>, vector<28x3x32xf32>, vector<28x14x32xf32> -> vector<28x14x32xf32>
    "tpu.trace_stop"() : () -> ()
    %47 = arith.addf %39, %46 : vector<28x14x32xf32>
    %48 = vector.extract_strided_slice %0 {offsets = [0, 2, 0, 0], sizes = [2, 14, 14, 3], strides = [1, 1, 1, 1]} : vector<2x16x16x3xf32> to vector<2x14x14x3xf32>
    %49 = vector.shape_cast %48 : vector<2x14x14x3xf32> to vector<28x14x3xf32>
    %c6 = arith.constant 6 : index
    %c0_21 = arith.constant 0 : index
    %c0_22 = arith.constant 0 : index
    %50 = vector.load %arg1[%c6, %c0_21, %c0_22] : memref<9x3x32xf32, #tpu.memory_space<vmem>>, vector<1x3x32xf32>
    %51 = vector.shape_cast %50 : vector<1x3x32xf32> to vector<3x32xf32>
    %52 = vector.shape_cast %51 : vector<3x32xf32> to vector<1x3x32xf32>
    %53 = vector.broadcast %52 : vector<1x3x32xf32> to vector<28x3x32xf32>
    "tpu.trace_start"() <{level = 10 : i32, message = "nwc,nco->nwo"}> : () -> ()
    %cst_23 = arith.constant dense<0.000000e+00> : vector<28x14x32xf32>
    %54 = tpu.matmul %49, %53, %cst_23 {dimension_numbers = #tpu.dot_dimension_numbers<[2], [1], [1], [2], [0, 0, 0, 1, 1, 2], [0], [0]>} : vector<28x14x3xf32>, vector<28x3x32xf32>, vector<28x14x32xf32> -> vector<28x14x32xf32>
    "tpu.trace_stop"() : () -> ()
    %55 = arith.addf %47, %54 : vector<28x14x32xf32>
    %56 = vector.extract_strided_slice %0 {offsets = [0, 2, 1, 0], sizes = [2, 14, 14, 3], strides = [1, 1, 1, 1]} : vector<2x16x16x3xf32> to vector<2x14x14x3xf32>
    %57 = vector.shape_cast %56 : vector<2x14x14x3xf32> to vector<28x14x3xf32>
    %c7 = arith.constant 7 : index
    %c0_24 = arith.constant 0 : index
    %c0_25 = arith.constant 0 : index
    %58 = vector.load %arg1[%c7, %c0_24, %c0_25] : memref<9x3x32xf32, #tpu.memory_space<vmem>>, vector<1x3x32xf32>
    %59 = vector.shape_cast %58 : vector<1x3x32xf32> to vector<3x32xf32>
    %60 = vector.shape_cast %59 : vector<3x32xf32> to vector<1x3x32xf32>
    %61 = vector.broadcast %60 : vector<1x3x32xf32> to vector<28x3x32xf32>
    "tpu.trace_start"() <{level = 10 : i32, message = "nwc,nco->nwo"}> : () -> ()
    %cst_26 = arith.constant dense<0.000000e+00> : vector<28x14x32xf32>
    %62 = tpu.matmul %57, %61, %cst_26 {dimension_numbers = #tpu.dot_dimension_numbers<[2], [1], [1], [2], [0, 0, 0, 1, 1, 2], [0], [0]>} : vector<28x14x3xf32>, vector<28x3x32xf32>, vector<28x14x32xf32> -> vector<28x14x32xf32>
    "tpu.trace_stop"() : () -> ()
    %63 = arith.addf %55, %62 : vector<28x14x32xf32>
    %64 = vector.extract_strided_slice %0 {offsets = [0, 2, 2, 0], sizes = [2, 14, 14, 3], strides = [1, 1, 1, 1]} : vector<2x16x16x3xf32> to vector<2x14x14x3xf32>
    %65 = vector.shape_cast %64 : vector<2x14x14x3xf32> to vector<28x14x3xf32>
    %c8 = arith.constant 8 : index
    %c0_27 = arith.constant 0 : index
    %c0_28 = arith.constant 0 : index
    %66 = vector.load %arg1[%c8, %c0_27, %c0_28] : memref<9x3x32xf32, #tpu.memory_space<vmem>>, vector<1x3x32xf32>
    %67 = vector.shape_cast %66 : vector<1x3x32xf32> to vector<3x32xf32>
    %68 = vector.shape_cast %67 : vector<3x32xf32> to vector<1x3x32xf32>
    %69 = vector.broadcast %68 : vector<1x3x32xf32> to vector<28x3x32xf32>
    "tpu.trace_start"() <{level = 10 : i32, message = "nwc,nco->nwo"}> : () -> ()
    %cst_29 = arith.constant dense<0.000000e+00> : vector<28x14x32xf32>
    %70 = tpu.matmul %65, %69, %cst_29 {dimension_numbers = #tpu.dot_dimension_numbers<[2], [1], [1], [2], [0, 0, 0, 1, 1, 2], [0], [0]>} : vector<28x14x3xf32>, vector<28x3x32xf32>, vector<28x14x32xf32> -> vector<28x14x32xf32>
    "tpu.trace_stop"() : () -> ()
    %71 = arith.addf %63, %70 : vector<28x14x32xf32>
    %c0_30 = arith.constant 0 : index
    %c0_31 = arith.constant 0 : index
    %72 = vector.load %arg2[%c0_30, %c0_31] : memref<1x32xf32, #tpu.memory_space<vmem>>, vector<1x32xf32>
    %73 = vector.shape_cast %72 : vector<1x32xf32> to vector<1x1x32xf32>
    %74 = vector.broadcast %73 : vector<1x1x32xf32> to vector<28x14x32xf32>
    %75 = arith.addf %71, %74 : vector<28x14x32xf32>
    %cst_32 = arith.constant 0.000000e+00 : f32
    %76 = vector.broadcast %cst_32 : f32 to vector<28x14x32xf32>
    %77 = arith.maximumf %75, %76 : vector<28x14x32xf32>
    %78 = vector.shape_cast %77 : vector<28x14x32xf32> to vector<2x14x14x32xf32>
    %79 = vector.shape_cast %78 : vector<2x14x14x32xf32> to vector<2x7x2x14x32xf32>
    %80 = vector.extract_strided_slice %79 {offsets = [0, 0, 0, 0, 0], sizes = [2, 7, 1, 14, 32], strides = [1, 1, 1, 1, 1]} : vector<2x7x2x14x32xf32> to vector<2x7x1x14x32xf32>
    %81 = vector.shape_cast %80 : vector<2x7x1x14x32xf32> to vector<2x7x14x32xf32>
    %82 = vector.extract_strided_slice %79 {offsets = [0, 0, 1, 0, 0], sizes = [2, 7, 1, 14, 32], strides = [1, 1, 1, 1, 1]} : vector<2x7x2x14x32xf32> to vector<2x7x1x14x32xf32>
    %83 = vector.shape_cast %82 : vector<2x7x1x14x32xf32> to vector<2x7x14x32xf32>
    %84 = arith.maximumf %81, %83 : vector<2x7x14x32xf32>
    %85 = vector.shape_cast %84 : vector<2x7x14x32xf32> to vector<14x14x32xf32>
    %c0_33 = arith.constant 0 : index
    %c0_34 = arith.constant 0 : index
    %c0_35 = arith.constant 0 : index
    %86 = vector.load %arg5[%c0_33, %c0_34, %c0_35] : memref<2x7x14xf32, #tpu.memory_space<vmem>>, vector<1x7x14xf32>
    %87 = vector.shape_cast %86 : vector<1x7x14xf32> to vector<7x14xf32>
    %88 = vector.shape_cast %87 : vector<7x14xf32> to vector<1x7x14xf32>
    %89 = vector.broadcast %88 : vector<1x7x14xf32> to vector<14x7x14xf32>
    %c1_36 = arith.constant 1 : index
    %c0_37 = arith.constant 0 : index
    %c0_38 = arith.constant 0 : index
    %90 = vector.load %arg5[%c1_36, %c0_37, %c0_38] : memref<2x7x14xf32, #tpu.memory_space<vmem>>, vector<1x7x14xf32>
    %91 = vector.shape_cast %90 : vector<1x7x14xf32> to vector<7x14xf32>
    %92 = vector.shape_cast %91 : vector<7x14xf32> to vector<1x7x14xf32>
    %93 = vector.broadcast %92 : vector<1x7x14xf32> to vector<14x7x14xf32>
    "tpu.trace_start"() <{level = 10 : i32, message = "njw,nwc->njc"}> : () -> ()
    %cst_39 = arith.constant dense<0.000000e+00> : vector<14x7x32xf32>
    %94 = tpu.matmul %89, %85, %cst_39 {dimension_numbers = #tpu.dot_dimension_numbers<[2], [1], [1], [2], [0, 0, 0, 1, 1, 2], [0], [0]>} : vector<14x7x14xf32>, vector<14x14x32xf32>, vector<14x7x32xf32> -> vector<14x7x32xf32>
    %cst_40 = arith.constant dense<0.000000e+00> : vector<14x7x32xf32>
    %95 = tpu.matmul %93, %85, %cst_40 {dimension_numbers = #tpu.dot_dimension_numbers<[2], [1], [1], [2], [0, 0, 0, 1, 1, 2], [0], [0]>} : vector<14x7x14xf32>, vector<14x14x32xf32>, vector<14x7x32xf32> -> vector<14x7x32xf32>
    "tpu.trace_stop"() : () -> ()
    %96 = arith.maximumf %94, %95 : vector<14x7x32xf32>
    %97 = vector.shape_cast %96 : vector<14x7x32xf32> to vector<2x7x7x32xf32>
    %98 = vector.extract_strided_slice %97 {offsets = [0, 0, 0, 0], sizes = [2, 5, 5, 32], strides = [1, 1, 1, 1]} : vector<2x7x7x32xf32> to vector<2x5x5x32xf32>
    %99 = vector.shape_cast %98 : vector<2x5x5x32xf32> to vector<10x5x32xf32>
    %c0_41 = arith.constant 0 : index
    %c0_42 = arith.constant 0 : index
    %c0_43 = arith.constant 0 : index
    %100 = vector.load %arg3[%c0_41, %c0_42, %c0_43] : memref<9x32x64xf32, #tpu.memory_space<vmem>>, vector<1x32x64xf32>
    %101 = vector.shape_cast %100 : vector<1x32x64xf32> to vector<32x64xf32>
    %102 = vector.shape_cast %101 : vector<32x64xf32> to vector<1x32x64xf32>
    %103 = vector.broadcast %102 : vector<1x32x64xf32> to vector<10x32x64xf32>
    "tpu.trace_start"() <{level = 10 : i32, message = "nwc,nco->nwo"}> : () -> ()
    %cst_44 = arith.constant dense<0.000000e+00> : vector<10x5x64xf32>
    %104 = tpu.matmul %99, %103, %cst_44 {dimension_numbers = #tpu.dot_dimension_numbers<[2], [1], [1], [2], [0, 0, 0, 1, 1, 2], [0], [0]>} : vector<10x5x32xf32>, vector<10x32x64xf32>, vector<10x5x64xf32> -> vector<10x5x64xf32>
    "tpu.trace_stop"() : () -> ()
    %105 = vector.extract_strided_slice %97 {offsets = [0, 0, 1, 0], sizes = [2, 5, 5, 32], strides = [1, 1, 1, 1]} : vector<2x7x7x32xf32> to vector<2x5x5x32xf32>
    %106 = vector.shape_cast %105 : vector<2x5x5x32xf32> to vector<10x5x32xf32>
    %c1_45 = arith.constant 1 : index
    %c0_46 = arith.constant 0 : index
    %c0_47 = arith.constant 0 : index
    %107 = vector.load %arg3[%c1_45, %c0_46, %c0_47] : memref<9x32x64xf32, #tpu.memory_space<vmem>>, vector<1x32x64xf32>
    %108 = vector.shape_cast %107 : vector<1x32x64xf32> to vector<32x64xf32>
    %109 = vector.shape_cast %108 : vector<32x64xf32> to vector<1x32x64xf32>
    %110 = vector.broadcast %109 : vector<1x32x64xf32> to vector<10x32x64xf32>
    "tpu.trace_start"() <{level = 10 : i32, message = "nwc,nco->nwo"}> : () -> ()
    %cst_48 = arith.constant dense<0.000000e+00> : vector<10x5x64xf32>
    %111 = tpu.matmul %106, %110, %cst_48 {dimension_numbers = #tpu.dot_dimension_numbers<[2], [1], [1], [2], [0, 0, 0, 1, 1, 2], [0], [0]>} : vector<10x5x32xf32>, vector<10x32x64xf32>, vector<10x5x64xf32> -> vector<10x5x64xf32>
    "tpu.trace_stop"() : () -> ()
    %112 = arith.addf %104, %111 : vector<10x5x64xf32>
    %113 = vector.extract_strided_slice %97 {offsets = [0, 0, 2, 0], sizes = [2, 5, 5, 32], strides = [1, 1, 1, 1]} : vector<2x7x7x32xf32> to vector<2x5x5x32xf32>
    %114 = vector.shape_cast %113 : vector<2x5x5x32xf32> to vector<10x5x32xf32>
    %c2_49 = arith.constant 2 : index
    %c0_50 = arith.constant 0 : index
    %c0_51 = arith.constant 0 : index
    %115 = vector.load %arg3[%c2_49, %c0_50, %c0_51] : memref<9x32x64xf32, #tpu.memory_space<vmem>>, vector<1x32x64xf32>
    %116 = vector.shape_cast %115 : vector<1x32x64xf32> to vector<32x64xf32>
    %117 = vector.shape_cast %116 : vector<32x64xf32> to vector<1x32x64xf32>
    %118 = vector.broadcast %117 : vector<1x32x64xf32> to vector<10x32x64xf32>
    "tpu.trace_start"() <{level = 10 : i32, message = "nwc,nco->nwo"}> : () -> ()
    %cst_52 = arith.constant dense<0.000000e+00> : vector<10x5x64xf32>
    %119 = tpu.matmul %114, %118, %cst_52 {dimension_numbers = #tpu.dot_dimension_numbers<[2], [1], [1], [2], [0, 0, 0, 1, 1, 2], [0], [0]>} : vector<10x5x32xf32>, vector<10x32x64xf32>, vector<10x5x64xf32> -> vector<10x5x64xf32>
    "tpu.trace_stop"() : () -> ()
    %120 = arith.addf %112, %119 : vector<10x5x64xf32>
    %121 = vector.extract_strided_slice %97 {offsets = [0, 1, 0, 0], sizes = [2, 5, 5, 32], strides = [1, 1, 1, 1]} : vector<2x7x7x32xf32> to vector<2x5x5x32xf32>
    %122 = vector.shape_cast %121 : vector<2x5x5x32xf32> to vector<10x5x32xf32>
    %c3_53 = arith.constant 3 : index
    %c0_54 = arith.constant 0 : index
    %c0_55 = arith.constant 0 : index
    %123 = vector.load %arg3[%c3_53, %c0_54, %c0_55] : memref<9x32x64xf32, #tpu.memory_space<vmem>>, vector<1x32x64xf32>
    %124 = vector.shape_cast %123 : vector<1x32x64xf32> to vector<32x64xf32>
    %125 = vector.shape_cast %124 : vector<32x64xf32> to vector<1x32x64xf32>
    %126 = vector.broadcast %125 : vector<1x32x64xf32> to vector<10x32x64xf32>
    "tpu.trace_start"() <{level = 10 : i32, message = "nwc,nco->nwo"}> : () -> ()
    %cst_56 = arith.constant dense<0.000000e+00> : vector<10x5x64xf32>
    %127 = tpu.matmul %122, %126, %cst_56 {dimension_numbers = #tpu.dot_dimension_numbers<[2], [1], [1], [2], [0, 0, 0, 1, 1, 2], [0], [0]>} : vector<10x5x32xf32>, vector<10x32x64xf32>, vector<10x5x64xf32> -> vector<10x5x64xf32>
    "tpu.trace_stop"() : () -> ()
    %128 = arith.addf %120, %127 : vector<10x5x64xf32>
    %129 = vector.extract_strided_slice %97 {offsets = [0, 1, 1, 0], sizes = [2, 5, 5, 32], strides = [1, 1, 1, 1]} : vector<2x7x7x32xf32> to vector<2x5x5x32xf32>
    %130 = vector.shape_cast %129 : vector<2x5x5x32xf32> to vector<10x5x32xf32>
    %c4_57 = arith.constant 4 : index
    %c0_58 = arith.constant 0 : index
    %c0_59 = arith.constant 0 : index
    %131 = vector.load %arg3[%c4_57, %c0_58, %c0_59] : memref<9x32x64xf32, #tpu.memory_space<vmem>>, vector<1x32x64xf32>
    %132 = vector.shape_cast %131 : vector<1x32x64xf32> to vector<32x64xf32>
    %133 = vector.shape_cast %132 : vector<32x64xf32> to vector<1x32x64xf32>
    %134 = vector.broadcast %133 : vector<1x32x64xf32> to vector<10x32x64xf32>
    "tpu.trace_start"() <{level = 10 : i32, message = "nwc,nco->nwo"}> : () -> ()
    %cst_60 = arith.constant dense<0.000000e+00> : vector<10x5x64xf32>
    %135 = tpu.matmul %130, %134, %cst_60 {dimension_numbers = #tpu.dot_dimension_numbers<[2], [1], [1], [2], [0, 0, 0, 1, 1, 2], [0], [0]>} : vector<10x5x32xf32>, vector<10x32x64xf32>, vector<10x5x64xf32> -> vector<10x5x64xf32>
    "tpu.trace_stop"() : () -> ()
    %136 = arith.addf %128, %135 : vector<10x5x64xf32>
    %137 = vector.extract_strided_slice %97 {offsets = [0, 1, 2, 0], sizes = [2, 5, 5, 32], strides = [1, 1, 1, 1]} : vector<2x7x7x32xf32> to vector<2x5x5x32xf32>
    %138 = vector.shape_cast %137 : vector<2x5x5x32xf32> to vector<10x5x32xf32>
    %c5_61 = arith.constant 5 : index
    %c0_62 = arith.constant 0 : index
    %c0_63 = arith.constant 0 : index
    %139 = vector.load %arg3[%c5_61, %c0_62, %c0_63] : memref<9x32x64xf32, #tpu.memory_space<vmem>>, vector<1x32x64xf32>
    %140 = vector.shape_cast %139 : vector<1x32x64xf32> to vector<32x64xf32>
    %141 = vector.shape_cast %140 : vector<32x64xf32> to vector<1x32x64xf32>
    %142 = vector.broadcast %141 : vector<1x32x64xf32> to vector<10x32x64xf32>
    "tpu.trace_start"() <{level = 10 : i32, message = "nwc,nco->nwo"}> : () -> ()
    %cst_64 = arith.constant dense<0.000000e+00> : vector<10x5x64xf32>
    %143 = tpu.matmul %138, %142, %cst_64 {dimension_numbers = #tpu.dot_dimension_numbers<[2], [1], [1], [2], [0, 0, 0, 1, 1, 2], [0], [0]>} : vector<10x5x32xf32>, vector<10x32x64xf32>, vector<10x5x64xf32> -> vector<10x5x64xf32>
    "tpu.trace_stop"() : () -> ()
    %144 = arith.addf %136, %143 : vector<10x5x64xf32>
    %145 = vector.extract_strided_slice %97 {offsets = [0, 2, 0, 0], sizes = [2, 5, 5, 32], strides = [1, 1, 1, 1]} : vector<2x7x7x32xf32> to vector<2x5x5x32xf32>
    %146 = vector.shape_cast %145 : vector<2x5x5x32xf32> to vector<10x5x32xf32>
    %c6_65 = arith.constant 6 : index
    %c0_66 = arith.constant 0 : index
    %c0_67 = arith.constant 0 : index
    %147 = vector.load %arg3[%c6_65, %c0_66, %c0_67] : memref<9x32x64xf32, #tpu.memory_space<vmem>>, vector<1x32x64xf32>
    %148 = vector.shape_cast %147 : vector<1x32x64xf32> to vector<32x64xf32>
    %149 = vector.shape_cast %148 : vector<32x64xf32> to vector<1x32x64xf32>
    %150 = vector.broadcast %149 : vector<1x32x64xf32> to vector<10x32x64xf32>
    "tpu.trace_start"() <{level = 10 : i32, message = "nwc,nco->nwo"}> : () -> ()
    %cst_68 = arith.constant dense<0.000000e+00> : vector<10x5x64xf32>
    %151 = tpu.matmul %146, %150, %cst_68 {dimension_numbers = #tpu.dot_dimension_numbers<[2], [1], [1], [2], [0, 0, 0, 1, 1, 2], [0], [0]>} : vector<10x5x32xf32>, vector<10x32x64xf32>, vector<10x5x64xf32> -> vector<10x5x64xf32>
    "tpu.trace_stop"() : () -> ()
    %152 = arith.addf %144, %151 : vector<10x5x64xf32>
    %153 = vector.extract_strided_slice %97 {offsets = [0, 2, 1, 0], sizes = [2, 5, 5, 32], strides = [1, 1, 1, 1]} : vector<2x7x7x32xf32> to vector<2x5x5x32xf32>
    %154 = vector.shape_cast %153 : vector<2x5x5x32xf32> to vector<10x5x32xf32>
    %c7_69 = arith.constant 7 : index
    %c0_70 = arith.constant 0 : index
    %c0_71 = arith.constant 0 : index
    %155 = vector.load %arg3[%c7_69, %c0_70, %c0_71] : memref<9x32x64xf32, #tpu.memory_space<vmem>>, vector<1x32x64xf32>
    %156 = vector.shape_cast %155 : vector<1x32x64xf32> to vector<32x64xf32>
    %157 = vector.shape_cast %156 : vector<32x64xf32> to vector<1x32x64xf32>
    %158 = vector.broadcast %157 : vector<1x32x64xf32> to vector<10x32x64xf32>
    "tpu.trace_start"() <{level = 10 : i32, message = "nwc,nco->nwo"}> : () -> ()
    %cst_72 = arith.constant dense<0.000000e+00> : vector<10x5x64xf32>
    %159 = tpu.matmul %154, %158, %cst_72 {dimension_numbers = #tpu.dot_dimension_numbers<[2], [1], [1], [2], [0, 0, 0, 1, 1, 2], [0], [0]>} : vector<10x5x32xf32>, vector<10x32x64xf32>, vector<10x5x64xf32> -> vector<10x5x64xf32>
    "tpu.trace_stop"() : () -> ()
    %160 = arith.addf %152, %159 : vector<10x5x64xf32>
    %161 = vector.extract_strided_slice %97 {offsets = [0, 2, 2, 0], sizes = [2, 5, 5, 32], strides = [1, 1, 1, 1]} : vector<2x7x7x32xf32> to vector<2x5x5x32xf32>
    %162 = vector.shape_cast %161 : vector<2x5x5x32xf32> to vector<10x5x32xf32>
    %c8_73 = arith.constant 8 : index
    %c0_74 = arith.constant 0 : index
    %c0_75 = arith.constant 0 : index
    %163 = vector.load %arg3[%c8_73, %c0_74, %c0_75] : memref<9x32x64xf32, #tpu.memory_space<vmem>>, vector<1x32x64xf32>
    %164 = vector.shape_cast %163 : vector<1x32x64xf32> to vector<32x64xf32>
    %165 = vector.shape_cast %164 : vector<32x64xf32> to vector<1x32x64xf32>
    %166 = vector.broadcast %165 : vector<1x32x64xf32> to vector<10x32x64xf32>
    "tpu.trace_start"() <{level = 10 : i32, message = "nwc,nco->nwo"}> : () -> ()
    %cst_76 = arith.constant dense<0.000000e+00> : vector<10x5x64xf32>
    %167 = tpu.matmul %162, %166, %cst_76 {dimension_numbers = #tpu.dot_dimension_numbers<[2], [1], [1], [2], [0, 0, 0, 1, 1, 2], [0], [0]>} : vector<10x5x32xf32>, vector<10x32x64xf32>, vector<10x5x64xf32> -> vector<10x5x64xf32>
    "tpu.trace_stop"() : () -> ()
    %168 = arith.addf %160, %167 : vector<10x5x64xf32>
    %c0_77 = arith.constant 0 : index
    %c0_78 = arith.constant 0 : index
    %169 = vector.load %arg4[%c0_77, %c0_78] : memref<1x64xf32, #tpu.memory_space<vmem>>, vector<1x64xf32>
    %170 = vector.shape_cast %169 : vector<1x64xf32> to vector<1x1x64xf32>
    %171 = vector.broadcast %170 : vector<1x1x64xf32> to vector<10x5x64xf32>
    %172 = arith.addf %168, %171 : vector<10x5x64xf32>
    %cst_79 = arith.constant 0.000000e+00 : f32
    %173 = vector.broadcast %cst_79 : f32 to vector<10x5x64xf32>
    %174 = arith.maximumf %172, %173 : vector<10x5x64xf32>
    %175 = vector.shape_cast %174 : vector<10x5x64xf32> to vector<2x5x5x64xf32>
    %176 = vector.extract_strided_slice %175 {offsets = [0, 0, 0, 0], sizes = [2, 4, 5, 64], strides = [1, 1, 1, 1]} : vector<2x5x5x64xf32> to vector<2x4x5x64xf32>
    %177 = vector.shape_cast %176 : vector<2x4x5x64xf32> to vector<2x2x2x5x64xf32>
    %178 = vector.extract_strided_slice %177 {offsets = [0, 0, 0, 0, 0], sizes = [2, 2, 1, 5, 64], strides = [1, 1, 1, 1, 1]} : vector<2x2x2x5x64xf32> to vector<2x2x1x5x64xf32>
    %179 = vector.shape_cast %178 : vector<2x2x1x5x64xf32> to vector<2x2x5x64xf32>
    %180 = vector.extract_strided_slice %177 {offsets = [0, 0, 1, 0, 0], sizes = [2, 2, 1, 5, 64], strides = [1, 1, 1, 1, 1]} : vector<2x2x2x5x64xf32> to vector<2x2x1x5x64xf32>
    %181 = vector.shape_cast %180 : vector<2x2x1x5x64xf32> to vector<2x2x5x64xf32>
    %182 = arith.maximumf %179, %181 : vector<2x2x5x64xf32>
    %183 = vector.shape_cast %182 : vector<2x2x5x64xf32> to vector<4x5x64xf32>
    %c0_80 = arith.constant 0 : index
    %c0_81 = arith.constant 0 : index
    %c0_82 = arith.constant 0 : index
    %184 = vector.load %arg6[%c0_80, %c0_81, %c0_82] : memref<2x2x5xf32, #tpu.memory_space<vmem>>, vector<1x2x5xf32>
    %185 = vector.shape_cast %184 : vector<1x2x5xf32> to vector<2x5xf32>
    %186 = vector.shape_cast %185 : vector<2x5xf32> to vector<1x2x5xf32>
    %187 = vector.broadcast %186 : vector<1x2x5xf32> to vector<4x2x5xf32>
    %c1_83 = arith.constant 1 : index
    %c0_84 = arith.constant 0 : index
    %c0_85 = arith.constant 0 : index
    %188 = vector.load %arg6[%c1_83, %c0_84, %c0_85] : memref<2x2x5xf32, #tpu.memory_space<vmem>>, vector<1x2x5xf32>
    %189 = vector.shape_cast %188 : vector<1x2x5xf32> to vector<2x5xf32>
    %190 = vector.shape_cast %189 : vector<2x5xf32> to vector<1x2x5xf32>
    %191 = vector.broadcast %190 : vector<1x2x5xf32> to vector<4x2x5xf32>
    "tpu.trace_start"() <{level = 10 : i32, message = "njw,nwc->njc"}> : () -> ()
    %cst_86 = arith.constant dense<0.000000e+00> : vector<4x2x64xf32>
    %192 = tpu.matmul %187, %183, %cst_86 {dimension_numbers = #tpu.dot_dimension_numbers<[2], [1], [1], [2], [0, 0, 0, 1, 1, 2], [0], [0]>} : vector<4x2x5xf32>, vector<4x5x64xf32>, vector<4x2x64xf32> -> vector<4x2x64xf32>
    %cst_87 = arith.constant dense<0.000000e+00> : vector<4x2x64xf32>
    %193 = tpu.matmul %191, %183, %cst_87 {dimension_numbers = #tpu.dot_dimension_numbers<[2], [1], [1], [2], [0, 0, 0, 1, 1, 2], [0], [0]>} : vector<4x2x5xf32>, vector<4x5x64xf32>, vector<4x2x64xf32> -> vector<4x2x64xf32>
    "tpu.trace_stop"() : () -> ()
    %194 = arith.maximumf %192, %193 : vector<4x2x64xf32>
    %195 = vector.shape_cast %194 : vector<4x2x64xf32> to vector<2x2x2x64xf32>
    %196 = vector.extract_strided_slice %195 {offsets = [0, 0, 0, 0], sizes = [2, 1, 2, 64], strides = [1, 1, 1, 1]} : vector<2x2x2x64xf32> to vector<2x1x2x64xf32>
    %197 = vector.shape_cast %196 : vector<2x1x2x64xf32> to vector<2x2x64xf32>
    %198 = vector.extract_strided_slice %197 {offsets = [0, 0, 0], sizes = [2, 1, 64], strides = [1, 1, 1]} : vector<2x2x64xf32> to vector<2x1x64xf32>
    %c0_88 = arith.constant 0 : index
    %c0_89 = arith.constant 0 : index
    %c0_90 = arith.constant 0 : index
    %199 = vector.load %arg7[%c0_88, %c0_89, %c0_90] : memref<4x64x384xf32, #tpu.memory_space<vmem>>, vector<1x64x384xf32>
    %200 = vector.shape_cast %199 : vector<1x64x384xf32> to vector<64x384xf32>
    %201 = vector.shape_cast %200 : vector<64x384xf32> to vector<1x64x384xf32>
    %202 = vector.broadcast %201 : vector<1x64x384xf32> to vector<2x64x384xf32>
    "tpu.trace_start"() <{level = 10 : i32, message = "bkc,bcg->bkg"}> : () -> ()
    %cst_91 = arith.constant dense<0.000000e+00> : vector<2x1x384xf32>
    %203 = tpu.matmul %198, %202, %cst_91 {dimension_numbers = #tpu.dot_dimension_numbers<[2], [1], [1], [2], [0, 0, 0, 1, 1, 2], [0], [0]>} : vector<2x1x64xf32>, vector<2x64x384xf32>, vector<2x1x384xf32> -> vector<2x1x384xf32>
    "tpu.trace_stop"() : () -> ()
    %204 = vector.extract_strided_slice %195 {offsets = [0, 0, 0, 0], sizes = [2, 1, 2, 64], strides = [1, 1, 1, 1]} : vector<2x2x2x64xf32> to vector<2x1x2x64xf32>
    %205 = vector.shape_cast %204 : vector<2x1x2x64xf32> to vector<2x2x64xf32>
    %206 = vector.extract_strided_slice %205 {offsets = [0, 1, 0], sizes = [2, 1, 64], strides = [1, 1, 1]} : vector<2x2x64xf32> to vector<2x1x64xf32>
    %c1_92 = arith.constant 1 : index
    %c0_93 = arith.constant 0 : index
    %c0_94 = arith.constant 0 : index
    %207 = vector.load %arg7[%c1_92, %c0_93, %c0_94] : memref<4x64x384xf32, #tpu.memory_space<vmem>>, vector<1x64x384xf32>
    %208 = vector.shape_cast %207 : vector<1x64x384xf32> to vector<64x384xf32>
    %209 = vector.shape_cast %208 : vector<64x384xf32> to vector<1x64x384xf32>
    %210 = vector.broadcast %209 : vector<1x64x384xf32> to vector<2x64x384xf32>
    "tpu.trace_start"() <{level = 10 : i32, message = "bkc,bcg->bkg"}> : () -> ()
    %cst_95 = arith.constant dense<0.000000e+00> : vector<2x1x384xf32>
    %211 = tpu.matmul %206, %210, %cst_95 {dimension_numbers = #tpu.dot_dimension_numbers<[2], [1], [1], [2], [0, 0, 0, 1, 1, 2], [0], [0]>} : vector<2x1x64xf32>, vector<2x64x384xf32>, vector<2x1x384xf32> -> vector<2x1x384xf32>
    "tpu.trace_stop"() : () -> ()
    %212 = arith.addf %203, %211 : vector<2x1x384xf32>
    %213 = vector.extract_strided_slice %195 {offsets = [0, 1, 0, 0], sizes = [2, 1, 2, 64], strides = [1, 1, 1, 1]} : vector<2x2x2x64xf32> to vector<2x1x2x64xf32>
    %214 = vector.shape_cast %213 : vector<2x1x2x64xf32> to vector<2x2x64xf32>
    %215 = vector.extract_strided_slice %214 {offsets = [0, 0, 0], sizes = [2, 1, 64], strides = [1, 1, 1]} : vector<2x2x64xf32> to vector<2x1x64xf32>
    %c2_96 = arith.constant 2 : index
    %c0_97 = arith.constant 0 : index
    %c0_98 = arith.constant 0 : index
    %216 = vector.load %arg7[%c2_96, %c0_97, %c0_98] : memref<4x64x384xf32, #tpu.memory_space<vmem>>, vector<1x64x384xf32>
    %217 = vector.shape_cast %216 : vector<1x64x384xf32> to vector<64x384xf32>
    %218 = vector.shape_cast %217 : vector<64x384xf32> to vector<1x64x384xf32>
    %219 = vector.broadcast %218 : vector<1x64x384xf32> to vector<2x64x384xf32>
    "tpu.trace_start"() <{level = 10 : i32, message = "bkc,bcg->bkg"}> : () -> ()
    %cst_99 = arith.constant dense<0.000000e+00> : vector<2x1x384xf32>
    %220 = tpu.matmul %215, %219, %cst_99 {dimension_numbers = #tpu.dot_dimension_numbers<[2], [1], [1], [2], [0, 0, 0, 1, 1, 2], [0], [0]>} : vector<2x1x64xf32>, vector<2x64x384xf32>, vector<2x1x384xf32> -> vector<2x1x384xf32>
    "tpu.trace_stop"() : () -> ()
    %221 = arith.addf %212, %220 : vector<2x1x384xf32>
    %222 = vector.extract_strided_slice %195 {offsets = [0, 1, 0, 0], sizes = [2, 1, 2, 64], strides = [1, 1, 1, 1]} : vector<2x2x2x64xf32> to vector<2x1x2x64xf32>
    %223 = vector.shape_cast %222 : vector<2x1x2x64xf32> to vector<2x2x64xf32>
    %224 = vector.extract_strided_slice %223 {offsets = [0, 1, 0], sizes = [2, 1, 64], strides = [1, 1, 1]} : vector<2x2x64xf32> to vector<2x1x64xf32>
    %c3_100 = arith.constant 3 : index
    %c0_101 = arith.constant 0 : index
    %c0_102 = arith.constant 0 : index
    %225 = vector.load %arg7[%c3_100, %c0_101, %c0_102] : memref<4x64x384xf32, #tpu.memory_space<vmem>>, vector<1x64x384xf32>
    %226 = vector.shape_cast %225 : vector<1x64x384xf32> to vector<64x384xf32>
    %227 = vector.shape_cast %226 : vector<64x384xf32> to vector<1x64x384xf32>
    %228 = vector.broadcast %227 : vector<1x64x384xf32> to vector<2x64x384xf32>
    "tpu.trace_start"() <{level = 10 : i32, message = "bkc,bcg->bkg"}> : () -> ()
    %cst_103 = arith.constant dense<0.000000e+00> : vector<2x1x384xf32>
    %229 = tpu.matmul %224, %228, %cst_103 {dimension_numbers = #tpu.dot_dimension_numbers<[2], [1], [1], [2], [0, 0, 0, 1, 1, 2], [0], [0]>} : vector<2x1x64xf32>, vector<2x64x384xf32>, vector<2x1x384xf32> -> vector<2x1x384xf32>
    "tpu.trace_stop"() : () -> ()
    %230 = arith.addf %221, %229 : vector<2x1x384xf32>
    %c0_104 = arith.constant 0 : index
    %c0_105 = arith.constant 0 : index
    %231 = vector.load %arg8[%c0_104, %c0_105] : memref<1x384xf32, #tpu.memory_space<vmem>>, vector<1x384xf32>
    %232 = vector.shape_cast %231 : vector<1x384xf32> to vector<1x1x384xf32>
    %233 = vector.broadcast %232 : vector<1x1x384xf32> to vector<2x1x384xf32>
    %234 = arith.addf %230, %233 : vector<2x1x384xf32>
    %235 = vector.extract_strided_slice %234 {offsets = [0, 0, 0], sizes = [2, 1, 128], strides = [1, 1, 1]} : vector<2x1x384xf32> to vector<2x1x128xf32>
    %cst_106 = arith.constant 0.000000e+00 : f32
    %236 = vector.broadcast %cst_106 : f32 to vector<2x1x128xf32>
    %237 = arith.subf %236, %235 : vector<2x1x128xf32>
    %238 = math.exp %237 : vector<2x1x128xf32>
    %cst_107 = arith.constant 1.000000e+00 : f32
    %239 = vector.broadcast %cst_107 : f32 to vector<2x1x128xf32>
    %240 = arith.addf %239, %238 : vector<2x1x128xf32>
    %241 = tpu.reciprocal %240 {approx = true} : vector<2x1x128xf32> -> vector<2x1x128xf32>
    %242 = vector.extract_strided_slice %234 {offsets = [0, 0, 128], sizes = [2, 1, 128], strides = [1, 1, 1]} : vector<2x1x384xf32> to vector<2x1x128xf32>
    %243 = math.tanh %242 : vector<2x1x128xf32>
    %244 = vector.extract_strided_slice %234 {offsets = [0, 0, 256], sizes = [2, 1, 128], strides = [1, 1, 1]} : vector<2x1x384xf32> to vector<2x1x128xf32>
    %cst_108 = arith.constant 0.000000e+00 : f32
    %245 = vector.broadcast %cst_108 : f32 to vector<2x1x128xf32>
    %246 = arith.subf %245, %244 : vector<2x1x128xf32>
    %247 = math.exp %246 : vector<2x1x128xf32>
    %cst_109 = arith.constant 1.000000e+00 : f32
    %248 = vector.broadcast %cst_109 : f32 to vector<2x1x128xf32>
    %249 = arith.addf %248, %247 : vector<2x1x128xf32>
    %250 = tpu.reciprocal %249 {approx = true} : vector<2x1x128xf32> -> vector<2x1x128xf32>
    %251 = arith.mulf %241, %243 : vector<2x1x128xf32>
    %252 = math.tanh %251 : vector<2x1x128xf32>
    %253 = arith.mulf %250, %252 : vector<2x1x128xf32>
    %c0_110 = arith.constant 0 : index
    %c0_111 = arith.constant 0 : index
    %254 = vector.load %arg9[%c0_110, %c0_111] : memref<128x128xf32, #tpu.memory_space<vmem>>, vector<128x128xf32>
    %255 = vector.shape_cast %254 : vector<128x128xf32> to vector<1x128x128xf32>
    %256 = vector.broadcast %255 : vector<1x128x128xf32> to vector<2x128x128xf32>
    "tpu.trace_start"() <{level = 10 : i32, message = "bkc,bco->bko"}> : () -> ()
    %cst_112 = arith.constant dense<0.000000e+00> : vector<2x1x128xf32>
    %257 = tpu.matmul %253, %256, %cst_112 {dimension_numbers = #tpu.dot_dimension_numbers<[2], [1], [1], [2], [0, 0, 0, 1, 1, 2], [0], [0]>} : vector<2x1x128xf32>, vector<2x128x128xf32>, vector<2x1x128xf32> -> vector<2x1x128xf32>
    "tpu.trace_stop"() : () -> ()
    %c0_113 = arith.constant 0 : index
    %c0_114 = arith.constant 0 : index
    %258 = vector.load %arg10[%c0_113, %c0_114] : memref<1x128xf32, #tpu.memory_space<vmem>>, vector<1x128xf32>
    %259 = vector.shape_cast %258 : vector<1x128xf32> to vector<1x1x128xf32>
    %260 = vector.broadcast %259 : vector<1x1x128xf32> to vector<2x1x128xf32>
    %261 = arith.addf %257, %260 : vector<2x1x128xf32>
    %cst_115 = arith.constant 0.000000e+00 : f32
    %262 = vector.broadcast %cst_115 : f32 to vector<2x1x128xf32>
    %263 = arith.maximumf %261, %262 : vector<2x1x128xf32>
    %c0_116 = arith.constant 0 : index
    %c0_117 = arith.constant 0 : index
    %264 = vector.load %arg11[%c0_116, %c0_117] : memref<128x128xf32, #tpu.memory_space<vmem>>, vector<128x128xf32>
    %265 = vector.shape_cast %264 : vector<128x128xf32> to vector<1x128x128xf32>
    %266 = vector.broadcast %265 : vector<1x128x128xf32> to vector<2x128x128xf32>
    "tpu.trace_start"() <{level = 10 : i32, message = "bkc,bco->bko"}> : () -> ()
    %cst_118 = arith.constant dense<0.000000e+00> : vector<2x1x128xf32>
    %267 = tpu.matmul %263, %266, %cst_118 {dimension_numbers = #tpu.dot_dimension_numbers<[2], [1], [1], [2], [0, 0, 0, 1, 1, 2], [0], [0]>} : vector<2x1x128xf32>, vector<2x128x128xf32>, vector<2x1x128xf32> -> vector<2x1x128xf32>
    "tpu.trace_stop"() : () -> ()
    %c0_119 = arith.constant 0 : index
    %c0_120 = arith.constant 0 : index
    %268 = vector.load %arg12[%c0_119, %c0_120] : memref<1x128xf32, #tpu.memory_space<vmem>>, vector<1x128xf32>
    %269 = vector.shape_cast %268 : vector<1x128xf32> to vector<1x1x128xf32>
    %270 = vector.broadcast %269 : vector<1x1x128xf32> to vector<2x1x128xf32>
    %271 = arith.addf %267, %270 : vector<2x1x128xf32>
    %c0_121 = arith.constant 0 : index
    %c0_122 = arith.constant 0 : index
    %c0_123 = arith.constant 0 : index
    %272 = vector.load %arg13[%c0_121, %c0_122, %c0_123] : memref<2x1x128xf32, #tpu.memory_space<vmem>>, vector<2x1x128xf32>
    tpu.vector_store %arg13[%c0_121, %c0_122, %c0_123], %271 {strides = array<i32>} : memref<2x1x128xf32, #tpu.memory_space<vmem>>, vector<2x1x128xf32>,
    return
  }
}

</mosaic_0001>

<bundles_post_ra>
// kernel: lstm_model_forward.1
= control target key start
LH: loop header
LB: loop body
LE: loop exit
PB: predicated region body
PF: predicated region fallthrough
CT: control target
= control target key end

     0   :  { %18 = vsyncpa [#allocation3], 0  ;;  %s14587_s0 = inlined_call_operand.vmem [shape: f32[2,16,16,3], index: 0, kind: input, shape index: {}]   ;;  %s14588_s1 = inlined_call_operand.vmem [shape: f32[9,3,32], index: 1, kind: input, shape index: {}]   ;;  %s14589_s2 = inlined_call_operand.vmem [shape: f32[1,32], index: 2, kind: input, shape index: {}]   ;;  %s14590_s3 = inlined_call_operand.vmem [shape: f32[9,32,64], index: 3, kind: input, shape index: {}]   ;;  %s14591_s4 = inlined_call_operand.vmem [shape: f32[1,64], index: 4, kind: input, shape index: {}]   ;;  %s14592_s5 = inlined_call_operand.vmem [shape: f32[2,7,14], index: 5, kind: input, shape index: {}]   ;;  %s14593_s6 = inlined_call_operand.vmem [shape: f32[2,2,5], index: 6, kind: input, shape index: {}]   ;;  %s14594_s7 = inlined_call_operand.hbm [shape: f32[4,64,384], index: 7, kind: input, shape index: {}]   ;;  %s14595_s8 = inlined_call_operand.vmem [shape: f32[1,384], index: 8, kind: input, shape index: {}]   ;;  %s14596_s9 = inlined_call_operand.vmem [shape: f32[128,128], index: 9, kind: input, shape index: {}]   ;;  %s14597_s10 = inlined_call_operand.vmem [shape: f32[1,128], index: 10, kind: input, shape index: {}]   ;;  %s14598_s11 = inlined_call_operand.vmem [shape: f32[128,128], index: 11, kind: input, shape index: {}]   ;;  %s14599_s12 = inlined_call_operand.vmem [shape: f32[1,128], index: 12, kind: input, shape index: {}]   ;;  %s14600_s13 = inlined_call_operand.hbm [shape: f32[2,1,128], index: 13, kind: output, shape index: {}]  }
   0x1   :  { %19 = vsyncpa [#allocation4], 0  ;;  %s38_s27 = sshll.u32 %s14594_s7, 4  ;;  %s10320_s28 = smov [#allocation2]   ;;  %s39_s27 = int_to_ptr.hbm [resolvable:$true] %s38_s27 }
   0x2   :  { %s40_s29 = sshll.u32 %s10320_s28, 4  ;;  %s10321_s30 = smov 384   ;;  %s41_s29 = int_to_ptr.vmem [resolvable:$true] %s40_s29 }
   0x3   :  { %s10322_s14 = smov 24  }
   0x4   :  { %46 = dma.hbm_to_vmem [thread:$0]  %s39_s27, 12288, %s41_s29, [#allocation3], %s10321_s30, %s10321_s30, %s10322_s14  }
   0x5   :  { %10316 = dma.done.wait [#allocation3], 12288  }
   0x6   :  { %10317 = vsyncadd [#allocation3], 4294955008  ;;  %vm131_vm0 = vcmask 1042432   ;;  %v10402_v0 = vld [vmem:[%s14588_s1 + $0x4] sm:$0x7]  ;;  %v10412_v2 = vld [vmem:[%s14587_s0 + $0x8] sm:$0xff] }
   0x7   :  { %v10407_v1 = vld [vmem:[%s14587_s0] sm:$0xff]  ;;  %vm122_vm1 = vcmask 1046528   ;;  %9347 = vmatpush.msk.msra.mxu0 %vm131_vm0, %v10402_v0  ;;  %9350 = vmatpush.msk.msra.mxu1 %vm131_vm0, %v10402_v0  ;;  %v124_v4 = vrot.slane %v10412_v2, 1  ;;  %vm126_vm2 = vcmask 23552   ;;  %v10423_v5 = vld [vmem:[%s14587_s0 + $0x10] sm:$0xff]  ;;  %v10428_v6 = vld [vmem:[%s14587_s0 + $0x18] sm:$0xff] }
   0x8   :  { %v123_v3 = vrot.slane %v10407_v1, 1  ;;  %9353 = vmatpush.msk.msra.mxu2 %vm131_vm0, %v10402_v0  ;;  %9356 = vmatpush.msk.msra.mxu3 %vm131_vm0, %v10402_v0  ;;  %v160_v7 = vrot.slane %v10423_v5, 1  ;;  %v10436_v8 = vrot.slane %v10428_v6, 1  ;;  %v10441_v9 = vld [vmem:[%s14587_s0 + $0x20] sm:$0xff]  ;;  %v10446_v10 = vld [vmem:[%s14587_s0 + $0x28] sm:$0xff]  ;;  %v10451_v11 = vld [vmem:[%s14587_s0 + $0x30] sm:$0xff] }
   0x9   :  { %v192_v13 = vrot.slane %v10441_v9, 1  ;;  %v10456_v14 = vrot.slane %v10446_v10, 1  ;;  %v10461_v15 = vld [vmem:[%s14587_s0 + $0x38] sm:$0xff]  ;;  %v224_v16 = vrot.slane %v10451_v11, 1  ;;  %9359 = vmatpush.msk.msrb.mxu0 %vm131_vm0, %v10402_v0  ;;  %9362 = vmatpush.msk.msrb.mxu1 %vm131_vm0, %v10402_v0  ;;  %v10505_v21 = vld [vmem:[%s14587_s0 + $0x40] sm:$0xff]  ;;  %v10510_v22 = vld [vmem:[%s14587_s0 + $0x48] sm:$0xff] }
   0xa   :  { %14778 = vst [vmem:[#allocation8_spill] sm:$0xff] %v10436_v8  ;;  %v125_v12 = vsel %vm122_vm1, %v123_v3, %v124_v4  ;;  %v10471_v17 = vsel %vm122_vm1, %v160_v7, %v10436_v8  ;;  %v10474_v18 = vrot.slane %v10461_v15, 1  ;;  %9365 = vmatpush.msk.msrb.mxu2 %vm131_vm0, %v10402_v0  ;;  %9368 = vmatpush.msk.msrb.mxu3 %vm131_vm0, %v10402_v0  ;;  %v10515_v23 = vld [vmem:[%s14587_s0 + $0x50] sm:$0xff]  ;;  %v10520_v24 = vld [vmem:[%s14587_s0 + $0x58] sm:$0xff]  ;;  %v10526_v25 = vld [vmem:[%s14587_s0 + $0x60] sm:$0xff]  ;;  %v256_v27 = vrot.slane %v10505_v21, 1 }
   0xb   :  { %14779 = vst [vmem:[#allocation9_spill] sm:$0xff] %v10456_v14  ;;  %9348 = vmatmul.msk.f32.vlgmr.msra.gmra.mxu0 %vm126_vm2, %v125_v12  ;;  %9351 = vmatmul.msk.f32.vlgmr.msra.gmra.mxu1 %vm126_vm2, %v10471_v17  ;;  %v10482_v19 = vsel %vm122_vm1, %v192_v13, %v10456_v14  ;;  %v10531_v26 = vld [vmem:[%s14587_s0 + $0x68] sm:$0xff]  ;;  %v10537_v28 = vrot.slane %v10510_v22, 1  ;;  %v10542_v29 = vld [vmem:[%s14587_s0 + $0x70] sm:$0xff]  ;;  %v10547_v30 = vld [vmem:[%s14587_s0 + $0x78] sm:$0xff]  ;;  %v288_v31 = vrot.slane %v10515_v23, 1 }
   0xc   :  { %14780 = vst [vmem:[#allocation10_spill] sm:$0xff] %v10471_v17  ;;  %9354 = vmatmul.msk.f32.vlgmr.msra.gmra.mxu2 %vm126_vm2, %v10482_v19  ;;  %v10490_v20 = vsel %vm122_vm1, %v224_v16, %v10474_v18  ;;  %9371 = vmatpush.msk.msra.mxu0 %vm131_vm0, %v10402_v0  ;;  %v10553_v32 = vrot.slane %v10520_v24, 1  ;;  %v320_v33 = vrot.slane %v10526_v25, 1  ;;  %v10559_v34 = vrot.slane %v10531_v26, 1  ;;  %v10600_v41 = vld [vmem:[%s14587_s0 + $0x80] sm:$0xff]  ;;  %v10605_v42 = vld [vmem:[%s14587_s0 + $0x88] sm:$0xff] }
   0xd   :  { %14781 = vst [vmem:[#allocation11_spill] sm:$0xff] %v10474_v18  ;;  %9357 = vmatmul.msk.f32.vlgmr.msra.gmra.mxu3 %vm126_vm2, %v10490_v20  ;;  %9374 = vmatpush.msk.msra.mxu1 %vm131_vm0, %v10402_v0  ;;  %v352_v35 = vrot.slane %v10542_v29, 1  ;;  %v10563_v36 = vrot.slane %v10547_v30, 1  ;;  %v10567_v37 = vsel %vm122_vm1, %v256_v27, %v10537_v28  ;;  %v10610_v43 = vld [vmem:[%s14587_s0 + $0x90] sm:$0xff]  ;;  %v10615_v44 = vld [vmem:[%s14587_s0 + $0x98] sm:$0xff]  ;;  %v10622_v45 = vld [vmem:[%s14587_s0 + $0xa0] sm:$0xff] }
   0xe   :  { %14782 = vst [vmem:[#allocation12_spill] sm:$0xff] %v10482_v19  ;;  %9377 = vmatpush.msk.msra.mxu2 %vm131_vm0, %v10402_v0  ;;  %9380 = vmatpush.msk.msra.mxu3 %vm131_vm0, %v10402_v0  ;;  %v10571_v38 = vsel %vm122_vm1, %v288_v31, %v10553_v32  ;;  %v10575_v39 = vsel %vm122_vm1, %v320_v33, %v10559_v34  ;;  %v10627_v46 = vld [vmem:[%s14587_s0 + $0xa8] sm:$0xff]  ;;  %v384_v47 = vrot.slane %v10600_v41, 1  ;;  %v10633_v48 = vrot.slane %v10605_v42, 1  ;;  %v10638_v49 = vld [vmem:[%s14587_s0 + $0xb0] sm:$0xff]  ;;  %v10643_v50 = vld [vmem:[%s14587_s0 + $0xb8] sm:$0xff] }
   0xf   :  { %14783 = vst [vmem:[#allocation13_spill] sm:$0xff] %v10490_v20  ;;  %v10581_v40 = vsel %vm122_vm1, %v352_v35, %v10563_v36  ;;  %v416_v51 = vrot.slane %v10610_v43, 1  ;;  %v10649_v52 = vrot.slane %v10615_v44, 1  ;;  %v448_v53 = vrot.slane %v10622_v45, 1  ;;  %v10696_v61 = vld [vmem:[%s14587_s0 + $0x100] sm:$0xff]  ;;  %v10701_v62 = vld [vmem:[%s14587_s0 + $0x108] sm:$0xff] }
  0x10   :  { %14784 = vst [vmem:[#allocation14_spill] sm:$0xff] %v10537_v28  ;;  %v10655_v54 = vrot.slane %v10627_v46, 1  ;;  %v480_v55 = vrot.slane %v10638_v49, 1  ;;  %v10659_v56 = vrot.slane %v10643_v50, 1  ;;  %v10663_v57 = vsel %vm122_vm1, %v384_v47, %v10633_v48  ;;  %v10706_v63 = vld [vmem:[%s14587_s0 + $0x110] sm:$0xff]  ;;  %v10711_v3 = vld [vmem:[%s14587_s0 + $0x118] sm:$0xff] }
  0x11   :  { %14785 = vst [vmem:[#allocation15_spill] sm:$0xff] %v10553_v32  ;;  %v10667_v58 = vsel %vm122_vm1, %v416_v51, %v10649_v52  ;;  %v10723_v7 = vld [vmem:[%s14587_s0 + $0x128] sm:$0xff]  ;;  %v512_v12 = vrot.slane %v10696_v61, 1  ;;  %v513_v13 = vrot.slane %v10701_v62, 1  ;;  %v10732_v16 = vld [vmem:[%s14587_s0 + $0x130] sm:$0xff]  ;;  %v10737_v27 = vld [vmem:[%s14587_s0 + $0x138] sm:$0xff] }
  0x12   :  { %14786 = vst [vmem:[#allocation16_spill] sm:$0xff] %v10559_v34  ;;  %v10671_v59 = vsel %vm122_vm1, %v448_v53, %v10655_v54  ;;  %v10677_v60 = vsel %vm122_vm1, %v480_v55, %v10659_v56  ;;  %v544_v31 = vrot.slane %v10706_v63, 1  ;;  %v10743_v33 = vrot.slane %v10711_v3, 1  ;;  %s10325_s17 = smov 1  }
  0x13   :  { %9349 = vmatmul.msk.f32.gmra.mxu0 %vm126_vm2, %v124_v4  ;;  %9352 = vmatmul.msk.f32.gmra.mxu1 %vm126_vm2, %v10436_v8  ;;  %14787 = vst [vmem:[#allocation17_spill] sm:$0xff] %v10563_v36  ;;  %v10718_v4 = vld [vmem:[%s14587_s0 + $0x120] sm:$0xff]  ;;  %v10749_v47 = vrot.slane %v10723_v7, 1  ;;  %v608_v51 = vrot.slane %v10732_v16, 1  ;;  %v10753_v53 = vrot.slane %v10737_v27, 1  ;;  %v514_v55 = vsel %vm122_vm1, %v512_v12, %v513_v13 }
  0x14   :  { %9355 = vmatmul.msk.f32.gmra.mxu2 %vm126_vm2, %v10456_v14  ;;  %14788 = vst [vmem:[#allocation18_spill] sm:$0xff] %v10567_v37  ;;  %v576_v35 = vrot.slane %v10718_v4, 1  ;;  %v10786_v12 = vld [vmem:[%s14587_s0 + $0x140] sm:$0xff]  ;;  %vm1547_vm3 = vcmask 1045504   ;;  %vm6156_vm4 = vcmask 113664   ;;  %vm6702_vm5 = vcmask 261120  }
  0x15   :  { %9358 = vmatmul.msk.f32.gmra.mxu3 %vm126_vm2, %v10474_v18  ;;  %14789 = vst [vmem:[#allocation19_spill] sm:$0xff] %v10571_v38  ;;  %vm8371_vm6 = vcmask 1044480   ;;  %vm8367_vm7 = vcmask 39936   ;;  %vm8602_vm8 = vcmask 523264  }
  0x16   :  { %14790 = vst [vmem:[#allocation20_spill] sm:$0xff] %v10575_v39 }
  0x17   :  { %14791 = vst [vmem:[#allocation21_spill] sm:$0xff] %v10581_v40 }
  0x18   :  { %14792 = vst [vmem:[#allocation22_spill] sm:$0xff] %v10633_v48 }
  0x19   :  { %14793 = vst [vmem:[#allocation23_spill] sm:$0xff] %v10649_v52 }
  0x1a   :  { %14794 = vst [vmem:[#allocation24_spill] sm:$0xff] %v10655_v54 }
  0x1b   :  { %9360 = vmatmul.msk.f32.vlgmr.msrb.gmra.mxu0 %vm126_vm2, %v10567_v37  ;;  %9363 = vmatmul.msk.f32.vlgmr.msrb.gmra.mxu1 %vm126_vm2, %v10571_v38  ;;  %14795 = vst [vmem:[#allocation25_spill] sm:$0xff] %v10659_v56 }
  0x1c   :  { %9383 = vmatpush.msk.msrb.mxu0 %vm131_vm0, %v10402_v0  ;;  %9366 = vmatmul.msk.f32.vlgmr.msrb.gmra.mxu2 %vm126_vm2, %v10575_v39  ;;  %14796 = vst [vmem:[#allocation26_spill] sm:$0xff] %v10663_v57 }
  0x1d   :  { %9386 = vmatpush.msk.msrb.mxu1 %vm131_vm0, %v10402_v0  ;;  %9369 = vmatmul.msk.f32.vlgmr.msrb.gmra.mxu3 %vm126_vm2, %v10581_v40  ;;  %14797 = vst [vmem:[#allocation27_spill] sm:$0xff] %v10667_v58  ;;  %v10929_v40 = vld [vmem:[%s14587_s0 + $0x1b8] sm:$0xff] }
  0x1e   :  { %9389 = vmatpush.msk.msrb.mxu2 %vm131_vm0, %v10402_v0  ;;  %9392 = vmatpush.msk.msrb.mxu3 %vm131_vm0, %v10402_v0  ;;  %14798 = vst [vmem:[#allocation28_spill] sm:$0xff] %v10671_v59  ;;  %v10945_v14 = vrot.slane %v10929_v40, 1 }
  0x1f   :  { %14799 = vst [vmem:[#allocation29_spill] sm:$0xff] %v10677_v60 }
  0x20   :  { %14800 = vst [vmem:[#allocation30_spill] sm:$0xff] %v10737_v27 }
  0x21   :  { %14801 = vst [vmem:[#allocation31_spill] sm:$0xff] %v10743_v33 }
  0x22   :  { %14802 = vst [vmem:[#allocation32_spill] sm:$0xff] %v10749_v47 }
  0x23   :  { %9361 = vmatmul.msk.f32.gmra.mxu0 %vm126_vm2, %v10537_v28  ;;  %9364 = vmatmul.msk.f32.gmra.mxu1 %vm126_vm2, %v10553_v32  ;;  %14803 = vst [vmem:[#allocation33_spill] sm:$0xff] %v10753_v53 }
  0x24   :  { %9367 = vmatmul.msk.f32.gmra.mxu2 %vm126_vm2, %v10559_v34  ;;  %14822 = vst [vmem:[#allocation52_spill] sm:$0xff] %v10929_v40 }
  0x25   :  { %9370 = vmatmul.msk.f32.gmra.mxu3 %vm126_vm2, %v10563_v36  ;;  %14825 = vst [vmem:[#allocation55_spill] sm:$0xff] %v10945_v14 }
  0x2b   :  { %9372 = vmatmul.msk.f32.vlgmr.msra.gmra.mxu0 %vm126_vm2, %v10663_v57  ;;  %9375 = vmatmul.msk.f32.vlgmr.msra.gmra.mxu1 %vm126_vm2, %v10667_v58 }
  0x2c   :  { %9395 = vmatpush.msk.msra.mxu0 %vm131_vm0, %v10402_v0  ;;  %9378 = vmatmul.msk.f32.vlgmr.msra.gmra.mxu2 %vm126_vm2, %v10671_v59 }
  0x2d   :  { %9398 = vmatpush.msk.msra.mxu1 %vm131_vm0, %v10402_v0  ;;  %9381 = vmatmul.msk.f32.vlgmr.msra.gmra.mxu3 %vm126_vm2, %v10677_v60 }
  0x2e   :  { %9401 = vmatpush.msk.msra.mxu2 %vm131_vm0, %v10402_v0  ;;  %9404 = vmatpush.msk.msra.mxu3 %vm131_vm0, %v10402_v0 }
  0x33   :  { %9373 = vmatmul.msk.f32.gmra.mxu0 %vm126_vm2, %v10633_v48  ;;  %9376 = vmatmul.msk.f32.gmra.mxu1 %vm126_vm2, %v10649_v52  ;;  %v10762_v52 = vsel %vm122_vm1, %v576_v35, %v10749_v47  ;;  %v10796_v35 = vld [vmem:[%s14587_s0 + $0x150] sm:$0xff] }
  0x34   :  { %9379 = vmatmul.msk.f32.gmra.mxu2 %vm126_vm2, %v10655_v54  ;;  %v10758_v54 = vsel %vm122_vm1, %v544_v31, %v10743_v33  ;;  %14805 = vst [vmem:[#allocation35_spill] sm:$0xff] %v10762_v52  ;;  %v10791_v31 = vld [vmem:[%s14587_s0 + $0x148] sm:$0xff] }
  0x35   :  { %9382 = vmatmul.msk.f32.gmra.mxu3 %vm126_vm2, %v10659_v56  ;;  %14804 = vst [vmem:[#allocation34_spill] sm:$0xff] %v10758_v54  ;;  %v10767_v56 = vsel %vm122_vm1, %v608_v51, %v10753_v53  ;;  %v10801_v51 = vld [vmem:[%s14587_s0 + $0x158] sm:$0xff] }
  0x36   :  { %14806 = vst [vmem:[#allocation36_spill] sm:$0xff] %v10767_v56  ;;  %v10834_v60 = vrot.slane %v10801_v51, 1 }
  0x38   :  { %14810 = vst [vmem:[#allocation40_spill] sm:$0xff] %v10834_v60 }
  0x3b   :  { %9384 = vmatmul.msk.f32.vlgmr.msrb.gmra.mxu0 %vm126_vm2, %v514_v55  ;;  %9387 = vmatmul.msk.f32.vlgmr.msrb.gmra.mxu1 %vm126_vm2, %v10758_v54  ;;  %v10812_v55 = vld [vmem:[%s14587_s0 + $0x168] sm:$0xff]  ;;  %v10828_v54 = vld [vmem:[%s14587_s0 + $0x178] sm:$0xff] }
  0x3c   :  { %9407 = vmatpush.msk.msrb.mxu0 %vm131_vm0, %v10402_v0  ;;  %9390 = vmatmul.msk.f32.vlgmr.msrb.gmra.mxu2 %vm126_vm2, %v10762_v52  ;;  %14807 = vst [vmem:[#allocation37_spill] sm:$0xff] %v10812_v55  ;;  %v10818_v52 = vrot.slane %v10791_v31, 1  ;;  %v10840_v58 = vrot.slane %v10812_v55, 1  ;;  %v10844_v36 = vrot.slane %v10828_v54, 1 }
  0x3d   :  { %9410 = vmatpush.msk.msrb.mxu1 %vm131_vm0, %v10402_v0  ;;  %9393 = vmatmul.msk.f32.vlgmr.msrb.gmra.mxu3 %vm126_vm2, %v10767_v56  ;;  %v640_v56 = vrot.slane %v10786_v12, 1  ;;  %14809 = vst [vmem:[#allocation39_spill] sm:$0xff] %v10828_v54 }
  0x3e   :  { %9413 = vmatpush.msk.msrb.mxu2 %vm131_vm0, %v10402_v0  ;;  %9416 = vmatpush.msk.msrb.mxu3 %vm131_vm0, %v10402_v0  ;;  %v10807_v0 = vld [vmem:[%s14587_s0 + $0x160] sm:$0xff]  ;;  %14808 = vst [vmem:[#allocation38_spill] sm:$0xff] %v10818_v52 }
  0x3f   :  { %v704_v59 = vrot.slane %v10807_v0, 1  ;;  %14811 = vst [vmem:[#allocation41_spill] sm:$0xff] %v10840_v58 }
  0x40   :  { %14812 = vst [vmem:[#allocation42_spill] sm:$0xff] %v10844_v36 }
  0x41   :  { %v10861_v32 = vsel %vm122_vm1, %v704_v59, %v10840_v58  ;;  %v10891_v59 = vld [vmem:[%s14587_s0 + $0x188] sm:$0xff] }
  0x42   :  { %14815 = vst [vmem:[#allocation45_spill] sm:$0xff] %v10861_v32  ;;  %v10919_v57 = vrot.slane %v10891_v59, 1 }
  0x43   :  { %9385 = vmatmul.msk.f32.gmra.mxu0 %vm126_vm2, %v513_v13  ;;  %9388 = vmatmul.msk.f32.gmra.mxu1 %vm126_vm2, %v10743_v33  ;;  %v10823_v13 = vld [vmem:[%s14587_s0 + $0x170] sm:$0xff]  ;;  %v672_v33 = vrot.slane %v10796_v35, 1  ;;  %14817 = vst [vmem:[#allocation47_spill] sm:$0xff] %v10891_v59 }
  0x44   :  { %9391 = vmatmul.msk.f32.gmra.mxu2 %vm126_vm2, %v10749_v47  ;;  %v736_v48 = vrot.slane %v10823_v13, 1  ;;  %v10848_v47 = vsel %vm122_vm1, %v640_v56, %v10818_v52  ;;  %14821 = vst [vmem:[#allocation51_spill] sm:$0xff] %v10919_v57 }
  0x45   :  { %9394 = vmatmul.msk.f32.gmra.mxu3 %vm126_vm2, %v10753_v53  ;;  %14813 = vst [vmem:[#allocation43_spill] sm:$0xff] %v10848_v47  ;;  %v10852_v34 = vsel %vm122_vm1, %v672_v33, %v10834_v60  ;;  %v10857_v53 = vld [vmem:[%s14588_s1] sm:$0x7]  ;;  %v10896_v33 = vld [vmem:[%s14587_s0 + $0x190] sm:$0xff] }
  0x46   :  { %14814 = vst [vmem:[#allocation44_spill] sm:$0xff] %v10852_v34  ;;  %v10867_v56 = vsel %vm122_vm1, %v736_v48, %v10844_v36  ;;  %v10886_v48 = vld [vmem:[%s14587_s0 + $0x180] sm:$0xff] }
  0x47   :  { %14816 = vst [vmem:[#allocation46_spill] sm:$0xff] %v10867_v56 }
  0x48   :  { %14818 = vst [vmem:[#allocation48_spill] sm:$0xff] %v10896_v33 }
  0x4b   :  { %9396 = vmatmul.msk.f32.vlgmr.msra.gmra.mxu0 %vm126_vm2, %v10848_v47  ;;  %9399 = vmatmul.msk.f32.vlgmr.msra.gmra.mxu1 %vm126_vm2, %v10852_v34  ;;  %v10913_v34 = vld [vmem:[%s14587_s0 + $0x1a8] sm:$0xff]  ;;  %v768_v47 = vrot.slane %v10886_v48, 1 }
  0x4c   :  { %9419 = vmatpush.msk.msra.mxu0 %vm131_vm0, %v10857_v53  ;;  %9402 = vmatmul.msk.f32.vlgmr.msra.gmra.mxu2 %vm126_vm2, %v10861_v32  ;;  %v10908_v32 = vld [vmem:[%s14587_s0 + $0x1a0] sm:$0xff]  ;;  %14820 = vst [vmem:[#allocation50_spill] sm:$0xff] %v10913_v34  ;;  %v10941_v28 = vrot.slane %v10913_v34, 1 }
  0x4d   :  { %9422 = vmatpush.msk.msra.mxu1 %vm131_vm0, %v10857_v53  ;;  %9405 = vmatmul.msk.f32.vlgmr.msra.gmra.mxu3 %vm126_vm2, %v10867_v56  ;;  %v10901_v56 = vld [vmem:[%s14587_s0 + $0x198] sm:$0xff]  ;;  %v832_v38 = vrot.slane %v10908_v32, 1 }
  0x4e   :  { %9425 = vmatpush.msk.msra.mxu2 %vm131_vm0, %v10857_v53  ;;  %9428 = vmatpush.msk.msra.mxu3 %vm131_vm0, %v10857_v53  ;;  %14819 = vst [vmem:[#allocation49_spill] sm:$0xff] %v10901_v56  ;;  %v10935_v39 = vrot.slane %v10901_v56, 1 }
  0x4f   :  { %14824 = vst [vmem:[#allocation54_spill] sm:$0xff] %v10941_v28 }
  0x50   :  { %14823 = vst [vmem:[#allocation53_spill] sm:$0xff] %v10935_v39 }
  0x53   :  { %9397 = vmatmul.msk.f32.gmra.mxu0 %vm126_vm2, %v10818_v52  ;;  %9400 = vmatmul.msk.f32.gmra.mxu1 %vm126_vm2, %v10834_v60  ;;  %v10924_v52 = vld [vmem:[%s14587_s0 + $0x1b0] sm:$0xff]  ;;  %v800_v60 = vrot.slane %v10896_v33, 1 }
  0x54   :  { %9403 = vmatmul.msk.f32.gmra.mxu2 %vm126_vm2, %v10840_v58  ;;  %v864_v18 = vrot.slane %v10924_v52, 1  ;;  %v10949_v58 = vsel %vm122_vm1, %v768_v47, %v10919_v57 }
  0x55   :  { %9406 = vmatmul.msk.f32.gmra.mxu3 %vm126_vm2, %v10844_v36  ;;  %14826 = vst [vmem:[#allocation56_spill] sm:$0xff] %v10949_v58  ;;  %v10953_v8 = vsel %vm122_vm1, %v800_v60, %v10935_v39  ;;  %v10957_v36 = vsel %vm122_vm1, %v832_v38, %v10941_v28 }
  0x56   :  { %14827 = vst [vmem:[#allocation57_spill] sm:$0xff] %v10953_v8  ;;  %v10963_v37 = vsel %vm122_vm1, %v864_v18, %v10945_v14 }
  0x57   :  { %14828 = vst [vmem:[#allocation58_spill] sm:$0xff] %v10957_v36 }
  0x58   :  { %14829 = vst [vmem:[#allocation59_spill] sm:$0xff] %v10963_v37 }
  0x5b   :  { %9408 = vmatmul.msk.f32.vlgmr.msrb.gmra.mxu0 %vm126_vm2, %v10949_v58  ;;  %9411 = vmatmul.msk.f32.vlgmr.msrb.gmra.mxu1 %vm126_vm2, %v10953_v8 }
  0x5c   :  { %9431 = vmatpush.msk.msrb.mxu0 %vm131_vm0, %v10857_v53  ;;  %9414 = vmatmul.msk.f32.vlgmr.msrb.gmra.mxu2 %vm126_vm2, %v10957_v36 }
  0x5d   :  { %9434 = vmatpush.msk.msrb.mxu1 %vm131_vm0, %v10857_v53  ;;  %9417 = vmatmul.msk.f32.vlgmr.msrb.gmra.mxu3 %vm126_vm2, %v10963_v37 }
  0x5e   :  { %9437 = vmatpush.msk.msrb.mxu2 %vm131_vm0, %v10857_v53  ;;  %9440 = vmatpush.msk.msrb.mxu3 %vm131_vm0, %v10857_v53 }
  0x63   :  { %9409 = vmatmul.msk.f32.gmra.mxu0 %vm126_vm2, %v10919_v57  ;;  %9412 = vmatmul.msk.f32.gmra.mxu1 %vm126_vm2, %v10935_v39 }
  0x64   :  { %9415 = vmatmul.msk.f32.gmra.mxu2 %vm126_vm2, %v10941_v28 }
  0x65   :  { %9418 = vmatmul.msk.f32.gmra.mxu3 %vm126_vm2, %v10945_v14 }
  0x6b   :  { %9420 = vmatmul.msk.f32.vlgmr.msra.gmra.mxu0 %vm126_vm2, %v10407_v1  ;;  %9423 = vmatmul.msk.f32.vlgmr.msra.gmra.mxu1 %vm126_vm2, %v10423_v5 }
  0x6c   :  { %9443 = vmatpush.msk.msra.mxu0 %vm131_vm0, %v10857_v53  ;;  %9426 = vmatmul.msk.f32.vlgmr.msra.gmra.mxu2 %vm126_vm2, %v10441_v9 }
  0x6d   :  { %9446 = vmatpush.msk.msra.mxu1 %vm131_vm0, %v10857_v53  ;;  %9429 = vmatmul.msk.f32.vlgmr.msra.gmra.mxu3 %vm126_vm2, %v10451_v11 }
  0x6e   :  { %9449 = vmatpush.msk.msra.mxu2 %vm131_vm0, %v10857_v53  ;;  %9452 = vmatpush.msk.msra.mxu3 %vm131_vm0, %v10857_v53 }
  0x73   :  { %9421 = vmatmul.msk.f32.gmra.mxu0 %vm126_vm2, %v10412_v2  ;;  %9424 = vmatmul.msk.f32.gmra.mxu1 %vm126_vm2, %v10428_v6 }
  0x74   :  { %9427 = vmatmul.msk.f32.gmra.mxu2 %vm126_vm2, %v10446_v10 }
  0x75   :  { %9430 = vmatmul.msk.f32.gmra.mxu3 %vm126_vm2, %v10461_v15 }
  0x7b   :  { %9432 = vmatmul.msk.f32.vlgmr.msrb.gmra.mxu0 %vm126_vm2, %v10505_v21  ;;  %9435 = vmatmul.msk.f32.vlgmr.msrb.gmra.mxu1 %vm126_vm2, %v10515_v23 }
  0x7c   :  { %9455 = vmatpush.msk.msrb.mxu0 %vm131_vm0, %v10857_v53  ;;  %9438 = vmatmul.msk.f32.vlgmr.msrb.gmra.mxu2 %vm126_vm2, %v10526_v25 }
  0x7d   :  { %9458 = vmatpush.msk.msrb.mxu1 %vm131_vm0, %v10857_v53  ;;  %9441 = vmatmul.msk.f32.vlgmr.msrb.gmra.mxu3 %vm126_vm2, %v10542_v29 }
  0x7e   :  { %9461 = vmatpush.msk.msrb.mxu2 %vm131_vm0, %v10857_v53  ;;  %9464 = vmatpush.msk.msrb.mxu3 %vm131_vm0, %v10857_v53 }
  0x83   :  { %9433 = vmatmul.msk.f32.gmra.mxu0 %vm126_vm2, %v10510_v22  ;;  %9436 = vmatmul.msk.f32.gmra.mxu1 %vm126_vm2, %v10520_v24 }
  0x84   :  { %9439 = vmatmul.msk.f32.gmra.mxu2 %vm126_vm2, %v10531_v26 }
  0x85   :  { %9442 = vmatmul.msk.f32.gmra.mxu3 %vm126_vm2, %v10547_v30 }
  0x88   :  { %v11035_v18 = vpop.f32.mrf.mxu0  ;;  %v11037_v38 = vpop.f32.mrf.mxu1 }
  0x89   :  { %14830 = vst [vmem:[#allocation60_spill] sm:$0xff] %v11035_v18 }
  0x8a   :  { %14831 = vst [vmem:[#allocation61_spill] sm:$0xff] %v11037_v38 }
  0x8b   :  { %9444 = vmatmul.msk.f32.vlgmr.msra.gmra.mxu0 %vm126_vm2, %v10600_v41  ;;  %9447 = vmatmul.msk.f32.vlgmr.msra.gmra.mxu1 %vm126_vm2, %v10610_v43 }
  0x8c   :  { %9467 = vmatpush.msk.msra.mxu0 %vm131_vm0, %v10857_v53  ;;  %9450 = vmatmul.msk.f32.vlgmr.msra.gmra.mxu2 %vm126_vm2, %v10622_v45 }
  0x8d   :  { %9470 = vmatpush.msk.msra.mxu1 %vm131_vm0, %v10857_v53  ;;  %9453 = vmatmul.msk.f32.vlgmr.msra.gmra.mxu3 %vm126_vm2, %v10638_v49 }
  0x8e   :  { %9473 = vmatpush.msk.msra.mxu2 %vm131_vm0, %v10857_v53  ;;  %9476 = vmatpush.msk.msra.mxu3 %vm131_vm0, %v10857_v53 }
  0x8f   :  { %v11055_v60 = vpop.f32.mrf.mxu2 }
  0x90   :  { %v11057_v47 = vpop.f32.mrf.mxu0  ;;  %v11059_v38 = vpop.f32.mrf.mxu3 }
  0x91   :  { %14832 = vst [vmem:[#allocation62_spill] sm:$0xff] %v11057_v47  ;;  %v11061_v18 = vpop.f32.mrf.mxu1 }
  0x92   :  { %14833 = vst [vmem:[#allocation63_spill] sm:$0xff] %v11061_v18 }
  0x93   :  { %9445 = vmatmul.msk.f32.gmra.mxu0 %vm126_vm2, %v10605_v42  ;;  %9448 = vmatmul.msk.f32.gmra.mxu1 %vm126_vm2, %v10615_v44 }
  0x94   :  { %9451 = vmatmul.msk.f32.gmra.mxu2 %vm126_vm2, %v10627_v46 }
  0x95   :  { %9454 = vmatmul.msk.f32.gmra.mxu3 %vm126_vm2, %v10643_v50 }
  0x97   :  { %v11071_v14 = vpop.f32.mrf.mxu2 }
  0x98   :  { %14834 = vst [vmem:[#allocation64_spill] sm:$0xff] %v11071_v14  ;;  %v11073_v28 = vpop.f32.mrf.mxu0  ;;  %v11075_v47 = vpop.f32.mrf.mxu3 }
  0x99   :  { %14835 = vst [vmem:[#allocation65_spill] sm:$0xff] %v11073_v28  ;;  %v11077_v39 = vpop.f32.mrf.mxu1 }
  0x9a   :  { %14836 = vst [vmem:[#allocation66_spill] sm:$0xff] %v11075_v47 }
  0x9b   :  { %14837 = vst [vmem:[#allocation67_spill] sm:$0xff] %v11077_v39  ;;  %9456 = vmatmul.msk.f32.vlgmr.msrb.gmra.mxu0 %vm126_vm2, %v10696_v61  ;;  %9459 = vmatmul.msk.f32.vlgmr.msrb.gmra.mxu1 %vm126_vm2, %v10706_v63 }
  0x9c   :  { %9479 = vmatpush.msk.msrb.mxu0 %vm131_vm0, %v10857_v53  ;;  %9462 = vmatmul.msk.f32.vlgmr.msrb.gmra.mxu2 %vm126_vm2, %v10718_v4 }
  0x9d   :  { %9482 = vmatpush.msk.msrb.mxu1 %vm131_vm0, %v10857_v53  ;;  %9465 = vmatmul.msk.f32.vlgmr.msrb.gmra.mxu3 %vm126_vm2, %v10732_v16 }
  0x9e   :  { %9485 = vmatpush.msk.msrb.mxu2 %vm131_vm0, %v10857_v53  ;;  %9488 = vmatpush.msk.msrb.mxu3 %vm131_vm0, %v10857_v53 }
  0x9f   :  { %v11095_v39 = vpop.f32.mrf.mxu2 }
  0xa0   :  { %14838 = vst [vmem:[#allocation68_spill] sm:$0xff] %v11095_v39  ;;  %v11097_v28 = vpop.f32.mrf.mxu0  ;;  %v11099_v18 = vpop.f32.mrf.mxu3 }
  0xa1   :  { %14839 = vst [vmem:[#allocation69_spill] sm:$0xff] %v11097_v28  ;;  %v11101_v37 = vpop.f32.mrf.mxu1 }
  0xa2   :  { %14840 = vst [vmem:[#allocation70_spill] sm:$0xff] %v11099_v18 }
  0xa3   :  { %14841 = vst [vmem:[#allocation71_spill] sm:$0xff] %v11101_v37  ;;  %9457 = vmatmul.msk.f32.gmra.mxu0 %vm126_vm2, %v10701_v62  ;;  %9460 = vmatmul.msk.f32.gmra.mxu1 %vm126_vm2, %v10711_v3  ;;  %v11122_v37 = vld [vmem:[%s14588_s1 + $0x8] sm:$0x7] }
  0xa4   :  { %9463 = vmatmul.msk.f32.gmra.mxu2 %vm126_vm2, %v10723_v7 }
  0xa5   :  { %9466 = vmatmul.msk.f32.gmra.mxu3 %vm126_vm2, %v10737_v27 }
  0xa7   :  { %v11111_v53 = vpop.f32.mrf.mxu2 }
  0xa8   :  { %14842 = vst [vmem:[#allocation72_spill] sm:$0xff] %v11111_v53  ;;  %v11113_v36 = vpop.f32.mrf.mxu0  ;;  %v11115_v28 = vpop.f32.mrf.mxu3 }
  0xa9   :  { %14843 = vst [vmem:[#allocation73_spill] sm:$0xff] %v11113_v36  ;;  %v11117_v8 = vpop.f32.mrf.mxu1 }
  0xaa   :  { %14844 = vst [vmem:[#allocation74_spill] sm:$0xff] %v11115_v28 }
  0xab   :  { %14845 = vst [vmem:[#allocation75_spill] sm:$0xff] %v11117_v8  ;;  %9468 = vmatmul.msk.f32.vlgmr.msra.gmra.mxu0 %vm126_vm2, %v10786_v12  ;;  %9471 = vmatmul.msk.f32.vlgmr.msra.gmra.mxu1 %vm126_vm2, %v10796_v35 }
  0xac   :  { %9492 = vmatpush.msk.msra.mxu0 %vm131_vm0, %v11122_v37  ;;  %9474 = vmatmul.msk.f32.vlgmr.msra.gmra.mxu2 %vm126_vm2, %v10807_v0 }
  0xad   :  { %9495 = vmatpush.msk.msra.mxu1 %vm131_vm0, %v11122_v37  ;;  %9477 = vmatmul.msk.f32.vlgmr.msra.gmra.mxu3 %vm126_vm2, %v10823_v13 }
  0xae   :  { %9498 = vmatpush.msk.msra.mxu2 %vm131_vm0, %v11122_v37  ;;  %9501 = vmatpush.msk.msra.mxu3 %vm131_vm0, %v11122_v37 }
  0xaf   :  { %v11140_v8 = vpop.f32.mrf.mxu2 }
  0xb0   :  { %14846 = vst [vmem:[#allocation76_spill] sm:$0xff] %v11140_v8  ;;  %v11142_v36 = vpop.f32.mrf.mxu0  ;;  %v11144_v57 = vpop.f32.mrf.mxu3 }
  0xb1   :  { %14847 = vst [vmem:[#allocation77_spill] sm:$0xff] %v11142_v36  ;;  %v11146_v58 = vpop.f32.mrf.mxu1 }
  0xb2   :  { %14848 = vst [vmem:[#allocation78_spill] sm:$0xff] %v11144_v57  ;;  %v1549_v57 = vrot.slane %v10412_v2, 2  ;;  %v1641_v2 = vrot.slane %v10451_v11, 2 }
  0xb3   :  { %14849 = vst [vmem:[#allocation79_spill] sm:$0xff] %v11146_v58  ;;  %9469 = vmatmul.msk.f32.gmra.mxu0 %vm126_vm2, %v10791_v31  ;;  %9472 = vmatmul.msk.f32.gmra.mxu1 %vm126_vm2, %v10801_v51 }
  0xb4   :  { %9475 = vmatmul.msk.f32.gmra.mxu2 %vm126_vm2, %v10812_v55 }
  0xb5   :  { %9478 = vmatmul.msk.f32.gmra.mxu3 %vm126_vm2, %v10828_v54 }
  0xb7   :  { %v11156_v20 = vpop.f32.mrf.mxu2 }
  0xb8   :  { %14850 = vst [vmem:[#allocation80_spill] sm:$0xff] %v11156_v20  ;;  %v11158_v19 = vpop.f32.mrf.mxu0  ;;  %v11160_v36 = vpop.f32.mrf.mxu3  ;;  %v1548_v20 = vrot.slane %v10407_v1, 2  ;;  %v11204_v1 = vrot.slane %v10446_v10, 2 }
  0xb9   :  { %14851 = vst [vmem:[#allocation81_spill] sm:$0xff] %v11158_v19  ;;  %v11162_v17 = vpop.f32.mrf.mxu1 }
  0xba   :  { %14852 = vst [vmem:[#allocation82_spill] sm:$0xff] %v11160_v36  ;;  %v1550_v53 = vsel %vm1547_vm3, %v1548_v20, %v1549_v57 }
  0xbb   :  { %14853 = vst [vmem:[#allocation83_spill] sm:$0xff] %v11162_v17  ;;  %9480 = vmatmul.msk.f32.vlgmr.msrb.gmra.mxu0 %vm126_vm2, %v10886_v48  ;;  %9483 = vmatmul.msk.f32.vlgmr.msrb.gmra.mxu1 %vm126_vm2, %v10896_v33 }
  0xbc   :  { %9504 = vmatpush.msk.msrb.mxu0 %vm131_vm0, %v11122_v37  ;;  %9486 = vmatmul.msk.f32.vlgmr.msrb.gmra.mxu2 %vm126_vm2, %v10908_v32  ;;  %14859 = vst [vmem:[#allocation89_spill] sm:$0xff] %v11204_v1 }
  0xbd   :  { %9507 = vmatpush.msk.msrb.mxu1 %vm131_vm0, %v11122_v37  ;;  %9489 = vmatmul.msk.f32.vlgmr.msrb.gmra.mxu3 %vm126_vm2, %v10924_v52 }
  0xbe   :  { %9510 = vmatpush.msk.msrb.mxu2 %vm131_vm0, %v11122_v37  ;;  %9513 = vmatpush.msk.msrb.mxu3 %vm131_vm0, %v11122_v37 }
  0xbf   :  { %v11180_v17 = vpop.f32.mrf.mxu2 }
  0xc0   :  { %14854 = vst [vmem:[#allocation84_spill] sm:$0xff] %v11180_v17  ;;  %v11182_v19 = vpop.f32.mrf.mxu0  ;;  %v11184_v58 = vpop.f32.mrf.mxu3  ;;  %v11208_v17 = vrot.slane %v10461_v15, 2 }
  0xc1   :  { %14855 = vst [vmem:[#allocation85_spill] sm:$0xff] %v11182_v19  ;;  %v11186_v36 = vpop.f32.mrf.mxu1  ;;  %v1581_v19 = vrot.slane %v10423_v5, 2 }
  0xc2   :  { %14856 = vst [vmem:[#allocation86_spill] sm:$0xff] %v11184_v58  ;;  %v11198_v58 = vrot.slane %v10428_v6, 2 }
  0xc3   :  { %14857 = vst [vmem:[#allocation87_spill] sm:$0xff] %v11186_v36  ;;  %9481 = vmatmul.msk.f32.gmra.mxu0 %vm126_vm2, %v10891_v59  ;;  %9484 = vmatmul.msk.f32.gmra.mxu1 %vm126_vm2, %v10901_v56  ;;  %v1611_v36 = vrot.slane %v10441_v9, 2 }
  0xc4   :  { %9487 = vmatmul.msk.f32.gmra.mxu2 %vm126_vm2, %v10913_v34  ;;  %14858 = vst [vmem:[#allocation88_spill] sm:$0xff] %v11198_v58  ;;  %v11221_v47 = vsel %vm1547_vm3, %v1581_v19, %v11198_v58 }
  0xc5   :  { %9490 = vmatmul.msk.f32.gmra.mxu3 %vm126_vm2, %v10929_v40  ;;  %14860 = vst [vmem:[#allocation90_spill] sm:$0xff] %v11208_v17  ;;  %v11225_v14 = vsel %vm1547_vm3, %v1611_v36, %v11204_v1 }
  0xc6   :  { %14865 = vst [vmem:[#allocation95_spill] sm:$0xff] %v11221_v47 }
  0xc7   :  { %v11210_v8 = vpop.f32.mrf.mxu2  ;;  %14866 = vst [vmem:[#allocation96_spill] sm:$0xff] %v11225_v14 }
  0xc8   :  { %14861 = vst [vmem:[#allocation91_spill] sm:$0xff] %v11210_v8  ;;  %v11212_v28 = vpop.f32.mrf.mxu0  ;;  %v11215_v18 = vpop.f32.mrf.mxu3  ;;  %v11230_v8 = vsel %vm1547_vm3, %v1641_v2, %v11208_v17  ;;  %v1671_v2 = vrot.slane %v10505_v21, 2 }
  0xc9   :  { %14862 = vst [vmem:[#allocation92_spill] sm:$0xff] %v11212_v28  ;;  %v11217_v39 = vpop.f32.mrf.mxu1  ;;  %v1701_v28 = vrot.slane %v10515_v23, 2 }
  0xca   :  { %14863 = vst [vmem:[#allocation93_spill] sm:$0xff] %v11215_v18 }
  0xcb   :  { %14864 = vst [vmem:[#allocation94_spill] sm:$0xff] %v11217_v39  ;;  %9493 = vmatmul.msk.f32.vlgmr.msra.gmra.mxu0 %vm126_vm2, %v1550_v53  ;;  %9496 = vmatmul.msk.f32.vlgmr.msra.gmra.mxu1 %vm126_vm2, %v11221_v47  ;;  %v11259_v39 = vrot.slane %v10510_v22, 2 }
  0xcc   :  { %14867 = vst [vmem:[#allocation97_spill] sm:$0xff] %v11230_v8  ;;  %9516 = vmatpush.msk.msra.mxu0 %vm131_vm0, %v11122_v37  ;;  %9499 = vmatmul.msk.f32.vlgmr.msra.gmra.mxu2 %vm126_vm2, %v11225_v14 }
  0xcd   :  { %9519 = vmatpush.msk.msra.mxu1 %vm131_vm0, %v11122_v37  ;;  %9502 = vmatmul.msk.f32.vlgmr.msra.gmra.mxu3 %vm126_vm2, %v11230_v8  ;;  %14872 = vst [vmem:[#allocation102_spill] sm:$0xff] %v11259_v39  ;;  %v11275_v8 = vrot.slane %v10547_v30, 2  ;;  %v11283_v47 = vsel %vm1547_vm3, %v1671_v2, %v11259_v39 }
  0xce   :  { %9522 = vmatpush.msk.msra.mxu2 %vm131_vm0, %v11122_v37  ;;  %9525 = vmatpush.msk.msra.mxu3 %vm131_vm0, %v11122_v37  ;;  %14878 = vst [vmem:[#allocation108_spill] sm:$0xff] %v11283_v47 }
  0xcf   :  { %v11246_v19 = vpop.f32.mrf.mxu2  ;;  %14875 = vst [vmem:[#allocation105_spill] sm:$0xff] %v11275_v8 }
  0xd0   :  { %14868 = vst [vmem:[#allocation98_spill] sm:$0xff] %v11246_v19  ;;  %v11248_v20 = vpop.f32.mrf.mxu0  ;;  %v11250_v36 = vpop.f32.mrf.mxu3 }
  0xd1   :  { %14869 = vst [vmem:[#allocation99_spill] sm:$0xff] %v11248_v20  ;;  %v11252_v53 = vpop.f32.mrf.mxu1  ;;  %v11265_v20 = vrot.slane %v10520_v24, 2 }
  0xd2   :  { %14870 = vst [vmem:[#allocation100_spill] sm:$0xff] %v11250_v36 }
  0xd3   :  { %14871 = vst [vmem:[#allocation101_spill] sm:$0xff] %v11252_v53  ;;  %9494 = vmatmul.msk.f32.gmra.mxu0 %vm126_vm2, %v1549_v57  ;;  %9497 = vmatmul.msk.f32.gmra.mxu1 %vm126_vm2, %v11198_v58  ;;  %v1731_v57 = vrot.slane %v10526_v25, 2  ;;  %v11271_v53 = vrot.slane %v10531_v26, 2  ;;  %v1761_v58 = vrot.slane %v10542_v29, 2  ;;  %v11291_v19 = vsel %vm1547_vm3, %v1701_v28, %v11265_v20 }
  0xd4   :  { %9500 = vmatmul.msk.f32.gmra.mxu2 %vm126_vm2, %v11204_v1  ;;  %14873 = vst [vmem:[#allocation103_spill] sm:$0xff] %v11265_v20 }
  0xd5   :  { %9503 = vmatmul.msk.f32.gmra.mxu3 %vm126_vm2, %v11208_v17  ;;  %14874 = vst [vmem:[#allocation104_spill] sm:$0xff] %v11271_v53  ;;  %v11295_v18 = vsel %vm1547_vm3, %v1731_v57, %v11271_v53 }
  0xd6   :  { %14881 = vst [vmem:[#allocation111_spill] sm:$0xff] %v11291_v19 }
  0xd7   :  { %v11277_v14 = vpop.f32.mrf.mxu2  ;;  %14882 = vst [vmem:[#allocation112_spill] sm:$0xff] %v11295_v18 }
  0xd8   :  { %14876 = vst [vmem:[#allocation106_spill] sm:$0xff] %v11277_v14  ;;  %v11279_v1 = vpop.f32.mrf.mxu0  ;;  %v11285_v36 = vpop.f32.mrf.mxu3 }
  0xd9   :  { %14877 = vst [vmem:[#allocation107_spill] sm:$0xff] %v11279_v1  ;;  %v11287_v17 = vpop.f32.mrf.mxu1  ;;  %v11301_v1 = vsel %vm1547_vm3, %v1761_v58, %v11275_v8 }
  0xda   :  { %14879 = vst [vmem:[#allocation109_spill] sm:$0xff] %v11285_v36 }
  0xdb   :  { %14880 = vst [vmem:[#allocation110_spill] sm:$0xff] %v11287_v17  ;;  %9505 = vmatmul.msk.f32.vlgmr.msrb.gmra.mxu0 %vm126_vm2, %v11283_v47  ;;  %9508 = vmatmul.msk.f32.vlgmr.msrb.gmra.mxu1 %vm126_vm2, %v11291_v19  ;;  %v1791_v17 = vrot.slane %v10600_v41, 2  ;;  %v1881_v19 = vrot.slane %v10638_v49, 2 }
  0xdc   :  { %14883 = vst [vmem:[#allocation113_spill] sm:$0xff] %v11301_v1  ;;  %9528 = vmatpush.msk.msrb.mxu0 %vm131_vm0, %v11122_v37  ;;  %9511 = vmatmul.msk.f32.vlgmr.msrb.gmra.mxu2 %vm126_vm2, %v11295_v18  ;;  %v11337_v18 = vrot.slane %v10615_v44, 2 }
  0xdd   :  { %9531 = vmatpush.msk.msrb.mxu1 %vm131_vm0, %v11122_v37  ;;  %9514 = vmatmul.msk.f32.vlgmr.msrb.gmra.mxu3 %vm126_vm2, %v11301_v1  ;;  %v11331_v1 = vrot.slane %v10605_v42, 2 }
  0xde   :  { %9534 = vmatpush.msk.msrb.mxu2 %vm131_vm0, %v11122_v37  ;;  %9537 = vmatpush.msk.msrb.mxu3 %vm131_vm0, %v11122_v37  ;;  %14889 = vst [vmem:[#allocation119_spill] sm:$0xff] %v11337_v18 }
  0xdf   :  { %v11317_v28 = vpop.f32.mrf.mxu2  ;;  %14888 = vst [vmem:[#allocation118_spill] sm:$0xff] %v11331_v1 }
  0xe0   :  { %14884 = vst [vmem:[#allocation114_spill] sm:$0xff] %v11317_v28  ;;  %v11319_v58 = vpop.f32.mrf.mxu0  ;;  %v11321_v2 = vpop.f32.mrf.mxu3 }
  0xe1   :  { %14885 = vst [vmem:[#allocation115_spill] sm:$0xff] %v11319_v58  ;;  %v11323_v57 = vpop.f32.mrf.mxu1  ;;  %v1821_v58 = vrot.slane %v10610_v43, 2 }
  0xe2   :  { %14886 = vst [vmem:[#allocation116_spill] sm:$0xff] %v11321_v2  ;;  %v11355_v2 = vsel %vm1547_vm3, %v1791_v17, %v11331_v1 }
  0xe3   :  { %14887 = vst [vmem:[#allocation117_spill] sm:$0xff] %v11323_v57  ;;  %9506 = vmatmul.msk.f32.gmra.mxu0 %vm126_vm2, %v11259_v39  ;;  %9509 = vmatmul.msk.f32.gmra.mxu1 %vm126_vm2, %v11265_v20  ;;  %v1851_v57 = vrot.slane %v10622_v45, 2  ;;  %v11343_v20 = vrot.slane %v10627_v46, 2  ;;  %v11347_v39 = vrot.slane %v10643_v50, 2  ;;  %v11363_v36 = vsel %vm1547_vm3, %v1821_v58, %v11337_v18 }
  0xe4   :  { %9512 = vmatmul.msk.f32.gmra.mxu2 %vm126_vm2, %v11271_v53  ;;  %14894 = vst [vmem:[#allocation124_spill] sm:$0xff] %v11355_v2 }
  0xe5   :  { %9515 = vmatmul.msk.f32.gmra.mxu3 %vm126_vm2, %v11275_v8  ;;  %14890 = vst [vmem:[#allocation120_spill] sm:$0xff] %v11343_v20  ;;  %v11367_v14 = vsel %vm1547_vm3, %v1851_v57, %v11343_v20 }
  0xe6   :  { %14891 = vst [vmem:[#allocation121_spill] sm:$0xff] %v11347_v39 }
  0xe7   :  { %v11349_v47 = vpop.f32.mrf.mxu2  ;;  %14897 = vst [vmem:[#allocation127_spill] sm:$0xff] %v11363_v36 }
  0xe8   :  { %14892 = vst [vmem:[#allocation122_spill] sm:$0xff] %v11349_v47  ;;  %v11351_v53 = vpop.f32.mrf.mxu0  ;;  %v11357_v28 = vpop.f32.mrf.mxu3 }
  0xe9   :  { %14893 = vst [vmem:[#allocation123_spill] sm:$0xff] %v11351_v53  ;;  %v11359_v8 = vpop.f32.mrf.mxu1  ;;  %v11373_v53 = vsel %vm1547_vm3, %v1881_v19, %v11347_v39 }
  0xea   :  { %14895 = vst [vmem:[#allocation125_spill] sm:$0xff] %v11357_v28 }
  0xeb   :  { %14896 = vst [vmem:[#allocation126_spill] sm:$0xff] %v11359_v8  ;;  %9517 = vmatmul.msk.f32.vlgmr.msra.gmra.mxu0 %vm126_vm2, %v11355_v2  ;;  %9520 = vmatmul.msk.f32.vlgmr.msra.gmra.mxu1 %vm126_vm2, %v11363_v36  ;;  %v1911_v8 = vrot.slane %v10696_v61, 2  ;;  %v11413_v36 = vrot.slane %v10723_v7, 2  ;;  %v2001_v61 = vrot.slane %v10732_v16, 2 }
  0xec   :  { %14898 = vst [vmem:[#allocation128_spill] sm:$0xff] %v11367_v14  ;;  %9540 = vmatpush.msk.msra.mxu0 %vm131_vm0, %v11122_v37  ;;  %9523 = vmatmul.msk.f32.vlgmr.msra.gmra.mxu2 %vm126_vm2, %v11367_v14  ;;  %v1941_v14 = vrot.slane %v10706_v63, 2 }
  0xed   :  { %14899 = vst [vmem:[#allocation129_spill] sm:$0xff] %v11373_v53  ;;  %9543 = vmatpush.msk.msra.mxu1 %vm131_vm0, %v11122_v37  ;;  %9526 = vmatmul.msk.f32.vlgmr.msra.gmra.mxu3 %vm126_vm2, %v11373_v53  ;;  %v1912_v53 = vrot.slane %v10701_v62, 2  ;;  %v11417_v62 = vrot.slane %v10737_v27, 2 }
  0xee   :  { %9546 = vmatpush.msk.msra.mxu2 %vm131_vm0, %v11122_v37  ;;  %9549 = vmatpush.msk.msra.mxu3 %vm131_vm0, %v11122_v37  ;;  %14903 = vst [vmem:[#allocation133_spill] sm:$0xff] %v11413_v36 }
  0xef   :  { %v11389_v17 = vpop.f32.mrf.mxu2  ;;  %14904 = vst [vmem:[#allocation134_spill] sm:$0xff] %v11417_v62  ;;  %v11439_v27 = vsel %vm1547_vm3, %v2001_v61, %v11417_v62  ;;  %v2031_v61 = vrot.slane %v10786_v12, 2 }
  0xf0   :  { %v11391_v19 = vpop.f32.mrf.mxu0  ;;  %v11393_v58 = vpop.f32.mrf.mxu3  ;;  %14909 = vst [vmem:[#allocation139_spill] sm:$0xff] %v11439_v27 }
  0xf1   :  { %14900 = vst [vmem:[#allocation130_spill] sm:$0xff] %v11391_v19  ;;  %v11395_v57 = vpop.f32.mrf.mxu1  ;;  %v11407_v19 = vrot.slane %v10711_v3, 2 }
  0xf2   :  { %14901 = vst [vmem:[#allocation131_spill] sm:$0xff] %v11395_v57  ;;  %v1971_v57 = vrot.slane %v10718_v4, 2 }
  0xf3   :  { %9518 = vmatmul.msk.f32.gmra.mxu0 %vm126_vm2, %v11331_v1  ;;  %9521 = vmatmul.msk.f32.gmra.mxu1 %vm126_vm2, %v11337_v18  ;;  %14902 = vst [vmem:[#allocation132_spill] sm:$0xff] %v11407_v19  ;;  %v1913_v1 = vsel %vm1547_vm3, %v1911_v8, %v1912_v53 }
  0xf4   :  { %9524 = vmatmul.msk.f32.gmra.mxu2 %vm126_vm2, %v11343_v20  ;;  %v11434_v47 = vsel %vm1547_vm3, %v1971_v57, %v11413_v36 }
  0xf5   :  { %9527 = vmatmul.msk.f32.gmra.mxu3 %vm126_vm2, %v11347_v39  ;;  %v11430_v39 = vsel %vm1547_vm3, %v1941_v14, %v11407_v19  ;;  %14908 = vst [vmem:[#allocation138_spill] sm:$0xff] %v11434_v47 }
  0xf6   :  { %14907 = vst [vmem:[#allocation137_spill] sm:$0xff] %v11430_v39 }
  0xf7   :  { %v11419_v18 = vpop.f32.mrf.mxu2 }
  0xf8   :  { %v11421_v20 = vpop.f32.mrf.mxu0  ;;  %v11424_v2 = vpop.f32.mrf.mxu3 }
  0xf9   :  { %14905 = vst [vmem:[#allocation135_spill] sm:$0xff] %v11421_v20  ;;  %v11426_v28 = vpop.f32.mrf.mxu1  ;;  %v2121_v20 = vrot.slane %v10823_v13, 2 }
  0xfa   :  { %14906 = vst [vmem:[#allocation136_spill] sm:$0xff] %v11426_v28  ;;  %v11468_v28 = vrot.slane %v10791_v31, 2 }
  0xfb   :  { %9529 = vmatmul.msk.f32.vlgmr.msrb.gmra.mxu0 %vm126_vm2, %v1913_v1  ;;  %9532 = vmatmul.msk.f32.vlgmr.msrb.gmra.mxu1 %vm126_vm2, %v11430_v39 }
  0xfc   :  { %9552 = vmatpush.msk.msrb.mxu0 %vm131_vm0, %v11122_v37  ;;  %9535 = vmatmul.msk.f32.vlgmr.msrb.gmra.mxu2 %vm126_vm2, %v11434_v47  ;;  %14912 = vst [vmem:[#allocation142_spill] sm:$0xff] %v11468_v28  ;;  %v11492_v47 = vsel %vm1547_vm3, %v2031_v61, %v11468_v28 }
  0xfd   :  { %9555 = vmatpush.msk.msrb.mxu1 %vm131_vm0, %v11122_v37  ;;  %9538 = vmatmul.msk.f32.vlgmr.msrb.gmra.mxu3 %vm126_vm2, %v11439_v27  ;;  %14917 = vst [vmem:[#allocation147_spill] sm:$0xff] %v11492_v47 }
  0xfe   :  { %9558 = vmatpush.msk.msrb.mxu2 %vm131_vm0, %v11122_v37  ;;  %9561 = vmatpush.msk.msrb.mxu3 %vm131_vm0, %v11122_v37  ;;  %v2061_v37 = vrot.slane %v10796_v35, 2 }
  0xff   :  { %v11455_v8 = vpop.f32.mrf.mxu2 }
 0x100   :  { %v11457_v14 = vpop.f32.mrf.mxu0  ;;  %v11459_v1 = vpop.f32.mrf.mxu3 }
 0x101   :  { %14910 = vst [vmem:[#allocation140_spill] sm:$0xff] %v11457_v14  ;;  %v11461_v57 = vpop.f32.mrf.mxu1  ;;  %v11474_v14 = vrot.slane %v10801_v51, 2 }
 0x102   :  { %14911 = vst [vmem:[#allocation141_spill] sm:$0xff] %v11461_v57  ;;  %v11480_v57 = vrot.slane %v10812_v55, 2 }
 0x103   :  { %9530 = vmatmul.msk.f32.gmra.mxu0 %vm126_vm2, %v1912_v53  ;;  %9533 = vmatmul.msk.f32.gmra.mxu1 %vm126_vm2, %v11407_v19  ;;  %14913 = vst [vmem:[#allocation143_spill] sm:$0xff] %v11474_v14  ;;  %v2091_v53 = vrot.slane %v10807_v0, 2  ;;  %v11484_v19 = vrot.slane %v10828_v54, 2  ;;  %v11500_v55 = vsel %vm1547_vm3, %v2061_v37, %v11474_v14 }
 0x104   :  { %9536 = vmatmul.msk.f32.gmra.mxu2 %vm126_vm2, %v11413_v36  ;;  %14914 = vst [vmem:[#allocation144_spill] sm:$0xff] %v11480_v57 }
 0x105   :  { %9539 = vmatmul.msk.f32.gmra.mxu3 %vm126_vm2, %v11417_v62  ;;  %14915 = vst [vmem:[#allocation145_spill] sm:$0xff] %v11484_v19  ;;  %v11504_v54 = vsel %vm1547_vm3, %v2091_v53, %v11480_v57  ;;  %v11515_v61 = vsel %vm1547_vm3, %v2121_v20, %v11484_v19 }
 0x106   :  { %14919 = vst [vmem:[#allocation149_spill] sm:$0xff] %v11500_v55 }
 0x107   :  { %v11486_v27 = vpop.f32.mrf.mxu2  ;;  %14920 = vst [vmem:[#allocation150_spill] sm:$0xff] %v11504_v54 }
 0x108   :  { %v11488_v36 = vpop.f32.mrf.mxu0  ;;  %v11494_v39 = vpop.f32.mrf.mxu3  ;;  %14921 = vst [vmem:[#allocation151_spill] sm:$0xff] %v11515_v61 }
 0x109   :  { %14916 = vst [vmem:[#allocation146_spill] sm:$0xff] %v11488_v36  ;;  %v11496_v62 = vpop.f32.mrf.mxu1  ;;  %v11509_v36 = vld [vmem:[%s14588_s1 + $0xc] sm:$0x7] }
 0x10a   :  { %14918 = vst [vmem:[#allocation148_spill] sm:$0xff] %v11496_v62 }
 0x10b   :  { %9541 = vmatmul.msk.f32.vlgmr.msra.gmra.mxu0 %vm126_vm2, %v11492_v47  ;;  %9544 = vmatmul.msk.f32.vlgmr.msra.gmra.mxu1 %vm126_vm2, %v11500_v55  ;;  %v11551_v55 = vrot.slane %v10901_v56, 2  ;;  %v11561_v47 = vrot.slane %v10929_v40, 2 }
 0x10c   :  { %9565 = vmatpush.msk.msra.mxu0 %vm131_vm0, %v11509_v36  ;;  %9547 = vmatmul.msk.f32.vlgmr.msra.gmra.mxu2 %vm126_vm2, %v11504_v54  ;;  %v11545_v54 = vrot.slane %v10891_v59, 2 }
 0x10d   :  { %9568 = vmatpush.msk.msra.mxu1 %vm131_vm0, %v11509_v36  ;;  %9550 = vmatmul.msk.f32.vlgmr.msra.gmra.mxu3 %vm126_vm2, %v11515_v61  ;;  %v2151_v61 = vrot.slane %v10886_v48, 2  ;;  %14926 = vst [vmem:[#allocation156_spill] sm:$0xff] %v11561_v47 }
 0x10e   :  { %9571 = vmatpush.msk.msra.mxu2 %vm131_vm0, %v11509_v36  ;;  %9574 = vmatpush.msk.msra.mxu3 %vm131_vm0, %v11509_v36  ;;  %14924 = vst [vmem:[#allocation154_spill] sm:$0xff] %v11545_v54 }
 0x10f   :  { %v11531_v20 = vpop.f32.mrf.mxu2  ;;  %v11569_v56 = vsel %vm1547_vm3, %v2151_v61, %v11545_v54 }
 0x110   :  { %v11533_v37 = vpop.f32.mrf.mxu0  ;;  %v11535_v53 = vpop.f32.mrf.mxu3  ;;  %14928 = vst [vmem:[#allocation158_spill] sm:$0xff] %v11569_v56 }
 0x111   :  { %14922 = vst [vmem:[#allocation152_spill] sm:$0xff] %v11533_v37  ;;  %v11537_v62 = vpop.f32.mrf.mxu1  ;;  %v2181_v37 = vrot.slane %v10896_v33, 2 }
 0x112   :  { %14923 = vst [vmem:[#allocation153_spill] sm:$0xff] %v11537_v62  ;;  %v2211_v62 = vrot.slane %v10908_v32, 2 }
 0x113   :  { %9542 = vmatmul.msk.f32.gmra.mxu0 %vm126_vm2, %v11468_v28  ;;  %9545 = vmatmul.msk.f32.gmra.mxu1 %vm126_vm2, %v11474_v14  ;;  %v11557_v14 = vrot.slane %v10913_v34, 2  ;;  %v2241_v28 = vrot.slane %v10924_v52, 2  ;;  %v11577_v34 = vsel %vm1547_vm3, %v2181_v37, %v11551_v55 }
 0x114   :  { %9548 = vmatmul.msk.f32.gmra.mxu2 %vm126_vm2, %v11480_v57 }
 0x115   :  { %9551 = vmatmul.msk.f32.gmra.mxu3 %vm126_vm2, %v11484_v19  ;;  %14925 = vst [vmem:[#allocation155_spill] sm:$0xff] %v11557_v14  ;;  %v11581_v40 = vsel %vm1547_vm3, %v2211_v62, %v11557_v14 }
 0x116   :  { %14930 = vst [vmem:[#allocation160_spill] sm:$0xff] %v11581_v40 }
 0x117   :  { %v11563_v59 = vpop.f32.mrf.mxu2 }
 0x118   :  { %v11565_v57 = vpop.f32.mrf.mxu0  ;;  %v11571_v33 = vpop.f32.mrf.mxu3 }
 0x119   :  { %14927 = vst [vmem:[#allocation157_spill] sm:$0xff] %v11565_v57  ;;  %v11573_v19 = vpop.f32.mrf.mxu1  ;;  %v11587_v57 = vsel %vm1547_vm3, %v2241_v28, %v11561_v47 }
 0x11a   :  { %14929 = vst [vmem:[#allocation159_spill] sm:$0xff] %v11573_v19 }
 0x11b   :  { %9553 = vmatmul.msk.f32.vlgmr.msrb.gmra.mxu0 %vm126_vm2, %v11569_v56  ;;  %14931 = vst [vmem:[#allocation161_spill] sm:$0xff] %v11587_v57  ;;  %9556 = vmatmul.msk.f32.vlgmr.msrb.gmra.mxu1 %vm126_vm2, %v11577_v34 }
 0x11c   :  { %9577 = vmatpush.msk.msrb.mxu0 %vm131_vm0, %v11509_v36  ;;  %9559 = vmatmul.msk.f32.vlgmr.msrb.gmra.mxu2 %vm126_vm2, %v11581_v40 }
 0x11d   :  { %9580 = vmatpush.msk.msrb.mxu1 %vm131_vm0, %v11509_v36  ;;  %9562 = vmatmul.msk.f32.vlgmr.msrb.gmra.mxu3 %vm126_vm2, %v11587_v57 }
 0x11e   :  { %9583 = vmatpush.msk.msrb.mxu2 %vm131_vm0, %v11509_v36  ;;  %9586 = vmatpush.msk.msrb.mxu3 %vm131_vm0, %v11509_v36 }
 0x11f   :  { %v11603_v28 = vpop.f32.mrf.mxu2 }
 0x120   :  { %v11605_v62 = vpop.f32.mrf.mxu0  ;;  %v11607_v61 = vpop.f32.mrf.mxu3 }
 0x121   :  { %14932 = vst [vmem:[#allocation162_spill] sm:$0xff] %v11605_v62  ;;  %v11609_v37 = vpop.f32.mrf.mxu1 }
 0x122   :  { %14933 = vst [vmem:[#allocation163_spill] sm:$0xff] %v11609_v37 }
 0x123   :  { %9554 = vmatmul.msk.f32.gmra.mxu0 %vm126_vm2, %v11545_v54  ;;  %9557 = vmatmul.msk.f32.gmra.mxu1 %vm126_vm2, %v11551_v55 }
 0x124   :  { %9560 = vmatmul.msk.f32.gmra.mxu2 %vm126_vm2, %v11557_v14 }
 0x125   :  { %9563 = vmatmul.msk.f32.gmra.mxu3 %vm126_vm2, %v11561_v47 }
 0x127   :  { %v11619_v19 = vpop.f32.mrf.mxu2 }
 0x128   :  { %v11621_v57 = vpop.f32.mrf.mxu0  ;;  %v11623_v62 = vpop.f32.mrf.mxu3 }
 0x129   :  { %14934 = vst [vmem:[#allocation164_spill] sm:$0xff] %v11621_v57  ;;  %v11625_v40 = vpop.f32.mrf.mxu1 }
 0x12a   :  { %14935 = vst [vmem:[#allocation165_spill] sm:$0xff] %v11625_v40 }
 0x12b   :  { %9566 = vmatmul.msk.f32.vlgmr.msra.gmra.mxu0 %vm126_vm2, %v10423_v5  ;;  %9569 = vmatmul.msk.f32.vlgmr.msra.gmra.mxu1 %vm126_vm2, %v10441_v9 }
 0x12c   :  { %9589 = vmatpush.msk.msra.mxu0 %vm131_vm0, %v11509_v36  ;;  %9572 = vmatmul.msk.f32.vlgmr.msra.gmra.mxu2 %vm126_vm2, %v10451_v11 }
 0x12d   :  { %9592 = vmatpush.msk.msra.mxu1 %vm131_vm0, %v11509_v36  ;;  %9575 = vmatmul.msk.f32.vlgmr.msra.gmra.mxu3 %vm126_vm2, %v10505_v21 }
 0x12e   :  { %9595 = vmatpush.msk.msra.mxu2 %vm131_vm0, %v11509_v36  ;;  %9598 = vmatpush.msk.msra.mxu3 %vm131_vm0, %v11509_v36 }
 0x12f   :  { %v11643_v5 = vpop.f32.mrf.mxu2 }
 0x130   :  { %v11645_v9 = vpop.f32.mrf.mxu0  ;;  %v11647_v40 = vpop.f32.mrf.mxu3 }
 0x131   :  { %14936 = vst [vmem:[#allocation166_spill] sm:$0xff] %v11645_v9  ;;  %v11649_v57 = vpop.f32.mrf.mxu1 }
 0x132   :  { %14937 = vst [vmem:[#allocation167_spill] sm:$0xff] %v11649_v57 }
 0x133   :  { %9567 = vmatmul.msk.f32.gmra.mxu0 %vm126_vm2, %v10428_v6  ;;  %9570 = vmatmul.msk.f32.gmra.mxu1 %vm126_vm2, %v10446_v10 }
 0x134   :  { %9573 = vmatmul.msk.f32.gmra.mxu2 %vm126_vm2, %v10461_v15 }
 0x135   :  { %9576 = vmatmul.msk.f32.gmra.mxu3 %vm126_vm2, %v10510_v22 }
 0x137   :  { %v11659_v11 = vpop.f32.mrf.mxu2 }
 0x138   :  { %v11661_v21 = vpop.f32.mrf.mxu0  ;;  %v11663_v9 = vpop.f32.mrf.mxu3 }
 0x139   :  { %14938 = vst [vmem:[#allocation168_spill] sm:$0xff] %v11661_v21  ;;  %v11665_v37 = vpop.f32.mrf.mxu1  ;;  %v14983_v21 = vld [vmem:[#allocation12_spill] sm:$0xff] }
 0x13a   :  { %14939 = vst [vmem:[#allocation169_spill] sm:$0xff] %v11665_v37 }
 0x13b   :  { %9578 = vmatmul.msk.f32.vlgmr.msrb.gmra.mxu0 %vm126_vm2, %v10515_v23  ;;  %9581 = vmatmul.msk.f32.vlgmr.msrb.gmra.mxu1 %vm126_vm2, %v10526_v25 }
 0x13c   :  { %9601 = vmatpush.msk.msrb.mxu0 %vm131_vm0, %v11509_v36  ;;  %9584 = vmatmul.msk.f32.vlgmr.msrb.gmra.mxu2 %vm126_vm2, %v10542_v29 }
 0x13d   :  { %9604 = vmatpush.msk.msrb.mxu1 %vm131_vm0, %v11509_v36  ;;  %9587 = vmatmul.msk.f32.vlgmr.msrb.gmra.mxu3 %vm126_vm2, %v10600_v41 }
 0x13e   :  { %9607 = vmatpush.msk.msrb.mxu2 %vm131_vm0, %v11509_v36  ;;  %9610 = vmatpush.msk.msrb.mxu3 %vm131_vm0, %v11509_v36 }
 0x13f   :  { %v11683_v6 = vpop.f32.mrf.mxu2 }
 0x140   :  { %v11685_v10 = vpop.f32.mrf.mxu0  ;;  %v11687_v15 = vpop.f32.mrf.mxu3 }
 0x141   :  { %14940 = vst [vmem:[#allocation170_spill] sm:$0xff] %v11685_v10  ;;  %v11689_v22 = vpop.f32.mrf.mxu1 }
 0x142   :  { %14941 = vst [vmem:[#allocation171_spill] sm:$0xff] %v11689_v22 }
 0x143   :  { %9579 = vmatmul.msk.f32.gmra.mxu0 %vm126_vm2, %v10520_v24  ;;  %9582 = vmatmul.msk.f32.gmra.mxu1 %vm126_vm2, %v10531_v26  ;;  %v11712_v24 = vld [vmem:[%s14587_s0 + $0xc0] sm:$0xff]  ;;  %v973_v26 = vadd.f32 %v11389_v17, %v11055_v60  ;;  %v11745_v60 = vld [vmem:[%s14587_s0 + $0xc8] sm:$0xff] }
 0x144   :  { %9585 = vmatmul.msk.f32.gmra.mxu2 %vm126_vm2, %v10547_v30  ;;  %v1000_v30 = vadd.f32 %v11393_v58, %v11059_v38  ;;  %v14946_v38 = vld [vmem:[#allocation64_spill] sm:$0xff]  ;;  %v14947_v58 = vld [vmem:[#allocation66_spill] sm:$0xff] }
 0x145   :  { %9588 = vmatmul.msk.f32.gmra.mxu3 %vm126_vm2, %v10605_v42  ;;  %v976_v17 = vadd.f32 %v11419_v18, %v14946_v38 }
 0x147   :  { %v11699_v23 = vpop.f32.mrf.mxu2 }
 0x148   :  { %v11701_v25 = vpop.f32.mrf.mxu0  ;;  %v11703_v29 = vpop.f32.mrf.mxu3 }
 0x149   :  { %14942 = vst [vmem:[#allocation172_spill] sm:$0xff] %v11701_v25  ;;  %v11705_v41 = vpop.f32.mrf.mxu1  ;;  %v15026_v25 = vld [vmem:[#allocation34_spill] sm:$0xff] }
 0x14a   :  { %14943 = vst [vmem:[#allocation173_spill] sm:$0xff] %v11705_v41  ;;  %v15023_v41 = vld [vmem:[#allocation25_spill] sm:$0xff] }
 0x14b   :  { %9590 = vmatmul.msk.f32.vlgmr.msra.gmra.mxu0 %vm126_vm2, %v10610_v43  ;;  %9593 = vmatmul.msk.f32.vlgmr.msra.gmra.mxu1 %vm126_vm2, %v10622_v45 }
 0x14c   :  { %9613 = vmatpush.msk.msra.mxu0 %vm131_vm0, %v11509_v36  ;;  %9596 = vmatmul.msk.f32.vlgmr.msra.gmra.mxu2 %vm126_vm2, %v10638_v49 }
 0x14d   :  { %9616 = vmatpush.msk.msra.mxu1 %vm131_vm0, %v11509_v36  ;;  %9599 = vmatmul.msk.f32.vlgmr.msra.gmra.mxu3 %vm126_vm2, %v11712_v24 }
 0x14e   :  { %9619 = vmatpush.msk.msra.mxu2 %vm131_vm0, %v11509_v36  ;;  %9622 = vmatpush.msk.msra.mxu3 %vm131_vm0, %v11509_v36 }
 0x14f   :  { %v1635_v42 = vpop.f32.mrf.mxu2 }
 0x150   :  { %v11732_v43 = vpop.f32.mrf.mxu0  ;;  %v11734_v45 = vadd.f32 %v1635_v42, %v973_v26  ;;  %v1665_v49 = vpop.f32.mrf.mxu3 }
 0x151   :  { %14944 = vst [vmem:[#allocation174_spill] sm:$0xff] %v11732_v43  ;;  %v11736_v22 = vpop.f32.mrf.mxu1  ;;  %v11738_v10 = vadd.f32 %v1665_v49, %v1000_v30  ;;  %v15015_v43 = vld [vmem:[#allocation27_spill] sm:$0xff] }
 0x152   :  { %14945 = vst [vmem:[#allocation175_spill] sm:$0xff] %v11736_v22 }
 0x153   :  { %9591 = vmatmul.msk.f32.gmra.mxu0 %vm126_vm2, %v10615_v44  ;;  %9594 = vmatmul.msk.f32.gmra.mxu1 %vm126_vm2, %v10627_v46  ;;  %v1003_v44 = vadd.f32 %v11424_v2, %v14947_v58 }
 0x154   :  { %9597 = vmatmul.msk.f32.gmra.mxu2 %vm126_vm2, %v10643_v50  ;;  %v14950_v50 = vld [vmem:[#allocation68_spill] sm:$0xff] }
 0x155   :  { %9600 = vmatmul.msk.f32.gmra.mxu3 %vm126_vm2, %v11745_v60 }
 0x157   :  { %v1638_v26 = vpop.f32.mrf.mxu2 }
 0x158   :  { %v11757_v30 = vpop.f32.mrf.mxu0  ;;  %v11759_v42 = vadd.f32 %v1638_v26, %v976_v17  ;;  %v1668_v49 = vpop.f32.mrf.mxu3 }
 0x159   :  { %14948 = vst [vmem:[#allocation64_spill] sm:$0xff] %v11757_v30  ;;  %v11761_v37 = vpop.f32.mrf.mxu1  ;;  %v11763_v46 = vadd.f32 %v1668_v49, %v1003_v44  ;;  %v14956_v44 = vld [vmem:[#allocation74_spill] sm:$0xff] }
 0x15a   :  { %14949 = vst [vmem:[#allocation66_spill] sm:$0xff] %v11761_v37  ;;  %v1111_v26 = vadd.f32 %v11494_v39, %v14956_v44  ;;  %v14959_v39 = vld [vmem:[#allocation76_spill] sm:$0xff] }
 0x15b   :  { %9602 = vmatmul.msk.f32.vlgmr.msrb.gmra.mxu0 %vm126_vm2, %v10706_v63  ;;  %9605 = vmatmul.msk.f32.vlgmr.msrb.gmra.mxu1 %vm126_vm2, %v10718_v4  ;;  %v1081_v63 = vadd.f32 %v11455_v8, %v14950_v50  ;;  %v14951_v4 = vld [vmem:[#allocation70_spill] sm:$0xff]  ;;  %v14955_v8 = vld [vmem:[#allocation72_spill] sm:$0xff] }
 0x15c   :  { %9625 = vmatpush.msk.msrb.mxu0 %vm131_vm0, %v11509_v36  ;;  %9608 = vmatmul.msk.f32.vlgmr.msrb.gmra.mxu2 %vm126_vm2, %v10732_v16  ;;  %v1108_v18 = vadd.f32 %v11459_v1, %v14951_v4  ;;  %v1084_v1 = vadd.f32 %v11486_v27, %v14955_v8  ;;  %v1189_v27 = vadd.f32 %v11531_v20, %v14959_v39  ;;  %v14963_v20 = vld [vmem:[#allocation37_spill] sm:$0xff]  ;;  %v14964_v8 = vld [vmem:[#allocation39_spill] sm:$0xff] }
 0x15d   :  { %9628 = vmatpush.msk.msrb.mxu1 %vm131_vm0, %v11509_v36  ;;  %9611 = vmatmul.msk.f32.vlgmr.msrb.gmra.mxu3 %vm126_vm2, %v10786_v12 }
 0x15e   :  { %9631 = vmatpush.msk.msrb.mxu2 %vm131_vm0, %v11509_v36  ;;  %9634 = vmatpush.msk.msrb.mxu3 %vm131_vm0, %v11509_v36  ;;  %v14954_v36 = vld [vmem:[#allocation30_spill] sm:$0xff] }
 0x15f   :  { %v1755_v2 = vpop.f32.mrf.mxu2 }
 0x160   :  { %v11785_v16 = vpop.f32.mrf.mxu0  ;;  %v11787_v38 = vadd.f32 %v1755_v2, %v1081_v63  ;;  %v1785_v17 = vpop.f32.mrf.mxu3 }
 0x161   :  { %14952 = vst [vmem:[#allocation68_spill] sm:$0xff] %v11785_v16  ;;  %v11789_v58 = vpop.f32.mrf.mxu1  ;;  %v11791_v12 = vadd.f32 %v1785_v17, %v1108_v18 }
 0x162   :  { %14953 = vst [vmem:[#allocation70_spill] sm:$0xff] %v11789_v58 }
 0x163   :  { %9603 = vmatmul.msk.f32.gmra.mxu0 %vm126_vm2, %v10711_v3  ;;  %9606 = vmatmul.msk.f32.gmra.mxu1 %vm126_vm2, %v10723_v7 }
 0x164   :  { %9609 = vmatmul.msk.f32.gmra.mxu2 %vm126_vm2, %v14954_v36 }
 0x165   :  { %9612 = vmatmul.msk.f32.gmra.mxu3 %vm126_vm2, %v10791_v31  ;;  %v11816_v31 = vld [vmem:[%s14588_s1 + $0x10] sm:$0x7] }
 0x167   :  { %v1758_v49 = vpop.f32.mrf.mxu2 }
 0x168   :  { %v11805_v50 = vpop.f32.mrf.mxu0  ;;  %v11807_v63 = vadd.f32 %v1758_v49, %v1084_v1  ;;  %v1788_v3 = vpop.f32.mrf.mxu3  ;;  %v14966_v1 = vld [vmem:[#allocation80_spill] sm:$0xff] }
 0x169   :  { %14957 = vst [vmem:[#allocation30_spill] sm:$0xff] %v11805_v50  ;;  %v11809_v4 = vpop.f32.mrf.mxu1  ;;  %v11811_v7 = vadd.f32 %v1788_v3, %v1111_v26  ;;  %v1192_v44 = vadd.f32 %v11563_v59, %v14966_v1  ;;  %v14967_v26 = vld [vmem:[#allocation82_spill] sm:$0xff]  ;;  %v11871_v59 = vld [vmem:[%s14587_s0 + $0x1c0] sm:$0xff] }
 0x16a   :  { %14958 = vst [vmem:[#allocation72_spill] sm:$0xff] %v11809_v4  ;;  %v1219_v49 = vadd.f32 %v11571_v33, %v14967_v26  ;;  %v14971_v33 = vld [vmem:[#allocation84_spill] sm:$0xff]  ;;  %v15006_v50 = vld [vmem:[#allocation15_spill] sm:$0xff] }
 0x16b   :  { %9614 = vmatmul.msk.f32.vlgmr.msra.gmra.mxu0 %vm126_vm2, %v10796_v35  ;;  %9617 = vmatmul.msk.f32.vlgmr.msra.gmra.mxu1 %vm126_vm2, %v10807_v0  ;;  %v14960_v35 = vld [vmem:[#allocation78_spill] sm:$0xff] }
 0x16c   :  { %9638 = vmatpush.msk.msra.mxu0 %vm131_vm0, %v11816_v31  ;;  %9620 = vmatmul.msk.f32.vlgmr.msra.gmra.mxu2 %vm126_vm2, %v10823_v13  ;;  %v1216_v0 = vadd.f32 %v11535_v53, %v14960_v35  ;;  %v14965_v53 = vld [vmem:[#allocation47_spill] sm:$0xff] }
 0x16d   :  { %9641 = vmatpush.msk.msra.mxu1 %vm131_vm0, %v11816_v31  ;;  %9623 = vmatmul.msk.f32.vlgmr.msra.gmra.mxu3 %vm126_vm2, %v10886_v48 }
 0x16e   :  { %9644 = vmatpush.msk.msra.mxu2 %vm131_vm0, %v11816_v31  ;;  %9647 = vmatpush.msk.msra.mxu3 %vm131_vm0, %v11816_v31 }
 0x16f   :  { %v1875_v18 = vpop.f32.mrf.mxu2 }
 0x170   :  { %v11838_v13 = vpop.f32.mrf.mxu0  ;;  %v11840_v2 = vadd.f32 %v1875_v18, %v1189_v27  ;;  %v1905_v17 = vpop.f32.mrf.mxu3  ;;  %v14970_v18 = vld [vmem:[#allocation48_spill] sm:$0xff] }
 0x171   :  { %14961 = vst [vmem:[#allocation74_spill] sm:$0xff] %v11838_v13  ;;  %v11842_v36 = vpop.f32.mrf.mxu1  ;;  %v11844_v48 = vadd.f32 %v1905_v17, %v1216_v0  ;;  %v1297_v17 = vadd.f32 %v11603_v28, %v14971_v33  ;;  %v11904_v28 = vld [vmem:[%s14587_s0 + $0x1c8] sm:$0xff] }
 0x172   :  { %14962 = vst [vmem:[#allocation76_spill] sm:$0xff] %v11842_v36  ;;  %v14979_v33 = vld [vmem:[#allocation93_spill] sm:$0xff]  ;;  %v14999_v36 = vld [vmem:[#allocation20_spill] sm:$0xff] }
 0x173   :  { %9615 = vmatmul.msk.f32.gmra.mxu0 %vm126_vm2, %v10801_v51  ;;  %9618 = vmatmul.msk.f32.gmra.mxu1 %vm126_vm2, %v14963_v20 }
 0x174   :  { %9621 = vmatmul.msk.f32.gmra.mxu2 %vm126_vm2, %v14964_v8 }
 0x175   :  { %9624 = vmatmul.msk.f32.gmra.mxu3 %vm126_vm2, %v14965_v53 }
 0x177   :  { %v1878_v3 = vpop.f32.mrf.mxu2 }
 0x178   :  { %v11858_v39 = vpop.f32.mrf.mxu0  ;;  %v11860_v27 = vadd.f32 %v1878_v3, %v1192_v44  ;;  %v1908_v51 = vpop.f32.mrf.mxu3  ;;  %v14976_v3 = vld [vmem:[#allocation50_spill] sm:$0xff] }
 0x179   :  { %14968 = vst [vmem:[#allocation78_spill] sm:$0xff] %v11858_v39  ;;  %v11862_v35 = vpop.f32.mrf.mxu1  ;;  %v11864_v0 = vadd.f32 %v1908_v51, %v1219_v49  ;;  %v14975_v49 = vld [vmem:[#allocation49_spill] sm:$0xff]  ;;  %v14978_v51 = vld [vmem:[#allocation91_spill] sm:$0xff] }
 0x17a   :  { %14969 = vst [vmem:[#allocation37_spill] sm:$0xff] %v11862_v35  ;;  %v14998_v39 = vld [vmem:[#allocation19_spill] sm:$0xff] }
 0x17b   :  { %9626 = vmatmul.msk.f32.vlgmr.msrb.gmra.mxu0 %vm126_vm2, %v14970_v18  ;;  %9629 = vmatmul.msk.f32.vlgmr.msrb.gmra.mxu1 %vm126_vm2, %v10908_v32  ;;  %v14972_v32 = vld [vmem:[#allocation86_spill] sm:$0xff]  ;;  %v1300_v18 = vadd.f32 %v11619_v19, %v14978_v51  ;;  %v14984_v19 = vld [vmem:[#allocation13_spill] sm:$0xff] }
 0x17c   :  { %9650 = vmatpush.msk.msrb.mxu0 %vm131_vm0, %v11816_v31  ;;  %9632 = vmatmul.msk.f32.vlgmr.msrb.gmra.mxu2 %vm126_vm2, %v10924_v52  ;;  %v1324_v20 = vadd.f32 %v11607_v61, %v14972_v32  ;;  %v14977_v61 = vld [vmem:[#allocation52_spill] sm:$0xff]  ;;  %v14986_v51 = vld [vmem:[#allocation98_spill] sm:$0xff] }
 0x17d   :  { %9653 = vmatpush.msk.msrb.mxu1 %vm131_vm0, %v11816_v31  ;;  %9635 = vmatmul.msk.f32.vlgmr.msrb.gmra.mxu3 %vm126_vm2, %v11871_v59 }
 0x17e   :  { %9656 = vmatpush.msk.msrb.mxu2 %vm131_vm0, %v11816_v31  ;;  %9659 = vmatpush.msk.msrb.mxu3 %vm131_vm0, %v11816_v31 }
 0x17f   :  { %v1995_v8 = vpop.f32.mrf.mxu2 }
 0x180   :  { %v11891_v52 = vpop.f32.mrf.mxu0  ;;  %v11893_v53 = vadd.f32 %v1995_v8, %v1297_v17  ;;  %v2025_v1 = vpop.f32.mrf.mxu3  ;;  %v1327_v17 = vadd.f32 %v11623_v62, %v14979_v33  ;;  %v14985_v62 = vld [vmem:[#allocation18_spill] sm:$0xff]  ;;  %v14987_v33 = vld [vmem:[#allocation100_spill] sm:$0xff] }
 0x181   :  { %14973 = vst [vmem:[#allocation39_spill] sm:$0xff] %v11891_v52  ;;  %v11895_v44 = vpop.f32.mrf.mxu1  ;;  %v11897_v26 = vadd.f32 %v2025_v1, %v1324_v20 }
 0x182   :  { %14974 = vst [vmem:[#allocation47_spill] sm:$0xff] %v11895_v44  ;;  %v14990_v44 = vld [vmem:[#allocation8_spill] sm:$0xff] }
 0x183   :  { %9627 = vmatmul.msk.f32.gmra.mxu0 %vm126_vm2, %v14975_v49  ;;  %9630 = vmatmul.msk.f32.gmra.mxu1 %vm126_vm2, %v14976_v3 }
 0x184   :  { %9633 = vmatmul.msk.f32.gmra.mxu2 %vm126_vm2, %v14977_v61  ;;  %v14982_v61 = vld [vmem:[#allocation10_spill] sm:$0xff] }
 0x185   :  { %9636 = vmatmul.msk.f32.gmra.mxu3 %vm126_vm2, %v11904_v28 }
 0x187   :  { %v1998_v32 = vpop.f32.mrf.mxu2 }
 0x188   :  { %v11916_v20 = vpop.f32.mrf.mxu0  ;;  %v11918_v8 = vadd.f32 %v1998_v32, %v1300_v18  ;;  %v2028_v1 = vpop.f32.mrf.mxu3  ;;  %v1405_v18 = vadd.f32 %v11643_v5, %v14986_v51  ;;  %v14991_v5 = vld [vmem:[#allocation9_spill] sm:$0xff]  ;;  %v14992_v51 = vld [vmem:[#allocation11_spill] sm:$0xff] }
 0x189   :  { %14980 = vst [vmem:[#allocation80_spill] sm:$0xff] %v11916_v20  ;;  %v11920_v49 = vpop.f32.mrf.mxu1  ;;  %v11922_v3 = vadd.f32 %v2028_v1, %v1327_v17  ;;  %v1432_v17 = vadd.f32 %v11647_v40, %v14987_v33  ;;  %v14993_v40 = vld [vmem:[#allocation14_spill] sm:$0xff] }
 0x18a   :  { %14981 = vst [vmem:[#allocation82_spill] sm:$0xff] %v11920_v49  ;;  %v14994_v33 = vld [vmem:[#allocation106_spill] sm:$0xff] }
 0x18b   :  { %9639 = vmatmul.msk.f32.vlgmr.msra.gmra.mxu0 %vm126_vm2, %v14982_v61  ;;  %9642 = vmatmul.msk.f32.vlgmr.msra.gmra.mxu1 %vm126_vm2, %v14983_v21 }
 0x18c   :  { %9662 = vmatpush.msk.msra.mxu0 %vm131_vm0, %v11816_v31  ;;  %9645 = vmatmul.msk.f32.vlgmr.msra.gmra.mxu2 %vm126_vm2, %v14984_v19 }
 0x18d   :  { %9665 = vmatpush.msk.msra.mxu1 %vm131_vm0, %v11816_v31  ;;  %9648 = vmatmul.msk.f32.vlgmr.msra.gmra.mxu3 %vm126_vm2, %v14985_v62 }
 0x18e   :  { %9668 = vmatpush.msk.msra.mxu2 %vm131_vm0, %v11816_v31  ;;  %9671 = vmatpush.msk.msra.mxu3 %vm131_vm0, %v11816_v31 }
 0x18f   :  { %v2115_v32 = vpop.f32.mrf.mxu2 }
 0x190   :  { %v11944_v1 = vpop.f32.mrf.mxu0  ;;  %v11946_v61 = vadd.f32 %v2115_v32, %v1405_v18  ;;  %v2145_v49 = vpop.f32.mrf.mxu3  ;;  %v1408_v18 = vadd.f32 %v11659_v11, %v14994_v33  ;;  %v14995_v32 = vld [vmem:[#allocation109_spill] sm:$0xff]  ;;  %v15001_v11 = vld [vmem:[#allocation26_spill] sm:$0xff] }
 0x191   :  { %14988 = vst [vmem:[#allocation48_spill] sm:$0xff] %v11944_v1  ;;  %v11948_v20 = vpop.f32.mrf.mxu1  ;;  %v11950_v57 = vadd.f32 %v2145_v49, %v1432_v17 }
 0x192   :  { %14989 = vst [vmem:[#allocation84_spill] sm:$0xff] %v11948_v20  ;;  %v1435_v20 = vadd.f32 %v11663_v9, %v14995_v32  ;;  %v15000_v9 = vld [vmem:[#allocation21_spill] sm:$0xff] }
 0x193   :  { %9640 = vmatmul.msk.f32.gmra.mxu0 %vm126_vm2, %v14990_v44  ;;  %9643 = vmatmul.msk.f32.gmra.mxu1 %vm126_vm2, %v14991_v5 }
 0x194   :  { %9646 = vmatmul.msk.f32.gmra.mxu2 %vm126_vm2, %v14992_v51 }
 0x195   :  { %9649 = vmatmul.msk.f32.gmra.mxu3 %vm126_vm2, %v14993_v40 }
 0x197   :  { %v2118_v49 = vpop.f32.mrf.mxu2 }
 0x198   :  { %v11964_v17 = vpop.f32.mrf.mxu0  ;;  %v11966_v1 = vadd.f32 %v2118_v49, %v1408_v18  ;;  %v2148_v44 = vpop.f32.mrf.mxu3  ;;  %v15003_v18 = vld [vmem:[#allocation116_spill] sm:$0xff] }
 0x199   :  { %14996 = vst [vmem:[#allocation86_spill] sm:$0xff] %v11964_v17  ;;  %v11968_v52 = vpop.f32.mrf.mxu1  ;;  %v11970_v35 = vadd.f32 %v2148_v44, %v1435_v20  ;;  %v15002_v20 = vld [vmem:[#allocation114_spill] sm:$0xff]  ;;  %v1540_v32 = vadd.f32 %v11687_v15, %v15003_v18 }
 0x19a   :  { %14997 = vst [vmem:[#allocation49_spill] sm:$0xff] %v11968_v52  ;;  %v1513_v33 = vadd.f32 %v11683_v6, %v15002_v20  ;;  %v15007_v6 = vld [vmem:[#allocation16_spill] sm:$0xff]  ;;  %v15008_v20 = vld [vmem:[#allocation17_spill] sm:$0xff]  ;;  %v15009_v15 = vld [vmem:[#allocation22_spill] sm:$0xff] }
 0x19b   :  { %9651 = vmatmul.msk.f32.vlgmr.msrb.gmra.mxu0 %vm126_vm2, %v14998_v39  ;;  %9654 = vmatmul.msk.f32.vlgmr.msrb.gmra.mxu1 %vm126_vm2, %v14999_v36  ;;  %v15010_v18 = vld [vmem:[#allocation122_spill] sm:$0xff] }
 0x19c   :  { %9674 = vmatpush.msk.msrb.mxu0 %vm131_vm0, %v11816_v31  ;;  %9657 = vmatmul.msk.f32.vlgmr.msrb.gmra.mxu2 %vm126_vm2, %v15000_v9 }
 0x19d   :  { %9677 = vmatpush.msk.msrb.mxu1 %vm131_vm0, %v11816_v31  ;;  %9660 = vmatmul.msk.f32.vlgmr.msrb.gmra.mxu3 %vm126_vm2, %v15001_v11 }
 0x19e   :  { %9680 = vmatpush.msk.msrb.mxu2 %vm131_vm0, %v11816_v31  ;;  %9683 = vmatpush.msk.msrb.mxu3 %vm131_vm0, %v11816_v31 }
 0x19f   :  { %v2235_v49 = vpop.f32.mrf.mxu2 }
 0x1a0   :  { %v11992_v44 = vpop.f32.mrf.mxu0  ;;  %v11994_v52 = vadd.f32 %v2235_v49, %v1513_v33  ;;  %v2265_v17 = vpop.f32.mrf.mxu3  ;;  %v1516_v33 = vadd.f32 %v11699_v23, %v15010_v18  ;;  %v3194_v49 = vrot.slane %v11712_v24, 1  ;;  %v15017_v18 = vld [vmem:[#allocation28_spill] sm:$0xff] }
 0x1a1   :  { %15004 = vst [vmem:[#allocation50_spill] sm:$0xff] %v11992_v44  ;;  %v11996_v13 = vpop.f32.mrf.mxu1  ;;  %v11998_v4 = vadd.f32 %v2265_v17, %v1540_v32  ;;  %v12012_v17 = vrot.slane %v11745_v60, 1  ;;  %v15012_v32 = vld [vmem:[#allocation125_spill] sm:$0xff] }
 0x1a2   :  { %15005 = vst [vmem:[#allocation52_spill] sm:$0xff] %v11996_v13  ;;  %v1543_v13 = vadd.f32 %v11703_v29, %v15012_v32  ;;  %v15018_v29 = vld [vmem:[#allocation29_spill] sm:$0xff] }
 0x1a3   :  { %9652 = vmatmul.msk.f32.gmra.mxu0 %vm126_vm2, %v15006_v50  ;;  %9655 = vmatmul.msk.f32.gmra.mxu1 %vm126_vm2, %v15007_v6  ;;  %15011 = vst [vmem:[#allocation91_spill] sm:$0xff] %v12012_v17  ;;  %v12028_v23 = vsel %vm122_vm1, %v3194_v49, %v12012_v17 }
 0x1a4   :  { %9658 = vmatmul.msk.f32.gmra.mxu2 %vm126_vm2, %v15008_v20  ;;  %15016 = vst [vmem:[#allocation12_spill] sm:$0xff] %v12028_v23 }
 0x1a5   :  { %9661 = vmatmul.msk.f32.gmra.mxu3 %vm126_vm2, %v15009_v15 }
 0x1a7   :  { %v2238_v44 = vpop.f32.mrf.mxu2 }
 0x1a8   :  { %v12016_v58 = vpop.f32.mrf.mxu0  ;;  %v12018_v16 = vadd.f32 %v2238_v44, %v1516_v33  ;;  %v2268_v37 = vpop.f32.mrf.mxu3 }
 0x1a9   :  { %15013 = vst [vmem:[#allocation93_spill] sm:$0xff] %v12016_v58  ;;  %v12020_v30 = vpop.f32.mrf.mxu1  ;;  %v12022_v22 = vadd.f32 %v2268_v37, %v1543_v13  ;;  %v15022_v58 = vld [vmem:[#allocation24_spill] sm:$0xff] }
 0x1aa   :  { %15014 = vst [vmem:[#allocation10_spill] sm:$0xff] %v12020_v30  ;;  %v15021_v30 = vld [vmem:[#allocation23_spill] sm:$0xff] }
 0x1ab   :  { %9663 = vmatmul.msk.f32.vlgmr.msra.gmra.mxu0 %vm126_vm2, %v15015_v43  ;;  %9666 = vmatmul.msk.f32.vlgmr.msra.gmra.mxu1 %vm126_vm2, %v15017_v18 }
 0x1ac   :  { %9686 = vmatpush.msk.msra.mxu0 %vm131_vm0, %v11816_v31  ;;  %9669 = vmatmul.msk.f32.vlgmr.msra.gmra.mxu2 %vm126_vm2, %v15018_v29 }
 0x1ad   :  { %9689 = vmatpush.msk.msra.mxu1 %vm131_vm0, %v11816_v31  ;;  %9672 = vmatmul.msk.f32.vlgmr.msra.gmra.mxu3 %vm126_vm2, %v12028_v23  ;;  %v15053_v23 = vld [vmem:[#allocation58_spill] sm:$0xff] }
 0x1ae   :  { %9692 = vmatpush.msk.msra.mxu2 %vm131_vm0, %v11816_v31  ;;  %9695 = vmatpush.msk.msra.mxu3 %vm131_vm0, %v11816_v31 }
 0x1af   :  { %v2387_v37 = vpop.f32.mrf.mxu2 }
 0x1b0   :  { %v12044_v13 = vpop.f32.mrf.mxu0  ;;  %v12047_v44 = vadd.f32 %v2387_v37, %v11734_v45  ;;  %v2410_v33 = vpop.f32.mrf.mxu3 }
 0x1b1   :  { %15019 = vst [vmem:[#allocation13_spill] sm:$0xff] %v12044_v13  ;;  %v12049_v49 = vpop.f32.mrf.mxu1  ;;  %v12052_v32 = vadd.f32 %v2410_v33, %v11738_v10 }
 0x1b2   :  { %15020 = vst [vmem:[#allocation18_spill] sm:$0xff] %v12049_v49 }
 0x1b3   :  { %9664 = vmatmul.msk.f32.gmra.mxu0 %vm126_vm2, %v15021_v30  ;;  %9667 = vmatmul.msk.f32.gmra.mxu1 %vm126_vm2, %v15022_v58  ;;  %v15027_v58 = vld [vmem:[#allocation35_spill] sm:$0xff] }
 0x1b4   :  { %9670 = vmatmul.msk.f32.gmra.mxu2 %vm126_vm2, %v15023_v41  ;;  %v15047_v41 = vld [vmem:[#allocation51_spill] sm:$0xff] }
 0x1b5   :  { %9673 = vmatmul.msk.f32.gmra.mxu3 %vm126_vm2, %v12012_v17  ;;  %v15028_v17 = vld [vmem:[#allocation36_spill] sm:$0xff] }
 0x1b7   :  { %v2390_v45 = vpop.f32.mrf.mxu2 }
 0x1b8   :  { %v12062_v37 = vpop.f32.mrf.mxu0  ;;  %v12065_v49 = vadd.f32 %v2390_v45, %v11759_v42  ;;  %v2413_v10 = vpop.f32.mrf.mxu3  ;;  %v15029_v42 = vld [vmem:[#allocation43_spill] sm:$0xff] }
 0x1b9   :  { %15024 = vst [vmem:[#allocation98_spill] sm:$0xff] %v12062_v37  ;;  %v12067_v33 = vpop.f32.mrf.mxu1  ;;  %v12070_v13 = vadd.f32 %v2413_v10, %v11763_v46 }
 0x1ba   :  { %15025 = vst [vmem:[#allocation100_spill] sm:$0xff] %v12067_v33 }
 0x1bb   :  { %9675 = vmatmul.msk.f32.vlgmr.msrb.gmra.mxu0 %vm126_vm2, %v15026_v25  ;;  %9678 = vmatmul.msk.f32.vlgmr.msrb.gmra.mxu1 %vm126_vm2, %v15027_v58  ;;  %v15034_v58 = vld [vmem:[#allocation33_spill] sm:$0xff] }
 0x1bc   :  { %9698 = vmatpush.msk.msrb.mxu0 %vm131_vm0, %v11816_v31  ;;  %9681 = vmatmul.msk.f32.vlgmr.msrb.gmra.mxu2 %vm126_vm2, %v15028_v17  ;;  %v15032_v17 = vld [vmem:[#allocation31_spill] sm:$0xff] }
 0x1bd   :  { %9701 = vmatpush.msk.msrb.mxu1 %vm131_vm0, %v11816_v31  ;;  %9684 = vmatmul.msk.f32.vlgmr.msrb.gmra.mxu3 %vm126_vm2, %v15029_v42  ;;  %v15033_v42 = vld [vmem:[#allocation32_spill] sm:$0xff] }
 0x1be   :  { %9704 = vmatpush.msk.msrb.mxu2 %vm131_vm0, %v11816_v31  ;;  %9707 = vmatpush.msk.msrb.mxu3 %vm131_vm0, %v11816_v31  ;;  %v15035_v31 = vld [vmem:[#allocation38_spill] sm:$0xff] }
 0x1bf   :  { %v2479_v25 = vpop.f32.mrf.mxu2 }
 0x1c0   :  { %v12088_v46 = vpop.f32.mrf.mxu0  ;;  %v12091_v45 = vadd.f32 %v2479_v25, %v11787_v38  ;;  %v2502_v10 = vpop.f32.mrf.mxu3 }
 0x1c1   :  { %15030 = vst [vmem:[#allocation8_spill] sm:$0xff] %v12088_v46  ;;  %v12093_v33 = vpop.f32.mrf.mxu1  ;;  %v12096_v37 = vadd.f32 %v2502_v10, %v11791_v12  ;;  %v12119_v46 = vld [vmem:[%s14588_s1 + $0x14] sm:$0x7] }
 0x1c2   :  { %15031 = vst [vmem:[#allocation9_spill] sm:$0xff] %v12093_v33 }
 0x1c3   :  { %9676 = vmatmul.msk.f32.gmra.mxu0 %vm126_vm2, %v15032_v17  ;;  %9679 = vmatmul.msk.f32.gmra.mxu1 %vm126_vm2, %v15033_v42  ;;  %v15044_v42 = vld [vmem:[#allocation40_spill] sm:$0xff] }
 0x1c4   :  { %9682 = vmatmul.msk.f32.gmra.mxu2 %vm126_vm2, %v15034_v58  ;;  %v15038_v58 = vld [vmem:[#allocation44_spill] sm:$0xff] }
 0x1c5   :  { %9685 = vmatmul.msk.f32.gmra.mxu3 %vm126_vm2, %v15035_v31  ;;  %v15039_v31 = vld [vmem:[#allocation45_spill] sm:$0xff] }
 0x1c7   :  { %v2482_v38 = vpop.f32.mrf.mxu2 }
 0x1c8   :  { %v12106_v25 = vpop.f32.mrf.mxu0  ;;  %v12109_v33 = vadd.f32 %v2482_v38, %v11807_v63  ;;  %v2505_v12 = vpop.f32.mrf.mxu3  ;;  %v15040_v63 = vld [vmem:[#allocation46_spill] sm:$0xff] }
 0x1c9   :  { %15036 = vst [vmem:[#allocation11_spill] sm:$0xff] %v12106_v25  ;;  %v12111_v10 = vpop.f32.mrf.mxu1  ;;  %v12114_v17 = vadd.f32 %v2505_v12, %v11811_v7  ;;  %v15041_v7 = vld [vmem:[#allocation56_spill] sm:$0xff] }
 0x1ca   :  { %15037 = vst [vmem:[#allocation14_spill] sm:$0xff] %v12111_v10 }
 0x1cb   :  { %9687 = vmatmul.msk.f32.vlgmr.msra.gmra.mxu0 %vm126_vm2, %v15038_v58  ;;  %9690 = vmatmul.msk.f32.vlgmr.msra.gmra.mxu1 %vm126_vm2, %v15039_v31  ;;  %v15046_v58 = vld [vmem:[#allocation42_spill] sm:$0xff] }
 0x1cc   :  { %9711 = vmatpush.msk.msra.mxu0 %vm131_vm0, %v12119_v46  ;;  %9693 = vmatmul.msk.f32.vlgmr.msra.gmra.mxu2 %vm126_vm2, %v15040_v63 }
 0x1cd   :  { %9714 = vmatpush.msk.msra.mxu1 %vm131_vm0, %v12119_v46  ;;  %9696 = vmatmul.msk.f32.vlgmr.msra.gmra.mxu3 %vm126_vm2, %v15041_v7  ;;  %v15045_v7 = vld [vmem:[#allocation41_spill] sm:$0xff] }
 0x1ce   :  { %9717 = vmatpush.msk.msra.mxu2 %vm131_vm0, %v12119_v46  ;;  %9720 = vmatpush.msk.msra.mxu3 %vm131_vm0, %v12119_v46 }
 0x1cf   :  { %v2571_v38 = vpop.f32.mrf.mxu2 }
 0x1d0   :  { %v12137_v12 = vpop.f32.mrf.mxu0  ;;  %v12140_v10 = vadd.f32 %v2571_v38, %v11840_v2  ;;  %v2600_v25 = vpop.f32.mrf.mxu3  ;;  %v3477_v2 = vrot.slane %v11871_v59, 1  ;;  %v12157_v38 = vrot.slane %v11904_v28, 1 }
 0x1d1   :  { %15042 = vst [vmem:[#allocation106_spill] sm:$0xff] %v12137_v12  ;;  %v12142_v63 = vpop.f32.mrf.mxu1  ;;  %v12145_v31 = vadd.f32 %v2600_v25, %v11844_v48 }
 0x1d2   :  { %15043 = vst [vmem:[#allocation109_spill] sm:$0xff] %v12142_v63 }
 0x1d3   :  { %9688 = vmatmul.msk.f32.gmra.mxu0 %vm126_vm2, %v15044_v42  ;;  %9691 = vmatmul.msk.f32.gmra.mxu1 %vm126_vm2, %v15045_v7  ;;  %15048 = vst [vmem:[#allocation19_spill] sm:$0xff] %v12157_v38 }
 0x1d4   :  { %9694 = vmatmul.msk.f32.gmra.mxu2 %vm126_vm2, %v15046_v58  ;;  %v15051_v58 = vld [vmem:[#allocation57_spill] sm:$0xff] }
 0x1d5   :  { %9697 = vmatmul.msk.f32.gmra.mxu3 %vm126_vm2, %v15047_v41  ;;  %v12173_v41 = vsel %vm122_vm1, %v3477_v2, %v12157_v38 }
 0x1d6   :  { %15052 = vst [vmem:[#allocation26_spill] sm:$0xff] %v12173_v41 }
 0x1d7   :  { %v2574_v63 = vpop.f32.mrf.mxu2 }
 0x1d8   :  { %v12159_v48 = vpop.f32.mrf.mxu0  ;;  %v12162_v25 = vadd.f32 %v2574_v63, %v11860_v27  ;;  %v2603_v12 = vpop.f32.mrf.mxu3  ;;  %v15054_v27 = vld [vmem:[#allocation59_spill] sm:$0xff] }
 0x1d9   :  { %15049 = vst [vmem:[#allocation20_spill] sm:$0xff] %v12159_v48  ;;  %v12164_v42 = vpop.f32.mrf.mxu1  ;;  %v12167_v7 = vadd.f32 %v2603_v12, %v11864_v0 }
 0x1da   :  { %15050 = vst [vmem:[#allocation21_spill] sm:$0xff] %v12164_v42 }
 0x1db   :  { %9699 = vmatmul.msk.f32.vlgmr.msrb.gmra.mxu0 %vm126_vm2, %v15051_v58  ;;  %9702 = vmatmul.msk.f32.vlgmr.msrb.gmra.mxu1 %vm126_vm2, %v15053_v23  ;;  %v15059_v23 = vld [vmem:[#allocation55_spill] sm:$0xff]  ;;  %v15089_v58 = vld [vmem:[#allocation128_spill] sm:$0xff] }
 0x1dc   :  { %9723 = vmatpush.msk.msrb.mxu0 %vm131_vm0, %v12119_v46  ;;  %9705 = vmatmul.msk.f32.vlgmr.msrb.gmra.mxu2 %vm126_vm2, %v15054_v27  ;;  %v15057_v27 = vld [vmem:[#allocation53_spill] sm:$0xff] }
 0x1dd   :  { %9726 = vmatpush.msk.msrb.mxu1 %vm131_vm0, %v12119_v46  ;;  %9708 = vmatmul.msk.f32.vlgmr.msrb.gmra.mxu3 %vm126_vm2, %v12173_v41  ;;  %v15058_v41 = vld [vmem:[#allocation54_spill] sm:$0xff] }
 0x1de   :  { %9729 = vmatpush.msk.msrb.mxu2 %vm131_vm0, %v12119_v46  ;;  %9732 = vmatpush.msk.msrb.mxu3 %vm131_vm0, %v12119_v46 }
 0x1df   :  { %v2669_v0 = vpop.f32.mrf.mxu2 }
 0x1e0   :  { %v12189_v63 = vpop.f32.mrf.mxu0  ;;  %v12192_v12 = vadd.f32 %v2669_v0, %v11893_v53  ;;  %v2692_v2 = vpop.f32.mrf.mxu3 }
 0x1e1   :  { %15055 = vst [vmem:[#allocation114_spill] sm:$0xff] %v12189_v63  ;;  %v12194_v42 = vpop.f32.mrf.mxu1  ;;  %v12197_v48 = vadd.f32 %v2692_v2, %v11897_v26 }
 0x1e2   :  { %15056 = vst [vmem:[#allocation116_spill] sm:$0xff] %v12194_v42 }
 0x1e3   :  { %9700 = vmatmul.msk.f32.gmra.mxu0 %vm126_vm2, %v15057_v27  ;;  %9703 = vmatmul.msk.f32.gmra.mxu1 %vm126_vm2, %v15058_v41  ;;  %v15062_v27 = vld [vmem:[#allocation95_spill] sm:$0xff]  ;;  %v15063_v41 = vld [vmem:[#allocation96_spill] sm:$0xff] }
 0x1e4   :  { %9706 = vmatmul.msk.f32.gmra.mxu2 %vm126_vm2, %v15059_v23  ;;  %v15071_v23 = vld [vmem:[#allocation102_spill] sm:$0xff] }
 0x1e5   :  { %9709 = vmatmul.msk.f32.gmra.mxu3 %vm126_vm2, %v12157_v38  ;;  %v15064_v38 = vld [vmem:[#allocation97_spill] sm:$0xff] }
 0x1e7   :  { %v2672_v53 = vpop.f32.mrf.mxu2 }
 0x1e8   :  { %v12207_v0 = vpop.f32.mrf.mxu0  ;;  %v12210_v42 = vadd.f32 %v2672_v53, %v11918_v8  ;;  %v2695_v26 = vpop.f32.mrf.mxu3  ;;  %v15065_v8 = vld [vmem:[#allocation108_spill] sm:$0xff] }
 0x1e9   :  { %15060 = vst [vmem:[#allocation15_spill] sm:$0xff] %v12207_v0  ;;  %v12212_v2 = vpop.f32.mrf.mxu1  ;;  %v12215_v63 = vadd.f32 %v2695_v26, %v11922_v3 }
 0x1ea   :  { %15061 = vst [vmem:[#allocation16_spill] sm:$0xff] %v12212_v2 }
 0x1eb   :  { %9712 = vmatmul.msk.f32.vlgmr.msra.gmra.mxu0 %vm126_vm2, %v15062_v27  ;;  %9715 = vmatmul.msk.f32.vlgmr.msra.gmra.mxu1 %vm126_vm2, %v15063_v41  ;;  %v15070_v41 = vld [vmem:[#allocation90_spill] sm:$0xff] }
 0x1ec   :  { %9735 = vmatpush.msk.msra.mxu0 %vm131_vm0, %v12119_v46  ;;  %9718 = vmatmul.msk.f32.vlgmr.msra.gmra.mxu2 %vm126_vm2, %v15064_v38  ;;  %v15068_v38 = vld [vmem:[#allocation88_spill] sm:$0xff] }
 0x1ed   :  { %9738 = vmatpush.msk.msra.mxu1 %vm131_vm0, %v12119_v46  ;;  %9721 = vmatmul.msk.f32.vlgmr.msra.gmra.mxu3 %vm126_vm2, %v15065_v8  ;;  %v15069_v8 = vld [vmem:[#allocation89_spill] sm:$0xff] }
 0x1ee   :  { %9741 = vmatpush.msk.msra.mxu2 %vm131_vm0, %v12119_v46  ;;  %9744 = vmatpush.msk.msra.mxu3 %vm131_vm0, %v12119_v46 }
 0x1ef   :  { %v2761_v3 = vpop.f32.mrf.mxu2 }
 0x1f0   :  { %v12233_v27 = vpop.f32.mrf.mxu0  ;;  %v12236_v53 = vadd.f32 %v2761_v3, %v11946_v61  ;;  %v2784_v26 = vpop.f32.mrf.mxu3 }
 0x1f1   :  { %15066 = vst [vmem:[#allocation17_spill] sm:$0xff] %v12233_v27  ;;  %v12238_v2 = vpop.f32.mrf.mxu1  ;;  %v12241_v0 = vadd.f32 %v2784_v26, %v11950_v57  ;;  %v15074_v27 = vld [vmem:[#allocation111_spill] sm:$0xff] }
 0x1f2   :  { %15067 = vst [vmem:[#allocation22_spill] sm:$0xff] %v12238_v2 }
 0x1f3   :  { %9713 = vmatmul.msk.f32.gmra.mxu0 %vm126_vm2, %v15068_v38  ;;  %9716 = vmatmul.msk.f32.gmra.mxu1 %vm126_vm2, %v15069_v8  ;;  %v15075_v8 = vld [vmem:[#allocation112_spill] sm:$0xff] }
 0x1f4   :  { %9719 = vmatmul.msk.f32.gmra.mxu2 %vm126_vm2, %v15070_v41  ;;  %v15082_v41 = vld [vmem:[#allocation105_spill] sm:$0xff] }
 0x1f5   :  { %9722 = vmatmul.msk.f32.gmra.mxu3 %vm126_vm2, %v15071_v23  ;;  %v15076_v23 = vld [vmem:[#allocation113_spill] sm:$0xff] }
 0x1f7   :  { %v2764_v61 = vpop.f32.mrf.mxu2 }
 0x1f8   :  { %v12251_v3 = vpop.f32.mrf.mxu0  ;;  %v12254_v2 = vadd.f32 %v2764_v61, %v11966_v1  ;;  %v2787_v57 = vpop.f32.mrf.mxu3  ;;  %v15077_v1 = vld [vmem:[#allocation124_spill] sm:$0xff] }
 0x1f9   :  { %15072 = vst [vmem:[#allocation122_spill] sm:$0xff] %v12251_v3  ;;  %v12256_v26 = vpop.f32.mrf.mxu1  ;;  %v12259_v38 = vadd.f32 %v2787_v57, %v11970_v35 }
 0x1fa   :  { %15073 = vst [vmem:[#allocation125_spill] sm:$0xff] %v12256_v26 }
 0x1fb   :  { %9724 = vmatmul.msk.f32.vlgmr.msrb.gmra.mxu0 %vm126_vm2, %v15074_v27  ;;  %9727 = vmatmul.msk.f32.vlgmr.msrb.gmra.mxu1 %vm126_vm2, %v15075_v8  ;;  %v15080_v8 = vld [vmem:[#allocation103_spill] sm:$0xff]  ;;  %v15083_v27 = vld [vmem:[#allocation118_spill] sm:$0xff] }
 0x1fc   :  { %9747 = vmatpush.msk.msrb.mxu0 %vm131_vm0, %v12119_v46  ;;  %9730 = vmatmul.msk.f32.vlgmr.msrb.gmra.mxu2 %vm126_vm2, %v15076_v23 }
 0x1fd   :  { %9750 = vmatpush.msk.msrb.mxu1 %vm131_vm0, %v12119_v46  ;;  %9733 = vmatmul.msk.f32.vlgmr.msrb.gmra.mxu3 %vm126_vm2, %v15077_v1  ;;  %v15081_v1 = vld [vmem:[#allocation104_spill] sm:$0xff] }
 0x1fe   :  { %9753 = vmatpush.msk.msrb.mxu2 %vm131_vm0, %v12119_v46  ;;  %9756 = vmatpush.msk.msrb.mxu3 %vm131_vm0, %v12119_v46 }
 0x1ff   :  { %v2853_v35 = vpop.f32.mrf.mxu2 }
 0x200   :  { %v12277_v61 = vpop.f32.mrf.mxu0  ;;  %v12280_v57 = vadd.f32 %v2853_v35, %v11994_v52  ;;  %v2882_v26 = vpop.f32.mrf.mxu3  ;;  %v3813_v52 = vrot.slane %v11712_v24, 2  ;;  %v12297_v35 = vrot.slane %v11745_v60, 2 }
 0x201   :  { %15078 = vst [vmem:[#allocation27_spill] sm:$0xff] %v12277_v61  ;;  %v12282_v3 = vpop.f32.mrf.mxu1  ;;  %v12285_v23 = vadd.f32 %v2882_v26, %v11998_v4 }
 0x202   :  { %15079 = vst [vmem:[#allocation28_spill] sm:$0xff] %v12282_v3 }
 0x203   :  { %9725 = vmatmul.msk.f32.gmra.mxu0 %vm126_vm2, %v15080_v8  ;;  %9728 = vmatmul.msk.f32.gmra.mxu1 %vm126_vm2, %v15081_v1  ;;  %15084 = vst [vmem:[#allocation29_spill] sm:$0xff] %v12297_v35 }
 0x204   :  { %9731 = vmatmul.msk.f32.gmra.mxu2 %vm126_vm2, %v15082_v41  ;;  %v15087_v41 = vld [vmem:[#allocation127_spill] sm:$0xff] }
 0x205   :  { %9734 = vmatmul.msk.f32.gmra.mxu3 %vm126_vm2, %v15083_v27  ;;  %v12313_v27 = vsel %vm1547_vm3, %v3813_v52, %v12297_v35 }
 0x206   :  { %15088 = vst [vmem:[#allocation31_spill] sm:$0xff] %v12313_v27 }
 0x207   :  { %v2856_v3 = vpop.f32.mrf.mxu2 }
 0x208   :  { %v12299_v4 = vpop.f32.mrf.mxu0  ;;  %v12302_v26 = vadd.f32 %v2856_v3, %v12018_v16  ;;  %v2885_v61 = vpop.f32.mrf.mxu3  ;;  %v15090_v16 = vld [vmem:[#allocation129_spill] sm:$0xff] }
 0x209   :  { %15085 = vst [vmem:[#allocation23_spill] sm:$0xff] %v12299_v4  ;;  %v12304_v8 = vpop.f32.mrf.mxu1  ;;  %v12307_v1 = vadd.f32 %v2885_v61, %v12022_v22 }
 0x20a   :  { %15086 = vst [vmem:[#allocation34_spill] sm:$0xff] %v12304_v8 }
 0x20b   :  { %9736 = vmatmul.msk.f32.vlgmr.msra.gmra.mxu0 %vm126_vm2, %v15087_v41  ;;  %9739 = vmatmul.msk.f32.vlgmr.msra.gmra.mxu1 %vm126_vm2, %v15089_v58  ;;  %v15095_v58 = vld [vmem:[#allocation121_spill] sm:$0xff] }
 0x20c   :  { %9759 = vmatpush.msk.msra.mxu0 %vm131_vm0, %v12119_v46  ;;  %9742 = vmatmul.msk.f32.vlgmr.msra.gmra.mxu2 %vm126_vm2, %v15090_v16  ;;  %v15093_v16 = vld [vmem:[#allocation119_spill] sm:$0xff] }
 0x20d   :  { %9762 = vmatpush.msk.msra.mxu1 %vm131_vm0, %v12119_v46  ;;  %9745 = vmatmul.msk.f32.vlgmr.msra.gmra.mxu3 %vm126_vm2, %v12313_v27  ;;  %v15094_v27 = vld [vmem:[#allocation120_spill] sm:$0xff] }
 0x20e   :  { %9765 = vmatpush.msk.msra.mxu2 %vm131_vm0, %v12119_v46  ;;  %9768 = vmatpush.msk.msra.mxu3 %vm131_vm0, %v12119_v46 }
 0x20f   :  { %v3004_v22 = vpop.f32.mrf.mxu2 }
 0x210   :  { %v12329_v3 = vpop.f32.mrf.mxu0  ;;  %v12332_v61 = vadd.f32 %v3004_v22, %v12047_v44  ;;  %v3027_v52 = vpop.f32.mrf.mxu3 }
 0x211   :  { %15091 = vst [vmem:[#allocation95_spill] sm:$0xff] %v12329_v3  ;;  %v12334_v8 = vpop.f32.mrf.mxu1  ;;  %v12337_v4 = vadd.f32 %v3027_v52, %v12052_v32 }
 0x212   :  { %15092 = vst [vmem:[#allocation88_spill] sm:$0xff] %v12334_v8 }
 0x213   :  { %9737 = vmatmul.msk.f32.gmra.mxu0 %vm126_vm2, %v15093_v16  ;;  %9740 = vmatmul.msk.f32.gmra.mxu1 %vm126_vm2, %v15094_v27  ;;  %v15098_v16 = vld [vmem:[#allocation137_spill] sm:$0xff]  ;;  %v15099_v27 = vld [vmem:[#allocation138_spill] sm:$0xff] }
 0x214   :  { %9743 = vmatmul.msk.f32.gmra.mxu2 %vm126_vm2, %v15095_v58 }
 0x215   :  { %9746 = vmatmul.msk.f32.gmra.mxu3 %vm126_vm2, %v12297_v35  ;;  %v15100_v35 = vld [vmem:[#allocation139_spill] sm:$0xff] }
 0x217   :  { %v3007_v44 = vpop.f32.mrf.mxu2 }
 0x218   :  { %v12347_v22 = vpop.f32.mrf.mxu0  ;;  %v12350_v8 = vadd.f32 %v3007_v44, %v12065_v49  ;;  %v3030_v32 = vpop.f32.mrf.mxu3  ;;  %v15101_v49 = vld [vmem:[#allocation147_spill] sm:$0xff] }
 0x219   :  { %15096 = vst [vmem:[#allocation127_spill] sm:$0xff] %v12347_v22  ;;  %v12352_v52 = vpop.f32.mrf.mxu1  ;;  %v12355_v3 = vadd.f32 %v3030_v32, %v12070_v13 }
 0x21a   :  { %15097 = vst [vmem:[#allocation121_spill] sm:$0xff] %v12352_v52 }
 0x21b   :  { %9748 = vmatmul.msk.f32.vlgmr.msrb.gmra.mxu0 %vm126_vm2, %v15098_v16  ;;  %9751 = vmatmul.msk.f32.vlgmr.msrb.gmra.mxu1 %vm126_vm2, %v15099_v27  ;;  %v15106_v27 = vld [vmem:[#allocation134_spill] sm:$0xff] }
 0x21c   :  { %9771 = vmatpush.msk.msrb.mxu0 %vm131_vm0, %v12119_v46  ;;  %9754 = vmatmul.msk.f32.vlgmr.msrb.gmra.mxu2 %vm126_vm2, %v15100_v35  ;;  %v15104_v35 = vld [vmem:[#allocation132_spill] sm:$0xff] }
 0x21d   :  { %9774 = vmatpush.msk.msrb.mxu1 %vm131_vm0, %v12119_v46  ;;  %9757 = vmatmul.msk.f32.vlgmr.msrb.gmra.mxu3 %vm126_vm2, %v15101_v49  ;;  %v15105_v49 = vld [vmem:[#allocation133_spill] sm:$0xff] }
 0x21e   :  { %9777 = vmatpush.msk.msrb.mxu2 %vm131_vm0, %v12119_v46  ;;  %9780 = vmatpush.msk.msrb.mxu3 %vm131_vm0, %v12119_v46  ;;  %v15107_v46 = vld [vmem:[#allocation142_spill] sm:$0xff] }
 0x21f   :  { %v3096_v13 = vpop.f32.mrf.mxu2 }
 0x220   :  { %v12373_v16 = vpop.f32.mrf.mxu0  ;;  %v12376_v44 = vadd.f32 %v3096_v13, %v12091_v45  ;;  %v3119_v32 = vpop.f32.mrf.mxu3 }
 0x221   :  { %15102 = vst [vmem:[#allocation137_spill] sm:$0xff] %v12373_v16  ;;  %v12378_v52 = vpop.f32.mrf.mxu1  ;;  %v12381_v22 = vadd.f32 %v3119_v32, %v12096_v37  ;;  %v12404_v16 = vld [vmem:[%s14588_s1 + $0x18] sm:$0x7] }
 0x222   :  { %15103 = vst [vmem:[#allocation176_spill] sm:$0xff] %v12378_v52 }
 0x223   :  { %9749 = vmatmul.msk.f32.gmra.mxu0 %vm126_vm2, %v15104_v35  ;;  %9752 = vmatmul.msk.f32.gmra.mxu1 %vm126_vm2, %v15105_v49  ;;  %v15117_v49 = vld [vmem:[#allocation145_spill] sm:$0xff] }
 0x224   :  { %9755 = vmatmul.msk.f32.gmra.mxu2 %vm126_vm2, %v15106_v27  ;;  %v15110_v27 = vld [vmem:[#allocation149_spill] sm:$0xff] }
 0x225   :  { %9758 = vmatmul.msk.f32.gmra.mxu3 %vm126_vm2, %v15107_v46  ;;  %v15111_v46 = vld [vmem:[#allocation150_spill] sm:$0xff] }
 0x227   :  { %v3099_v45 = vpop.f32.mrf.mxu2 }
 0x228   :  { %v12391_v13 = vpop.f32.mrf.mxu0  ;;  %v12394_v52 = vadd.f32 %v3099_v45, %v12109_v33  ;;  %v3122_v37 = vpop.f32.mrf.mxu3  ;;  %v15112_v33 = vld [vmem:[#allocation151_spill] sm:$0xff] }
 0x229   :  { %15108 = vst [vmem:[#allocation132_spill] sm:$0xff] %v12391_v13  ;;  %v12396_v32 = vpop.f32.mrf.mxu1  ;;  %v12399_v35 = vadd.f32 %v3122_v37, %v12114_v17 }
 0x22a   :  { %15109 = vst [vmem:[#allocation177_spill] sm:$0xff] %v12396_v32 }
 0x22b   :  { %9760 = vmatmul.msk.f32.vlgmr.msra.gmra.mxu0 %vm126_vm2, %v15110_v27  ;;  %9763 = vmatmul.msk.f32.vlgmr.msra.gmra.mxu1 %vm126_vm2, %v15111_v46  ;;  %v15115_v46 = vld [vmem:[#allocation143_spill] sm:$0xff] }
 0x22c   :  { %9784 = vmatpush.msk.msra.mxu0 %vm131_vm0, %v12404_v16  ;;  %9766 = vmatmul.msk.f32.vlgmr.msra.gmra.mxu2 %vm126_vm2, %v15112_v33 }
 0x22d   :  { %9787 = vmatpush.msk.msra.mxu1 %vm131_vm0, %v12404_v16  ;;  %9769 = vmatmul.msk.f32.vlgmr.msra.gmra.mxu3 %vm126_vm2, %v11569_v56  ;;  %v15116_v56 = vld [vmem:[#allocation144_spill] sm:$0xff] }
 0x22e   :  { %9790 = vmatpush.msk.msra.mxu2 %vm131_vm0, %v12404_v16  ;;  %9793 = vmatpush.msk.msra.mxu3 %vm131_vm0, %v12404_v16 }
 0x22f   :  { %v3188_v17 = vpop.f32.mrf.mxu2 }
 0x230   :  { %v12422_v45 = vpop.f32.mrf.mxu0  ;;  %v12425_v37 = vadd.f32 %v3188_v17, %v12140_v10  ;;  %v3218_v32 = vpop.f32.mrf.mxu3  ;;  %v4096_v10 = vrot.slane %v11871_v59, 2  ;;  %v12442_v17 = vrot.slane %v11904_v28, 2 }
 0x231   :  { %15113 = vst [vmem:[#allocation149_spill] sm:$0xff] %v12422_v45  ;;  %v12427_v13 = vpop.f32.mrf.mxu1  ;;  %v12430_v33 = vadd.f32 %v3218_v32, %v12145_v31 }
 0x232   :  { %15114 = vst [vmem:[#allocation178_spill] sm:$0xff] %v12427_v13 }
 0x233   :  { %9761 = vmatmul.msk.f32.gmra.mxu0 %vm126_vm2, %v15115_v46  ;;  %9764 = vmatmul.msk.f32.gmra.mxu1 %vm126_vm2, %v15116_v56  ;;  %15118 = vst [vmem:[#allocation179_spill] sm:$0xff] %v12442_v17 }
 0x234   :  { %9767 = vmatmul.msk.f32.gmra.mxu2 %vm126_vm2, %v15117_v49  ;;  %v15121_v49 = vld [vmem:[#allocation160_spill] sm:$0xff] }
 0x235   :  { %9770 = vmatmul.msk.f32.gmra.mxu3 %vm126_vm2, %v11545_v54  ;;  %v12458_v54 = vsel %vm1547_vm3, %v4096_v10, %v12442_v17 }
 0x237   :  { %v3191_v13 = vpop.f32.mrf.mxu2 }
 0x238   :  { %v12444_v31 = vpop.f32.mrf.mxu0  ;;  %v12447_v32 = vadd.f32 %v3191_v13, %v12162_v25  ;;  %v3221_v45 = vpop.f32.mrf.mxu3  ;;  %v15122_v25 = vld [vmem:[#allocation161_spill] sm:$0xff] }
 0x239   :  { %15119 = vst [vmem:[#allocation180_spill] sm:$0xff] %v12444_v31  ;;  %v12449_v46 = vpop.f32.mrf.mxu1  ;;  %v12452_v56 = vadd.f32 %v3221_v45, %v12167_v7 }
 0x23a   :  { %15120 = vst [vmem:[#allocation181_spill] sm:$0xff] %v12449_v46 }
 0x23b   :  { %9772 = vmatmul.msk.f32.vlgmr.msrb.gmra.mxu0 %vm126_vm2, %v11577_v34  ;;  %9775 = vmatmul.msk.f32.vlgmr.msrb.gmra.mxu1 %vm126_vm2, %v15121_v49 }
 0x23c   :  { %9796 = vmatpush.msk.msrb.mxu0 %vm131_vm0, %v12404_v16  ;;  %9778 = vmatmul.msk.f32.vlgmr.msrb.gmra.mxu2 %vm126_vm2, %v15122_v25 }
 0x23d   :  { %9799 = vmatpush.msk.msrb.mxu1 %vm131_vm0, %v12404_v16  ;;  %9781 = vmatmul.msk.f32.vlgmr.msrb.gmra.mxu3 %vm126_vm2, %v12458_v54 }
 0x23e   :  { %9802 = vmatpush.msk.msrb.mxu2 %vm131_vm0, %v12404_v16  ;;  %9805 = vmatpush.msk.msrb.mxu3 %vm131_vm0, %v12404_v16 }
 0x23f   :  { %v3287_v7 = vpop.f32.mrf.mxu2 }
 0x240   :  { %v12474_v13 = vpop.f32.mrf.mxu0  ;;  %v12477_v45 = vadd.f32 %v3287_v7, %v12192_v12  ;;  %v3310_v10 = vpop.f32.mrf.mxu3 }
 0x241   :  { %15123 = vst [vmem:[#allocation160_spill] sm:$0xff] %v12474_v13  ;;  %v12479_v46 = vpop.f32.mrf.mxu1  ;;  %v12482_v31 = vadd.f32 %v3310_v10, %v12197_v48 }
 0x242   :  { %15124 = vst [vmem:[#allocation161_spill] sm:$0xff] %v12479_v46 }
 0x243   :  { %9773 = vmatmul.msk.f32.gmra.mxu0 %vm126_vm2, %v11551_v55  ;;  %9776 = vmatmul.msk.f32.gmra.mxu1 %vm126_vm2, %v11557_v14  ;;  %v10228_v14 = vld [vmem:[%s14587_s0 + $0x20] sm:$0xff] }
 0x244   :  { %9779 = vmatmul.msk.f32.gmra.mxu2 %vm126_vm2, %v11561_v47 }
 0x245   :  { %9782 = vmatmul.msk.f32.gmra.mxu3 %vm126_vm2, %v12442_v17  ;;  %v10229_v17 = vld [vmem:[%s14587_s0 + $0x30] sm:$0xff] }
 0x247   :  { %v3290_v12 = vpop.f32.mrf.mxu2 }
 0x248   :  { %v12492_v7 = vpop.f32.mrf.mxu0  ;;  %v12495_v46 = vadd.f32 %v3290_v12, %v12210_v42  ;;  %v3313_v48 = vpop.f32.mrf.mxu3  ;;  %v10230_v42 = vld [vmem:[%s14587_s0 + $0x40] sm:$0xff] }
 0x249   :  { %15125 = vst [vmem:[#allocation182_spill] sm:$0xff] %v12492_v7  ;;  %v12497_v10 = vpop.f32.mrf.mxu1  ;;  %v12500_v13 = vadd.f32 %v3313_v48, %v12215_v63  ;;  %v10233_v7 = vld [vmem:[%s14587_s0 + $0x38] sm:$0xff] }
 0x24a   :  { %15126 = vst [vmem:[#allocation183_spill] sm:$0xff] %v12497_v10 }
 0x24b   :  { %9785 = vmatmul.msk.f32.vlgmr.msra.gmra.mxu0 %vm126_vm2, %v10228_v14  ;;  %9788 = vmatmul.msk.f32.vlgmr.msra.gmra.mxu1 %vm126_vm2, %v10229_v17  ;;  %v10231_v14 = vld [vmem:[%s14587_s0 + $0x50] sm:$0xff] }
 0x24c   :  { %9808 = vmatpush.msk.msra.mxu0 %vm131_vm0, %v12404_v16  ;;  %9791 = vmatmul.msk.f32.vlgmr.msra.gmra.mxu2 %vm126_vm2, %v10230_v42 }
 0x24d   :  { %9811 = vmatpush.msk.msra.mxu1 %vm131_vm0, %v12404_v16  ;;  %9794 = vmatmul.msk.f32.vlgmr.msra.gmra.mxu3 %vm126_vm2, %v10231_v14  ;;  %v10232_v14 = vld [vmem:[%s14587_s0 + $0x28] sm:$0xff] }
 0x24e   :  { %9814 = vmatpush.msk.msra.mxu2 %vm131_vm0, %v12404_v16  ;;  %9817 = vmatpush.msk.msra.mxu3 %vm131_vm0, %v12404_v16 }
 0x24f   :  { %v3379_v63 = vpop.f32.mrf.mxu2 }
 0x250   :  { %v12526_v17 = vpop.f32.mrf.mxu0  ;;  %v12529_v12 = vadd.f32 %v3379_v63, %v12236_v53  ;;  %v3402_v48 = vpop.f32.mrf.mxu3  ;;  %v10234_v53 = vld [vmem:[%s14587_s0 + $0x48] sm:$0xff] }
 0x251   :  { %15127 = vst [vmem:[#allocation184_spill] sm:$0xff] %v12526_v17  ;;  %v12531_v42 = vpop.f32.mrf.mxu1  ;;  %v12534_v10 = vadd.f32 %v3402_v48, %v12241_v0  ;;  %v10235_v0 = vld [vmem:[%s14587_s0 + $0x58] sm:$0xff] }
 0x252   :  { %15128 = vst [vmem:[#allocation185_spill] sm:$0xff] %v12531_v42 }
 0x253   :  { %9786 = vmatmul.msk.f32.gmra.mxu0 %vm126_vm2, %v10232_v14  ;;  %9789 = vmatmul.msk.f32.gmra.mxu1 %vm126_vm2, %v10233_v7 }
 0x254   :  { %9792 = vmatmul.msk.f32.gmra.mxu2 %vm126_vm2, %v10234_v53  ;;  %v10236_v53 = vld [vmem:[%s14587_s0 + $0x60] sm:$0xff] }
 0x255   :  { %9795 = vmatmul.msk.f32.gmra.mxu3 %vm126_vm2, %v10235_v0  ;;  %v10237_v0 = vld [vmem:[%s14587_s0 + $0x70] sm:$0xff] }
 0x257   :  { %v3382_v63 = vpop.f32.mrf.mxu2 }
 0x258   :  { %v12552_v48 = vpop.f32.mrf.mxu0  ;;  %v12555_v14 = vadd.f32 %v3382_v63, %v12254_v2  ;;  %v3405_v42 = vpop.f32.mrf.mxu3  ;;  %v10238_v2 = vld [vmem:[%s14587_s0 + $0x80] sm:$0xff] }
 0x259   :  { %15129 = vst [vmem:[#allocation186_spill] sm:$0xff] %v12552_v48  ;;  %v12557_v7 = vpop.f32.mrf.mxu1  ;;  %v12560_v17 = vadd.f32 %v3405_v42, %v12259_v38  ;;  %v10239_v38 = vld [vmem:[%s14587_s0 + $0x90] sm:$0xff]  ;;  %v10241_v48 = vld [vmem:[%s14587_s0 + $0x78] sm:$0xff] }
 0x25a   :  { %15130 = vst [vmem:[#allocation187_spill] sm:$0xff] %v12557_v7 }
 0x25b   :  { %9797 = vmatmul.msk.f32.vlgmr.msrb.gmra.mxu0 %vm126_vm2, %v10236_v53  ;;  %9800 = vmatmul.msk.f32.vlgmr.msrb.gmra.mxu1 %vm126_vm2, %v10237_v0 }
 0x25c   :  { %9820 = vmatpush.msk.msrb.mxu0 %vm131_vm0, %v12404_v16  ;;  %9803 = vmatmul.msk.f32.vlgmr.msrb.gmra.mxu2 %vm126_vm2, %v10238_v2 }
 0x25d   :  { %9823 = vmatpush.msk.msrb.mxu1 %vm131_vm0, %v12404_v16  ;;  %9806 = vmatmul.msk.f32.vlgmr.msrb.gmra.mxu3 %vm126_vm2, %v10239_v38  ;;  %v10240_v38 = vld [vmem:[%s14587_s0 + $0x68] sm:$0xff] }
 0x25e   :  { %9826 = vmatpush.msk.msrb.mxu2 %vm131_vm0, %v12404_v16  ;;  %9829 = vmatpush.msk.msrb.mxu3 %vm131_vm0, %v12404_v16 }
 0x25f   :  { %v3471_v42 = vpop.f32.mrf.mxu2 }
 0x260   :  { %v12586_v63 = vpop.f32.mrf.mxu0  ;;  %v12589_v53 = vadd.f32 %v3471_v42, %v12280_v57  ;;  %v3501_v0 = vpop.f32.mrf.mxu3  ;;  %v10242_v57 = vld [vmem:[%s14587_s0 + $0x88] sm:$0xff] }
 0x261   :  { %15131 = vst [vmem:[#allocation188_spill] sm:$0xff] %v12586_v63  ;;  %v12591_v2 = vpop.f32.mrf.mxu1  ;;  %v12594_v7 = vadd.f32 %v3501_v0, %v12285_v23  ;;  %v10243_v23 = vld [vmem:[%s14587_s0 + $0x98] sm:$0xff] }
 0x262   :  { %15132 = vst [vmem:[#allocation189_spill] sm:$0xff] %v12591_v2 }
 0x263   :  { %9798 = vmatmul.msk.f32.gmra.mxu0 %vm126_vm2, %v10240_v38  ;;  %9801 = vmatmul.msk.f32.gmra.mxu1 %vm126_vm2, %v10241_v48 }
 0x264   :  { %9804 = vmatmul.msk.f32.gmra.mxu2 %vm126_vm2, %v10242_v57  ;;  %v10244_v57 = vld [vmem:[%s14587_s0 + $0xa0] sm:$0xff] }
 0x265   :  { %9807 = vmatmul.msk.f32.gmra.mxu3 %vm126_vm2, %v10243_v23  ;;  %v12629_v23 = vld [vmem:[%s14587_s0 + $0xd0] sm:$0xff] }
 0x267   :  { %v3474_v42 = vpop.f32.mrf.mxu2 }
 0x268   :  { %v12612_v0 = vpop.f32.mrf.mxu0  ;;  %v12615_v38 = vadd.f32 %v3474_v42, %v12302_v26  ;;  %v3504_v2 = vpop.f32.mrf.mxu3  ;;  %v10245_v26 = vld [vmem:[%s14587_s0 + $0xb0] sm:$0xff] }
 0x269   :  { %15133 = vst [vmem:[#allocation190_spill] sm:$0xff] %v12612_v0  ;;  %v12617_v48 = vpop.f32.mrf.mxu1  ;;  %v12620_v63 = vadd.f32 %v3504_v2, %v12307_v1  ;;  %v12664_v0 = vld [vmem:[%s14587_s0 + $0xd8] sm:$0xff] }
 0x26a   :  { %15134 = vst [vmem:[#allocation191_spill] sm:$0xff] %v12617_v48  ;;  %v10246_v48 = vld [vmem:[%s14587_s0 + $0xa8] sm:$0xff] }
 0x26b   :  { %9809 = vmatmul.msk.f32.vlgmr.msra.gmra.mxu0 %vm126_vm2, %v10244_v57  ;;  %9812 = vmatmul.msk.f32.vlgmr.msra.gmra.mxu1 %vm126_vm2, %v10245_v26 }
 0x26c   :  { %9832 = vmatpush.msk.msra.mxu0 %vm131_vm0, %v12404_v16  ;;  %9815 = vmatmul.msk.f32.vlgmr.msra.gmra.mxu2 %vm126_vm2, %v11712_v24 }
 0x26d   :  { %9835 = vmatpush.msk.msra.mxu1 %vm131_vm0, %v12404_v16  ;;  %9818 = vmatmul.msk.f32.vlgmr.msra.gmra.mxu3 %vm126_vm2, %v12629_v23 }
 0x26e   :  { %9838 = vmatpush.msk.msra.mxu2 %vm131_vm0, %v12404_v16  ;;  %9841 = vmatpush.msk.msra.mxu3 %vm131_vm0, %v12404_v16 }
 0x26f   :  { %v3623_v1 = vpop.f32.mrf.mxu2 }
 0x270   :  { %v12647_v2 = vpop.f32.mrf.mxu0  ;;  %v12650_v42 = vadd.f32 %v3623_v1, %v12332_v61  ;;  %v3646_v57 = vpop.f32.mrf.mxu3  ;;  %v10247_v61 = vld [vmem:[%s14587_s0 + $0xb8] sm:$0xff] }
 0x271   :  { %15135 = vst [vmem:[#allocation192_spill] sm:$0xff] %v12647_v2  ;;  %v12652_v24 = vpop.f32.mrf.mxu1  ;;  %v12655_v26 = vadd.f32 %v3646_v57, %v12337_v4 }
 0x272   :  { %15136 = vst [vmem:[#allocation193_spill] sm:$0xff] %v12652_v24 }
 0x273   :  { %9810 = vmatmul.msk.f32.gmra.mxu0 %vm126_vm2, %v10246_v48  ;;  %9813 = vmatmul.msk.f32.gmra.mxu1 %vm126_vm2, %v10247_v61  ;;  %v10248_v61 = vld [vmem:[%s14587_s0 + $0x120] sm:$0xff] }
 0x274   :  { %9816 = vmatmul.msk.f32.gmra.mxu2 %vm126_vm2, %v11745_v60  ;;  %v10249_v60 = vld [vmem:[%s14587_s0 + $0x130] sm:$0xff] }
 0x275   :  { %9819 = vmatmul.msk.f32.gmra.mxu3 %vm126_vm2, %v12664_v0 }
 0x277   :  { %v3626_v4 = vpop.f32.mrf.mxu2 }
 0x278   :  { %v12674_v1 = vpop.f32.mrf.mxu0  ;;  %v12677_v48 = vadd.f32 %v3626_v4, %v12350_v8  ;;  %v3649_v57 = vpop.f32.mrf.mxu3  ;;  %v10250_v8 = vld [vmem:[%s14587_s0 + $0x140] sm:$0xff] }
 0x279   :  { %15137 = vst [vmem:[#allocation194_spill] sm:$0xff] %v12674_v1  ;;  %v12679_v24 = vpop.f32.mrf.mxu1  ;;  %v12682_v2 = vadd.f32 %v3649_v57, %v12355_v3  ;;  %v10251_v3 = vld [vmem:[%s14587_s0 + $0x150] sm:$0xff]  ;;  %v10261_v1 = vld [vmem:[%s14587_s0 + $0x178] sm:$0xff] }
 0x27a   :  { %15138 = vst [vmem:[#allocation195_spill] sm:$0xff] %v12679_v24 }
 0x27b   :  { %9821 = vmatmul.msk.f32.vlgmr.msrb.gmra.mxu0 %vm126_vm2, %v10248_v61  ;;  %9824 = vmatmul.msk.f32.vlgmr.msrb.gmra.mxu1 %vm126_vm2, %v10249_v60 }
 0x27c   :  { %9844 = vmatpush.msk.msrb.mxu0 %vm131_vm0, %v12404_v16  ;;  %9827 = vmatmul.msk.f32.vlgmr.msrb.gmra.mxu2 %vm126_vm2, %v10250_v8 }
 0x27d   :  { %9847 = vmatpush.msk.msrb.mxu1 %vm131_vm0, %v12404_v16  ;;  %9830 = vmatmul.msk.f32.vlgmr.msrb.gmra.mxu3 %vm126_vm2, %v10251_v3  ;;  %v10252_v3 = vld [vmem:[%s14587_s0 + $0x128] sm:$0xff] }
 0x27e   :  { %9850 = vmatpush.msk.msrb.mxu2 %vm131_vm0, %v12404_v16  ;;  %9853 = vmatpush.msk.msrb.mxu3 %vm131_vm0, %v12404_v16  ;;  %v10253_v16 = vld [vmem:[%s14587_s0 + $0x138] sm:$0xff] }
 0x27f   :  { %v3715_v4 = vpop.f32.mrf.mxu2 }
 0x280   :  { %v12708_v57 = vpop.f32.mrf.mxu0  ;;  %v12711_v61 = vadd.f32 %v3715_v4, %v12376_v44  ;;  %v3738_v60 = vpop.f32.mrf.mxu3  ;;  %v10254_v44 = vld [vmem:[%s14587_s0 + $0x148] sm:$0xff] }
 0x281   :  { %15139 = vst [vmem:[#allocation196_spill] sm:$0xff] %v12708_v57  ;;  %v12713_v8 = vpop.f32.mrf.mxu1  ;;  %v12716_v24 = vadd.f32 %v3738_v60, %v12381_v22  ;;  %v10255_v22 = vld [vmem:[%s14587_s0 + $0x158] sm:$0xff] }
 0x282   :  { %15140 = vst [vmem:[#allocation197_spill] sm:$0xff] %v12713_v8 }
 0x283   :  { %9822 = vmatmul.msk.f32.gmra.mxu0 %vm126_vm2, %v10252_v3  ;;  %9825 = vmatmul.msk.f32.gmra.mxu1 %vm126_vm2, %v10253_v16 }
 0x284   :  { %9828 = vmatmul.msk.f32.gmra.mxu2 %vm126_vm2, %v10254_v44  ;;  %v12747_v44 = vld [vmem:[%s14588_s1 + $0x1c] sm:$0x7] }
 0x285   :  { %9831 = vmatmul.msk.f32.gmra.mxu3 %vm126_vm2, %v10255_v22  ;;  %v10256_v22 = vld [vmem:[%s14587_s0 + $0x160] sm:$0xff] }
 0x287   :  { %v3718_v4 = vpop.f32.mrf.mxu2 }
 0x288   :  { %v12734_v60 = vpop.f32.mrf.mxu0  ;;  %v12737_v3 = vadd.f32 %v3718_v4, %v12394_v52  ;;  %v3741_v8 = vpop.f32.mrf.mxu3  ;;  %v10257_v52 = vld [vmem:[%s14587_s0 + $0x170] sm:$0xff] }
 0x289   :  { %15141 = vst [vmem:[#allocation198_spill] sm:$0xff] %v12734_v60  ;;  %v12739_v16 = vpop.f32.mrf.mxu1  ;;  %v12742_v57 = vadd.f32 %v3741_v8, %v12399_v35  ;;  %v10258_v35 = vld [vmem:[%s14587_s0 + $0x180] sm:$0xff]  ;;  %v10259_v8 = vld [vmem:[%s14587_s0 + $0x190] sm:$0xff] }
 0x28a   :  { %15142 = vst [vmem:[#allocation199_spill] sm:$0xff] %v12739_v16 }
 0x28b   :  { %9833 = vmatmul.msk.f32.vlgmr.msra.gmra.mxu0 %vm126_vm2, %v10256_v22  ;;  %9836 = vmatmul.msk.f32.vlgmr.msra.gmra.mxu1 %vm126_vm2, %v10257_v52 }
 0x28c   :  { %9857 = vmatpush.msk.msra.mxu0 %vm131_vm0, %v12747_v44  ;;  %9839 = vmatmul.msk.f32.vlgmr.msra.gmra.mxu2 %vm126_vm2, %v10258_v35 }
 0x28d   :  { %9860 = vmatpush.msk.msra.mxu1 %vm131_vm0, %v12747_v44  ;;  %9842 = vmatmul.msk.f32.vlgmr.msra.gmra.mxu3 %vm126_vm2, %v10259_v8  ;;  %v10260_v8 = vld [vmem:[%s14587_s0 + $0x168] sm:$0xff] }
 0x28e   :  { %9863 = vmatpush.msk.msra.mxu2 %vm131_vm0, %v12747_v44  ;;  %9866 = vmatpush.msk.msra.mxu3 %vm131_vm0, %v12747_v44 }
 0x28f   :  { %v3807_v4 = vpop.f32.mrf.mxu2 }
 0x290   :  { %v12773_v22 = vpop.f32.mrf.mxu0  ;;  %v12776_v52 = vadd.f32 %v3807_v4, %v12425_v37  ;;  %v3837_v35 = vpop.f32.mrf.mxu3  ;;  %v10262_v37 = vld [vmem:[%s14587_s0 + $0x188] sm:$0xff] }
 0x291   :  { %15143 = vst [vmem:[#allocation200_spill] sm:$0xff] %v12773_v22  ;;  %v12778_v16 = vpop.f32.mrf.mxu1  ;;  %v12781_v60 = vadd.f32 %v3837_v35, %v12430_v33  ;;  %v10263_v33 = vld [vmem:[%s14587_s0 + $0x198] sm:$0xff] }
 0x292   :  { %15144 = vst [vmem:[#allocation201_spill] sm:$0xff] %v12778_v16 }
 0x293   :  { %9834 = vmatmul.msk.f32.gmra.mxu0 %vm126_vm2, %v10260_v8  ;;  %9837 = vmatmul.msk.f32.gmra.mxu1 %vm126_vm2, %v10261_v1 }
 0x294   :  { %9840 = vmatmul.msk.f32.gmra.mxu2 %vm126_vm2, %v10262_v37  ;;  %v10264_v37 = vld [vmem:[%s14587_s0 + $0x1a0] sm:$0xff] }
 0x295   :  { %9843 = vmatmul.msk.f32.gmra.mxu3 %vm126_vm2, %v10263_v33  ;;  %v12816_v33 = vld [vmem:[%s14587_s0 + $0x1d0] sm:$0xff] }
 0x297   :  { %v3810_v4 = vpop.f32.mrf.mxu2 }
 0x298   :  { %v12799_v35 = vpop.f32.mrf.mxu0  ;;  %v12802_v8 = vadd.f32 %v3810_v4, %v12447_v32  ;;  %v3840_v16 = vpop.f32.mrf.mxu3  ;;  %v10265_v32 = vld [vmem:[%s14587_s0 + $0x1b0] sm:$0xff] }
 0x299   :  { %15145 = vst [vmem:[#allocation202_spill] sm:$0xff] %v12799_v35  ;;  %v12804_v1 = vpop.f32.mrf.mxu1  ;;  %v12807_v22 = vadd.f32 %v3840_v16, %v12452_v56  ;;  %v12851_v35 = vld [vmem:[%s14587_s0 + $0x1d8] sm:$0xff] }
 0x29a   :  { %15146 = vst [vmem:[#allocation203_spill] sm:$0xff] %v12804_v1  ;;  %v10266_v1 = vld [vmem:[%s14587_s0 + $0x1a8] sm:$0xff] }
 0x29b   :  { %9845 = vmatmul.msk.f32.vlgmr.msrb.gmra.mxu0 %vm126_vm2, %v10264_v37  ;;  %9848 = vmatmul.msk.f32.vlgmr.msrb.gmra.mxu1 %vm126_vm2, %v10265_v32 }
 0x29c   :  { %9869 = vmatpush.msk.msrb.mxu0 %vm131_vm0, %v12747_v44  ;;  %9851 = vmatmul.msk.f32.vlgmr.msrb.gmra.mxu2 %vm126_vm2, %v11871_v59 }
 0x29d   :  { %9872 = vmatpush.msk.msrb.mxu1 %vm131_vm0, %v12747_v44  ;;  %9854 = vmatmul.msk.f32.vlgmr.msrb.gmra.mxu3 %vm126_vm2, %v12816_v33 }
 0x29e   :  { %9875 = vmatpush.msk.msrb.mxu2 %vm131_vm0, %v12747_v44  ;;  %9878 = vmatpush.msk.msrb.mxu3 %vm131_vm0, %v12747_v44 }
 0x29f   :  { %v3906_v56 = vpop.f32.mrf.mxu2 }
 0x2a0   :  { %v12834_v16 = vpop.f32.mrf.mxu0  ;;  %v12837_v4 = vadd.f32 %v3906_v56, %v12477_v45  ;;  %v3929_v37 = vpop.f32.mrf.mxu3  ;;  %v10267_v45 = vld [vmem:[%s14587_s0 + $0x1b8] sm:$0xff] }
 0x2a1   :  { %15147 = vst [vmem:[#allocation204_spill] sm:$0xff] %v12834_v16  ;;  %v12839_v59 = vpop.f32.mrf.mxu1  ;;  %v12842_v32 = vadd.f32 %v3929_v37, %v12482_v31  ;;  %v5050_v37 = vrot.slane %v12664_v0, 1 }
 0x2a2   :  { %15148 = vst [vmem:[#allocation205_spill] sm:$0xff] %v12839_v59 }
 0x2a3   :  { %9846 = vmatmul.msk.f32.gmra.mxu0 %vm126_vm2, %v10266_v1  ;;  %9849 = vmatmul.msk.f32.gmra.mxu1 %vm126_vm2, %v10267_v45  ;;  %v5049_v1 = vrot.slane %v12629_v23, 1 }
 0x2a4   :  { %9852 = vmatmul.msk.f32.gmra.mxu2 %vm126_vm2, %v11904_v28 }
 0x2a5   :  { %9855 = vmatmul.msk.f32.gmra.mxu3 %vm126_vm2, %v12851_v35  ;;  %v5051_v28 = vsel %vm122_vm1, %v5049_v1, %v5050_v37 }
 0x2a7   :  { %v3909_v31 = vpop.f32.mrf.mxu2 }
 0x2a8   :  { %v12861_v56 = vpop.f32.mrf.mxu0  ;;  %v12866_v59 = vadd.f32 %v3909_v31, %v12495_v46  ;;  %v3932_v16 = vpop.f32.mrf.mxu3 }
 0x2a9   :  { %15149 = vst [vmem:[#allocation206_spill] sm:$0xff] %v12861_v56  ;;  %v12868_v47 = vpop.f32.mrf.mxu1  ;;  %v12871_v45 = vadd.f32 %v3932_v16, %v12500_v13 }
 0x2aa   :  { %15150 = vst [vmem:[#allocation207_spill] sm:$0xff] %v12868_v47 }
 0x2ab   :  { %9858 = vmatmul.msk.f32.vlgmr.msra.gmra.mxu0 %vm126_vm2, %v14983_v21  ;;  %9861 = vmatmul.msk.f32.vlgmr.msra.gmra.mxu1 %vm126_vm2, %v14984_v19 }
 0x2ac   :  { %9881 = vmatpush.msk.msra.mxu0 %vm131_vm0, %v12747_v44  ;;  %9864 = vmatmul.msk.f32.vlgmr.msra.gmra.mxu2 %vm126_vm2, %v14985_v62 }
 0x2ad   :  { %9884 = vmatpush.msk.msra.mxu1 %vm131_vm0, %v12747_v44  ;;  %9867 = vmatmul.msk.f32.vlgmr.msra.gmra.mxu3 %vm126_vm2, %v14998_v39 }
 0x2ae   :  { %9887 = vmatpush.msk.msra.mxu2 %vm131_vm0, %v12747_v44  ;;  %9890 = vmatpush.msk.msra.mxu3 %vm131_vm0, %v12747_v44 }
 0x2af   :  { %v3998_v21 = vpop.f32.mrf.mxu2 }
 0x2b0   :  { %v12892_v19 = vpop.f32.mrf.mxu0  ;;  %v12895_v62 = vadd.f32 %v3998_v21, %v12529_v12  ;;  %v4021_v46 = vpop.f32.mrf.mxu3  ;;  %v15158_v21 = vld [vmem:[#allocation24_spill] sm:$0xff] }
 0x2b1   :  { %15151 = vst [vmem:[#allocation208_spill] sm:$0xff] %v12892_v19  ;;  %v12897_v13 = vpop.f32.mrf.mxu1  ;;  %v12900_v16 = vadd.f32 %v4021_v46, %v12534_v10  ;;  %v15160_v46 = vld [vmem:[#allocation91_spill] sm:$0xff]  ;;  %v5668_v19 = vrot.slane %v12629_v23, 2  ;;  %v15199_v23 = vld [vmem:[#allocation108_spill] sm:$0xff] }
 0x2b2   :  { %15152 = vst [vmem:[#allocation209_spill] sm:$0xff] %v12897_v13  ;;  %v15192_v13 = vrot.slane %v12851_v35, 1 }
 0x2b3   :  { %9859 = vmatmul.msk.f32.gmra.mxu0 %vm126_vm2, %v14991_v5  ;;  %9862 = vmatmul.msk.f32.gmra.mxu1 %vm126_vm2, %v14992_v51 }
 0x2b4   :  { %9865 = vmatmul.msk.f32.gmra.mxu2 %vm126_vm2, %v14993_v40 }
 0x2b5   :  { %9868 = vmatmul.msk.f32.gmra.mxu3 %vm126_vm2, %v15006_v50 }
 0x2b7   :  { %v4001_v39 = vpop.f32.mrf.mxu2 }
 0x2b8   :  { %v12910_v12 = vpop.f32.mrf.mxu0  ;;  %v12913_v31 = vadd.f32 %v4001_v39, %v12555_v14  ;;  %v4024_v10 = vpop.f32.mrf.mxu3 }
 0x2b9   :  { %15153 = vst [vmem:[#allocation210_spill] sm:$0xff] %v12910_v12  ;;  %v12915_v1 = vpop.f32.mrf.mxu1  ;;  %v12918_v5 = vadd.f32 %v4024_v10, %v12560_v17  ;;  %v5332_v10 = vrot.slane %v12816_v33, 1  ;;  %v15182_v12 = vld [vmem:[#allocation58_spill] sm:$0xff] }
 0x2ba   :  { %15154 = vst [vmem:[#allocation211_spill] sm:$0xff] %v12915_v1 }
 0x2bb   :  { %9870 = vmatmul.msk.f32.vlgmr.msrb.gmra.mxu0 %vm126_vm2, %v14999_v36  ;;  %9873 = vmatmul.msk.f32.vlgmr.msrb.gmra.mxu1 %vm126_vm2, %v15000_v9 }
 0x2bc   :  { %9893 = vmatpush.msk.msrb.mxu0 %vm131_vm0, %v12747_v44  ;;  %9876 = vmatmul.msk.f32.vlgmr.msrb.gmra.mxu2 %vm126_vm2, %v15001_v11 }
 0x2bd   :  { %9896 = vmatpush.msk.msrb.mxu1 %vm131_vm0, %v12747_v44  ;;  %9879 = vmatmul.msk.f32.vlgmr.msrb.gmra.mxu3 %vm126_vm2, %v15015_v43 }
 0x2be   :  { %9899 = vmatpush.msk.msrb.mxu2 %vm131_vm0, %v12747_v44  ;;  %9902 = vmatpush.msk.msrb.mxu3 %vm131_vm0, %v12747_v44 }
 0x2bf   :  { %v4090_v50 = vpop.f32.mrf.mxu2 }
 0x2c0   :  { %v12936_v36 = vpop.f32.mrf.mxu0  ;;  %v12939_v51 = vadd.f32 %v4090_v50, %v12589_v53  ;;  %v4120_v40 = vpop.f32.mrf.mxu3 }
 0x2c1   :  { %15155 = vst [vmem:[#allocation212_spill] sm:$0xff] %v12936_v36  ;;  %v12941_v9 = vpop.f32.mrf.mxu1  ;;  %v12944_v11 = vadd.f32 %v4120_v40, %v12594_v7  ;;  %v15177_v36 = vld [vmem:[#allocation53_spill] sm:$0xff] }
 0x2c2   :  { %15156 = vst [vmem:[#allocation213_spill] sm:$0xff] %v12941_v9  ;;  %v15176_v9 = vld [vmem:[#allocation51_spill] sm:$0xff] }
 0x2c3   :  { %9871 = vmatmul.msk.f32.gmra.mxu0 %vm126_vm2, %v15007_v6  ;;  %9874 = vmatmul.msk.f32.gmra.mxu1 %vm126_vm2, %v15008_v20 }
 0x2c4   :  { %9877 = vmatmul.msk.f32.gmra.mxu2 %vm126_vm2, %v15009_v15 }
 0x2c5   :  { %9880 = vmatmul.msk.f32.gmra.mxu3 %vm126_vm2, %v15021_v30  ;;  %v15157_v30 = vld [vmem:[#allocation12_spill] sm:$0xff] }
 0x2c7   :  { %v4093_v43 = vpop.f32.mrf.mxu2 }
 0x2c8   :  { %v12954_v17 = vpop.f32.mrf.mxu0  ;;  %v12957_v14 = vadd.f32 %v4093_v43, %v12615_v38  ;;  %v4123_v7 = vpop.f32.mrf.mxu3 }
 0x2c9   :  { %v12959_v53 = vpop.f32.mrf.mxu1  ;;  %v12962_v6 = vadd.f32 %v4123_v7, %v12620_v63 }
 0x2cb   :  { %9882 = vmatmul.msk.f32.vlgmr.msra.gmra.mxu0 %vm126_vm2, %v15017_v18  ;;  %9885 = vmatmul.msk.f32.vlgmr.msra.gmra.mxu1 %vm126_vm2, %v15018_v29 }
 0x2cc   :  { %9905 = vmatpush.msk.msra.mxu0 %vm131_vm0, %v12747_v44  ;;  %9888 = vmatmul.msk.f32.vlgmr.msra.gmra.mxu2 %vm126_vm2, %v15157_v30  ;;  %v15161_v30 = vld [vmem:[#allocation35_spill] sm:$0xff] }
 0x2cd   :  { %9908 = vmatpush.msk.msra.mxu1 %vm131_vm0, %v12747_v44  ;;  %9891 = vmatmul.msk.f32.vlgmr.msra.gmra.mxu3 %vm126_vm2, %v5051_v28  ;;  %v15159_v28 = vld [vmem:[#allocation25_spill] sm:$0xff] }
 0x2ce   :  { %9911 = vmatpush.msk.msra.mxu2 %vm131_vm0, %v12747_v44  ;;  %9914 = vmatpush.msk.msra.mxu3 %vm131_vm0, %v12747_v44 }
 0x2cf   :  { %v4242_v20 = vpop.f32.mrf.mxu2 }
 0x2d0   :  { %v12979_v15 = vpop.f32.mrf.mxu0  ;;  %v12982_v18 = vadd.f32 %v4242_v20, %v12650_v42  ;;  %v4265_v29 = vpop.f32.mrf.mxu3  ;;  %v15163_v20 = vld [vmem:[#allocation43_spill] sm:$0xff] }
 0x2d1   :  { %v12984_v63 = vpop.f32.mrf.mxu1  ;;  %v12987_v38 = vadd.f32 %v4265_v29, %v12655_v26  ;;  %v14776_v26 = vrot.slane %v12851_v35, 1 }
 0x2d3   :  { %9883 = vmatmul.msk.f32.gmra.mxu0 %vm126_vm2, %v15158_v21  ;;  %9886 = vmatmul.msk.f32.gmra.mxu1 %vm126_vm2, %v15159_v28 }
 0x2d4   :  { %9889 = vmatmul.msk.f32.gmra.mxu2 %vm126_vm2, %v15160_v46 }
 0x2d5   :  { %9892 = vmatmul.msk.f32.gmra.mxu3 %vm126_vm2, %v5050_v37  ;;  %v15162_v37 = vld [vmem:[#allocation36_spill] sm:$0xff] }
 0x2d7   :  { %v4245_v42 = vpop.f32.mrf.mxu2 }
 0x2d8   :  { %v12998_v39 = vpop.f32.mrf.mxu0  ;;  %v13003_v50 = vadd.f32 %v4245_v42, %v12677_v48  ;;  %v4268_v40 = vpop.f32.mrf.mxu3  ;;  %v15164_v48 = vld [vmem:[#allocation44_spill] sm:$0xff] }
 0x2d9   :  { %v13005_v43 = vpop.f32.mrf.mxu1  ;;  %v13008_v7 = vadd.f32 %v4268_v40, %v12682_v2  ;;  %v5334_v2 = vsel %vm122_vm1, %v5332_v10, %v14776_v26  ;;  %v15165_v40 = vld [vmem:[#allocation32_spill] sm:$0xff]  ;;  %v15174_v26 = vld [vmem:[#allocation41_spill] sm:$0xff] }
 0x2db   :  { %9894 = vmatmul.msk.f32.vlgmr.msrb.gmra.mxu0 %vm126_vm2, %v15161_v30  ;;  %9897 = vmatmul.msk.f32.vlgmr.msrb.gmra.mxu1 %vm126_vm2, %v15162_v37  ;;  %v15166_v30 = vld [vmem:[#allocation33_spill] sm:$0xff]  ;;  %v15167_v37 = vld [vmem:[#allocation38_spill] sm:$0xff] }
 0x2dc   :  { %9917 = vmatpush.msk.msrb.mxu0 %vm131_vm0, %v12747_v44  ;;  %9900 = vmatmul.msk.f32.vlgmr.msrb.gmra.mxu2 %vm126_vm2, %v15163_v20 }
 0x2dd   :  { %9920 = vmatpush.msk.msrb.mxu1 %vm131_vm0, %v12747_v44  ;;  %9903 = vmatmul.msk.f32.vlgmr.msrb.gmra.mxu3 %vm126_vm2, %v15164_v48 }
 0x2de   :  { %9923 = vmatpush.msk.msrb.mxu2 %vm131_vm0, %v12747_v44  ;;  %9926 = vmatpush.msk.msrb.mxu3 %vm131_vm0, %v12747_v44  ;;  %v15168_v44 = vld [vmem:[#allocation40_spill] sm:$0xff] }
 0x2df   :  { %v4334_v29 = vpop.f32.mrf.mxu2 }
 0x2e0   :  { %v13029_v21 = vpop.f32.mrf.mxu0  ;;  %v13032_v28 = vadd.f32 %v4334_v29, %v12711_v61  ;;  %v4357_v46 = vpop.f32.mrf.mxu3 }
 0x2e1   :  { %v13034_v42 = vpop.f32.mrf.mxu1  ;;  %v13037_v10 = vadd.f32 %v4357_v46, %v12716_v24 }
 0x2e3   :  { %9895 = vmatmul.msk.f32.gmra.mxu0 %vm126_vm2, %v15165_v40  ;;  %9898 = vmatmul.msk.f32.gmra.mxu1 %vm126_vm2, %v15166_v30  ;;  %v13060_v40 = vld [vmem:[%s14588_s1 + $0x20] sm:$0x7]  ;;  %v15169_v30 = vld [vmem:[#allocation45_spill] sm:$0xff] }
 0x2e4   :  { %9901 = vmatmul.msk.f32.gmra.mxu2 %vm126_vm2, %v15167_v37  ;;  %v15170_v37 = vld [vmem:[#allocation46_spill] sm:$0xff] }
 0x2e5   :  { %9904 = vmatmul.msk.f32.gmra.mxu3 %vm126_vm2, %v15168_v44 }
 0x2e7   :  { %v4337_v61 = vpop.f32.mrf.mxu2 }
 0x2e8   :  { %v13047_v20 = vpop.f32.mrf.mxu0  ;;  %v13050_v48 = vadd.f32 %v4337_v61, %v12737_v3  ;;  %v4360_v24 = vpop.f32.mrf.mxu3  ;;  %v15171_v3 = vld [vmem:[#allocation56_spill] sm:$0xff] }
 0x2e9   :  { %v13052_v29 = vpop.f32.mrf.mxu1  ;;  %v13055_v46 = vadd.f32 %v4360_v24, %v12742_v57  ;;  %v15172_v57 = vld [vmem:[#allocation57_spill] sm:$0xff] }
 0x2eb   :  { %9906 = vmatmul.msk.f32.vlgmr.msra.gmra.mxu0 %vm126_vm2, %v15169_v30  ;;  %9909 = vmatmul.msk.f32.vlgmr.msra.gmra.mxu1 %vm126_vm2, %v15170_v37 }
 0x2ec   :  { %9930 = vmatpush.msk.msra.mxu0 %vm131_vm0, %v13060_v40  ;;  %9912 = vmatmul.msk.f32.vlgmr.msra.gmra.mxu2 %vm126_vm2, %v15171_v3 }
 0x2ed   :  { %9933 = vmatpush.msk.msra.mxu1 %vm131_vm0, %v13060_v40  ;;  %9915 = vmatmul.msk.f32.vlgmr.msra.gmra.mxu3 %vm126_vm2, %v15172_v57  ;;  %v15175_v57 = vld [vmem:[#allocation42_spill] sm:$0xff] }
 0x2ee   :  { %9936 = vmatpush.msk.msra.mxu2 %vm131_vm0, %v13060_v40  ;;  %9939 = vmatpush.msk.msra.mxu3 %vm131_vm0, %v13060_v40 }
 0x2ef   :  { %v4426_v44 = vpop.f32.mrf.mxu2 }
 0x2f0   :  { %v13078_v61 = vpop.f32.mrf.mxu0  ;;  %v13081_v24 = vadd.f32 %v4426_v44, %v12776_v52  ;;  %v4455_v30 = vpop.f32.mrf.mxu3 }
 0x2f1   :  { %v13083_v37 = vpop.f32.mrf.mxu1  ;;  %v13086_v3 = vadd.f32 %v4455_v30, %v12781_v60 }
 0x2f3   :  { %15173 = vst [vmem:[#allocation12_spill] sm:$0xff] %v13086_v3  ;;  %9907 = vmatmul.msk.f32.gmra.mxu0 %vm126_vm2, %v15174_v26  ;;  %9910 = vmatmul.msk.f32.gmra.mxu1 %vm126_vm2, %v15175_v57  ;;  %v15183_v57 = vld [vmem:[#allocation59_spill] sm:$0xff]  ;;  %v15291_v3 = vld [vmem:[#allocation34_spill] sm:$0xff] }
 0x2f4   :  { %9913 = vmatmul.msk.f32.gmra.mxu2 %vm126_vm2, %v15176_v9 }
 0x2f5   :  { %9916 = vmatmul.msk.f32.gmra.mxu3 %vm126_vm2, %v15177_v36  ;;  %v15184_v36 = vld [vmem:[#allocation26_spill] sm:$0xff] }
 0x2f7   :  { %v4429_v52 = vpop.f32.mrf.mxu2 }
 0x2f8   :  { %v13096_v44 = vpop.f32.mrf.mxu0  ;;  %v13099_v1 = vadd.f32 %v4429_v52, %v12802_v8  ;;  %v4458_v60 = vpop.f32.mrf.mxu3 }
 0x2f9   :  { %15178 = vst [vmem:[#allocation24_spill] sm:$0xff] %v13096_v44  ;;  %v13101_v30 = vpop.f32.mrf.mxu1  ;;  %v13104_v26 = vadd.f32 %v4458_v60, %v12807_v22  ;;  %v15282_v44 = vld [vmem:[#allocation62_spill] sm:$0xff] }
 0x2fa   :  { %15179 = vst [vmem:[#allocation25_spill] sm:$0xff] %v13099_v1  ;;  %v15288_v1 = vld [vmem:[#allocation174_spill] sm:$0xff] }
 0x2fb   :  { %15180 = vst [vmem:[#allocation91_spill] sm:$0xff] %v13101_v30  ;;  %9918 = vmatmul.msk.f32.vlgmr.msrb.gmra.mxu0 %vm126_vm2, %v15182_v12  ;;  %9921 = vmatmul.msk.f32.vlgmr.msrb.gmra.mxu1 %vm126_vm2, %v15183_v57  ;;  %v15189_v57 = vld [vmem:[#allocation54_spill] sm:$0xff]  ;;  %v15281_v30 = vld [vmem:[#allocation173_spill] sm:$0xff] }
 0x2fc   :  { %15181 = vst [vmem:[#allocation35_spill] sm:$0xff] %v13104_v26  ;;  %9942 = vmatpush.msk.msrb.mxu0 %vm131_vm0, %v13060_v40  ;;  %9924 = vmatmul.msk.f32.vlgmr.msrb.gmra.mxu2 %vm126_vm2, %v15184_v36  ;;  %v15191_v36 = vld [vmem:[#allocation19_spill] sm:$0xff] }
 0x2fd   :  { %9945 = vmatpush.msk.msrb.mxu1 %vm131_vm0, %v13060_v40  ;;  %9927 = vmatmul.msk.f32.vlgmr.msrb.gmra.mxu3 %vm126_vm2, %v5334_v2  ;;  %v15190_v2 = vld [vmem:[#allocation55_spill] sm:$0xff] }
 0x2fe   :  { %9948 = vmatpush.msk.msrb.mxu2 %vm131_vm0, %v13060_v40  ;;  %9951 = vmatpush.msk.msrb.mxu3 %vm131_vm0, %v13060_v40  ;;  %v15284_v26 = vld [vmem:[#allocation63_spill] sm:$0xff] }
 0x2ff   :  { %v4524_v22 = vpop.f32.mrf.mxu2 }
 0x300   :  { %v13121_v8 = vpop.f32.mrf.mxu0  ;;  %v13124_v12 = vadd.f32 %v4524_v22, %v12837_v4  ;;  %v4547_v9 = vpop.f32.mrf.mxu3 }
 0x301   :  { %15185 = vst [vmem:[#allocation36_spill] sm:$0xff] %v13121_v8  ;;  %v13126_v52 = vpop.f32.mrf.mxu1  ;;  %v13129_v60 = vadd.f32 %v4547_v9, %v12842_v32  ;;  %v14777_v32 = vrot.slane %v12664_v0, 2 }
 0x302   :  { %15186 = vst [vmem:[#allocation43_spill] sm:$0xff] %v13124_v12  ;;  %v15257_v12 = vld [vmem:[#allocation155_spill] sm:$0xff] }
 0x303   :  { %15187 = vst [vmem:[#allocation44_spill] sm:$0xff] %v13126_v52  ;;  %9919 = vmatmul.msk.f32.gmra.mxu0 %vm126_vm2, %v15189_v57  ;;  %9922 = vmatmul.msk.f32.gmra.mxu1 %vm126_vm2, %v15190_v2 }
 0x304   :  { %15188 = vst [vmem:[#allocation32_spill] sm:$0xff] %v13129_v60  ;;  %9925 = vmatmul.msk.f32.gmra.mxu2 %vm126_vm2, %v15191_v36  ;;  %v15197_v36 = vld [vmem:[#allocation96_spill] sm:$0xff] }
 0x305   :  { %9928 = vmatmul.msk.f32.gmra.mxu3 %vm126_vm2, %v15192_v13  ;;  %v15198_v13 = vld [vmem:[#allocation97_spill] sm:$0xff] }
 0x307   :  { %v4527_v4 = vpop.f32.mrf.mxu2 }
 0x308   :  { %v13140_v22 = vpop.f32.mrf.mxu0  ;;  %v13145_v9 = vadd.f32 %v4527_v4, %v12866_v59  ;;  %v4550_v57 = vpop.f32.mrf.mxu3  ;;  %v5670_v59 = vsel %vm1547_vm3, %v5668_v19, %v14777_v32  ;;  %v15205_v32 = vld [vmem:[#allocation89_spill] sm:$0xff] }
 0x309   :  { %15193 = vst [vmem:[#allocation33_spill] sm:$0xff] %v13140_v22  ;;  %v13147_v47 = vpop.f32.mrf.mxu1  ;;  %v13150_v2 = vadd.f32 %v4550_v57, %v12871_v45  ;;  %v15200_v45 = vld [vmem:[#allocation111_spill] sm:$0xff] }
 0x30a   :  { %15194 = vst [vmem:[#allocation38_spill] sm:$0xff] %v13145_v9  ;;  %v15208_v22 = vld [vmem:[#allocation103_spill] sm:$0xff]  ;;  %v15246_v9 = vld [vmem:[#allocation144_spill] sm:$0xff] }
 0x30b   :  { %15195 = vst [vmem:[#allocation40_spill] sm:$0xff] %v13147_v47  ;;  %9931 = vmatmul.msk.f32.vlgmr.msra.gmra.mxu0 %vm126_vm2, %v15197_v36  ;;  %9934 = vmatmul.msk.f32.vlgmr.msra.gmra.mxu1 %vm126_vm2, %v15198_v13  ;;  %v15207_v47 = vld [vmem:[#allocation102_spill] sm:$0xff] }
 0x30c   :  { %15196 = vst [vmem:[#allocation45_spill] sm:$0xff] %v13150_v2  ;;  %9954 = vmatpush.msk.msra.mxu0 %vm131_vm0, %v13060_v40  ;;  %9937 = vmatmul.msk.f32.vlgmr.msra.gmra.mxu2 %vm126_vm2, %v15199_v23 }
 0x30d   :  { %9957 = vmatpush.msk.msra.mxu1 %vm131_vm0, %v13060_v40  ;;  %9940 = vmatmul.msk.f32.vlgmr.msra.gmra.mxu3 %vm126_vm2, %v15200_v45  ;;  %v15206_v45 = vld [vmem:[#allocation90_spill] sm:$0xff] }
 0x30e   :  { %9960 = vmatpush.msk.msra.mxu2 %vm131_vm0, %v13060_v40  ;;  %9963 = vmatpush.msk.msra.mxu3 %vm131_vm0, %v13060_v40 }
 0x30f   :  { %v4616_v4 = vpop.f32.mrf.mxu2 }
 0x310   :  { %v13171_v57 = vpop.f32.mrf.mxu0  ;;  %v13174_v36 = vadd.f32 %v4616_v4, %v12895_v62  ;;  %v4639_v13 = vpop.f32.mrf.mxu3 }
 0x311   :  { %15201 = vst [vmem:[#allocation46_spill] sm:$0xff] %v13171_v57  ;;  %v13176_v23 = vpop.f32.mrf.mxu1  ;;  %v13179_v19 = vadd.f32 %v4639_v13, %v12900_v16 }
 0x312   :  { %15202 = vst [vmem:[#allocation56_spill] sm:$0xff] %v13174_v36 }
 0x313   :  { %15203 = vst [vmem:[#allocation57_spill] sm:$0xff] %v13176_v23  ;;  %9932 = vmatmul.msk.f32.gmra.mxu0 %vm126_vm2, %v15205_v32  ;;  %9935 = vmatmul.msk.f32.gmra.mxu1 %vm126_vm2, %v15206_v45  ;;  %v15214_v45 = vld [vmem:[#allocation113_spill] sm:$0xff]  ;;  %v15239_v23 = vld [vmem:[#allocation150_spill] sm:$0xff] }
 0x314   :  { %15204 = vst [vmem:[#allocation41_spill] sm:$0xff] %v13179_v19  ;;  %9938 = vmatmul.msk.f32.gmra.mxu2 %vm126_vm2, %v15207_v47  ;;  %v15213_v19 = vld [vmem:[#allocation112_spill] sm:$0xff] }
 0x315   :  { %9941 = vmatmul.msk.f32.gmra.mxu3 %vm126_vm2, %v15208_v22  ;;  %v15215_v47 = vld [vmem:[#allocation124_spill] sm:$0xff] }
 0x317   :  { %v4619_v62 = vpop.f32.mrf.mxu2 }
 0x318   :  { %v13189_v4 = vpop.f32.mrf.mxu0  ;;  %v13192_v36 = vadd.f32 %v4619_v62, %v12913_v31  ;;  %v4642_v16 = vpop.f32.mrf.mxu3 }
 0x319   :  { %15209 = vst [vmem:[#allocation42_spill] sm:$0xff] %v13189_v4  ;;  %v13194_v13 = vpop.f32.mrf.mxu1  ;;  %v13197_v32 = vadd.f32 %v4642_v16, %v12918_v5 }
 0x31a   :  { %15210 = vst [vmem:[#allocation51_spill] sm:$0xff] %v13192_v36 }
 0x31b   :  { %15211 = vst [vmem:[#allocation53_spill] sm:$0xff] %v13194_v13  ;;  %9943 = vmatmul.msk.f32.vlgmr.msrb.gmra.mxu0 %vm126_vm2, %v15213_v19  ;;  %9946 = vmatmul.msk.f32.vlgmr.msrb.gmra.mxu1 %vm126_vm2, %v15214_v45  ;;  %v15220_v45 = vld [vmem:[#allocation104_spill] sm:$0xff]  ;;  %v15223_v13 = vld [vmem:[#allocation119_spill] sm:$0xff] }
 0x31c   :  { %15212 = vst [vmem:[#allocation58_spill] sm:$0xff] %v13197_v32  ;;  %9966 = vmatpush.msk.msrb.mxu0 %vm131_vm0, %v13060_v40  ;;  %9949 = vmatmul.msk.f32.vlgmr.msrb.gmra.mxu2 %vm126_vm2, %v15215_v47  ;;  %v15222_v47 = vld [vmem:[#allocation118_spill] sm:$0xff] }
 0x31d   :  { %9969 = vmatpush.msk.msrb.mxu1 %vm131_vm0, %v13060_v40  ;;  %9952 = vmatmul.msk.f32.vlgmr.msrb.gmra.mxu3 %vm126_vm2, %v15087_v41  ;;  %v15221_v41 = vld [vmem:[#allocation105_spill] sm:$0xff] }
 0x31e   :  { %9972 = vmatpush.msk.msrb.mxu2 %vm131_vm0, %v13060_v40  ;;  %9975 = vmatpush.msk.msrb.mxu3 %vm131_vm0, %v13060_v40 }
 0x31f   :  { %v4708_v31 = vpop.f32.mrf.mxu2 }
 0x320   :  { %v13215_v5 = vpop.f32.mrf.mxu0  ;;  %v13218_v22 = vadd.f32 %v4708_v31, %v12939_v51  ;;  %v4737_v19 = vpop.f32.mrf.mxu3 }
 0x321   :  { %15216 = vst [vmem:[#allocation59_spill] sm:$0xff] %v13215_v5  ;;  %v13220_v62 = vpop.f32.mrf.mxu1  ;;  %v13223_v16 = vadd.f32 %v4737_v19, %v12944_v11  ;;  %v15238_v5 = vld [vmem:[#allocation143_spill] sm:$0xff] }
 0x322   :  { %15217 = vst [vmem:[#allocation26_spill] sm:$0xff] %v13218_v22 }
 0x323   :  { %15218 = vst [vmem:[#allocation54_spill] sm:$0xff] %v13220_v62  ;;  %9944 = vmatmul.msk.f32.gmra.mxu0 %vm126_vm2, %v15220_v45  ;;  %9947 = vmatmul.msk.f32.gmra.mxu1 %vm126_vm2, %v15221_v41  ;;  %v15227_v41 = vld [vmem:[#allocation129_spill] sm:$0xff] }
 0x324   :  { %15219 = vst [vmem:[#allocation55_spill] sm:$0xff] %v13223_v16  ;;  %9950 = vmatmul.msk.f32.gmra.mxu2 %vm126_vm2, %v15222_v47  ;;  %v15226_v16 = vld [vmem:[#allocation128_spill] sm:$0xff] }
 0x325   :  { %9953 = vmatmul.msk.f32.gmra.mxu3 %vm126_vm2, %v15223_v13  ;;  %v15228_v13 = vld [vmem:[#allocation31_spill] sm:$0xff] }
 0x327   :  { %v4711_v51 = vpop.f32.mrf.mxu2 }
 0x328   :  { %v13233_v31 = vpop.f32.mrf.mxu0  ;;  %v13236_v22 = vadd.f32 %v4711_v51, %v12957_v14  ;;  %v4740_v11 = vpop.f32.mrf.mxu3  ;;  %v15229_v51 = vld [vmem:[#allocation120_spill] sm:$0xff] }
 0x329   :  { %v13238_v19 = vpop.f32.mrf.mxu1  ;;  %v13241_v45 = vadd.f32 %v4740_v11, %v12962_v6  ;;  %v15231_v11 = vrot.slane %v12664_v0, 2  ;;  %v15234_v0 = vld [vmem:[#allocation147_spill] sm:$0xff] }
 0x32a   :  { %15224 = vst [vmem:[#allocation19_spill] sm:$0xff] %v13236_v22  ;;  %v5952_v22 = vrot.slane %v12851_v35, 2 }
 0x32b   :  { %15225 = vst [vmem:[#allocation96_spill] sm:$0xff] %v13241_v45  ;;  %9955 = vmatmul.msk.f32.vlgmr.msra.gmra.mxu0 %vm126_vm2, %v15226_v16  ;;  %9958 = vmatmul.msk.f32.vlgmr.msra.gmra.mxu1 %vm126_vm2, %v15227_v41  ;;  %v5951_v45 = vrot.slane %v12816_v33, 2 }
 0x32c   :  { %9978 = vmatpush.msk.msra.mxu0 %vm131_vm0, %v13060_v40  ;;  %9961 = vmatmul.msk.f32.vlgmr.msra.gmra.mxu2 %vm126_vm2, %v15228_v13 }
 0x32d   :  { %9981 = vmatpush.msk.msra.mxu1 %vm131_vm0, %v13060_v40  ;;  %9964 = vmatmul.msk.f32.vlgmr.msra.gmra.mxu3 %vm126_vm2, %v5670_v59  ;;  %v15230_v59 = vld [vmem:[#allocation29_spill] sm:$0xff]  ;;  %v5953_v35 = vsel %vm1547_vm3, %v5951_v45, %v5952_v22  ;;  %v15236_v45 = vld [vmem:[#allocation134_spill] sm:$0xff] }
 0x32e   :  { %9984 = vmatpush.msk.msra.mxu2 %vm131_vm0, %v13060_v40  ;;  %9987 = vmatpush.msk.msra.mxu3 %vm131_vm0, %v13060_v40 }
 0x32f   :  { %v13258_v14 = vpop.f32.mrf.mxu2 }
 0x330   :  { %v13260_v6 = vpop.f32.mrf.mxu0  ;;  %v13262_v16 = vpop.f32.mrf.mxu3 }
 0x331   :  { %v13264_v47 = vpop.f32.mrf.mxu1 }
 0x333   :  { %9956 = vmatmul.msk.f32.gmra.mxu0 %vm126_vm2, %v15229_v51  ;;  %9959 = vmatmul.msk.f32.gmra.mxu1 %vm126_vm2, %v15095_v58  ;;  %v15232_v58 = vld [vmem:[#allocation138_spill] sm:$0xff] }
 0x334   :  { %9962 = vmatmul.msk.f32.gmra.mxu2 %vm126_vm2, %v15230_v59  ;;  %v15233_v59 = vld [vmem:[#allocation139_spill] sm:$0xff] }
 0x335   :  { %9965 = vmatmul.msk.f32.gmra.mxu3 %vm126_vm2, %v15231_v11 }
 0x337   :  { %v13275_v41 = vpop.f32.mrf.mxu2 }
 0x338   :  { %v13277_v13 = vpop.f32.mrf.mxu0  ;;  %v13281_v62 = vpop.f32.mrf.mxu3 }
 0x339   :  { %v13283_v51 = vpop.f32.mrf.mxu1 }
 0x33b   :  { %9967 = vmatmul.msk.f32.vlgmr.msrb.gmra.mxu0 %vm126_vm2, %v15232_v58  ;;  %9970 = vmatmul.msk.f32.vlgmr.msrb.gmra.mxu1 %vm126_vm2, %v15233_v59 }
 0x33c   :  { %9990 = vmatpush.msk.msrb.mxu0 %vm131_vm0, %v13060_v40  ;;  %9973 = vmatmul.msk.f32.vlgmr.msrb.gmra.mxu2 %vm126_vm2, %v15234_v0  ;;  %v15235_v0 = vld [vmem:[#allocation133_spill] sm:$0xff] }
 0x33d   :  { %9993 = vmatpush.msk.msrb.mxu1 %vm131_vm0, %v13060_v40  ;;  %9976 = vmatmul.msk.f32.vlgmr.msrb.gmra.mxu3 %vm126_vm2, %v15110_v27  ;;  %v15237_v27 = vld [vmem:[#allocation142_spill] sm:$0xff] }
 0x33e   :  { %9996 = vmatpush.msk.msrb.mxu2 %vm131_vm0, %v13060_v40  ;;  %9999 = vmatpush.msk.msrb.mxu3 %vm131_vm0, %v13060_v40 }
 0x33f   :  { %v13302_v33 = vpop.f32.mrf.mxu2 }
 0x340   :  { %v13304_v11 = vpop.f32.mrf.mxu0  ;;  %v13306_v58 = vpop.f32.mrf.mxu3 }
 0x341   :  { %v13308_v59 = vpop.f32.mrf.mxu1 }
 0x343   :  { %9968 = vmatmul.msk.f32.gmra.mxu0 %vm126_vm2, %v15235_v0  ;;  %9971 = vmatmul.msk.f32.gmra.mxu1 %vm126_vm2, %v15236_v45  ;;  %v15240_v0 = vld [vmem:[#allocation151_spill] sm:$0xff]  ;;  %v15241_v45 = vld [vmem:[#allocation158_spill] sm:$0xff] }
 0x344   :  { %9974 = vmatmul.msk.f32.gmra.mxu2 %vm126_vm2, %v15237_v27 }
 0x345   :  { %9977 = vmatmul.msk.f32.gmra.mxu3 %vm126_vm2, %v15238_v5 }
 0x347   :  { %v13318_v40 = vpop.f32.mrf.mxu2 }
 0x348   :  { %v13320_v4 = vpop.f32.mrf.mxu0  ;;  %v13322_v32 = vpop.f32.mrf.mxu3 }
 0x349   :  { %v13324_v36 = vpop.f32.mrf.mxu1 }
 0x34b   :  { %9979 = vmatmul.msk.f32.vlgmr.msra.gmra.mxu0 %vm126_vm2, %v15239_v23  ;;  %9982 = vmatmul.msk.f32.vlgmr.msra.gmra.mxu1 %vm126_vm2, %v15240_v0  ;;  %v15247_v23 = vld [vmem:[#allocation145_spill] sm:$0xff]  ;;  %v15248_v0 = vld [vmem:[#allocation154_spill] sm:$0xff] }
 0x34c   :  { %9985 = vmatmul.msk.f32.vlgmr.msra.gmra.mxu2 %vm126_vm2, %v15241_v45 }
 0x34d   :  { %9988 = vmatmul.msk.f32.vlgmr.msra.gmra.mxu3 %vm126_vm2, %v11577_v34 }
 0x34f   :  { %v13334_v5 = vpop.f32.mrf.mxu2 }
 0x350   :  { %15242 = vst [vmem:[#allocation97_spill] sm:$0xff] %v13334_v5  ;;  %v13336_v27 = vpop.f32.mrf.mxu0  ;;  %v13338_v57 = vpop.f32.mrf.mxu3  ;;  %v15295_v5 = vld [vmem:[#allocation191_spill] sm:$0xff] }
 0x351   :  { %15243 = vst [vmem:[#allocation108_spill] sm:$0xff] %v13336_v27  ;;  %v13340_v2 = vpop.f32.mrf.mxu1 }
 0x352   :  { %15244 = vst [vmem:[#allocation111_spill] sm:$0xff] %v13338_v57  ;;  %v15290_v57 = vld [vmem:[#allocation23_spill] sm:$0xff] }
 0x353   :  { %15245 = vst [vmem:[#allocation89_spill] sm:$0xff] %v13340_v2  ;;  %9980 = vmatmul.msk.f32.gmra.mxu0 %vm126_vm2, %v15246_v9  ;;  %9983 = vmatmul.msk.f32.gmra.mxu1 %vm126_vm2, %v15247_v23  ;;  %v15289_v2 = vld [vmem:[#allocation175_spill] sm:$0xff] }
 0x354   :  { %9986 = vmatmul.msk.f32.gmra.mxu2 %vm126_vm2, %v15248_v0 }
 0x355   :  { %9989 = vmatmul.msk.f32.gmra.mxu3 %vm126_vm2, %v11551_v55 }
 0x357   :  { %v13350_v34 = vpop.f32.mrf.mxu2 }
 0x358   :  { %15249 = vst [vmem:[#allocation90_spill] sm:$0xff] %v13350_v34  ;;  %v13352_v45 = vpop.f32.mrf.mxu0  ;;  %v13354_v56 = vpop.f32.mrf.mxu3  ;;  %v15286_v34 = vld [vmem:[#allocation93_spill] sm:$0xff] }
 0x359   :  { %15250 = vst [vmem:[#allocation102_spill] sm:$0xff] %v13352_v45  ;;  %v13356_v60 = vpop.f32.mrf.mxu1 }
 0x35a   :  { %15251 = vst [vmem:[#allocation103_spill] sm:$0xff] %v13354_v56 }
 0x35b   :  { %15252 = vst [vmem:[#allocation112_spill] sm:$0xff] %v13356_v60  ;;  %9991 = vmatmul.msk.f32.vlgmr.msrb.gmra.mxu0 %vm126_vm2, %v15121_v49  ;;  %9994 = vmatmul.msk.f32.vlgmr.msrb.gmra.mxu1 %vm126_vm2, %v15122_v25  ;;  %v15258_v49 = vld [vmem:[#allocation156_spill] sm:$0xff]  ;;  %v15259_v25 = vld [vmem:[#allocation179_spill] sm:$0xff]  ;;  %v15275_v60 = vld [vmem:[#allocation126_spill] sm:$0xff] }
 0x35c   :  { %9997 = vmatmul.msk.f32.vlgmr.msrb.gmra.mxu2 %vm126_vm2, %v12458_v54 }
 0x35d   :  { %10000 = vmatmul.msk.f32.vlgmr.msrb.gmra.mxu3 %vm126_vm2, %v5953_v35 }
 0x35f   :  { %v13365_v55 = vpop.f32.mrf.mxu2 }
 0x360   :  { %15253 = vst [vmem:[#allocation113_spill] sm:$0xff] %v13365_v55  ;;  %v13367_v9 = vpop.f32.mrf.mxu0  ;;  %v13369_v23 = vpop.f32.mrf.mxu3 }
 0x361   :  { %15254 = vst [vmem:[#allocation124_spill] sm:$0xff] %v13367_v9  ;;  %v13371_v0 = vpop.f32.mrf.mxu1 }
 0x362   :  { %15255 = vst [vmem:[#allocation104_spill] sm:$0xff] %v13369_v23 }
 0x363   :  { %15256 = vst [vmem:[#allocation105_spill] sm:$0xff] %v13371_v0  ;;  %9992 = vmatmul.msk.f32.gmra.mxu0 %vm126_vm2, %v15257_v12  ;;  %9995 = vmatmul.msk.f32.gmra.mxu1 %vm126_vm2, %v15258_v49 }
 0x364   :  { %9998 = vmatmul.msk.f32.gmra.mxu2 %vm126_vm2, %v15259_v25 }
 0x365   :  { %10001 = vmatmul.msk.f32.gmra.mxu3 %vm126_vm2, %v5952_v22 }
 0x367   :  { %v13380_v54 = vpop.f32.mrf.mxu2 }
 0x368   :  { %15260 = vst [vmem:[#allocation118_spill] sm:$0xff] %v13380_v54  ;;  %v13382_v35 = vpop.f32.mrf.mxu0  ;;  %v13384_v9 = vpop.f32.mrf.mxu3 }
 0x369   :  { %15261 = vst [vmem:[#allocation119_spill] sm:$0xff] %v13382_v35  ;;  %v13386_v23 = vpop.f32.mrf.mxu1  ;;  %v15272_v35 = vld [vmem:[#allocation60_spill] sm:$0xff] }
 0x36a   :  { %15262 = vst [vmem:[#allocation128_spill] sm:$0xff] %v13384_v9  ;;  %v15273_v9 = vld [vmem:[#allocation123_spill] sm:$0xff] }
 0x36b   :  { %15263 = vst [vmem:[#allocation129_spill] sm:$0xff] %v13386_v23  ;;  %v919_v8 = vadd.f32 %v15273_v9, %v15272_v35  ;;  %v15274_v23 = vld [vmem:[#allocation61_spill] sm:$0xff]  ;;  %v15285_v9 = vld [vmem:[#allocation131_spill] sm:$0xff] }
 0x36c   :  { %v949_v35 = vadd.f32 %v15285_v9, %v15284_v26 }
 0x36f   :  { %v13388_v0 = vpop.f32.mrf.mxu2 }
 0x370   :  { %15264 = vst [vmem:[#allocation31_spill] sm:$0xff] %v13388_v0  ;;  %v13390_v55 = vpop.f32.mrf.mxu0  ;;  %v13392_v12 = vpop.f32.mrf.mxu3  ;;  %v946_v0 = vadd.f32 %v15275_v60, %v15274_v23  ;;  %v15287_v23 = vld [vmem:[#allocation10_spill] sm:$0xff] }
 0x371   :  { %15265 = vst [vmem:[#allocation120_spill] sm:$0xff] %v13390_v55  ;;  %v13394_v49 = vpop.f32.mrf.mxu1 }
 0x372   :  { %15266 = vst [vmem:[#allocation29_spill] sm:$0xff] %v13392_v12 }
 0x373   :  { %15267 = vst [vmem:[#allocation138_spill] sm:$0xff] %v13394_v49 }
 0x377   :  { %v13396_v52 = vpop.f32.mrf.mxu2 }
 0x378   :  { %15268 = vst [vmem:[#allocation139_spill] sm:$0xff] %v13396_v52  ;;  %v13398_v25 = vpop.f32.mrf.mxu0  ;;  %v13400_v22 = vpop.f32.mrf.mxu3  ;;  %v15280_v52 = vld [vmem:[#allocation172_spill] sm:$0xff] }
 0x379   :  { %15269 = vst [vmem:[#allocation147_spill] sm:$0xff] %v13398_v25  ;;  %v13402_v54 = vpop.f32.mrf.mxu1  ;;  %v2271_v25 = vadd.f32 %v15280_v52, %v919_v8  ;;  %v15292_v52 = vld [vmem:[#allocation13_spill] sm:$0xff] }
 0x37a   :  { %15270 = vst [vmem:[#allocation133_spill] sm:$0xff] %v13400_v22  ;;  %v2273_v22 = vadd.f32 %v15281_v30, %v946_v0  ;;  %v15293_v0 = vld [vmem:[#allocation18_spill] sm:$0xff] }
 0x37b   :  { %15271 = vst [vmem:[#allocation134_spill] sm:$0xff] %v13402_v54  ;;  %v15283_v54 = vld [vmem:[#allocation130_spill] sm:$0xff]  ;;  %v2888_v60 = vadd.f32 %v15286_v34, %v2271_v25  ;;  %v15296_v25 = vld [vmem:[#allocation95_spill] sm:$0xff] }
 0x37c   :  { %v922_v56 = vadd.f32 %v15283_v54, %v15282_v44  ;;  %v15294_v44 = vld [vmem:[#allocation190_spill] sm:$0xff] }
 0x37f   :  { %v13408_v45 = vpop.f32.mrf.mxu2 }
 0x380   :  { %15276 = vst [vmem:[#allocation142_spill] sm:$0xff] %v13408_v45  ;;  %v13410_v55 = vpop.f32.mrf.mxu0  ;;  %v13412_v12 = vpop.f32.mrf.mxu3  ;;  %v2890_v45 = vadd.f32 %v15287_v23, %v2273_v22 }
 0x381   :  { %15277 = vst [vmem:[#allocation143_spill] sm:$0xff] %v13410_v55  ;;  %v13414_v49 = vpop.f32.mrf.mxu1  ;;  %v2272_v55 = vadd.f32 %v15288_v1, %v922_v56 }
 0x382   :  { %15278 = vst [vmem:[#allocation150_spill] sm:$0xff] %v13412_v12  ;;  %v2274_v12 = vadd.f32 %v15289_v2, %v949_v35  ;;  %v3509_v8 = vadd.f32 %v15291_v3, %v2890_v45  ;;  %v15297_v2 = vld [vmem:[#allocation88_spill] sm:$0xff]  ;;  %v15299_v35 = vld [vmem:[#allocation193_spill] sm:$0xff] }
 0x383   :  { %15279 = vst [vmem:[#allocation151_spill] sm:$0xff] %v13414_v49  ;;  %v3507_v49 = vadd.f32 %v15290_v57, %v2888_v60  ;;  %v2889_v30 = vadd.f32 %v15292_v52, %v2272_v55  ;;  %v15298_v55 = vld [vmem:[#allocation192_spill] sm:$0xff] }
 0x384   :  { %v2891_v27 = vadd.f32 %v15293_v0, %v2274_v12  ;;  %v4128_v26 = vadd.f32 %v15295_v5, %v3509_v8 }
 0x385   :  { %v4126_v54 = vadd.f32 %v15294_v44, %v3507_v49  ;;  %v3508_v22 = vadd.f32 %v15296_v25, %v2889_v30  ;;  %v15301_v30 = vld [vmem:[#allocation135_spill] sm:$0xff] }
 0x386   :  { %v3510_v57 = vadd.f32 %v15297_v2, %v2891_v27  ;;  %v4745_v45 = vadd.f32 %v12959_v53, %v4128_v26  ;;  %v13449_v27 = vld [vmem:[%s14589_s2] ss:$0 sm:$0xff]  ;;  %v15300_v53 = vld [vmem:[#allocation65_spill] sm:$0xff] }
 0x387   :  { %v13432_v9 = vpop.f32.mrf.mxu2  ;;  %v4743_v3 = vadd.f32 %v12954_v17, %v4126_v54  ;;  %v4127_v12 = vadd.f32 %v15298_v55, %v3508_v22  ;;  %v1027_v0 = vadd.f32 %v15301_v30, %v15300_v53  ;;  %v15302_v44 = vld [vmem:[#allocation67_spill] sm:$0xff]  ;;  %v15303_v54 = vld [vmem:[#allocation136_spill] sm:$0xff]  ;;  %v15307_v22 = vld [vmem:[#allocation141_spill] sm:$0xff] }
 0x388   :  { %v5432_v34 = vpop.f32.mrf.mxu0  ;;  %v13435_v56 = vpop.f32.mrf.mxu3  ;;  %v4129_v49 = vadd.f32 %v15299_v35, %v3510_v57  ;;  %v5364_v60 = vadd.f32 %v13238_v19, %v4745_v45  ;;  %v1054_v26 = vadd.f32 %v15303_v54, %v15302_v44  ;;  %v15304_v19 = vld [vmem:[#allocation69_spill] sm:$0xff]  ;;  %v15306_v25 = vld [vmem:[#allocation71_spill] sm:$0xff]  ;;  %v15308_v55 = vld [vmem:[#allocation64_spill] sm:$0xff] }
 0x389   :  { %v5455_v1 = vpop.f32.mrf.mxu1  ;;  %v5362_v5 = vadd.f32 %v13233_v31, %v4743_v3  ;;  %v4744_v23 = vadd.f32 %v12979_v15, %v4127_v12  ;;  %v5366_v31 = vadd.f32 %v13258_v14, %v12982_v18  ;;  %v1057_v2 = vadd.f32 %v15307_v22, %v15306_v25  ;;  %v15309_v35 = vld [vmem:[#allocation66_spill] sm:$0xff]  ;;  %v15312_v54 = vld [vmem:[#allocation68_spill] sm:$0xff]  ;;  %v15315_v25 = vld [vmem:[#allocation121_spill] sm:$0xff] }
 0x38a   :  { %v4746_v8 = vadd.f32 %v12984_v63, %v4129_v49  ;;  %v5983_v17 = vadd.f32 %v5455_v1, %v5364_v60  ;;  %v15305_v63 = vld [vmem:[#allocation140_spill] sm:$0xff]  ;;  %v5368_v1 = vadd.f32 %v13262_v16, %v12987_v38  ;;  %v2279_v12 = vadd.f32 %v15308_v55, %v1027_v0  ;;  %v15310_v44 = vld [vmem:[#allocation98_spill] sm:$0xff] }
 0x38b   :  { %v5981_v52 = vadd.f32 %v5432_v34, %v5362_v5  ;;  %v5363_v15 = vadd.f32 %v13260_v6, %v4744_v23  ;;  %v1030_v34 = vadd.f32 %v15305_v63, %v15304_v19  ;;  %v2281_v49 = vadd.f32 %v15309_v35, %v1054_v26  ;;  %v15311_v16 = vld [vmem:[#allocation100_spill] sm:$0xff]  ;;  %v15314_v63 = vld [vmem:[#allocation127_spill] sm:$0xff] }
 0x38c   :  { %v5365_v57 = vadd.f32 %v13264_v47, %v4746_v8  ;;  %v6035_v23 = vadd.f32 %v13449_v27, %v5983_v17  ;;  %v2896_v38 = vadd.f32 %v15310_v44, %v2279_v12  ;;  %v15316_v35 = vld [vmem:[#allocation8_spill] sm:$0xff] }
 0x38d   :  { %v6033_v60 = vadd.f32 %v13449_v27, %v5981_v52  ;;  %v2898_v47 = vadd.f32 %v15311_v16, %v2281_v49  ;;  %v2280_v26 = vadd.f32 %v15312_v54, %v1030_v34  ;;  %v15320_v16 = vld [vmem:[#allocation137_spill] sm:$0xff] }
 0x38e   :  { %v3515_v17 = vadd.f32 %v15314_v63, %v2896_v38  ;;  %v15323_v63 = vld [vmem:[#allocation197_spill] sm:$0xff] }
 0x38f   :  { %v5478_v3 = vpop.f32.mrf.mxu2  ;;  %v3517_v22 = vadd.f32 %v15315_v25, %v2898_v47  ;;  %v2897_v49 = vadd.f32 %v15316_v35, %v2280_v26 }
 0x390   :  { %v5435_v45 = vpop.f32.mrf.mxu0  ;;  %v5985_v18 = vadd.f32 %v5478_v3, %v5366_v31  ;;  %v5501_v14 = vpop.f32.mrf.mxu3  ;;  %v15313_v31 = vld [vmem:[#allocation70_spill] sm:$0xff]  ;;  %v6081_v3 = vmax.f32 %v6033_v60, 0.0 }
 0x391   :  { %v5982_v6 = vadd.f32 %v5435_v45, %v5363_v15  ;;  %v5458_v5 = vpop.f32.mrf.mxu1  ;;  %v5987_v53 = vadd.f32 %v5501_v14, %v5368_v1  ;;  %v2282_v19 = vadd.f32 %v15313_v31, %v1057_v2  ;;  %v6083_v45 = vmax.f32 %v6035_v23, 0.0  ;;  %v15318_v14 = vld [vmem:[#allocation194_spill] sm:$0xff] }
 0x392   :  { %v5984_v30 = vadd.f32 %v5458_v5, %v5365_v57  ;;  %v6037_v8 = vadd.f32 %v13449_v27, %v5985_v18  ;;  %v15317_v18 = vld [vmem:[#allocation9_spill] sm:$0xff]  ;;  %v4134_v2 = vadd.f32 %v15318_v14, %v3515_v17  ;;  %v15319_v5 = vld [vmem:[#allocation195_spill] sm:$0xff]  ;;  %v3516_v47 = vadd.f32 %v15320_v16, %v2897_v49 }
 0x393   :  { %v6034_v0 = vadd.f32 %v13449_v27, %v5982_v6  ;;  %v6039_v15 = vadd.f32 %v13449_v27, %v5987_v53  ;;  %v2899_v34 = vadd.f32 %v15317_v18, %v2282_v19  ;;  %v5367_v6 = vadd.f32 %v13275_v41, %v13003_v50  ;;  %v15326_v18 = vld [vmem:[#allocation75_spill] sm:$0xff]  ;;  %v15328_v14 = vld [vmem:[#allocation77_spill] sm:$0xff] }
 0x394   :  { %v6036_v52 = vadd.f32 %v13449_v27, %v5984_v30  ;;  %v6085_v1 = vmax.f32 %v6037_v8, 0.0  ;;  %v4136_v53 = vadd.f32 %v15319_v5, %v3517_v22  ;;  %v5369_v30 = vadd.f32 %v13281_v62, %v13008_v7  ;;  %v15321_v8 = vld [vmem:[#allocation176_spill] sm:$0xff] }
 0x395   :  { %v6082_v57 = vmax.f32 %v6034_v0, 0.0  ;;  %v6087_v55 = vmax.f32 %v6039_v15, 0.0  ;;  %v3518_v0 = vadd.f32 %v15321_v8, %v2899_v34  ;;  %v4751_v50 = vadd.f32 %v12998_v39, %v4134_v2  ;;  %v15322_v62 = vld [vmem:[#allocation196_spill] sm:$0xff]  ;;  %v15332_v8 = vld [vmem:[#allocation30_spill] sm:$0xff] }
 0x396   :  { %v6084_v12 = vmax.f32 %v6036_v52, 0.0  ;;  %v4753_v41 = vadd.f32 %v13005_v43, %v4136_v53  ;;  %v13497_v7 = vmax.f32 %v6081_v3, %v6083_v45  ;;  %v4135_v15 = vadd.f32 %v15322_v62, %v3516_v47  ;;  %v15324_v43 = vld [vmem:[#allocation73_spill] sm:$0xff]  ;;  %v15327_v34 = vld [vmem:[#allocation148_spill] sm:$0xff]  ;;  %v15330_v53 = vld [vmem:[#allocation79_spill] sm:$0xff] }
 0x397   :  { %v5481_v60 = vpop.f32.mrf.mxu2  ;;  %v13489_v38 = vmax.f32 %v6085_v1, %v6087_v55  ;;  %v4137_v17 = vadd.f32 %v15323_v63, %v3518_v0  ;;  %v5370_v25 = vadd.f32 %v13277_v13, %v4751_v50  ;;  %v15325_v1 = vld [vmem:[#allocation146_spill] sm:$0xff]  ;;  %v1162_v13 = vadd.f32 %v15327_v34, %v15326_v18 }
 0x398   :  { %v13487_v44 = vmax.f32 %v6082_v57, %v6084_v12  ;;  %v5524_v23 = vpop.f32.mrf.mxu0  ;;  %v5986_v54 = vadd.f32 %v5481_v60, %v5367_v6  ;;  %v5504_v26 = vpop.f32.mrf.mxu3  ;;  %v5372_v22 = vadd.f32 %v13283_v51, %v4753_v41  ;;  %v1135_v57 = vadd.f32 %v15325_v1, %v15324_v43  ;;  %v15329_v51 = vld [vmem:[#allocation152_spill] sm:$0xff]  ;;  %v15335_v62 = vld [vmem:[#allocation14_spill] sm:$0xff] }
 0x399   :  { %v5547_v31 = vpop.f32.mrf.mxu1  ;;  %v5988_v19 = vadd.f32 %v5504_v26, %v5369_v30  ;;  %v4752_v3 = vadd.f32 %v13029_v21, %v4135_v15  ;;  %v4754_v55 = vadd.f32 %v13034_v42, %v4137_v17  ;;  %v5989_v35 = vadd.f32 %v5524_v23, %v5370_v25  ;;  %v15331_v30 = vld [vmem:[#allocation153_spill] sm:$0xff]  ;;  %v15336_v17 = vld [vmem:[#allocation74_spill] sm:$0xff] }
 0x39a   :  { %10003 = vmatpush.msk.msra.mxu0 %vm1547_vm3, %v13487_v44  ;;  %v6038_v52 = vadd.f32 %v13449_v27, %v5986_v54  ;;  %v5991_v49 = vadd.f32 %v5547_v31, %v5372_v22  ;;  %v1138_v2 = vadd.f32 %v15329_v51, %v15328_v14  ;;  %v5374_v6 = vadd.f32 %v13302_v33, %v13032_v28  ;;  %v15333_v54 = vld [vmem:[#allocation72_spill] sm:$0xff]  ;;  %v15340_v14 = vld [vmem:[#allocation106_spill] sm:$0xff] }
 0x39b   :  { %v6040_v39 = vadd.f32 %v13449_v27, %v5988_v19  ;;  %v5371_v5 = vadd.f32 %v13304_v11, %v4752_v3  ;;  %v1165_v21 = vadd.f32 %v15331_v30, %v15330_v53  ;;  %v5376_v42 = vadd.f32 %v13306_v58, %v13037_v10  ;;  %v15334_v58 = vld [vmem:[#allocation11_spill] sm:$0xff]  ;;  %v15337_v22 = vld [vmem:[#allocation76_spill] sm:$0xff] }
 0x39c   :  { %6178 = vmatpush.msra.mxu0 %v13497_v7  ;;  %v6086_v45 = vmax.f32 %v6038_v52, 0.0  ;;  %v5373_v60 = vadd.f32 %v13308_v59, %v4754_v55  ;;  %v2287_v0 = vadd.f32 %v15332_v8, %v1135_v57  ;;  %v2289_v26 = vadd.f32 %v15333_v54, %v1162_v13  ;;  %v15338_v57 = vld [vmem:[#allocation132_spill] sm:$0xff]  ;;  %v15344_v54 = vld [vmem:[#allocation149_spill] sm:$0xff] }
 0x39d   :  { %v6088_v12 = vmax.f32 %v6040_v39, 0.0  ;;  %v6041_v50 = vadd.f32 %v13449_v27, %v5989_v35  ;;  %v6043_v41 = vadd.f32 %v13449_v27, %v5991_v49  ;;  %v2288_v25 = vadd.f32 %v15336_v17, %v1138_v2  ;;  %v15341_v2 = vld [vmem:[#allocation109_spill] sm:$0xff]  ;;  %v15350_v17 = vld [vmem:[#allocation83_spill] sm:$0xff] }
 0x39e   :  { %v2904_v59 = vadd.f32 %v15334_v58, %v2287_v0  ;;  %v2906_v15 = vadd.f32 %v15335_v62, %v2289_v26  ;;  %v2290_v39 = vadd.f32 %v15337_v22, %v1165_v21  ;;  %v5375_v30 = vadd.f32 %v13318_v40, %v13050_v48  ;;  %v15343_v21 = vld [vmem:[#allocation199_spill] sm:$0xff]  ;;  %v15348_v62 = vld [vmem:[#allocation81_spill] sm:$0xff] }
 0x39f   :  { %v13522_v23 = vmax.f32 %v6086_v45, %v6088_v12  ;;  %v5570_v16 = vpop.f32.mrf.mxu2  ;;  %v15339_v45 = vld [vmem:[#allocation177_spill] sm:$0xff]  ;;  %v6089_v49 = vmax.f32 %v6041_v50, 0.0  ;;  %v6091_v18 = vmax.f32 %v6043_v41, 0.0  ;;  %v2905_v51 = vadd.f32 %v15340_v14, %v2288_v25  ;;  %v15351_v25 = vld [vmem:[#allocation159_spill] sm:$0xff]  ;;  %v15358_v14 = vld [vmem:[#allocation12_spill] sm:$0xff] }
 0x3a0   :  { %v5527_v47 = vpop.f32.mrf.mxu0  ;;  %v5993_v31 = vadd.f32 %v5570_v16, %v5374_v6  ;;  %v5593_v28 = vpop.f32.mrf.mxu3  ;;  %v3523_v3 = vadd.f32 %v15338_v57, %v2904_v59  ;;  %v3525_v55 = vadd.f32 %v15339_v45, %v2906_v15  ;;  %v2907_v6 = vadd.f32 %v15341_v2, %v2290_v39  ;;  %v15349_v15 = vld [vmem:[#allocation157_spill] sm:$0xff] }
 0x3a1   :  { %v5990_v33 = vadd.f32 %v5527_v47, %v5371_v5  ;;  %v5550_v11 = vpop.f32.mrf.mxu1  ;;  %v5995_v19 = vadd.f32 %v5593_v28, %v5376_v42  ;;  %10005 = vmatpush.msk.msra.mxu1 %vm1547_vm3, %v13522_v23  ;;  %v15342_v5 = vld [vmem:[#allocation198_spill] sm:$0xff]  ;;  %v3524_v26 = vadd.f32 %v15344_v54, %v2905_v51  ;;  %v1270_v22 = vadd.f32 %v15351_v25, %v15350_v17  ;;  %v15359_v51 = vld [vmem:[#allocation111_spill] sm:$0xff]  ;;  %v15368_v17 = vld [vmem:[#allocation181_spill] sm:$0xff] }
 0x3a2   :  { %v5992_v10 = vadd.f32 %v5550_v11, %v5373_v60  ;;  %v6045_v52 = vadd.f32 %v13449_v27, %v5993_v31  ;;  %v4142_v53 = vadd.f32 %v15342_v5, %v3523_v3  ;;  %v4144_v42 = vadd.f32 %v15343_v21, %v3525_v55  ;;  %v15345_v31 = vld [vmem:[#allocation178_spill] sm:$0xff] }
 0x3a3   :  { %v6042_v63 = vadd.f32 %v13449_v27, %v5990_v33  ;;  %v6047_v43 = vadd.f32 %v13449_v27, %v5995_v19  ;;  %6201 = vmatpush.msra.mxu1 %v13489_v38  ;;  %v5377_v60 = vadd.f32 %v13322_v32, %v13055_v46  ;;  %v3526_v28 = vadd.f32 %v15345_v31, %v2907_v6  ;;  %v15346_v32 = vld [vmem:[#allocation200_spill] sm:$0xff]  ;;  %v15353_v55 = vld [vmem:[#allocation162_spill] sm:$0xff]  ;;  %v15360_v6 = vld [vmem:[#allocation89_spill] sm:$0xff] }
 0x3a4   :  { %v6044_v1 = vadd.f32 %v13449_v27, %v5992_v10  ;;  %v6093_v12 = vmax.f32 %v6045_v52, 0.0  ;;  %v4759_v48 = vadd.f32 %v13047_v20, %v4142_v53  ;;  %v4761_v40 = vadd.f32 %v13052_v29, %v4144_v42  ;;  %v15347_v10 = vld [vmem:[#allocation201_spill] sm:$0xff]  ;;  %v15361_v21 = vld [vmem:[#allocation78_spill] sm:$0xff] }
 0x3a5   :  { %v6090_v35 = vmax.f32 %v6042_v63, 0.0  ;;  %v6095_v34 = vmax.f32 %v6047_v43, 0.0  ;;  %v13559_v46 = vmax.f32 %v6089_v49, %v6091_v18  ;;  %v4143_v19 = vadd.f32 %v15346_v32, %v3524_v26  ;;  %v15355_v18 = vld [vmem:[#allocation108_spill] sm:$0xff] }
 0x3a6   :  { %v6092_v13 = vmax.f32 %v6044_v1, 0.0  ;;  %v4145_v58 = vadd.f32 %v15347_v10, %v3526_v28  ;;  %v1243_v52 = vadd.f32 %v15349_v15, %v15348_v62  ;;  %v5378_v63 = vadd.f32 %v13320_v4, %v4759_v48  ;;  %v13577_v4 = vld [vmem:[%s14592_s5] sm:$0x7f] }
 0x3a7   :  { %v5573_v47 = vpop.f32.mrf.mxu2  ;;  %v13551_v0 = vmax.f32 %v6093_v12, %v6095_v34  ;;  %v5380_v20 = vadd.f32 %v13324_v36, %v4761_v40  ;;  %v4760_v39 = vadd.f32 %v13078_v61, %v4143_v19  ;;  %v15352_v36 = vld [vmem:[#allocation85_spill] sm:$0xff]  ;;  %10004 = vmatmul.msk.f32.vlgmr.msra.gmra.mxu0 %vm6156_vm4, %v13577_v4  ;;  %10006 = vmatmul.msk.f32.vlgmr.msra.gmra.mxu1 %vm6156_vm4, %v13577_v4  ;;  %v15357_v34 = vld [vmem:[#allocation163_spill] sm:$0xff]  ;;  %v15363_v48 = vld [vmem:[#allocation20_spill] sm:$0xff] }
 0x3a8   :  { %v13549_v16 = vmax.f32 %v6090_v35, %v6092_v13  ;;  %v5616_v8 = vpop.f32.mrf.mxu0  ;;  %v5994_v33 = vadd.f32 %v5573_v47, %v5375_v30  ;;  %v5596_v11 = vpop.f32.mrf.mxu3  ;;  %v4762_v43 = vadd.f32 %v13083_v37, %v4145_v58  ;;  %v1246_v12 = vadd.f32 %v15353_v55, %v15352_v36  ;;  %v15354_v35 = vld [vmem:[#allocation97_spill] sm:$0xff]  ;;  %v15356_v37 = vld [vmem:[#allocation87_spill] sm:$0xff]  ;;  %v15370_v55 = vld [vmem:[#allocation116_spill] sm:$0xff] }
 0x3a9   :  { %v5639_v50 = vpop.f32.mrf.mxu1  ;;  %v5996_v41 = vadd.f32 %v5596_v11, %v5377_v60  ;;  %v5997_v3 = vadd.f32 %v5616_v8, %v5378_v63  ;;  %v5382_v49 = vadd.f32 %v15354_v35, %v13081_v24  ;;  %v5379_v61 = vadd.f32 %v15355_v18, %v4760_v39  ;;  %v15362_v60 = vld [vmem:[#allocation37_spill] sm:$0xff]  ;;  %v15365_v58 = vld [vmem:[#allocation39_spill] sm:$0xff]  ;;  %v15371_v35 = vld [vmem:[#allocation202_spill] sm:$0xff] }
 0x3aa   :  { %10007 = vmatpush.msk.msra.mxu2 %vm1547_vm3, %v13549_v16  ;;  %v6046_v59 = vadd.f32 %v13449_v27, %v5994_v33  ;;  %v5999_v45 = vadd.f32 %v5639_v50, %v5380_v20  ;;  %v1273_v13 = vadd.f32 %v15357_v34, %v15356_v37  ;;  %v5384_v2 = vadd.f32 %v15359_v51, %v15358_v14  ;;  %v15366_v62 = vld [vmem:[#allocation47_spill] sm:$0xff]  ;;  %v15367_v20 = vld [vmem:[#allocation180_spill] sm:$0xff]  ;;  %v15372_v18 = vld [vmem:[#allocation25_spill] sm:$0xff] }
 0x3ab   :  { %v6048_v29 = vadd.f32 %v13449_v27, %v5996_v41  ;;  %v5381_v5 = vadd.f32 %v15360_v6, %v4762_v43  ;;  %v2295_v42 = vadd.f32 %v15361_v21, %v1243_v52  ;;  %v2297_v47 = vadd.f32 %v15362_v60, %v1270_v22  ;;  %v15364_v41 = vld [vmem:[#allocation21_spill] sm:$0xff]  ;;  %v15374_v34 = vld [vmem:[#allocation203_spill] sm:$0xff]  ;;  %v15377_v21 = vld [vmem:[#allocation160_spill] sm:$0xff] }
 0x3ac   :  { %6224 = vmatpush.msra.mxu2 %v13559_v46  ;;  %v6094_v1 = vmax.f32 %v6046_v59, 0.0  ;;  %v6049_v28 = vadd.f32 %v13449_v27, %v5997_v3  ;;  %v6051_v33 = vadd.f32 %v13449_v27, %v5999_v45  ;;  %v2296_v59 = vadd.f32 %v15365_v58, %v1246_v12  ;;  %v15369_v45 = vld [vmem:[#allocation114_spill] sm:$0xff]  ;;  %v15375_v14 = vld [vmem:[#allocation35_spill] sm:$0xff]  ;;  %v15378_v60 = vld [vmem:[#allocation161_spill] sm:$0xff] }
 0x3ad   :  { %v6096_v57 = vmax.f32 %v6048_v29, 0.0  ;;  %10008 = vmatmul.msk.f32.vlgmr.msra.gmra.mxu2 %vm6156_vm4, %v13577_v4  ;;  %v2912_v40 = vadd.f32 %v15363_v48, %v2295_v42  ;;  %v2914_v32 = vadd.f32 %v15364_v41, %v2297_v47  ;;  %v2298_v15 = vadd.f32 %v15366_v62, %v1273_v13  ;;  %v15376_v51 = vld [vmem:[#allocation103_spill] sm:$0xff]  ;;  %v15383_v58 = vld [vmem:[#allocation102_spill] sm:$0xff]  ;;  %v15384_v62 = vld [vmem:[#allocation112_spill] sm:$0xff] }
 0x3ae   :  { %v6097_v43 = vmax.f32 %v6049_v28, 0.0  ;;  %v2913_v36 = vadd.f32 %v15369_v45, %v2296_v59  ;;  %v15389_v45 = vld [vmem:[#allocation94_spill] sm:$0xff] }
 0x3af   :  { %v13593_v53 = vmax.f32 %v6094_v1, %v6096_v57  ;;  %v5662_v30 = vpop.f32.mrf.mxu2  ;;  %v3531_v29 = vadd.f32 %v15367_v20, %v2912_v40  ;;  %v3533_v25 = vadd.f32 %v15368_v17, %v2914_v32  ;;  %v6099_v1 = vmax.f32 %v6051_v33, 0.0  ;;  %v15380_v33 = vld [vmem:[#allocation91_spill] sm:$0xff]  ;;  %v15381_v40 = vld [vmem:[#allocation204_spill] sm:$0xff] }
 0x3b0   :  { %v5619_v24 = vpop.f32.mrf.mxu0  ;;  %v6001_v8 = vadd.f32 %v5662_v30, %v5382_v49  ;;  %v5692_v54 = vpop.f32.mrf.mxu3  ;;  %v2915_v12 = vadd.f32 %v15370_v55, %v2298_v15  ;;  %v3532_v42 = vadd.f32 %v15377_v21, %v2913_v36  ;;  %v15386_v20 = vld [vmem:[#allocation164_spill] sm:$0xff]  ;;  %v15390_v36 = vld [vmem:[#allocation165_spill] sm:$0xff] }
 0x3b1   :  { %v5998_v26 = vadd.f32 %v5619_v24, %v5379_v61  ;;  %v5642_v31 = vpop.f32.mrf.mxu1  ;;  %v6003_v11 = vadd.f32 %v5692_v54, %v5384_v2  ;;  %10009 = vmatpush.msk.msra.mxu3 %vm1547_vm3, %v13593_v53  ;;  %v4150_v49 = vadd.f32 %v15371_v35, %v3531_v29  ;;  %v15373_v61 = vld [vmem:[#allocation90_spill] sm:$0xff]  ;;  %v4152_v13 = vadd.f32 %v15374_v34, %v3533_v25  ;;  %v15387_v17 = vld [vmem:[#allocation36_spill] sm:$0xff] }
 0x3b2   :  { %v6000_v50 = vadd.f32 %v5642_v31, %v5381_v5  ;;  %v6053_v19 = vadd.f32 %v13449_v27, %v6001_v8  ;;  %v5383_v37 = vadd.f32 %v15373_v61, %v15372_v18  ;;  %v5385_v2 = vadd.f32 %v15376_v51, %v15375_v14  ;;  %v15379_v31 = vld [vmem:[#allocation24_spill] sm:$0xff]  ;;  %v15392_v35 = vld [vmem:[#allocation166_spill] sm:$0xff]  ;;  %v15393_v18 = vld [vmem:[#allocation43_spill] sm:$0xff] }
 0x3b3   :  { %v6050_v10 = vadd.f32 %v13449_v27, %v5998_v26  ;;  %v6055_v52 = vadd.f32 %v13449_v27, %v6003_v11  ;;  %6247 = vmatpush.msra.mxu3 %v13551_v0  ;;  %v3534_v47 = vadd.f32 %v15378_v60, %v2915_v12  ;;  %v4767_v28 = vadd.f32 %v15379_v31, %v4150_v49  ;;  %v15391_v12 = vld [vmem:[#allocation99_spill] sm:$0xff]  ;;  %v15394_v61 = vld [vmem:[#allocation113_spill] sm:$0xff]  ;;  %v15395_v34 = vld [vmem:[#allocation124_spill] sm:$0xff] }
 0x3b4   :  { %v6052_v63 = vadd.f32 %v13449_v27, %v6000_v50  ;;  %v6101_v22 = vmax.f32 %v6053_v19, 0.0  ;;  %10010 = vmatmul.msk.f32.vlgmr.msra.gmra.mxu3 %vm6156_vm4, %v13577_v4  ;;  %v4769_v11 = vadd.f32 %v15380_v33, %v4152_v13  ;;  %v13634_v48 = vmax.f32 %v6097_v43, %v6099_v1  ;;  %v15382_v19 = vld [vmem:[#allocation205_spill] sm:$0xff]  ;;  %v15397_v51 = vld [vmem:[#allocation167_spill] sm:$0xff]  ;;  %v15399_v21 = vld [vmem:[#allocation104_spill] sm:$0xff] }
 0x3b5   :  { %v6098_v39 = vmax.f32 %v6050_v10, 0.0  ;;  %v6103_v57 = vmax.f32 %v6055_v52, 0.0  ;;  %v4151_v41 = vadd.f32 %v15381_v40, %v3532_v42  ;;  %v4153_v10 = vadd.f32 %v15382_v19, %v3534_v47  ;;  %v15396_v14 = vld [vmem:[#allocation101_spill] sm:$0xff] }
 0x3b6   :  { %v6100_v3 = vmax.f32 %v6052_v63, 0.0  ;;  %v5386_v59 = vadd.f32 %v15383_v58, %v4767_v28  ;;  %v5388_v15 = vadd.f32 %v15384_v62, %v4769_v11  ;;  %v15385_v63 = vld [vmem:[#allocation92_spill] sm:$0xff]  ;;  %v1378_v55 = vadd.f32 %v15390_v36, %v15389_v45  ;;  %v15400_v60 = vld [vmem:[#allocation105_spill] sm:$0xff]  ;;  %v15402_v28 = vld [vmem:[#allocation82_spill] sm:$0xff] }
 0x3b7   :  { %v5665_v5 = vpop.f32.mrf.mxu2  ;;  %v13626_v24 = vmax.f32 %v6101_v22, %v6103_v57  ;;  %v1351_v29 = vadd.f32 %v15386_v20, %v15385_v63  ;;  %v4768_v25 = vadd.f32 %v15387_v17, %v4151_v41  ;;  %v1354_v49 = vadd.f32 %v15392_v35, %v15391_v12 }
 0x3b8   :  { %v13624_v6 = vmax.f32 %v6098_v39, %v6100_v3  ;;  %v5715_v30 = vpop.f32.mrf.mxu0  ;;  %v6002_v8 = vadd.f32 %v5665_v5, %v5383_v37  ;;  %v5695_v54 = vpop.f32.mrf.mxu3  ;;  %v15388_v39 = vld [vmem:[#allocation44_spill] sm:$0xff]  ;;  %v5390_v37 = vadd.f32 %v15394_v61, %v15393_v18  ;;  %v2305_v33 = vadd.f32 %v15402_v28, %v1378_v55  ;;  %v15409_v61 = vld [vmem:[#allocation17_spill] sm:$0xff] }
 0x3b9   :  { %v5738_v26 = vpop.f32.mrf.mxu1  ;;  %v6004_v50 = vadd.f32 %v5695_v54, %v5385_v2  ;;  %v4770_v43 = vadd.f32 %v15388_v39, %v4153_v10  ;;  %v6005_v57 = vadd.f32 %v5715_v30, %v5386_v59  ;;  %v5387_v13 = vadd.f32 %v15395_v34, %v4768_v25  ;;  %v15398_v5 = vld [vmem:[#allocation32_spill] sm:$0xff]  ;;  %v15403_v59 = vld [vmem:[#allocation15_spill] sm:$0xff]  ;;  %v15410_v34 = vld [vmem:[#allocation22_spill] sm:$0xff] }
 0x3ba   :  { %10011 = vmatpush.msk.msrb.mxu0 %vm1547_vm3, %v13624_v6  ;;  %v6054_v32 = vadd.f32 %v13449_v27, %v6002_v8  ;;  %v6007_v3 = vadd.f32 %v5738_v26, %v5388_v15  ;;  %v1381_v2 = vadd.f32 %v15397_v51, %v15396_v14  ;;  %v5392_v42 = vadd.f32 %v15399_v21, %v15398_v5  ;;  %v15401_v26 = vld [vmem:[#allocation80_spill] sm:$0xff]  ;;  %v15411_v14 = vld [vmem:[#allocation206_spill] sm:$0xff] }
 0x3bb   :  { %v6056_v52 = vadd.f32 %v13449_v27, %v6004_v50  ;;  %v5389_v30 = vadd.f32 %v15400_v60, %v4770_v43  ;;  %v2303_v31 = vadd.f32 %v15401_v26, %v1351_v29  ;;  %v15404_v15 = vld [vmem:[#allocation16_spill] sm:$0xff]  ;;  %v15413_v5 = vld [vmem:[#allocation118_spill] sm:$0xff] }
 0x3bc   :  { %6270 = vmatpush.msrb.mxu0 %v13634_v48  ;;  %v6102_v22 = vmax.f32 %v6054_v32, 0.0  ;;  %v6057_v32 = vadd.f32 %v13449_v27, %v6005_v57  ;;  %v6059_v19 = vadd.f32 %v13449_v27, %v6007_v3  ;;  %v15405_v29 = vld [vmem:[#allocation48_spill] sm:$0xff]  ;;  %v15408_v3 = vld [vmem:[#allocation183_spill] sm:$0xff] }
 0x3bd   :  { %10012 = vmatmul.msk.f32.vlgmr.msrb.gmra.mxu0 %vm6156_vm4, %v13577_v4  ;;  %v6104_v1 = vmax.f32 %v6056_v52, 0.0  ;;  %v2920_v62 = vadd.f32 %v15403_v59, %v2303_v31  ;;  %v2922_v52 = vadd.f32 %v15404_v15, %v2305_v33  ;;  %v2304_v17 = vadd.f32 %v15405_v29, %v1354_v49  ;;  %v15406_v25 = vld [vmem:[#allocation84_spill] sm:$0xff] }
 0x3be   :  { %v6105_v12 = vmax.f32 %v6057_v32, 0.0  ;;  %v6107_v35 = vmax.f32 %v6059_v19, 0.0 }
 0x3bf   :  { %v13661_v47 = vmax.f32 %v6102_v22, %v6104_v1  ;;  %v5761_v8 = vpop.f32.mrf.mxu2  ;;  %v2306_v22 = vadd.f32 %v15406_v25, %v1381_v2  ;;  %v15407_v1 = vld [vmem:[#allocation182_spill] sm:$0xff]  ;;  %v3541_v45 = vadd.f32 %v15408_v3, %v2922_v52  ;;  %v15422_v25 = vld [vmem:[#allocation209_spill] sm:$0xff] }
 0x3c0   :  { %v5718_v54 = vpop.f32.mrf.mxu0  ;;  %v6009_v11 = vadd.f32 %v5761_v8, %v5390_v37  ;;  %v5784_v50 = vpop.f32.mrf.mxu3  ;;  %v3539_v57 = vadd.f32 %v15407_v1, %v2920_v62  ;;  %v2921_v37 = vadd.f32 %v15409_v61, %v2304_v17  ;;  %v15412_v2 = vld [vmem:[#allocation38_spill] sm:$0xff]  ;;  %v15416_v8 = vld [vmem:[#allocation128_spill] sm:$0xff]  ;;  %v15424_v1 = vld [vmem:[#allocation129_spill] sm:$0xff] }
 0x3c1   :  { %v6006_v40 = vadd.f32 %v5718_v54, %v5387_v13  ;;  %v5741_v41 = vpop.f32.mrf.mxu1  ;;  %v6011_v10 = vadd.f32 %v5784_v50, %v5392_v42  ;;  %10013 = vmatpush.msk.msrb.mxu1 %vm1547_vm3, %v13661_v47  ;;  %v2923_v13 = vadd.f32 %v15410_v34, %v2306_v22  ;;  %v5391_v21 = vadd.f32 %v15413_v5, %v15412_v2  ;;  %v15414_v42 = vld [vmem:[#allocation207_spill] sm:$0xff]  ;;  %v15420_v62 = vld [vmem:[#allocation40_spill] sm:$0xff] }
 0x3c2   :  { %v6008_v58 = vadd.f32 %v5741_v41, %v5389_v30  ;;  %v6061_v63 = vadd.f32 %v13449_v27, %v6009_v11  ;;  %v4158_v51 = vadd.f32 %v15411_v14, %v3539_v57  ;;  %v4160_v60 = vadd.f32 %v15414_v42, %v3541_v45  ;;  %v15415_v30 = vld [vmem:[#allocation45_spill] sm:$0xff]  ;;  %v15417_v11 = vld [vmem:[#allocation184_spill] sm:$0xff]  ;;  %v15425_v45 = vld [vmem:[#allocation107_spill] sm:$0xff] }
 0x3c3   :  { %v6058_v20 = vadd.f32 %v13449_v27, %v6006_v40  ;;  %v6063_v39 = vadd.f32 %v13449_v27, %v6011_v10  ;;  %6293 = vmatpush.msrb.mxu1 %v13626_v24  ;;  %v5393_v54 = vadd.f32 %v15416_v8, %v15415_v30  ;;  %v3540_v50 = vadd.f32 %v15417_v11, %v2921_v37  ;;  %v15418_v40 = vld [vmem:[#allocation185_spill] sm:$0xff]  ;;  %v15429_v14 = vld [vmem:[#allocation110_spill] sm:$0xff]  ;;  %v15431_v5 = vld [vmem:[#allocation115_spill] sm:$0xff] }
 0x3c4   :  { %v6060_v43 = vadd.f32 %v13449_v27, %v6008_v58  ;;  %v6109_v36 = vmax.f32 %v6061_v63, 0.0  ;;  %10014 = vmatmul.msk.f32.vlgmr.msrb.gmra.mxu1 %vm6156_vm4, %v13577_v4  ;;  %v3542_v41 = vadd.f32 %v15418_v40, %v2923_v13  ;;  %v15419_v58 = vld [vmem:[#allocation33_spill] sm:$0xff]  ;;  %v4777_v15 = vadd.f32 %v15420_v62, %v4160_v60  ;;  %v15433_v60 = vld [vmem:[#allocation56_spill] sm:$0xff]  ;;  %v15434_v30 = vld [vmem:[#allocation31_spill] sm:$0xff] }
 0x3c5   :  { %v6106_v55 = vmax.f32 %v6058_v20, 0.0  ;;  %v6111_v49 = vmax.f32 %v6063_v39, 0.0  ;;  %v4775_v59 = vadd.f32 %v15419_v58, %v4158_v51  ;;  %v13700_v63 = vmax.f32 %v6105_v12, %v6107_v35  ;;  %v15421_v20 = vld [vmem:[#allocation208_spill] sm:$0xff]  ;;  %v15423_v39 = vld [vmem:[#allocation119_spill] sm:$0xff]  ;;  %v15430_v51 = vld [vmem:[#allocation169_spill] sm:$0xff] }
 0x3c6   :  { %v6108_v18 = vmax.f32 %v6060_v43, 0.0  ;;  %v4159_v29 = vadd.f32 %v15421_v20, %v3540_v50  ;;  %v4161_v22 = vadd.f32 %v15422_v25, %v3542_v41  ;;  %v5396_v57 = vadd.f32 %v15424_v1, %v4777_v15  ;;  %v15436_v11 = vld [vmem:[#allocation117_spill] sm:$0xff]  ;;  %v15437_v50 = vld [vmem:[#allocation171_spill] sm:$0xff]  ;;  %v15440_v58 = vld [vmem:[#allocation138_spill] sm:$0xff] }
 0x3c7   :  { %v5764_v31 = vpop.f32.mrf.mxu2  ;;  %v13692_v33 = vmax.f32 %v6109_v36, %v6111_v49  ;;  %v5394_v43 = vadd.f32 %v15423_v39, %v4775_v59  ;;  %v15426_v36 = vld [vmem:[#allocation168_spill] sm:$0xff]  ;;  %v15427_v49 = vld [vmem:[#allocation46_spill] sm:$0xff]  ;;  %v1486_v2 = vadd.f32 %v15430_v51, %v15429_v14  ;;  %v5398_v8 = vadd.f32 %v15434_v30, %v15433_v60  ;;  %v15438_v41 = vld [vmem:[#allocation41_spill] sm:$0xff] }
 0x3c8   :  { %v13690_v26 = vmax.f32 %v6106_v55, %v6108_v18  ;;  %v5807_v28 = vpop.f32.mrf.mxu0  ;;  %v6010_v32 = vadd.f32 %v5764_v31, %v5391_v21  ;;  %v5787_v19 = vpop.f32.mrf.mxu3  ;;  %v1459_v55 = vadd.f32 %v15426_v36, %v15425_v45  ;;  %v4776_v12 = vadd.f32 %v15427_v49, %v4159_v29  ;;  %v15428_v18 = vld [vmem:[#allocation57_spill] sm:$0xff]  ;;  %v15432_v21 = vld [vmem:[#allocation170_spill] sm:$0xff] }
 0x3c9   :  { %v5830_v10 = vpop.f32.mrf.mxu1  ;;  %v6012_v52 = vadd.f32 %v5787_v19, %v5393_v54  ;;  %v4778_v61 = vadd.f32 %v15428_v18, %v4161_v22  ;;  %v6013_v34 = vadd.f32 %v5807_v28, %v5394_v43  ;;  %v1462_v42 = vadd.f32 %v15432_v21, %v15431_v5  ;;  %v15435_v54 = vld [vmem:[#allocation120_spill] sm:$0xff]  ;;  %v15441_v15 = vld [vmem:[#allocation86_spill] sm:$0xff]  ;;  %v15442_v20 = vld [vmem:[#allocation49_spill] sm:$0xff] }
 0x3ca   :  { %10015 = vmatpush.msk.msrb.mxu2 %vm1547_vm3, %v13690_v26  ;;  %v6062_v17 = vadd.f32 %v13449_v27, %v6010_v32  ;;  %v6015_v13 = vadd.f32 %v5830_v10, %v5396_v57  ;;  %v5395_v31 = vadd.f32 %v15435_v54, %v4776_v12  ;;  %v1489_v40 = vadd.f32 %v15437_v50, %v15436_v11  ;;  %v15439_v32 = vld [vmem:[#allocation29_spill] sm:$0xff]  ;;  %v15443_v45 = vld [vmem:[#allocation122_spill] sm:$0xff]  ;;  %v15448_v5 = vld [vmem:[#allocation187_spill] sm:$0xff] }
 0x3cb   :  { %v6064_v3 = vadd.f32 %v13449_v27, %v6012_v52  ;;  %v5400_v19 = vadd.f32 %v15439_v32, %v15438_v41  ;;  %v5397_v28 = vadd.f32 %v15440_v58, %v4778_v61  ;;  %v2311_v52 = vadd.f32 %v15441_v15, %v1459_v55  ;;  %v15444_v49 = vld [vmem:[#allocation125_spill] sm:$0xff]  ;;  %v15445_v18 = vld [vmem:[#allocation50_spill] sm:$0xff]  ;;  %v15449_v11 = vld [vmem:[#allocation27_spill] sm:$0xff] }
 0x3cc   :  { %6316 = vmatpush.msrb.mxu2 %v13700_v63  ;;  %v6110_v35 = vmax.f32 %v6062_v17, 0.0  ;;  %v2313_v29 = vadd.f32 %v15442_v20, %v1486_v2  ;;  %v6065_v43 = vadd.f32 %v13449_v27, %v6013_v34  ;;  %v6067_v1 = vadd.f32 %v13449_v27, %v6015_v13  ;;  %v15447_v51 = vld [vmem:[#allocation186_spill] sm:$0xff]  ;;  %v15452_v58 = vld [vmem:[#allocation51_spill] sm:$0xff]  ;;  %v15456_v20 = vld [vmem:[#allocation133_spill] sm:$0xff] }
 0x3cd   :  { %10016 = vmatmul.msk.f32.vlgmr.msrb.gmra.mxu2 %vm6156_vm4, %v13577_v4  ;;  %v6112_v37 = vmax.f32 %v6064_v3, 0.0  ;;  %v2928_v36 = vadd.f32 %v15443_v45, %v2311_v52  ;;  %v2312_v61 = vadd.f32 %v15445_v18, %v1462_v42  ;;  %v15451_v32 = vld [vmem:[#allocation210_spill] sm:$0xff] }
 0x3ce   :  { %v2930_v12 = vadd.f32 %v15444_v49, %v2313_v29  ;;  %v6115_v54 = vmax.f32 %v6067_v1, 0.0  ;;  %v15455_v52 = vld [vmem:[#allocation58_spill] sm:$0xff] }
 0x3cf   :  { %v13727_v10 = vmax.f32 %v6110_v35, %v6112_v37  ;;  %v5853_v59 = vpop.f32.mrf.mxu2  ;;  %v15446_v37 = vld [vmem:[#allocation52_spill] sm:$0xff]  ;;  %v3547_v2 = vadd.f32 %v15447_v51, %v2928_v36  ;;  %v2929_v50 = vadd.f32 %v15449_v11, %v2312_v61  ;;  %v5401_v29 = vadd.f32 %v15456_v20, %v15455_v52  ;;  %v15462_v51 = vld [vmem:[#allocation213_spill] sm:$0xff]  ;;  %v15471_v52 = vld [vmem:[#allocation150_spill] sm:$0xff] }
 0x3d0   :  { %v5810_v62 = vpop.f32.mrf.mxu0  ;;  %v6017_v17 = vadd.f32 %v5853_v59, %v5398_v8  ;;  %v5876_v25 = vpop.f32.mrf.mxu3  ;;  %v2314_v14 = vadd.f32 %v15446_v37, %v1489_v40  ;;  %v3549_v21 = vadd.f32 %v15448_v5, %v2930_v12  ;;  %v6113_v8 = vmax.f32 %v6065_v43, 0.0  ;;  %v15450_v40 = vld [vmem:[#allocation28_spill] sm:$0xff]  ;;  %v15459_v12 = vld [vmem:[#allocation42_spill] sm:$0xff]  ;;  %v15463_v5 = vld [vmem:[#allocation147_spill] sm:$0xff] }
 0x3d1   :  { %v6014_v22 = vadd.f32 %v5810_v62, %v5395_v31  ;;  %v5833_v39 = vpop.f32.mrf.mxu1  ;;  %v6019_v57 = vadd.f32 %v5876_v25, %v5400_v19  ;;  %10017 = vmatpush.msk.msrb.mxu3 %vm1547_vm3, %v13727_v10  ;;  %v4166_v19 = vadd.f32 %v15451_v32, %v3547_v2  ;;  %v15454_v62 = vld [vmem:[#allocation211_spill] sm:$0xff]  ;;  %v15457_v43 = vld [vmem:[#allocation188_spill] sm:$0xff] }
 0x3d2   :  { %v6016_v3 = vadd.f32 %v5833_v39, %v5397_v28  ;;  %v6069_v55 = vadd.f32 %v13449_v27, %v6017_v17  ;;  %v2931_v41 = vadd.f32 %v15450_v40, %v2314_v14  ;;  %v15453_v28 = vld [vmem:[#allocation139_spill] sm:$0xff]  ;;  %v4168_v15 = vadd.f32 %v15454_v62, %v3549_v21  ;;  %v15461_v14 = vld [vmem:[#allocation212_spill] sm:$0xff] }
 0x3d3   :  { %v6066_v35 = vadd.f32 %v13449_v27, %v6014_v22  ;;  %v6071_v34 = vadd.f32 %v13449_v27, %v6019_v57  ;;  %6339 = vmatpush.msrb.mxu3 %v13692_v33  ;;  %v5399_v59 = vadd.f32 %v15453_v28, %v15452_v58  ;;  %v3548_v1 = vadd.f32 %v15457_v43, %v2929_v50  ;;  %v15458_v57 = vld [vmem:[#allocation189_spill] sm:$0xff]  ;;  %v15468_v58 = vld [vmem:[#allocation142_spill] sm:$0xff] }
 0x3d4   :  { %v6068_v13 = vadd.f32 %v13449_v27, %v6016_v3  ;;  %v6117_v60 = vmax.f32 %v6069_v55, 0.0  ;;  %10018 = vmatmul.msk.f32.vlgmr.msrb.gmra.mxu3 %vm6156_vm4, %v13577_v4  ;;  %v3550_v3 = vadd.f32 %v15458_v57, %v2931_v41  ;;  %v4783_v55 = vadd.f32 %v15459_v12, %v4166_v19  ;;  %v15467_v19 = vld [vmem:[#allocation26_spill] sm:$0xff] }
 0x3d5   :  { %v6114_v30 = vmax.f32 %v6066_v35, 0.0  ;;  %v6119_v42 = vmax.f32 %v6071_v34, 0.0  ;;  %v15460_v35 = vld [vmem:[#allocation53_spill] sm:$0xff]  ;;  %v6145_v37 = vmax.f32 %v6113_v8, %v6115_v54  ;;  %v4167_v34 = vadd.f32 %v15461_v14, %v3548_v1  ;;  %v15466_v8 = vld [vmem:[#allocation54_spill] sm:$0xff] }
 0x3d6   :  { %v6116_v31 = vmax.f32 %v6068_v13, 0.0  ;;  %v4785_v18 = vadd.f32 %v15460_v35, %v4168_v15  ;;  %v4169_v2 = vadd.f32 %v15462_v51, %v3550_v3  ;;  %v5402_v21 = vadd.f32 %v15463_v5, %v4783_v55  ;;  %v15470_v15 = vld [vmem:[#allocation55_spill] sm:$0xff] }
 0x3d7   :  { %v5856_v25 = vpop.f32.mrf.mxu2  ;;  %v13758_v39 = vmax.f32 %v6117_v60, %v6119_v42  ;;  %v15464_v60 = vld [vmem:[#allocation134_spill] sm:$0xff]  ;;  %v5406_v28 = vadd.f32 %v15468_v58, %v15467_v19  ;;  %v5408_v20 = vadd.f32 %v15471_v52, %v15470_v15  ;;  %v13907_v52 = vld [vmem:[%s14590_s3] sm:$0xff] }
 0x3d8   :  { %v13756_v17 = vmax.f32 %v6114_v30, %v6116_v31  ;;  %v5899_v22 = vpop.f32.mrf.mxu0  ;;  %v6018_v45 = vadd.f32 %v5856_v25, %v5399_v59  ;;  %v5879_v36 = vpop.f32.mrf.mxu3  ;;  %v5404_v30 = vadd.f32 %v15464_v60, %v4785_v18  ;;  %v15465_v31 = vld [vmem:[#allocation59_spill] sm:$0xff]  ;;  %v4786_v54 = vadd.f32 %v15466_v8, %v4169_v2  ;;  %v15474_v60 = vld [vmem:[#allocation96_spill] sm:$0xff] }
 0x3d9   :  { %v5922_v49 = vpop.f32.mrf.mxu1  ;;  %v6020_v61 = vadd.f32 %v5879_v36, %v5401_v29  ;;  %v4784_v11 = vadd.f32 %v15465_v31, %v4167_v34  ;;  %v6021_v41 = vadd.f32 %v5899_v22, %v5402_v21  ;;  %v15469_v59 = vld [vmem:[#allocation143_spill] sm:$0xff] }
 0x3da   :  { %10019 = vmatpush.msk.msra.mxu0 %vm1547_vm3, %v13756_v17  ;;  %v6070_v13 = vadd.f32 %v13449_v27, %v6018_v45  ;;  %v6023_v32 = vadd.f32 %v5922_v49, %v5404_v30  ;;  %v15472_v29 = vld [vmem:[#allocation151_spill] sm:$0xff]  ;;  %v5409_v30 = vadd.f32 %v13435_v56, %v15474_v60 }
 0x3db   :  { %v6072_v42 = vadd.f32 %v13449_v27, %v6020_v61  ;;  %v5403_v62 = vadd.f32 %v15469_v59, %v4784_v11  ;;  %v5405_v25 = vadd.f32 %v15472_v29, %v4786_v54  ;;  %v6073_v36 = vadd.f32 %v13449_v27, %v6021_v41  ;;  %v13886_v19 = vld [vmem:[%s14590_s3 + $0x18] sm:$0xff] }
 0x3dc   :  { %6362 = vmatpush.msra.mxu0 %v6145_v37  ;;  %v6118_v50 = vmax.f32 %v6070_v13, 0.0  ;;  %v6075_v49 = vadd.f32 %v13449_v27, %v6023_v32 }
 0x3dd   :  { %10020 = vmatmul.msk.f32.vlgmr.msra.gmra.mxu0 %vm6156_vm4, %v13577_v4  ;;  %v6120_v40 = vmax.f32 %v6072_v42, 0.0  ;;  %v6121_v13 = vmax.f32 %v6073_v36, 0.0 }
 0x3de   :  { %10027 = vmatpush.msk.msrb.mxu0 %vm1547_vm3, %v13487_v44  ;;  %v6123_v51 = vmax.f32 %v6075_v49, 0.0 }
 0x3df   :  { %v6148_v43 = vmax.f32 %v6118_v50, %v6120_v40  ;;  %v5945_v1 = vpop.f32.mrf.mxu2 }
 0x3e0   :  { %6454 = vmatpush.msrb.mxu0 %v13497_v7  ;;  %v5902_v57 = vpop.f32.mrf.mxu0  ;;  %v6025_v22 = vadd.f32 %v5945_v1, %v5406_v28  ;;  %v5975_v3 = vpop.f32.mrf.mxu3  ;;  %v13793_v7 = vld [vmem:[%s14592_s5 + $0x8] sm:$0x7f]  ;;  %v13892_v28 = vld [vmem:[%s14590_s3 + $0x10] sm:$0xff] }
 0x3e1   :  { %v6022_v44 = vadd.f32 %v5902_v57, %v5403_v62  ;;  %v5925_v45 = vpop.f32.mrf.mxu1  ;;  %v6027_v12 = vadd.f32 %v5975_v3, %v5408_v20  ;;  %10021 = vmatpush.msk.msra.mxu1 %vm1547_vm3, %v6148_v43  ;;  %v13900_v62 = vld [vmem:[%s14590_s3 + $0x8] sm:$0xff] }
 0x3e2   :  { %10035 = vmatpush.msk.msra.mxu0 %vm1547_vm3, %v13624_v6  ;;  %v6024_v55 = vadd.f32 %v5925_v45, %v5405_v25  ;;  %v6077_v35 = vadd.f32 %v13449_v27, %v6025_v22 }
 0x3e3   :  { %v6074_v18 = vadd.f32 %v13449_v27, %v6022_v44  ;;  %v6079_v6 = vadd.f32 %v13449_v27, %v6027_v12  ;;  %6385 = vmatpush.msra.mxu1 %v13758_v39 }
 0x3e4   :  { %6534 = vmatpush.msra.mxu0 %v13634_v48  ;;  %v6076_v61 = vadd.f32 %v13449_v27, %v6024_v55  ;;  %v6125_v14 = vmax.f32 %v6077_v35, 0.0  ;;  %10022 = vmatmul.msk.f32.vlgmr.msra.gmra.mxu1 %vm6156_vm4, %v13577_v4  ;;  %v15473_v48 = vld [vmem:[#allocation19_spill] sm:$0xff] }
 0x3e5   :  { %v6122_v34 = vmax.f32 %v6074_v18, 0.0  ;;  %10028 = vmatmul.msk.f32.vlgmr.msrb.gmra.mxu0 %vm6156_vm4, %v13793_v7  ;;  %v6127_v2 = vmax.f32 %v6079_v6, 0.0  ;;  %10029 = vmatpush.msk.msrb.mxu1 %vm1547_vm3, %v13522_v23  ;;  %v5407_v21 = vadd.f32 %v13432_v9, %v15473_v48  ;;  %v10072_v48 = vld [vmem:[%s14590_s3 + $0x48] sm:$0xff] }
 0x3e6   :  { %v6124_v5 = vmax.f32 %v6076_v61, 0.0  ;;  %10043 = vmatpush.msk.msrb.mxu0 %vm1547_vm3, %v13756_v17  ;;  %v6149_v17 = vmax.f32 %v6121_v13, %v6123_v51 }
 0x3e7   :  { %6474 = vmatpush.msrb.mxu1 %v13489_v38  ;;  %v5948_v31 = vpop.f32.mrf.mxu2  ;;  %v6151_v11 = vmax.f32 %v6125_v14, %v6127_v2  ;;  %v10074_v2 = vld [vmem:[%s14590_s3 + $0x58] sm:$0xff] }
 0x3e8   :  { %v6150_v42 = vmax.f32 %v6122_v34, %v6124_v5  ;;  %6614 = vmatpush.msrb.mxu0 %v6145_v37  ;;  %v6026_v50 = vadd.f32 %v5948_v31, %v5407_v21  ;;  %v5978_v23 = vpop.f32.mrf.mxu3  ;;  %v10073_v5 = vld [vmem:[%s14590_s3 + $0x50] sm:$0xff]  ;;  %v10071_v21 = vld [vmem:[%s14590_s3 + $0x40] sm:$0xff] }
 0x3e9   :  { %10037 = vmatpush.msk.msra.mxu1 %vm1547_vm3, %v13661_v47  ;;  %v6028_v8 = vadd.f32 %v5978_v23, %v5409_v30  ;;  %v10086_v23 = vld [vmem:[%s14590_s3 + $0x78] sm:$0xff] }
 0x3ea   :  { %10023 = vmatpush.msk.msra.mxu2 %vm1547_vm3, %v6150_v42  ;;  %v6078_v9 = vadd.f32 %v13449_v27, %v6026_v50 }
 0x3eb   :  { %6554 = vmatpush.msra.mxu1 %v13626_v24  ;;  %v6080_v56 = vadd.f32 %v13449_v27, %v6028_v8  ;;  %v10054_v27 = vld [vmem:[%s14590_s3 + $0x38] sm:$0xff]  ;;  %v10085_v8 = vld [vmem:[%s14590_s3 + $0x70] sm:$0xff] }
 0x3ec   :  { %6408 = vmatpush.msra.mxu2 %v6149_v17  ;;  %v6126_v38 = vmax.f32 %v6078_v9, 0.0  ;;  %10030 = vmatmul.msk.f32.vlgmr.msrb.gmra.mxu1 %vm6156_vm4, %v13793_v7 }
 0x3ed   :  { %10024 = vmatmul.msk.f32.vlgmr.msra.gmra.mxu2 %vm6156_vm4, %v13577_v4  ;;  %v6128_v47 = vmax.f32 %v6080_v56, 0.0  ;;  %10045 = vmatpush.msk.msrb.mxu1 %vm1547_vm3, %v6148_v43  ;;  %v10083_v56 = vld [vmem:[%s14590_s3 + $0x60] sm:$0xff] }
 0x3ee   :  { %10031 = vmatpush.msk.msrb.mxu2 %vm1547_vm3, %v13549_v16  ;;  %10036 = vmatmul.msk.f32.vlgmr.msra.gmra.mxu0 %vm6156_vm4, %v13793_v7  ;;  %v10053_v16 = vld [vmem:[%s14590_s3 + $0x30] sm:$0xff] }
 0x3ef   :  { %v6152_v24 = vmax.f32 %v6126_v38, %v6128_v47  ;;  %6634 = vmatpush.msrb.mxu1 %v13758_v39  ;;  %6717 = vmatpush.msra.mxu0 %v10054_v27 }
 0x3f0   :  { %6494 = vmatpush.msrb.mxu2 %v13559_v46  ;;  %v10052_v46 = vld [vmem:[%s14590_s3 + $0x28] sm:$0xff] }
 0x3f1   :  { %10025 = vmatpush.msk.msra.mxu3 %vm1547_vm3, %v6152_v24  ;;  %6718 = vmatpush.msra.mxu0 %v10053_v16 }
 0x3f2   :  { %10039 = vmatpush.msk.msra.mxu2 %vm1547_vm3, %v13690_v26 }
 0x3f3   :  { %6431 = vmatpush.msra.mxu3 %v6151_v11  ;;  %6719 = vmatpush.msra.mxu0 %v10052_v46 }
 0x3f4   :  { %6574 = vmatpush.msra.mxu2 %v13700_v63  ;;  %10026 = vmatmul.msk.f32.vlgmr.msra.gmra.mxu3 %vm6156_vm4, %v13577_v4  ;;  %v10051_v4 = vld [vmem:[%s14590_s3 + $0x20] sm:$0xff] }
 0x3f5   :  { %10038 = vmatmul.msk.f32.vlgmr.msra.gmra.mxu1 %vm6156_vm4, %v13793_v7  ;;  %10033 = vmatpush.msk.msrb.mxu3 %vm1547_vm3, %v13593_v53 }
 0x3f6   :  { %10032 = vmatmul.msk.f32.vlgmr.msrb.gmra.mxu2 %vm6156_vm4, %v13793_v7  ;;  %10044 = vmatmul.msk.f32.vlgmr.msrb.gmra.mxu0 %vm6156_vm4, %v13793_v7 }
 0x3f7   :  { %10047 = vmatpush.msk.msrb.mxu2 %vm1547_vm3, %v6150_v42  ;;  %6514 = vmatpush.msrb.mxu3 %v13551_v0 }
 0x3f8   :  { %6741 = vmatpush.msra.mxu1 %v10054_v27  ;;  %6720 = vmatpush.msra.mxu0 %v10051_v4 }
 0x3f9   :  { %10041 = vmatpush.msk.msra.mxu3 %vm1547_vm3, %v13727_v10  ;;  %6654 = vmatpush.msrb.mxu2 %v6149_v17  ;;  %v10084_v17 = vld [vmem:[%s14590_s3 + $0x68] sm:$0xff] }
 0x3fa   :  { %6742 = vmatpush.msra.mxu1 %v10053_v16  ;;  %6813 = vmatpush.msrb.mxu0 %v10054_v27 }
 0x3fb   :  { %6594 = vmatpush.msra.mxu3 %v13692_v33 }
 0x3fc   :  { %10034 = vmatmul.msk.f32.vlgmr.msrb.gmra.mxu3 %vm6156_vm4, %v13793_v7  ;;  %6743 = vmatpush.msra.mxu1 %v10052_v46 }
 0x3fd   :  { %10046 = vmatmul.msk.f32.vlgmr.msrb.gmra.mxu1 %vm6156_vm4, %v13793_v7  ;;  %10049 = vmatpush.msk.msrb.mxu3 %vm1547_vm3, %v6152_v24  ;;  %v10098_v24 = vld [vmem:[%s14590_s3 + $0x98] sm:$0xff] }
 0x3fe   :  { %10040 = vmatmul.msk.f32.vlgmr.msra.gmra.mxu2 %vm6156_vm4, %v13793_v7  ;;  %6744 = vmatpush.msra.mxu1 %v10051_v4 }
 0x3ff   :  { %6674 = vmatpush.msrb.mxu3 %v6151_v11  ;;  %6765 = vmatpush.msra.mxu2 %v10054_v27 }
 0x400   :  { %6814 = vmatpush.msrb.mxu0 %v10053_v16  ;;  %6837 = vmatpush.msrb.mxu1 %v10054_v27 }
 0x401   :  { %6766 = vmatpush.msra.mxu2 %v10053_v16 }
 0x402   :  { %6815 = vmatpush.msrb.mxu0 %v10052_v46  ;;  %6838 = vmatpush.msrb.mxu1 %v10053_v16 }
 0x403   :  { %6767 = vmatpush.msra.mxu2 %v10052_v46 }
 0x404   :  { %10042 = vmatmul.msk.f32.vlgmr.msra.gmra.mxu3 %vm6156_vm4, %v13793_v7  ;;  %6816 = vmatpush.msrb.mxu0 %v10051_v4 }
 0x405   :  { %6789 = vmatpush.msra.mxu3 %v10054_v27  ;;  %6768 = vmatpush.msra.mxu2 %v10051_v4 }
 0x406   :  { %10048 = vmatmul.msk.f32.vlgmr.msrb.gmra.mxu2 %vm6156_vm4, %v13793_v7  ;;  %6839 = vmatpush.msrb.mxu1 %v10052_v46 }
 0x407   :  { %6790 = vmatpush.msra.mxu3 %v10053_v16  ;;  %6861 = vmatpush.msrb.mxu2 %v10054_v27 }
 0x408   :  { %6840 = vmatpush.msrb.mxu1 %v10051_v4 }
 0x409   :  { %6791 = vmatpush.msra.mxu3 %v10052_v46  ;;  %6862 = vmatpush.msrb.mxu2 %v10053_v16 }
 0x40b   :  { %6792 = vmatpush.msra.mxu3 %v10051_v4  ;;  %6863 = vmatpush.msrb.mxu2 %v10052_v46 }
 0x40c   :  { %10050 = vmatmul.msk.f32.vlgmr.msrb.gmra.mxu3 %vm6156_vm4, %v13793_v7 }
 0x40d   :  { %6885 = vmatpush.msrb.mxu3 %v10054_v27  ;;  %6864 = vmatpush.msrb.mxu2 %v10051_v4  ;;  %v10097_v27 = vld [vmem:[%s14590_s3 + $0x90] sm:$0xff] }
 0x40f   :  { %6886 = vmatpush.msrb.mxu3 %v10053_v16 }
 0x411   :  { %6887 = vmatpush.msrb.mxu3 %v10052_v46  ;;  %v10095_v46 = vld [vmem:[%s14590_s3 + $0x80] sm:$0xff] }
 0x413   :  { %6888 = vmatpush.msrb.mxu3 %v10051_v4 }
 0x424   :  { %v6180_v0 = vpop.f32.mrf.mxu0  ;;  %v6203_v53 = vpop.f32.mrf.mxu1 }
 0x430   :  { %v6226_v10 = vpop.f32.mrf.mxu2 }
 0x437   :  { %v6249_v40 = vpop.f32.mrf.mxu3 }
 0x43a   :  { %v13875_v26 = vpop.f32.mrf.mxu0 }
 0x441   :  { %v13877_v33 = vpop.f32.mrf.mxu1 }
 0x450   :  { %v6318_v32 = vpop.f32.mrf.mxu2 }
 0x457   :  { %v6341_v20 = vpop.f32.mrf.mxu3 }
 0x45a   :  { %v6364_v63 = vpop.f32.mrf.mxu0 }
 0x461   :  { %v6387_v39 = vpop.f32.mrf.mxu1 }
 0x462   :  { %v6456_v37 = vpop.f32.mrf.mxu0 }
 0x463   :  { %v13879_v54 = vmax.f32 %v6180_v0, %v6456_v37  ;;  %v10096_v0 = vld [vmem:[%s14590_s3 + $0x88] sm:$0xff] }
 0x465   :  { %v6701_v41 = vrot.slane %v13879_v54, 1  ;;  %v7074_v60 = vrot.slane %v13879_v54, 2 }
 0x467   :  { %10055 = vmatmul.msk.f32.vlgmr.msra.gmra.mxu0 %vm6702_vm5, %v6701_v41  ;;  %v10121_v41 = vld [vmem:[%s14590_s3 + $0xd0] sm:$0xff] }
 0x468   :  { %6907 = vmatpush.msra.mxu0 %v13886_v19 }
 0x469   :  { %v6476_v58 = vpop.f32.mrf.mxu1 }
 0x46a   :  { %v13894_v59 = vmax.f32 %v6203_v53, %v6476_v58  ;;  %6908 = vmatpush.msra.mxu0 %v13892_v28 }
 0x46b   :  { %v13917_v25 = vpop.f32.mrf.mxu0 }
 0x46c   :  { %v6726_v15 = vrot.slane %v13894_v59, 1  ;;  %6909 = vmatpush.msra.mxu0 %v13900_v62  ;;  %v7097_v42 = vrot.slane %v13894_v59, 2  ;;  %v14065_v47 = vmax.f32 %v13875_v26, %v13917_v25  ;;  %v10110_v26 = vld [vmem:[%s14590_s3 + $0xb8] sm:$0xff] }
 0x46e   :  { %10056 = vmatmul.msk.f32.vlgmr.msra.gmra.mxu1 %vm6702_vm5, %v6726_v15  ;;  %6910 = vmatpush.msra.mxu0 %v13907_v52  ;;  %v7510_v53 = vrot.slane %v14065_v47, 1 }
 0x46f   :  { %6929 = vmatpush.msra.mxu1 %v13886_v19 }
 0x470   :  { %v13913_v29 = vpop.f32.mrf.mxu2 }
 0x471   :  { %6930 = vmatpush.msra.mxu1 %v13892_v28 }
 0x472   :  { %v13923_v57 = vpop.f32.mrf.mxu1 }
 0x473   :  { %6931 = vmatpush.msra.mxu1 %v13900_v62  ;;  %v6616_v44 = vpop.f32.mrf.mxu0 }
 0x474   :  { %v13933_v45 = vmax.f32 %v6364_v63, %v6616_v44  ;;  %v10109_v63 = vld [vmem:[%s14590_s3 + $0xb0] sm:$0xff] }
 0x475   :  { %6932 = vmatpush.msra.mxu1 %v13907_v52 }
 0x476   :  { %v13945_v35 = vrot.slane %v13933_v45, 1  ;;  %v14028_v50 = vrot.slane %v13933_v45, 2 }
 0x477   :  { %v13921_v43 = vpop.f32.mrf.mxu3 }
 0x479   :  { %v6496_v1 = vpop.f32.mrf.mxu2 }
 0x47a   :  { %v13925_v22 = vmax.f32 %v6226_v10, %v6496_v1  ;;  %v6636_v18 = vpop.f32.mrf.mxu1  ;;  %v10108_v10 = vld [vmem:[%s14590_s3 + $0xa8] sm:$0xff] }
 0x47b   :  { %v13954_v61 = vmax.f32 %v6387_v39, %v6636_v18  ;;  %v10107_v39 = vld [vmem:[%s14590_s3 + $0xa0] sm:$0xff] }
 0x47c   :  { %v13928_v3 = vrot.slane %v13925_v22, 1  ;;  %v14013_v30 = vrot.slane %v13925_v22, 2 }
 0x47d   :  { %v13965_v13 = vrot.slane %v13954_v61, 1  ;;  %v14052_v38 = vrot.slane %v13954_v61, 2 }
 0x47e   :  { %10057 = vmatmul.msk.f32.vlgmr.msra.gmra.mxu2 %vm6702_vm5, %v13928_v3 }
 0x47f   :  { %6951 = vmatpush.msra.mxu2 %v13886_v19  ;;  %v6516_v36 = vpop.f32.mrf.mxu3 }
 0x480   :  { %v13935_v49 = vmax.f32 %v6249_v40, %v6516_v36  ;;  %v10122_v40 = vld [vmem:[%s14590_s3 + $0xd8] sm:$0xff]  ;;  %v10145_v36 = vld [vmem:[%s14590_s3 + $0x110] sm:$0xff] }
 0x481   :  { %v6576_v12 = vpop.f32.mrf.mxu2  ;;  %6952 = vmatpush.msra.mxu2 %v13892_v28 }
 0x482   :  { %v13938_v55 = vmax.f32 %v6318_v32, %v6576_v12  ;;  %v13941_v7 = vrot.slane %v13935_v49, 1  ;;  %v14024_v31 = vrot.slane %v13935_v49, 2  ;;  %v10120_v32 = vld [vmem:[%s14590_s3 + $0xc8] sm:$0xff] }
 0x483   :  { %6953 = vmatpush.msra.mxu2 %v13900_v62  ;;  %v10144_v12 = vld [vmem:[%s14590_s3 + $0x108] sm:$0xff] }
 0x484   :  { %v6798_v6 = vrot.slane %v13938_v55, 1  ;;  %10058 = vmatmul.msk.f32.vlgmr.msra.gmra.mxu3 %vm6702_vm5, %v13941_v7  ;;  %v7166_v11 = vrot.slane %v13938_v55, 2 }
 0x485   :  { %6954 = vmatpush.msra.mxu2 %v13907_v52  ;;  %6973 = vmatpush.msra.mxu3 %v13886_v19 }
 0x486   :  { %10059 = vmatmul.msk.f32.vlgmr.msrb.gmra.mxu0 %vm6702_vm5, %v6798_v6  ;;  %10061 = vmatmul.msk.f32.vlgmr.msrb.gmra.mxu2 %vm6702_vm5, %v13945_v35 }
 0x487   :  { %6995 = vmatpush.msrb.mxu0 %v13886_v19  ;;  %v6596_v14 = vpop.f32.mrf.mxu3  ;;  %7039 = vmatpush.msrb.mxu2 %v13886_v19 }
 0x488   :  { %v13959_v34 = vmax.f32 %v6341_v20, %v6596_v14  ;;  %6974 = vmatpush.msra.mxu3 %v13892_v28  ;;  %v10131_v20 = vld [vmem:[%s14590_s3 + $0xe0] sm:$0xff] }
 0x489   :  { %6996 = vmatpush.msrb.mxu0 %v13892_v28  ;;  %7040 = vmatpush.msrb.mxu2 %v13892_v28  ;;  %v6656_v16 = vpop.f32.mrf.mxu2 }
 0x48a   :  { %v6822_v51 = vrot.slane %v13959_v34, 1  ;;  %6975 = vmatpush.msra.mxu3 %v13900_v62  ;;  %v7189_v9 = vrot.slane %v13959_v34, 2  ;;  %v14088_v4 = vmax.f32 %v13913_v29, %v6656_v16 }
 0x48b   :  { %6997 = vmatpush.msrb.mxu0 %v13900_v62  ;;  %7041 = vmatpush.msrb.mxu2 %v13900_v62 }
 0x48c   :  { %10060 = vmatmul.msk.f32.vlgmr.msrb.gmra.mxu1 %vm6702_vm5, %v6822_v51  ;;  %10062 = vmatmul.msk.f32.vlgmr.msrb.gmra.mxu3 %vm6702_vm5, %v13965_v13  ;;  %v7593_v37 = vrot.slane %v14088_v4, 1  ;;  %v7772_v58 = vrot.slane %v14088_v4, 2 }
 0x48d   :  { %6976 = vmatpush.msra.mxu3 %v13907_v52  ;;  %6998 = vmatpush.msrb.mxu0 %v13907_v52 }
 0x48e   :  { %10063 = vmatmul.msk.f32.vlgmr.msra.gmra.mxu0 %vm6702_vm5, %v13879_v54  ;;  %10065 = vmatmul.msk.f32.vlgmr.msra.gmra.mxu2 %vm6702_vm5, %v13925_v22  ;;  %v7689_v54 = vrot.slane %v14065_v47, 2 }
 0x48f   :  { %7017 = vmatpush.msrb.mxu1 %v13886_v19  ;;  %7042 = vmatpush.msrb.mxu2 %v13907_v52 }
 0x490   :  { %7061 = vmatpush.msrb.mxu3 %v13886_v19  ;;  %7089 = vmatpush.msra.mxu0 %v10074_v2  ;;  %v10119_v19 = vld [vmem:[%s14590_s3 + $0xc0] sm:$0xff] }
 0x491   :  { %7018 = vmatpush.msrb.mxu1 %v13892_v28  ;;  %7135 = vmatpush.msra.mxu2 %v10074_v2 }
 0x492   :  { %7062 = vmatpush.msrb.mxu3 %v13892_v28  ;;  %7090 = vmatpush.msra.mxu0 %v10073_v5  ;;  %v14168_v28 = vmax.f32 %v13877_v33, %v13923_v57  ;;  %v10133_v33 = vld [vmem:[%s14590_s3 + $0xf0] sm:$0xff] }
 0x493   :  { %7019 = vmatpush.msrb.mxu1 %v13900_v62  ;;  %7136 = vmatpush.msra.mxu2 %v10073_v5 }
 0x494   :  { %10064 = vmatmul.msk.f32.vlgmr.msra.gmra.mxu1 %vm6702_vm5, %v13894_v59  ;;  %10066 = vmatmul.msk.f32.vlgmr.msra.gmra.mxu3 %vm6702_vm5, %v13935_v49  ;;  %v8047_v57 = vrot.slane %v14168_v28, 1 }
 0x495   :  { %7063 = vmatpush.msrb.mxu3 %v13900_v62  ;;  %7020 = vmatpush.msrb.mxu1 %v13907_v52  ;;  %v6676_v62 = vpop.f32.mrf.mxu3 }
 0x496   :  { %10067 = vmatmul.msk.f32.vlgmr.msrb.gmra.mxu0 %vm6702_vm5, %v13938_v55  ;;  %10069 = vmatmul.msk.f32.vlgmr.msrb.gmra.mxu2 %vm6702_vm5, %v13933_v45  ;;  %v14193_v29 = vmax.f32 %v13921_v43, %v6676_v62  ;;  %v10143_v55 = vld [vmem:[%s14590_s3 + $0x100] sm:$0xff] }
 0x497   :  { %7091 = vmatpush.msra.mxu0 %v10072_v48  ;;  %7137 = vmatpush.msra.mxu2 %v10072_v48 }
 0x498   :  { %7064 = vmatpush.msrb.mxu3 %v13907_v52  ;;  %7112 = vmatpush.msra.mxu1 %v10074_v2 }
 0x499   :  { %7092 = vmatpush.msra.mxu0 %v10071_v21  ;;  %7138 = vmatpush.msra.mxu2 %v10071_v21 }
 0x49a   :  { %7158 = vmatpush.msra.mxu3 %v10074_v2  ;;  %7113 = vmatpush.msra.mxu1 %v10073_v5 }
 0x49b   :  { %7181 = vmatpush.msrb.mxu0 %v10074_v2  ;;  %7227 = vmatpush.msrb.mxu2 %v10074_v2 }
 0x49c   :  { %10068 = vmatmul.msk.f32.vlgmr.msrb.gmra.mxu1 %vm6702_vm5, %v13959_v34  ;;  %10070 = vmatmul.msk.f32.vlgmr.msrb.gmra.mxu3 %vm6702_vm5, %v13954_v61 }
 0x49d   :  { %7159 = vmatpush.msra.mxu3 %v10073_v5  ;;  %7114 = vmatpush.msra.mxu1 %v10072_v48 }
 0x49e   :  { %10075 = vmatmul.msk.f32.vlgmr.msra.gmra.mxu0 %vm6702_vm5, %v7074_v60  ;;  %10077 = vmatmul.msk.f32.vlgmr.msra.gmra.mxu2 %vm6702_vm5, %v14013_v30 }
 0x49f   :  { %7182 = vmatpush.msrb.mxu0 %v10073_v5  ;;  %7228 = vmatpush.msrb.mxu2 %v10073_v5 }
 0x4a0   :  { %7160 = vmatpush.msra.mxu3 %v10072_v48  ;;  %7115 = vmatpush.msra.mxu1 %v10071_v21 }
 0x4a1   :  { %7183 = vmatpush.msrb.mxu0 %v10072_v48  ;;  %7229 = vmatpush.msrb.mxu2 %v10072_v48 }
 0x4a2   :  { %7161 = vmatpush.msra.mxu3 %v10071_v21  ;;  %7204 = vmatpush.msrb.mxu1 %v10074_v2 }
 0x4a3   :  { %7184 = vmatpush.msrb.mxu0 %v10071_v21  ;;  %7230 = vmatpush.msrb.mxu2 %v10071_v21 }
 0x4a4   :  { %10076 = vmatmul.msk.f32.vlgmr.msra.gmra.mxu1 %vm6702_vm5, %v7097_v42  ;;  %10078 = vmatmul.msk.f32.vlgmr.msra.gmra.mxu3 %vm6702_vm5, %v14024_v31 }
 0x4a5   :  { %7250 = vmatpush.msrb.mxu3 %v10074_v2  ;;  %7205 = vmatpush.msrb.mxu1 %v10073_v5 }
 0x4a6   :  { %10079 = vmatmul.msk.f32.vlgmr.msrb.gmra.mxu0 %vm6702_vm5, %v7166_v11  ;;  %10081 = vmatmul.msk.f32.vlgmr.msrb.gmra.mxu2 %vm6702_vm5, %v14028_v50 }
 0x4a7   :  { %7251 = vmatpush.msrb.mxu3 %v10073_v5  ;;  %7283 = vmatpush.msra.mxu0 %v10086_v23 }
 0x4a8   :  { %7323 = vmatpush.msra.mxu2 %v10086_v23  ;;  %7206 = vmatpush.msrb.mxu1 %v10072_v48 }
 0x4a9   :  { %7252 = vmatpush.msrb.mxu3 %v10072_v48  ;;  %7284 = vmatpush.msra.mxu0 %v10085_v8 }
 0x4aa   :  { %7324 = vmatpush.msra.mxu2 %v10085_v8  ;;  %7207 = vmatpush.msrb.mxu1 %v10071_v21 }
 0x4ab   :  { %7253 = vmatpush.msrb.mxu3 %v10071_v21  ;;  %7285 = vmatpush.msra.mxu0 %v10084_v17 }
 0x4ac   :  { %7325 = vmatpush.msra.mxu2 %v10084_v17  ;;  %10080 = vmatmul.msk.f32.vlgmr.msrb.gmra.mxu1 %vm6702_vm5, %v7189_v9 }
 0x4ad   :  { %10082 = vmatmul.msk.f32.vlgmr.msrb.gmra.mxu3 %vm6702_vm5, %v14052_v38  ;;  %7286 = vmatpush.msra.mxu0 %v10083_v56 }
 0x4ae   :  { %7303 = vmatpush.msra.mxu1 %v10086_v23  ;;  %7326 = vmatpush.msra.mxu2 %v10083_v56 }
 0x4af   :  { %7346 = vmatpush.msra.mxu3 %v10086_v23  ;;  %10087 = vmatmul.msk.f32.vlgmr.msra.gmra.mxu0 %vm6702_vm5, %v13894_v59  ;;  %v10134_v59 = vld [vmem:[%s14590_s3 + $0xf8] sm:$0xff] }
 0x4b0   :  { %10089 = vmatmul.msk.f32.vlgmr.msra.gmra.mxu2 %vm6702_vm5, %v13935_v49  ;;  %7304 = vmatpush.msra.mxu1 %v10085_v8 }
 0x4b1   :  { %7347 = vmatpush.msra.mxu3 %v10085_v8  ;;  %7366 = vmatpush.msrb.mxu0 %v10086_v23 }
 0x4b2   :  { %7406 = vmatpush.msrb.mxu2 %v10086_v23  ;;  %7305 = vmatpush.msra.mxu1 %v10084_v17 }
 0x4b3   :  { %7348 = vmatpush.msra.mxu3 %v10084_v17  ;;  %7367 = vmatpush.msrb.mxu0 %v10085_v8 }
 0x4b4   :  { %7407 = vmatpush.msrb.mxu2 %v10085_v8  ;;  %7306 = vmatpush.msra.mxu1 %v10083_v56 }
 0x4b5   :  { %7349 = vmatpush.msra.mxu3 %v10083_v56  ;;  %7368 = vmatpush.msrb.mxu0 %v10084_v17 }
 0x4b6   :  { %7408 = vmatpush.msrb.mxu2 %v10084_v17  ;;  %10088 = vmatmul.msk.f32.vlgmr.msra.gmra.mxu1 %vm6702_vm5, %v13925_v22 }
 0x4b7   :  { %10090 = vmatmul.msk.f32.vlgmr.msra.gmra.mxu3 %vm6702_vm5, %v14065_v47  ;;  %7369 = vmatpush.msrb.mxu0 %v10083_v56 }
 0x4b8   :  { %7386 = vmatpush.msrb.mxu1 %v10086_v23  ;;  %7409 = vmatpush.msrb.mxu2 %v10083_v56 }
 0x4b9   :  { %7429 = vmatpush.msrb.mxu3 %v10086_v23  ;;  %10091 = vmatmul.msk.f32.vlgmr.msrb.gmra.mxu0 %vm6702_vm5, %v13959_v34 }
 0x4ba   :  { %10093 = vmatmul.msk.f32.vlgmr.msrb.gmra.mxu2 %vm6702_vm5, %v13954_v61  ;;  %7387 = vmatpush.msrb.mxu1 %v10085_v8 }
 0x4bb   :  { %7430 = vmatpush.msrb.mxu3 %v10085_v8  ;;  %7462 = vmatpush.msra.mxu0 %v10098_v24 }
 0x4bc   :  { %7502 = vmatpush.msra.mxu2 %v10098_v24  ;;  %7388 = vmatpush.msrb.mxu1 %v10084_v17 }
 0x4bd   :  { %7431 = vmatpush.msrb.mxu3 %v10084_v17  ;;  %7463 = vmatpush.msra.mxu0 %v10097_v27 }
 0x4be   :  { %7503 = vmatpush.msra.mxu2 %v10097_v27  ;;  %7389 = vmatpush.msrb.mxu1 %v10083_v56 }
 0x4bf   :  { %7432 = vmatpush.msrb.mxu3 %v10083_v56  ;;  %7464 = vmatpush.msra.mxu0 %v10096_v0 }
 0x4c0   :  { %7504 = vmatpush.msra.mxu2 %v10096_v0  ;;  %10092 = vmatmul.msk.f32.vlgmr.msrb.gmra.mxu1 %vm6702_vm5, %v13933_v45 }
 0x4c1   :  { %10094 = vmatmul.msk.f32.vlgmr.msrb.gmra.mxu3 %vm6702_vm5, %v14088_v4  ;;  %7465 = vmatpush.msra.mxu0 %v10095_v46 }
 0x4c2   :  { %7482 = vmatpush.msra.mxu1 %v10098_v24  ;;  %7505 = vmatpush.msra.mxu2 %v10095_v46 }
 0x4c3   :  { %7525 = vmatpush.msra.mxu3 %v10098_v24  ;;  %10099 = vmatmul.msk.f32.vlgmr.msra.gmra.mxu0 %vm6702_vm5, %v6726_v15  ;;  %v10132_v15 = vld [vmem:[%s14590_s3 + $0xe8] sm:$0xff] }
 0x4c4   :  { %10101 = vmatmul.msk.f32.vlgmr.msra.gmra.mxu2 %vm6702_vm5, %v13941_v7  ;;  %7483 = vmatpush.msra.mxu1 %v10097_v27 }
 0x4c5   :  { %7526 = vmatpush.msra.mxu3 %v10097_v27  ;;  %7545 = vmatpush.msrb.mxu0 %v10098_v24 }
 0x4c6   :  { %7585 = vmatpush.msrb.mxu2 %v10098_v24  ;;  %7484 = vmatpush.msra.mxu1 %v10096_v0 }
 0x4c7   :  { %7527 = vmatpush.msra.mxu3 %v10096_v0  ;;  %7546 = vmatpush.msrb.mxu0 %v10097_v27 }
 0x4c8   :  { %7586 = vmatpush.msrb.mxu2 %v10097_v27  ;;  %7485 = vmatpush.msra.mxu1 %v10095_v46 }
 0x4c9   :  { %7528 = vmatpush.msra.mxu3 %v10095_v46  ;;  %7547 = vmatpush.msrb.mxu0 %v10096_v0 }
 0x4ca   :  { %7587 = vmatpush.msrb.mxu2 %v10096_v0  ;;  %10100 = vmatmul.msk.f32.vlgmr.msra.gmra.mxu1 %vm6702_vm5, %v13928_v3 }
 0x4cb   :  { %10102 = vmatmul.msk.f32.vlgmr.msra.gmra.mxu3 %vm6702_vm5, %v7510_v53  ;;  %7548 = vmatpush.msrb.mxu0 %v10095_v46 }
 0x4cc   :  { %7565 = vmatpush.msrb.mxu1 %v10098_v24  ;;  %7588 = vmatpush.msrb.mxu2 %v10095_v46 }
 0x4cd   :  { %7608 = vmatpush.msrb.mxu3 %v10098_v24  ;;  %10103 = vmatmul.msk.f32.vlgmr.msrb.gmra.mxu0 %vm6702_vm5, %v6822_v51 }
 0x4ce   :  { %10105 = vmatmul.msk.f32.vlgmr.msrb.gmra.mxu2 %vm6702_vm5, %v13965_v13  ;;  %7566 = vmatpush.msrb.mxu1 %v10097_v27 }
 0x4cf   :  { %7609 = vmatpush.msrb.mxu3 %v10097_v27  ;;  %7641 = vmatpush.msra.mxu0 %v10110_v26 }
 0x4d0   :  { %7681 = vmatpush.msra.mxu2 %v10110_v26  ;;  %7567 = vmatpush.msrb.mxu1 %v10096_v0 }
 0x4d1   :  { %7610 = vmatpush.msrb.mxu3 %v10096_v0  ;;  %7642 = vmatpush.msra.mxu0 %v10109_v63 }
 0x4d2   :  { %7682 = vmatpush.msra.mxu2 %v10109_v63  ;;  %7568 = vmatpush.msrb.mxu1 %v10095_v46 }
 0x4d3   :  { %7611 = vmatpush.msrb.mxu3 %v10095_v46  ;;  %7643 = vmatpush.msra.mxu0 %v10108_v10 }
 0x4d4   :  { %7683 = vmatpush.msra.mxu2 %v10108_v10  ;;  %10104 = vmatmul.msk.f32.vlgmr.msrb.gmra.mxu1 %vm6702_vm5, %v13945_v35 }
 0x4d5   :  { %10106 = vmatmul.msk.f32.vlgmr.msrb.gmra.mxu3 %vm6702_vm5, %v7593_v37  ;;  %7644 = vmatpush.msra.mxu0 %v10107_v39 }
 0x4d6   :  { %7661 = vmatpush.msra.mxu1 %v10110_v26  ;;  %7684 = vmatpush.msra.mxu2 %v10107_v39 }
 0x4d7   :  { %7704 = vmatpush.msra.mxu3 %v10110_v26  ;;  %10111 = vmatmul.msk.f32.vlgmr.msra.gmra.mxu0 %vm6702_vm5, %v7097_v42 }
 0x4d8   :  { %10113 = vmatmul.msk.f32.vlgmr.msra.gmra.mxu2 %vm6702_vm5, %v14024_v31  ;;  %7662 = vmatpush.msra.mxu1 %v10109_v63 }
 0x4d9   :  { %7705 = vmatpush.msra.mxu3 %v10109_v63  ;;  %7724 = vmatpush.msrb.mxu0 %v10110_v26 }
 0x4da   :  { %7764 = vmatpush.msrb.mxu2 %v10110_v26  ;;  %7663 = vmatpush.msra.mxu1 %v10108_v10 }
 0x4db   :  { %7706 = vmatpush.msra.mxu3 %v10108_v10  ;;  %7725 = vmatpush.msrb.mxu0 %v10109_v63 }
 0x4dc   :  { %7765 = vmatpush.msrb.mxu2 %v10109_v63  ;;  %7664 = vmatpush.msra.mxu1 %v10107_v39 }
 0x4dd   :  { %7707 = vmatpush.msra.mxu3 %v10107_v39  ;;  %7726 = vmatpush.msrb.mxu0 %v10108_v10 }
 0x4de   :  { %7766 = vmatpush.msrb.mxu2 %v10108_v10  ;;  %10112 = vmatmul.msk.f32.vlgmr.msra.gmra.mxu1 %vm6702_vm5, %v14013_v30 }
 0x4df   :  { %10114 = vmatmul.msk.f32.vlgmr.msra.gmra.mxu3 %vm6702_vm5, %v7689_v54  ;;  %7727 = vmatpush.msrb.mxu0 %v10107_v39 }
 0x4e0   :  { %7744 = vmatpush.msrb.mxu1 %v10110_v26  ;;  %7767 = vmatpush.msrb.mxu2 %v10107_v39 }
 0x4e1   :  { %7787 = vmatpush.msrb.mxu3 %v10110_v26  ;;  %10115 = vmatmul.msk.f32.vlgmr.msrb.gmra.mxu0 %vm6702_vm5, %v7189_v9 }
 0x4e2   :  { %10117 = vmatmul.msk.f32.vlgmr.msrb.gmra.mxu2 %vm6702_vm5, %v14052_v38  ;;  %7745 = vmatpush.msrb.mxu1 %v10109_v63 }
 0x4e3   :  { %7788 = vmatpush.msrb.mxu3 %v10109_v63  ;;  %7820 = vmatpush.msra.mxu0 %v10122_v40 }
 0x4e4   :  { %7860 = vmatpush.msra.mxu2 %v10122_v40  ;;  %7746 = vmatpush.msrb.mxu1 %v10108_v10  ;;  %v14187_v52 = vpop.f32.mrf.mxu0 }
 0x4e5   :  { %7789 = vmatpush.msrb.mxu3 %v10108_v10  ;;  %7821 = vmatpush.msra.mxu0 %v10121_v41 }
 0x4e6   :  { %7861 = vmatpush.msra.mxu2 %v10121_v41  ;;  %7747 = vmatpush.msrb.mxu1 %v10107_v39 }
 0x4e7   :  { %7790 = vmatpush.msrb.mxu3 %v10107_v39  ;;  %7822 = vmatpush.msra.mxu0 %v10120_v32 }
 0x4e8   :  { %7862 = vmatpush.msra.mxu2 %v10120_v32  ;;  %10116 = vmatmul.msk.f32.vlgmr.msrb.gmra.mxu1 %vm6702_vm5, %v14028_v50 }
 0x4e9   :  { %10118 = vmatmul.msk.f32.vlgmr.msrb.gmra.mxu3 %vm6702_vm5, %v7772_v58  ;;  %7823 = vmatpush.msra.mxu0 %v10119_v19 }
 0x4ea   :  { %7840 = vmatpush.msra.mxu1 %v10122_v40  ;;  %7863 = vmatpush.msra.mxu2 %v10119_v19 }
 0x4eb   :  { %7883 = vmatpush.msra.mxu3 %v10122_v40  ;;  %10123 = vmatmul.msk.f32.vlgmr.msra.gmra.mxu0 %vm6702_vm5, %v13925_v22  ;;  %v14206_v43 = vpop.f32.mrf.mxu1 }
 0x4ec   :  { %10125 = vmatmul.msk.f32.vlgmr.msra.gmra.mxu2 %vm6702_vm5, %v14065_v47  ;;  %7841 = vmatpush.msra.mxu1 %v10121_v41 }
 0x4ed   :  { %7884 = vmatpush.msra.mxu3 %v10121_v41  ;;  %7903 = vmatpush.msrb.mxu0 %v10122_v40 }
 0x4ee   :  { %7943 = vmatpush.msrb.mxu2 %v10122_v40  ;;  %7842 = vmatpush.msra.mxu1 %v10120_v32 }
 0x4ef   :  { %7885 = vmatpush.msra.mxu3 %v10120_v32  ;;  %7904 = vmatpush.msrb.mxu0 %v10121_v41 }
 0x4f0   :  { %7944 = vmatpush.msrb.mxu2 %v10121_v41  ;;  %7843 = vmatpush.msra.mxu1 %v10119_v19 }
 0x4f1   :  { %7886 = vmatpush.msra.mxu3 %v10119_v19  ;;  %7905 = vmatpush.msrb.mxu0 %v10120_v32 }
 0x4f2   :  { %7945 = vmatpush.msrb.mxu2 %v10120_v32  ;;  %10124 = vmatmul.msk.f32.vlgmr.msra.gmra.mxu1 %vm6702_vm5, %v13935_v49 }
 0x4f3   :  { %10126 = vmatmul.msk.f32.vlgmr.msra.gmra.mxu3 %vm6702_vm5, %v14168_v28  ;;  %7906 = vmatpush.msrb.mxu0 %v10119_v19 }
 0x4f4   :  { %7923 = vmatpush.msrb.mxu1 %v10122_v40  ;;  %7946 = vmatpush.msrb.mxu2 %v10119_v19 }
 0x4f5   :  { %7966 = vmatpush.msrb.mxu3 %v10122_v40  ;;  %10127 = vmatmul.msk.f32.vlgmr.msrb.gmra.mxu0 %vm6702_vm5, %v13933_v45 }
 0x4f6   :  { %10129 = vmatmul.msk.f32.vlgmr.msrb.gmra.mxu2 %vm6702_vm5, %v14088_v4  ;;  %7924 = vmatpush.msrb.mxu1 %v10121_v41 }
 0x4f7   :  { %7967 = vmatpush.msrb.mxu3 %v10121_v41  ;;  %7999 = vmatpush.msra.mxu0 %v10134_v59 }
 0x4f8   :  { %8039 = vmatpush.msra.mxu2 %v10134_v59  ;;  %7925 = vmatpush.msrb.mxu1 %v10120_v32 }
 0x4f9   :  { %7968 = vmatpush.msrb.mxu3 %v10120_v32  ;;  %8000 = vmatpush.msra.mxu0 %v10133_v33 }
 0x4fa   :  { %8040 = vmatpush.msra.mxu2 %v10133_v33  ;;  %7926 = vmatpush.msrb.mxu1 %v10119_v19 }
 0x4fb   :  { %7969 = vmatpush.msrb.mxu3 %v10119_v19  ;;  %8001 = vmatpush.msra.mxu0 %v10132_v15 }
 0x4fc   :  { %8041 = vmatpush.msra.mxu2 %v10132_v15  ;;  %10128 = vmatmul.msk.f32.vlgmr.msrb.gmra.mxu1 %vm6702_vm5, %v13954_v61 }
 0x4fd   :  { %10130 = vmatmul.msk.f32.vlgmr.msrb.gmra.mxu3 %vm6702_vm5, %v14193_v29  ;;  %8002 = vmatpush.msra.mxu0 %v10131_v20 }
 0x4fe   :  { %8019 = vmatpush.msra.mxu1 %v10134_v59  ;;  %8042 = vmatpush.msra.mxu2 %v10131_v20 }
 0x4ff   :  { %8062 = vmatpush.msra.mxu3 %v10134_v59  ;;  %10135 = vmatmul.msk.f32.vlgmr.msra.gmra.mxu0 %vm6702_vm5, %v13928_v3  ;;  %v10146_v3 = vld [vmem:[%s14590_s3 + $0x118] sm:$0xff]  ;;  %s10324_s3 = smov 16  }
 0x500   :  { %10137 = vmatmul.msk.f32.vlgmr.msra.gmra.mxu2 %vm6702_vm5, %v7510_v53  ;;  %8020 = vmatpush.msra.mxu1 %v10133_v33 }
 0x501   :  { %v14204_v25 = vpop.f32.mrf.mxu2  ;;  %8063 = vmatpush.msra.mxu3 %v10133_v33  ;;  %8082 = vmatpush.msrb.mxu0 %v10134_v59 }
 0x502   :  { %8122 = vmatpush.msrb.mxu2 %v10134_v59  ;;  %8021 = vmatpush.msra.mxu1 %v10132_v15 }
 0x503   :  { %v14208_v1 = vpop.f32.mrf.mxu0  ;;  %8064 = vmatpush.msra.mxu3 %v10132_v15  ;;  %8083 = vmatpush.msrb.mxu0 %v10133_v33 }
 0x504   :  { %8123 = vmatpush.msrb.mxu2 %v10133_v33  ;;  %8022 = vmatpush.msra.mxu1 %v10131_v20 }
 0x505   :  { %8065 = vmatpush.msra.mxu3 %v10131_v20  ;;  %8084 = vmatpush.msrb.mxu0 %v10132_v15 }
 0x506   :  { %8124 = vmatpush.msrb.mxu2 %v10132_v15  ;;  %10136 = vmatmul.msk.f32.vlgmr.msra.gmra.mxu1 %vm6702_vm5, %v13941_v7  ;;  %v8130_v7 = vrot.slane %v14193_v29, 1 }
 0x507   :  { %10138 = vmatmul.msk.f32.vlgmr.msra.gmra.mxu3 %vm6702_vm5, %v8047_v57  ;;  %8085 = vmatpush.msrb.mxu0 %v10131_v20  ;;  %v14214_v22 = vpop.f32.mrf.mxu3 }
 0x508   :  { %8102 = vmatpush.msrb.mxu1 %v10134_v59  ;;  %8125 = vmatpush.msrb.mxu2 %v10131_v20 }
 0x509   :  { %v14219_v44 = vpop.f32.mrf.mxu2  ;;  %8145 = vmatpush.msrb.mxu3 %v10134_v59  ;;  %10139 = vmatmul.msk.f32.vlgmr.msrb.gmra.mxu0 %vm6702_vm5, %v13945_v35  ;;  %v14223_v45 = vpop.f32.mrf.mxu1 }
 0x50a   :  { %10141 = vmatmul.msk.f32.vlgmr.msrb.gmra.mxu2 %vm6702_vm5, %v7593_v37  ;;  %8103 = vmatpush.msrb.mxu1 %v10133_v33 }
 0x50b   :  { %v14231_v49 = vpop.f32.mrf.mxu0  ;;  %8146 = vmatpush.msrb.mxu3 %v10133_v33  ;;  %8178 = vmatpush.msra.mxu0 %v10146_v3 }
 0x50c   :  { %8218 = vmatpush.msra.mxu2 %v10146_v3  ;;  %8104 = vmatpush.msrb.mxu1 %v10132_v15  ;;  %v6913_v8 = vadd.f32 %v14231_v49, %v14187_v52 }
 0x50d   :  { %8147 = vmatpush.msrb.mxu3 %v10132_v15  ;;  %8179 = vmatpush.msra.mxu0 %v10145_v36 }
 0x50e   :  { %8219 = vmatpush.msra.mxu2 %v10145_v36  ;;  %8105 = vmatpush.msrb.mxu1 %v10131_v20 }
 0x50f   :  { %8148 = vmatpush.msrb.mxu3 %v10131_v20  ;;  %8180 = vmatpush.msra.mxu0 %v10144_v12  ;;  %v14240_v35 = vpop.f32.mrf.mxu3 }
 0x510   :  { %8220 = vmatpush.msra.mxu2 %v10144_v12  ;;  %10140 = vmatmul.msk.f32.vlgmr.msrb.gmra.mxu1 %vm6702_vm5, %v13965_v13  ;;  %v8226_v13 = vrot.slane %v14168_v28, 2 }
 0x511   :  { %v14244_v18 = vpop.f32.mrf.mxu2  ;;  %10142 = vmatmul.msk.f32.vlgmr.msrb.gmra.mxu3 %vm6702_vm5, %v8130_v7  ;;  %8181 = vmatpush.msra.mxu0 %v10143_v55  ;;  %v6934_v6 = vpop.f32.mrf.mxu1 }
 0x512   :  { %8198 = vmatpush.msra.mxu1 %v10146_v3  ;;  %8221 = vmatpush.msra.mxu2 %v10143_v55  ;;  %v6935_v0 = vadd.f32 %v6934_v6, %v14206_v43  ;;  %v6957_v46 = vadd.f32 %v14244_v18, %v14204_v25 }
 0x513   :  { %v7000_v61 = vpop.f32.mrf.mxu0  ;;  %8241 = vmatpush.msra.mxu3 %v10146_v3  ;;  %10147 = vmatmul.msk.f32.vlgmr.msra.gmra.mxu0 %vm6702_vm5, %v14013_v30  ;;  %v8309_v30 = vrot.slane %v14193_v29, 2 }
 0x514   :  { %10149 = vmatmul.msk.f32.vlgmr.msra.gmra.mxu2 %vm6702_vm5, %v7689_v54  ;;  %8199 = vmatpush.msra.mxu1 %v10145_v36  ;;  %v7001_v21 = vadd.f32 %v7000_v61, %v14208_v1 }
 0x515   :  { %8242 = vmatpush.msra.mxu3 %v10145_v36  ;;  %8261 = vmatpush.msrb.mxu0 %v10146_v3 }
 0x516   :  { %8301 = vmatpush.msrb.mxu2 %v10146_v3  ;;  %8200 = vmatpush.msra.mxu1 %v10144_v12 }
 0x517   :  { %8243 = vmatpush.msra.mxu3 %v10144_v12  ;;  %8262 = vmatpush.msrb.mxu0 %v10145_v36  ;;  %v6978_v14 = vpop.f32.mrf.mxu3 }
 0x518   :  { %8302 = vmatpush.msrb.mxu2 %v10145_v36  ;;  %8201 = vmatpush.msra.mxu1 %v10143_v55  ;;  %v6979_v41 = vadd.f32 %v6978_v14, %v14214_v22 }
 0x519   :  { %v7044_v34 = vpop.f32.mrf.mxu2  ;;  %8244 = vmatpush.msra.mxu3 %v10143_v55  ;;  %8263 = vmatpush.msrb.mxu0 %v10144_v12  ;;  %v7022_v51 = vpop.f32.mrf.mxu1 }
 0x51a   :  { %8303 = vmatpush.msrb.mxu2 %v10144_v12  ;;  %10148 = vmatmul.msk.f32.vlgmr.msra.gmra.mxu1 %vm6702_vm5, %v14024_v31  ;;  %v7045_v23 = vadd.f32 %v7044_v34, %v14219_v44 }
 0x51b   :  { %v7094_v2 = vpop.f32.mrf.mxu0  ;;  %10150 = vmatmul.msk.f32.vlgmr.msra.gmra.mxu3 %vm6702_vm5, %v8226_v13  ;;  %8264 = vmatpush.msrb.mxu0 %v10143_v55 }
 0x51c   :  { %8281 = vmatpush.msrb.mxu1 %v10146_v3  ;;  %8304 = vmatpush.msrb.mxu2 %v10143_v55  ;;  %v7258_v24 = vadd.f32 %v7094_v2, %v6913_v8 }
 0x51d   :  { %8324 = vmatpush.msrb.mxu3 %v10146_v3  ;;  %10151 = vmatmul.msk.f32.vlgmr.msrb.gmra.mxu0 %vm6702_vm5, %v14028_v50  ;;  %v7023_v50 = vadd.f32 %v7022_v51, %v14223_v45 }
 0x51e   :  { %10153 = vmatmul.msk.f32.vlgmr.msrb.gmra.mxu2 %vm6702_vm5, %v7772_v58  ;;  %8282 = vmatpush.msrb.mxu1 %v10145_v36 }
 0x51f   :  { %8325 = vmatpush.msrb.mxu3 %v10145_v36  ;;  %v7066_v5 = vpop.f32.mrf.mxu3 }
 0x520   :  { %8283 = vmatpush.msrb.mxu1 %v10144_v12 }
 0x521   :  { %v7140_v48 = vpop.f32.mrf.mxu2  ;;  %8326 = vmatpush.msrb.mxu3 %v10144_v12  ;;  %v7117_v60 = vpop.f32.mrf.mxu1 }
 0x522   :  { %8284 = vmatpush.msrb.mxu1 %v10143_v55  ;;  %v7259_v26 = vadd.f32 %v7117_v60, %v6935_v0  ;;  %v7260_v63 = vadd.f32 %v7140_v48, %v6957_v46  ;;  %v14288_v0 = vld [vmem:[%s14591_s4] ss:$0 sm:$0xff] }
 0x523   :  { %v7186_v42 = vpop.f32.mrf.mxu0  ;;  %8327 = vmatpush.msrb.mxu3 %v10143_v55  ;;  %10152 = vmatmul.msk.f32.vlgmr.msrb.gmra.mxu1 %vm6702_vm5, %v14052_v38  ;;  %v7067_v38 = vadd.f32 %v7066_v5, %v14240_v35 }
 0x524   :  { %v7262_v31 = vadd.f32 %v7186_v42, %v7001_v21  ;;  %10154 = vmatmul.msk.f32.vlgmr.msrb.gmra.mxu3 %vm6702_vm5, %v8309_v30 }
 0x527   :  { %v7163_v11 = vpop.f32.mrf.mxu3 }
 0x528   :  { %v7261_v19 = vadd.f32 %v7163_v11, %v6979_v41 }
 0x529   :  { %v7209_v17 = vpop.f32.mrf.mxu1  ;;  %v7232_v9 = vpop.f32.mrf.mxu2 }
 0x52a   :  { %v7263_v56 = vadd.f32 %v7209_v17, %v7023_v50  ;;  %v7264_v47 = vadd.f32 %v7232_v9, %v7045_v23 }
 0x52c   :  { %v7288_v27 = vpop.f32.mrf.mxu0 }
 0x52d   :  { %v7437_v16 = vadd.f32 %v7288_v27, %v7258_v24 }
 0x530   :  { %v7255_v4 = vpop.f32.mrf.mxu3 }
 0x531   :  { %v7265_v53 = vadd.f32 %v7255_v4, %v7067_v38 }
 0x533   :  { %v7308_v10 = vpop.f32.mrf.mxu1  ;;  %v7328_v39 = vpop.f32.mrf.mxu2 }
 0x534   :  { %v7438_v37 = vadd.f32 %v7308_v10, %v7259_v26  ;;  %v7439_v54 = vadd.f32 %v7328_v39, %v7260_v63 }
 0x536   :  { %v7371_v40 = vpop.f32.mrf.mxu0 }
 0x537   :  { %v7441_v32 = vadd.f32 %v7371_v40, %v7262_v31 }
 0x53a   :  { %v7351_v58 = vpop.f32.mrf.mxu3 }
 0x53b   :  { %v7440_v28 = vadd.f32 %v7351_v58, %v7261_v19 }
 0x53d   :  { %v7391_v59 = vpop.f32.mrf.mxu1  ;;  %v7411_v33 = vpop.f32.mrf.mxu2 }
 0x53e   :  { %v7442_v62 = vadd.f32 %v7391_v59, %v7263_v56  ;;  %v14275_v15 = vadd.f32 %v7411_v33, %v7264_v47 }
 0x540   :  { %v7467_v52 = vpop.f32.mrf.mxu0 }
 0x541   :  { %v7616_v31 = vadd.f32 %v7467_v52, %v7437_v16 }
 0x544   :  { %v7434_v20 = vpop.f32.mrf.mxu3 }
 0x545   :  { %v14277_v29 = vadd.f32 %v7434_v20, %v7265_v53 }
 0x547   :  { %v7487_v25 = vpop.f32.mrf.mxu1  ;;  %v7507_v43 = vpop.f32.mrf.mxu2 }
 0x548   :  { %v7617_v8 = vadd.f32 %v7487_v25, %v7438_v37  ;;  %v7618_v24 = vadd.f32 %v7507_v43, %v7439_v54 }
 0x54a   :  { %v7550_v1 = vpop.f32.mrf.mxu0 }
 0x54b   :  { %v7620_v4 = vadd.f32 %v7550_v1, %v7441_v32 }
 0x54e   :  { %v7530_v57 = vpop.f32.mrf.mxu3 }
 0x54f   :  { %v7619_v26 = vadd.f32 %v7530_v57, %v7440_v28 }
 0x551   :  { %v7570_v3 = vpop.f32.mrf.mxu1  ;;  %v7590_v44 = vpop.f32.mrf.mxu2 }
 0x552   :  { %v7621_v54 = vadd.f32 %v7570_v3, %v7442_v62  ;;  %v7622_v28 = vadd.f32 %v7590_v44, %v14275_v15 }
 0x554   :  { %v7646_v22 = vpop.f32.mrf.mxu0 }
 0x555   :  { %v7795_v23 = vadd.f32 %v7646_v22, %v7616_v31 }
 0x558   :  { %v14279_v45 = vpop.f32.mrf.mxu3 }
 0x559   :  { %v7623_v15 = vadd.f32 %v14279_v45, %v14277_v29  ;;  %v14310_v29 = vld [vmem:[#allocation2 + $0x150] sm:$0xff] }
 0x55b   :  { %v7666_v36 = vpop.f32.mrf.mxu1  ;;  %v7686_v49 = vpop.f32.mrf.mxu2 }
 0x55c   :  { %v7796_v56 = vadd.f32 %v7666_v36, %v7617_v8  ;;  %v7797_v53 = vadd.f32 %v7686_v49, %v7618_v24  ;;  %v8598_v24 = vld [vmem:[#allocation2 + $0x170] sm:$0xff] }
 0x55e   :  { %v7729_v12 = vpop.f32.mrf.mxu0 }
 0x55f   :  { %v7799_v63 = vadd.f32 %v7729_v12, %v7620_v4  ;;  %v8595_v4 = vld [vmem:[#allocation2 + $0x158] sm:$0xff] }
 0x562   :  { %v7709_v55 = vpop.f32.mrf.mxu3 }
 0x563   :  { %v7798_v19 = vadd.f32 %v7709_v55, %v7619_v26  ;;  %v14296_v55 = vld [vmem:[%s14593_s6] sm:$0x3] }
 0x565   :  { %v7749_v7 = vpop.f32.mrf.mxu1  ;;  %v7769_v35 = vpop.f32.mrf.mxu2 }
 0x566   :  { %v7800_v20 = vadd.f32 %v7749_v7, %v7621_v54  ;;  %v7801_v12 = vadd.f32 %v7769_v35, %v7622_v28  ;;  %v14302_v35 = vld [vmem:[#allocation2 + $0x168] sm:$0xff]  ;;  %v8582_v54 = vld [vmem:[#allocation2 + $0xf0] sm:$0xff] }
 0x567   :  { %v14349_v28 = vld [vmem:[#allocation2 + $0xa8] sm:$0xff] }
 0x568   :  { %v7825_v18 = vpop.f32.mrf.mxu0 }
 0x569   :  { %v7974_v17 = vadd.f32 %v7825_v18, %v7795_v23 }
 0x56c   :  { %v14281_v6 = vpop.f32.mrf.mxu3 }
 0x56f   :  { %v7845_v61 = vpop.f32.mrf.mxu1  ;;  %v7865_v14 = vpop.f32.mrf.mxu2 }
 0x570   :  { %v7975_v27 = vadd.f32 %v7845_v61, %v7796_v56  ;;  %v7976_v10 = vadd.f32 %v7865_v14, %v7797_v53  ;;  %v8596_v53 = vld [vmem:[#allocation2 + $0x160] sm:$0xff] }
 0x572   :  { %v7908_v34 = vpop.f32.mrf.mxu0 }
 0x573   :  { %v7978_v58 = vadd.f32 %v7908_v34, %v7799_v63 }
 0x576   :  { %v7888_v13 = vpop.f32.mrf.mxu3 }
 0x577   :  { %v7977_v25 = vadd.f32 %v7888_v13, %v7798_v19  ;;  %v8587_v19 = vld [vmem:[#allocation2 + $0x118] sm:$0xff] }
 0x579   :  { %v7928_v51 = vpop.f32.mrf.mxu1  ;;  %v7948_v2 = vpop.f32.mrf.mxu2 }
 0x57a   :  { %v7979_v22 = vadd.f32 %v7928_v51, %v7800_v20  ;;  %v7980_v44 = vadd.f32 %v7948_v2, %v7801_v12  ;;  %v8576_v20 = vld [vmem:[#allocation2 + $0xc0] sm:$0xff]  ;;  %v8554_v12 = vld [vmem:[#allocation2 + $0x18] sm:$0xff] }
 0x57c   :  { %v8004_v5 = vpop.f32.mrf.mxu0 }
 0x57d   :  { %v8153_v47 = vadd.f32 %v8004_v5, %v7974_v17 }
 0x580   :  { %v14283_v48 = vpop.f32.mrf.mxu3 }
 0x583   :  { %v8024_v21 = vpop.f32.mrf.mxu1  ;;  %v8044_v60 = vpop.f32.mrf.mxu2 }
 0x584   :  { %v8154_v16 = vadd.f32 %v8024_v21, %v7975_v27  ;;  %v8155_v59 = vadd.f32 %v8044_v60, %v7976_v10  ;;  %v7802_v21 = vadd.f32 %v14281_v6, %v7623_v15  ;;  %v8599_v27 = vld [vmem:[#allocation2 + $0x178] sm:$0xff]  ;;  %v8592_v10 = vld [vmem:[#allocation2 + $0x140] sm:$0xff] }
 0x585   :  { %v8558_v15 = vld [vmem:[#allocation2 + $0x38] sm:$0xff] }
 0x586   :  { %v8087_v30 = vpop.f32.mrf.mxu0 }
 0x587   :  { %v8157_v32 = vadd.f32 %v8087_v30, %v7978_v58  ;;  %v8583_v58 = vld [vmem:[#allocation2 + $0xf8] sm:$0xff] }
 0x58a   :  { %v8067_v42 = vpop.f32.mrf.mxu3 }
 0x58b   :  { %v8156_v36 = vadd.f32 %v8067_v42, %v7977_v25  ;;  %v7981_v42 = vadd.f32 %v14283_v48, %v7802_v21  ;;  %v8581_v25 = vld [vmem:[#allocation2 + $0xe8] sm:$0xff]  ;;  %v8571_v21 = vld [vmem:[#allocation2 + $0xa0] sm:$0xff] }
 0x58d   :  { %v8107_v11 = vpop.f32.mrf.mxu1  ;;  %v8127_v50 = vpop.f32.mrf.mxu2 }
 0x58e   :  { %v8158_v7 = vadd.f32 %v8107_v11, %v7979_v22  ;;  %v8159_v60 = vadd.f32 %v8127_v50, %v7980_v44  ;;  %v14315_v11 = vld [vmem:[#allocation2 + $0x138] sm:$0xff]  ;;  %v14321_v50 = vld [vmem:[%s14593_s6 + $0x2] sm:$0x3] }
 0x58f   :  { %v8563_v22 = vld [vmem:[#allocation2 + $0x60] sm:$0xff] }
 0x590   :  { %v8183_v9 = vpop.f32.mrf.mxu0  ;;  %v8555_v44 = vld [vmem:[#allocation2 + $0x20] sm:$0xff] }
 0x591   :  { %v8332_v38 = vadd.f32 %v8183_v9, %v8153_v47 }
 0x593   :  { %v8344_v40 = vadd.f32 %v14288_v0, %v8332_v38  ;;  %v14330_v38 = vld [vmem:[#allocation2 + $0x120] sm:$0xff] }
 0x594   :  { %v8150_v46 = vpop.f32.mrf.mxu3 }
 0x595   :  { %v8352_v1 = vmax.f32 %v8344_v40, 0.0  ;;  %v8160_v6 = vadd.f32 %v8150_v46, %v7981_v42  ;;  %v8590_v40 = vld [vmem:[#allocation2 + $0x130] sm:$0xff] }
 0x597   :  { %v8203_v39 = vpop.f32.mrf.mxu1  ;;  %v8223_v37 = vpop.f32.mrf.mxu2 }
 0x598   :  { %v8333_v41 = vadd.f32 %v8203_v39, %v8154_v16  ;;  %v8334_v43 = vadd.f32 %v8223_v37, %v8155_v59  ;;  %v8585_v16 = vld [vmem:[#allocation2 + $0x108] sm:$0xff]  ;;  %v8579_v59 = vld [vmem:[#allocation2 + $0xd8] sm:$0xff] }
 0x599   :  { %v8589_v37 = vld [vmem:[#allocation2 + $0x128] sm:$0xff] }
 0x59a   :  { %v8345_v33 = vadd.f32 %v14288_v0, %v8333_v41  ;;  %v8266_v52 = vpop.f32.mrf.mxu0  ;;  %v8346_v18 = vadd.f32 %v14288_v0, %v8334_v43  ;;  %v8586_v41 = vld [vmem:[#allocation2 + $0x110] sm:$0xff] }
 0x59b   :  { %v8336_v49 = vadd.f32 %v8266_v52, %v8157_v32  ;;  %v8580_v52 = vld [vmem:[#allocation2 + $0xe0] sm:$0xff]  ;;  %v8577_v32 = vld [vmem:[#allocation2 + $0xc8] sm:$0xff]  ;;  %v8578_v43 = vld [vmem:[#allocation2 + $0xd0] sm:$0xff] }
 0x59c   :  { %v8353_v57 = vmax.f32 %v8345_v33, 0.0  ;;  %v8354_v45 = vmax.f32 %v8346_v18, 0.0  ;;  %v8584_v33 = vld [vmem:[#allocation2 + $0x100] sm:$0xff]  ;;  %v8564_v18 = vld [vmem:[#allocation2 + $0x68] sm:$0xff] }
 0x59d   :  { %v8348_v34 = vadd.f32 %v14288_v0, %v8336_v49  ;;  %v8557_v49 = vld [vmem:[#allocation2 + $0x30] sm:$0xff] }
 0x59e   :  { %v8360_v62 = vmax.f32 %v8352_v1, %v8353_v57  ;;  %v8246_v3 = vpop.f32.mrf.mxu3  ;;  %v8569_v1 = vld [vmem:[#allocation2 + $0x90] sm:$0xff]  ;;  %v8566_v57 = vld [vmem:[#allocation2 + $0x78] sm:$0xff] }
 0x59f   :  { %v8335_v61 = vadd.f32 %v8246_v3, %v8156_v36  ;;  %v8356_v23 = vmax.f32 %v8348_v34, 0.0  ;;  %v8560_v36 = vld [vmem:[#allocation2 + $0x48] sm:$0xff]  ;;  %v8573_v3 = vld [vmem:[#allocation2 + $0xb0] sm:$0xff] }
 0x5a0   :  { %v8286_v14 = vpop.f32.mrf.mxu1  ;;  %10156 = vmatpush.msk.msra.mxu0 %vm8371_vm6, %v8360_v62 }
 0x5a1   :  { %v8347_v13 = vadd.f32 %v14288_v0, %v8335_v61  ;;  %v8337_v51 = vadd.f32 %v8286_v14, %v8158_v7  ;;  %v8306_v5 = vpop.f32.mrf.mxu2  ;;  %10157 = vmatmul.msk.f32.vlgmr.msra.gmra.mxu0 %vm8367_vm7, %v14296_v55  ;;  %v8567_v7 = vld [vmem:[#allocation2 + $0x80] sm:$0xff]  ;;  %v8561_v61 = vld [vmem:[#allocation2 + $0x50] sm:$0xff]  ;;  %v8552_v14 = vld [vmem:[#allocation2 + $0x8] sm:$0xff] }
 0x5a2   :  { %10164 = vmatpush.msk.msrb.mxu0 %vm8371_vm6, %v8360_v62  ;;  %v8338_v31 = vadd.f32 %v8306_v5, %v8159_v60  ;;  %v14356_v62 = vld [vmem:[#allocation2] sm:$0xff]  ;;  %v8574_v5 = vld [vmem:[#allocation2 + $0xb8] sm:$0xff] }
 0x5a3   :  { %v8355_v2 = vmax.f32 %v8347_v13, 0.0  ;;  %v8349_v30 = vadd.f32 %v14288_v0, %v8337_v51 }
 0x5a4   :  { %8613 = vmatpush.msra.mxu0 %v14302_v35  ;;  %v8350_v48 = vadd.f32 %v14288_v0, %v8338_v31  ;;  %v14370_v31 = vld [vmem:[#allocation2 + $0x28] sm:$0xff] }
 0x5a5   :  { %v8361_v8 = vmax.f32 %v8354_v45, %v8355_v2  ;;  %v8357_v17 = vmax.f32 %v8349_v30, 0.0  ;;  %v8565_v45 = vld [vmem:[#allocation2 + $0x70] sm:$0xff]  ;;  %v8562_v2 = vld [vmem:[#allocation2 + $0x58] sm:$0xff]  ;;  %v14366_v30 = vld [vmem:[#allocation2 + $0x40] sm:$0xff] }
 0x5a6   :  { %8614 = vmatpush.msra.mxu0 %v14310_v29  ;;  %v8358_v26 = vmax.f32 %v8350_v48, 0.0  ;;  %v14397_v48 = vld [vmem:[#allocation2 + $0x220] sm:$0xff] }
 0x5a7   :  { %v8362_v9 = vmax.f32 %v8356_v23, %v8357_v17  ;;  %v8329_v56 = vpop.f32.mrf.mxu3  ;;  %10158 = vmatpush.msk.msra.mxu1 %vm8371_vm6, %v8361_v8  ;;  %v14381_v17 = vld [vmem:[#allocation2 + $0x228] sm:$0xff] }
 0x5a8   :  { %8615 = vmatpush.msra.mxu0 %v14315_v11  ;;  %v8339_v47 = vadd.f32 %v8329_v56, %v8160_v6  ;;  %10159 = vmatmul.msk.f32.vlgmr.msra.gmra.mxu1 %vm8367_vm7, %v14296_v55  ;;  %v14385_v6 = vld [vmem:[#allocation2 + $0x230] sm:$0xff]  ;;  %v14393_v56 = vld [vmem:[#allocation2 + $0x218] sm:$0xff] }
 0x5a9   :  { %10166 = vmatpush.msk.msrb.mxu1 %vm8371_vm6, %v8361_v8  ;;  %10160 = vmatpush.msk.msra.mxu2 %vm8371_vm6, %v8362_v9  ;;  %v14377_v8 = vld [vmem:[#allocation2 + $0x10] sm:$0xff] }
 0x5aa   :  { %10165 = vmatmul.msk.f32.vlgmr.msrb.gmra.mxu0 %vm8367_vm7, %v14321_v50  ;;  %v8351_v46 = vadd.f32 %v14288_v0, %v8339_v47  ;;  %10161 = vmatmul.msk.f32.vlgmr.msra.gmra.mxu2 %vm8367_vm7, %v14296_v55  ;;  %v8593_v0 = vld [vmem:[#allocation2 + $0x148] sm:$0xff] }
 0x5ab   :  { %10168 = vmatpush.msk.msrb.mxu2 %vm8371_vm6, %v8362_v9  ;;  %8633 = vmatpush.msra.mxu1 %v8598_v24  ;;  %v14391_v9 = vld [vmem:[#allocation2 + $0x210] sm:$0xff] }
 0x5ac   :  { %v8359_v63 = vmax.f32 %v8351_v46, 0.0  ;;  %8616 = vmatpush.msra.mxu0 %v14330_v38  ;;  %v14410_v46 = vld [vmem:[#allocation2 + $0x1e0] sm:$0xff] }
 0x5ad   :  { %8653 = vmatpush.msra.mxu2 %v8599_v27  ;;  %8634 = vmatpush.msra.mxu1 %v8595_v4 }
 0x5ae   :  { %v8363_v39 = vmax.f32 %v8358_v26, %v8359_v63  ;;  %8617 = vmatpush.msra.mxu0 %v8585_v16  ;;  %v8864_v26 = vld [vmem:[#allocation2 + $0x1d0] sm:$0xff]  ;;  %v8865_v63 = vld [vmem:[#allocation2 + $0x1d8] sm:$0xff] }
 0x5af   :  { %8654 = vmatpush.msra.mxu2 %v8596_v53  ;;  %8635 = vmatpush.msra.mxu1 %v8592_v10 }
 0x5b0   :  { %10162 = vmatpush.msk.msra.mxu3 %vm8371_vm6, %v8363_v39  ;;  %10167 = vmatmul.msk.f32.vlgmr.msrb.gmra.mxu1 %vm8367_vm7, %v14321_v50 }
 0x5b1   :  { %8655 = vmatpush.msra.mxu2 %v8593_v0  ;;  %8636 = vmatpush.msra.mxu1 %v8589_v37 }
 0x5b2   :  { %10170 = vmatpush.msk.msrb.mxu3 %vm8371_vm6, %v8363_v39  ;;  %10169 = vmatmul.msk.f32.vlgmr.msrb.gmra.mxu2 %vm8367_vm7, %v14321_v50  ;;  %v8862_v39 = vld [vmem:[#allocation2 + $0x1c0] sm:$0xff] }
 0x5b3   :  { %10163 = vmatmul.msk.f32.vlgmr.msra.gmra.mxu3 %vm8367_vm7, %v14296_v55  ;;  %8656 = vmatpush.msra.mxu2 %v8590_v40  ;;  %v8570_v55 = vld [vmem:[#allocation2 + $0x98] sm:$0xff] }
 0x5b4   :  { %8637 = vmatpush.msra.mxu1 %v8586_v41  ;;  %8618 = vmatpush.msra.mxu0 %v8582_v54 }
 0x5b5   :  { %8657 = vmatpush.msra.mxu2 %v8587_v19  ;;  %8677 = vmatpush.msra.mxu3 %v14302_v35 }
 0x5b6   :  { %8638 = vmatpush.msra.mxu1 %v8583_v58  ;;  %8619 = vmatpush.msra.mxu0 %v8579_v59 }
 0x5b7   :  { %8658 = vmatpush.msra.mxu2 %v8584_v33  ;;  %8678 = vmatpush.msra.mxu3 %v14310_v29  ;;  %v8568_v29 = vld [vmem:[#allocation2 + $0x88] sm:$0xff] }
 0x5b8   :  { %8639 = vmatpush.msra.mxu1 %v8580_v52  ;;  %8620 = vmatpush.msra.mxu0 %v8576_v20 }
 0x5b9   :  { %8659 = vmatpush.msra.mxu2 %v8581_v25  ;;  %8679 = vmatpush.msra.mxu3 %v14315_v11 }
 0x5ba   :  { %8697 = vmatpush.msrb.mxu0 %v8598_v24  ;;  %8640 = vmatpush.msra.mxu1 %v8577_v32  ;;  %v14401_v24 = vld [vmem:[#allocation2 + $0x1f8] sm:$0xff] }
 0x5bb   :  { %10171 = vmatmul.msk.f32.vlgmr.msrb.gmra.mxu3 %vm8367_vm7, %v14321_v50  ;;  %8660 = vmatpush.msra.mxu2 %v8578_v43  ;;  %v14387_v50 = vld [vmem:[#allocation2 + $0x238] sm:$0xff] }
 0x5bc   :  { %8717 = vmatpush.msrb.mxu1 %v8599_v27  ;;  %8698 = vmatpush.msrb.mxu0 %v8595_v4  ;;  %v14403_v27 = vld [vmem:[#allocation2 + $0x200] sm:$0xff]  ;;  %v14412_v4 = vld [vmem:[#allocation2 + $0x1e8] sm:$0xff] }
 0x5bd   :  { %8739 = vmatpush.msrb.mxu2 %v14349_v28  ;;  %8680 = vmatpush.msra.mxu3 %v14330_v38  ;;  %v14407_v38 = vld [vmem:[#allocation2 + $0x208] sm:$0xff] }
 0x5be   :  { %8718 = vmatpush.msrb.mxu1 %v8596_v53  ;;  %8699 = vmatpush.msrb.mxu0 %v8592_v10  ;;  %v8868_v53 = vld [vmem:[#allocation2 + $0x1f0] sm:$0xff] }
 0x5bf   :  { %8681 = vmatpush.msra.mxu3 %v8585_v16  ;;  %8740 = vmatpush.msrb.mxu2 %v8569_v1  ;;  %v8863_v16 = vld [vmem:[#allocation2 + $0x1c8] sm:$0xff]  ;;  %v8860_v10 = vld [vmem:[#allocation2 + $0x1b0] sm:$0xff] }
 0x5c0   :  { %8719 = vmatpush.msrb.mxu1 %v8593_v0  ;;  %8700 = vmatpush.msrb.mxu0 %v8589_v37  ;;  %v8861_v0 = vld [vmem:[#allocation2 + $0x1b8] sm:$0xff] }
 0x5c1   :  { %8682 = vmatpush.msra.mxu3 %v8582_v54  ;;  %8741 = vmatpush.msrb.mxu2 %v8566_v57  ;;  %v8859_v54 = vld [vmem:[#allocation2 + $0x1a8] sm:$0xff] }
 0x5c2   :  { %8720 = vmatpush.msrb.mxu1 %v8590_v40  ;;  %8701 = vmatpush.msrb.mxu0 %v8586_v41  ;;  %v8857_v40 = vld [vmem:[#allocation2 + $0x198] sm:$0xff]  ;;  %v8858_v41 = vld [vmem:[#allocation2 + $0x1a0] sm:$0xff] }
 0x5c3   :  { %8683 = vmatpush.msra.mxu3 %v8579_v59  ;;  %8742 = vmatpush.msrb.mxu2 %v8563_v22  ;;  %v8855_v59 = vld [vmem:[#allocation2 + $0x188] sm:$0xff] }
 0x5c4   :  { %8721 = vmatpush.msrb.mxu1 %v8587_v19  ;;  %8702 = vmatpush.msrb.mxu0 %v8583_v58  ;;  %v8854_v19 = vld [vmem:[#allocation2 + $0x180] sm:$0xff] }
 0x5c5   :  { %8684 = vmatpush.msra.mxu3 %v8576_v20  ;;  %8743 = vmatpush.msrb.mxu2 %v8560_v36 }
 0x5c6   :  { %8722 = vmatpush.msrb.mxu1 %v8584_v33  ;;  %8703 = vmatpush.msrb.mxu0 %v8580_v52  ;;  %v8856_v33 = vld [vmem:[#allocation2 + $0x190] sm:$0xff]  ;;  %v9032_v52 = vld [vmem:[#allocation2 + $0x2e8] sm:$0xff] }
 0x5c7   :  { %8744 = vmatpush.msrb.mxu2 %v8557_v49  ;;  %8759 = vmatpush.msrb.mxu3 %v8573_v3 }
 0x5c8   :  { %8723 = vmatpush.msrb.mxu1 %v8581_v25  ;;  %8704 = vmatpush.msrb.mxu0 %v8577_v32  ;;  %v9029_v25 = vld [vmem:[#allocation2 + $0x2d0] sm:$0xff]  ;;  %v9026_v32 = vld [vmem:[#allocation2 + $0x2b8] sm:$0xff] }
 0x5c9   :  { %8745 = vmatpush.msrb.mxu2 %v8554_v12  ;;  %8760 = vmatpush.msrb.mxu3 %v8570_v55 }
 0x5ca   :  { %8724 = vmatpush.msrb.mxu1 %v8578_v43  ;;  %v9023_v43 = vld [vmem:[#allocation2 + $0x2a0] sm:$0xff] }
 0x5cb   :  { %8746 = vmatpush.msrb.mxu2 %v14356_v62  ;;  %8761 = vmatpush.msrb.mxu3 %v8567_v7 }
 0x5cd   :  { %8762 = vmatpush.msrb.mxu3 %v8564_v18 }
 0x5cf   :  { %8763 = vmatpush.msrb.mxu3 %v8561_v61 }
 0x5d1   :  { %8764 = vmatpush.msrb.mxu3 %v8558_v15 }
 0x5d3   :  { %8765 = vmatpush.msrb.mxu3 %v8555_v44 }
 0x5d5   :  { %8766 = vmatpush.msrb.mxu3 %v8552_v14 }
 0x61e   :  { %v8392_v35 = vpop.f32.mrf.mxu0 }
 0x625   :  { %v8415_v47 = vpop.f32.mrf.mxu1 }
 0x627   :  { %v8484_v34 = vpop.f32.mrf.mxu0 }
 0x628   :  { %v14359_v13 = vmax.f32 %v8392_v35, %v8484_v34  ;;  %v9022_v35 = vld [vmem:[#allocation2 + $0x298] sm:$0xff] }
 0x629   :  { %v9018_v34 = vld [vmem:[#allocation2 + $0x278] sm:$0xff] }
 0x62a   :  { %v8601_v51 = vrot.slane %v14359_v13, 1 }
 0x62c   :  { %10172 = vmatmul.msk.f32.vlgmr.msra.gmra.mxu0 %vm8602_vm8, %v8601_v51  ;;  %10173 = vmatmul.msk.f32.vlgmr.msra.gmra.mxu1 %vm8602_vm8, %v8601_v51 }
 0x62d   :  { %10174 = vmatmul.msk.f32.vlgmr.msra.gmra.mxu2 %vm8602_vm8, %v8601_v51  ;;  %8779 = vmatpush.msra.mxu0 %v8574_v5  ;;  %v8438_v60 = vpop.f32.mrf.mxu2  ;;  %v8504_v37 = vpop.f32.mrf.mxu1  ;;  %v9015_v51 = vld [vmem:[#allocation2 + $0x260] sm:$0xff] }
 0x62e   :  { %8801 = vmatpush.msra.mxu1 %v14349_v28  ;;  %8821 = vmatpush.msra.mxu2 %v8573_v3  ;;  %v8548_v58 = vmax.f32 %v8415_v47, %v8504_v37  ;;  %v9020_v28 = vld [vmem:[#allocation2 + $0x288] sm:$0xff]  ;;  %v9034_v3 = vld [vmem:[#allocation2 + $0x2f8] sm:$0xff]  ;;  %v9213_v37 = vld [vmem:[%s14596_s9 + $0x20] sm:$0xff] }
 0x62f   :  { %8780 = vmatpush.msra.mxu0 %v8571_v21 }
 0x630   :  { %8802 = vmatpush.msra.mxu1 %v8569_v1  ;;  %8822 = vmatpush.msra.mxu2 %v8570_v55  ;;  %v9017_v1 = vld [vmem:[#allocation2 + $0x270] sm:$0xff]  ;;  %v9030_v55 = vld [vmem:[#allocation2 + $0x2d8] sm:$0xff] }
 0x631   :  { %8781 = vmatpush.msra.mxu0 %v8568_v29 }
 0x632   :  { %8803 = vmatpush.msra.mxu1 %v8566_v57  ;;  %8823 = vmatpush.msra.mxu2 %v8567_v7  ;;  %v9031_v7 = vld [vmem:[#allocation2 + $0x2e0] sm:$0xff] }
 0x633   :  { %8782 = vmatpush.msra.mxu0 %v8565_v45 }
 0x634   :  { %8804 = vmatpush.msra.mxu1 %v8563_v22  ;;  %8824 = vmatpush.msra.mxu2 %v8564_v18  ;;  %v9014_v22 = vld [vmem:[#allocation2 + $0x258] sm:$0xff]  ;;  %v9027_v18 = vld [vmem:[#allocation2 + $0x2c0] sm:$0xff] }
 0x635   :  { %10178 = vmatmul.msk.f32.vlgmr.msrb.gmra.mxu2 %vm8602_vm8, %v14359_v13  ;;  %8783 = vmatpush.msra.mxu0 %v8562_v2  ;;  %v8524_v42 = vpop.f32.mrf.mxu2 }
 0x636   :  { %8805 = vmatpush.msra.mxu1 %v8560_v36  ;;  %8825 = vmatpush.msra.mxu2 %v8561_v61  ;;  %v14372_v11 = vmax.f32 %v8438_v60, %v8524_v42  ;;  %v8461_v20 = vpop.f32.mrf.mxu3  ;;  %v9028_v61 = vld [vmem:[#allocation2 + $0x2c8] sm:$0xff]  ;;  %v9013_v60 = vld [vmem:[#allocation2 + $0x250] sm:$0xff] }
 0x637   :  { %8784 = vmatpush.msra.mxu0 %v14366_v30 }
 0x638   :  { %8806 = vmatpush.msra.mxu1 %v8557_v49  ;;  %8826 = vmatpush.msra.mxu2 %v8558_v15  ;;  %v8666_v23 = vrot.slane %v14372_v11, 1  ;;  %v9011_v49 = vld [vmem:[#allocation2 + $0x240] sm:$0xff]  ;;  %v9024_v15 = vld [vmem:[#allocation2 + $0x2a8] sm:$0xff] }
 0x639   :  { %8785 = vmatpush.msra.mxu0 %v14370_v31 }
 0x63a   :  { %8807 = vmatpush.msra.mxu1 %v8554_v12  ;;  %8827 = vmatpush.msra.mxu2 %v8555_v44  ;;  %v9033_v12 = vld [vmem:[#allocation2 + $0x2f0] sm:$0xff] }
 0x63b   :  { %10175 = vmatmul.msk.f32.vlgmr.msra.gmra.mxu3 %vm8602_vm8, %v8666_v23  ;;  %10176 = vmatmul.msk.f32.vlgmr.msrb.gmra.mxu0 %vm8602_vm8, %v8666_v23  ;;  %v9025_v44 = vld [vmem:[#allocation2 + $0x2b0] sm:$0xff] }
 0x63c   :  { %10177 = vmatmul.msk.f32.vlgmr.msrb.gmra.mxu1 %vm8602_vm8, %v8666_v23  ;;  %8786 = vmatpush.msra.mxu0 %v14377_v8  ;;  %v9224_v23 = vld [vmem:[%s14596_s9 + $0x78] sm:$0xff] }
 0x63d   :  { %8808 = vmatpush.msra.mxu1 %v14356_v62  ;;  %8828 = vmatpush.msra.mxu2 %v8552_v14  ;;  %v9035_v62 = vrot.slane %v8548_v58, 1  ;;  %v9021_v14 = vld [vmem:[#allocation2 + $0x290] sm:$0xff] }
 0x63e   :  { %8841 = vmatpush.msra.mxu3 %v8574_v5  ;;  %8889 = vmatpush.msrb.mxu0 %v14381_v17  ;;  %v8544_v57 = vpop.f32.mrf.mxu3  ;;  %v9016_v5 = vld [vmem:[#allocation2 + $0x268] sm:$0xff] }
 0x63f   :  { %8909 = vmatpush.msrb.mxu1 %v14385_v6  ;;  %8929 = vmatpush.msrb.mxu2 %v14387_v50  ;;  %v8550_v36 = vmax.f32 %v8461_v20, %v8544_v57 }
 0x640   :  { %10182 = vmatmul.msk.f32.vlgmr.msra.gmra.mxu2 %vm8602_vm8, %v14372_v11  ;;  %8842 = vmatpush.msra.mxu3 %v8571_v21  ;;  %v9012_v21 = vld [vmem:[#allocation2 + $0x248] sm:$0xff] }
 0x641   :  { %8890 = vmatpush.msrb.mxu0 %v14391_v9  ;;  %8910 = vmatpush.msrb.mxu1 %v14393_v56 }
 0x642   :  { %8930 = vmatpush.msrb.mxu2 %v14397_v48  ;;  %8843 = vmatpush.msra.mxu3 %v8568_v29  ;;  %v9098_v29 = vrot.slane %v8550_v36, 1 }
 0x643   :  { %8891 = vmatpush.msrb.mxu0 %v14401_v24  ;;  %8911 = vmatpush.msrb.mxu1 %v14403_v27 }
 0x644   :  { %8931 = vmatpush.msrb.mxu2 %v14407_v38  ;;  %8844 = vmatpush.msra.mxu3 %v8565_v45 }
 0x645   :  { %8892 = vmatpush.msrb.mxu0 %v14410_v46  ;;  %8912 = vmatpush.msrb.mxu1 %v14412_v4 }
 0x646   :  { %8932 = vmatpush.msrb.mxu2 %v8868_v53  ;;  %10179 = vmatmul.msk.f32.vlgmr.msrb.gmra.mxu3 %vm8602_vm8, %v14359_v13 }
 0x647   :  { %10180 = vmatmul.msk.f32.vlgmr.msra.gmra.mxu0 %vm8602_vm8, %v14359_v13  ;;  %10181 = vmatmul.msk.f32.vlgmr.msra.gmra.mxu1 %vm8602_vm8, %v14372_v11  ;;  %v9019_v13 = vld [vmem:[#allocation2 + $0x280] sm:$0xff] }
 0x648   :  { %8845 = vmatpush.msra.mxu3 %v8562_v2  ;;  %8893 = vmatpush.msrb.mxu0 %v8863_v16 }
 0x649   :  { %8913 = vmatpush.msrb.mxu1 %v8864_v26  ;;  %8933 = vmatpush.msrb.mxu2 %v8865_v63 }
 0x64a   :  { %8846 = vmatpush.msra.mxu3 %v14366_v30  ;;  %8894 = vmatpush.msrb.mxu0 %v8860_v10 }
 0x64b   :  { %8914 = vmatpush.msrb.mxu1 %v8861_v0  ;;  %8934 = vmatpush.msrb.mxu2 %v8862_v39 }
 0x64c   :  { %8847 = vmatpush.msra.mxu3 %v14370_v31  ;;  %8895 = vmatpush.msrb.mxu0 %v8857_v40 }
 0x64d   :  { %8915 = vmatpush.msrb.mxu1 %v8858_v41  ;;  %8935 = vmatpush.msrb.mxu2 %v8859_v54 }
 0x64e   :  { %8848 = vmatpush.msra.mxu3 %v14377_v8  ;;  %8896 = vmatpush.msrb.mxu0 %v8854_v19  ;;  %v9223_v8 = vld [vmem:[%s14596_s9 + $0x70] sm:$0xff] }
 0x64f   :  { %8916 = vmatpush.msrb.mxu1 %v8855_v59  ;;  %8936 = vmatpush.msrb.mxu2 %v8856_v33 }
 0x650   :  { %8952 = vmatpush.msrb.mxu3 %v14381_v17  ;;  %10184 = vmatmul.msk.f32.vlgmr.msrb.gmra.mxu0 %vm8602_vm8, %v8548_v58 }
 0x651   :  { %10183 = vmatmul.msk.f32.vlgmr.msra.gmra.mxu3 %vm8602_vm8, %v14372_v11  ;;  %10185 = vmatmul.msk.f32.vlgmr.msrb.gmra.mxu1 %vm8602_vm8, %v8548_v58 }
 0x652   :  { %10186 = vmatmul.msk.f32.vlgmr.msrb.gmra.mxu2 %vm8602_vm8, %v8548_v58  ;;  %8972 = vmatpush.msra.mxu0 %v14385_v6  ;;  %v9222_v6 = vld [vmem:[%s14596_s9 + $0x68] sm:$0xff]  ;;  %v9212_v58 = vld [vmem:[%s14596_s9 + $0x18] sm:$0xff] }
 0x653   :  { %8992 = vmatpush.msra.mxu1 %v14387_v50  ;;  %9046 = vmatpush.msra.mxu2 %v9032_v52  ;;  %v9221_v50 = vld [vmem:[%s14596_s9 + $0x60] sm:$0xff] }
 0x654   :  { %8953 = vmatpush.msrb.mxu3 %v14391_v9  ;;  %8973 = vmatpush.msra.mxu0 %v14393_v56  ;;  %v9220_v56 = vld [vmem:[%s14596_s9 + $0x58] sm:$0xff] }
 0x655   :  { %8993 = vmatpush.msra.mxu1 %v14397_v48  ;;  %9047 = vmatpush.msra.mxu2 %v9029_v25 }
 0x656   :  { %8954 = vmatpush.msrb.mxu3 %v14401_v24  ;;  %8974 = vmatpush.msra.mxu0 %v14403_v27  ;;  %v9219_v24 = vld [vmem:[%s14596_s9 + $0x50] sm:$0xff]  ;;  %v9218_v27 = vld [vmem:[%s14596_s9 + $0x48] sm:$0xff] }
 0x657   :  { %8994 = vmatpush.msra.mxu1 %v14407_v38  ;;  %9048 = vmatpush.msra.mxu2 %v9026_v32 }
 0x658   :  { %8955 = vmatpush.msrb.mxu3 %v14410_v46  ;;  %8975 = vmatpush.msra.mxu0 %v14412_v4  ;;  %v9217_v46 = vld [vmem:[%s14596_s9 + $0x40] sm:$0xff] }
 0x659   :  { %8995 = vmatpush.msra.mxu1 %v8868_v53  ;;  %9049 = vmatpush.msra.mxu2 %v9023_v43  ;;  %v9216_v53 = vld [vmem:[%s14596_s9 + $0x38] sm:$0xff] }
 0x65a   :  { %8956 = vmatpush.msrb.mxu3 %v8863_v16  ;;  %8976 = vmatpush.msra.mxu0 %v8864_v26  ;;  %v9215_v16 = vld [vmem:[%s14596_s9 + $0x30] sm:$0xff] }
 0x65b   :  { %8996 = vmatpush.msra.mxu1 %v8865_v63  ;;  %9050 = vmatpush.msra.mxu2 %v9020_v28 }
 0x65c   :  { %8957 = vmatpush.msrb.mxu3 %v8860_v10  ;;  %8977 = vmatpush.msra.mxu0 %v8861_v0  ;;  %v14498_v10 = vld [vmem:[%s14595_s8] sm:$0x7]  ;;  %v9214_v0 = vld [vmem:[%s14596_s9 + $0x28] sm:$0xff] }
 0x65d   :  { %8997 = vmatpush.msra.mxu1 %v8862_v39  ;;  %9051 = vmatpush.msra.mxu2 %v9017_v1 }
 0x65e   :  { %8958 = vmatpush.msrb.mxu3 %v8857_v40  ;;  %8978 = vmatpush.msra.mxu0 %v8858_v41 }
 0x65f   :  { %8998 = vmatpush.msra.mxu1 %v8859_v54  ;;  %9052 = vmatpush.msra.mxu2 %v9014_v22  ;;  %v9169_v54 = vperm.slane %v14498_v10, 0 }
 0x660   :  { %8959 = vmatpush.msrb.mxu3 %v8854_v19  ;;  %8979 = vmatpush.msra.mxu0 %v8855_v59 }
 0x661   :  { %10187 = vmatmul.msk.f32.vlgmr.msrb.gmra.mxu3 %vm8602_vm8, %v8550_v36  ;;  %8999 = vmatpush.msra.mxu1 %v8856_v33  ;;  %v9211_v33 = vld [vmem:[%s14596_s9 + $0x10] sm:$0xff] }
 0x662   :  { %9053 = vmatpush.msra.mxu2 %v9011_v49  ;;  %9066 = vmatpush.msra.mxu3 %v9033_v12 }
 0x663   :  { %10188 = vmatmul.msk.f32.vlgmr.msra.gmra.mxu0 %vm8602_vm8, %v8550_v36  ;;  %10189 = vmatmul.msk.f32.vlgmr.msra.gmra.mxu1 %vm8602_vm8, %v8550_v36 }
 0x664   :  { %10190 = vmatmul.msk.f32.vlgmr.msra.gmra.mxu2 %vm8602_vm8, %v9035_v62  ;;  %9086 = vmatpush.msrb.mxu0 %v9034_v3 }
 0x665   :  { %9109 = vmatpush.msrb.mxu1 %v9032_v52  ;;  %9129 = vmatpush.msrb.mxu2 %v9033_v12 }
 0x666   :  { %9067 = vmatpush.msra.mxu3 %v9030_v55  ;;  %9087 = vmatpush.msrb.mxu0 %v9031_v7 }
 0x667   :  { %9110 = vmatpush.msrb.mxu1 %v9029_v25  ;;  %9130 = vmatpush.msrb.mxu2 %v9030_v55 }
 0x668   :  { %9068 = vmatpush.msra.mxu3 %v9027_v18  ;;  %9088 = vmatpush.msrb.mxu0 %v9028_v61 }
 0x669   :  { %9111 = vmatpush.msrb.mxu1 %v9026_v32  ;;  %9131 = vmatpush.msrb.mxu2 %v9027_v18  ;;  %v9210_v32 = vld [vmem:[%s14596_s9 + $0x8] sm:$0xff] }
 0x66a   :  { %9069 = vmatpush.msra.mxu3 %v9024_v15  ;;  %9089 = vmatpush.msrb.mxu0 %v9025_v44 }
 0x66b   :  { %9112 = vmatpush.msrb.mxu1 %v9023_v43  ;;  %9132 = vmatpush.msrb.mxu2 %v9024_v15 }
 0x66c   :  { %9070 = vmatpush.msra.mxu3 %v9021_v14  ;;  %9090 = vmatpush.msrb.mxu0 %v9022_v35 }
 0x66d   :  { %9113 = vmatpush.msrb.mxu1 %v9020_v28  ;;  %9133 = vmatpush.msrb.mxu2 %v9021_v14  ;;  %v9209_v28 = vld [vmem:[%s14596_s9] sm:$0xff] }
 0x66e   :  { %9071 = vmatpush.msra.mxu3 %v9018_v34  ;;  %9091 = vmatpush.msrb.mxu0 %v9019_v13 }
 0x66f   :  { %9114 = vmatpush.msrb.mxu1 %v9017_v1  ;;  %9134 = vmatpush.msrb.mxu2 %v9018_v34 }
 0x670   :  { %9072 = vmatpush.msra.mxu3 %v9015_v51  ;;  %9092 = vmatpush.msrb.mxu0 %v9016_v5 }
 0x671   :  { %9115 = vmatpush.msrb.mxu1 %v9014_v22  ;;  %9135 = vmatpush.msrb.mxu2 %v9015_v51 }
 0x672   :  { %9073 = vmatpush.msra.mxu3 %v9012_v21  ;;  %9093 = vmatpush.msrb.mxu0 %v9013_v60 }
 0x673   :  { %10191 = vmatmul.msk.f32.vlgmr.msra.gmra.mxu3 %vm8602_vm8, %v9035_v62  ;;  %9116 = vmatpush.msrb.mxu1 %v9011_v49 }
 0x674   :  { %9136 = vmatpush.msrb.mxu2 %v9012_v21  ;;  %9149 = vmatpush.msrb.mxu3 %v9034_v3  ;;  %v9171_v3 = vperm.slane %v14498_v10, 2 }
 0x675   :  { %10192 = vmatmul.msk.f32.vlgmr.msrb.gmra.mxu0 %vm8602_vm8, %v9035_v62  ;;  %10193 = vmatmul.msk.f32.vlgmr.msrb.gmra.mxu1 %vm8602_vm8, %v9098_v29 }
 0x676   :  { %10194 = vmatmul.msk.f32.vlgmr.msrb.gmra.mxu2 %vm8602_vm8, %v9098_v29  ;;  %9150 = vmatpush.msrb.mxu3 %v9031_v7 }
 0x677   :  { %9226 = vmatpush.msra.mxu0 %v9224_v23  ;;  %9246 = vmatpush.msra.mxu1 %v9224_v23 }
 0x678   :  { %9151 = vmatpush.msrb.mxu3 %v9028_v61 }
 0x679   :  { %9227 = vmatpush.msra.mxu0 %v9223_v8  ;;  %9247 = vmatpush.msra.mxu1 %v9223_v8 }
 0x67a   :  { %9152 = vmatpush.msrb.mxu3 %v9025_v44 }
 0x67b   :  { %9228 = vmatpush.msra.mxu0 %v9222_v6  ;;  %9248 = vmatpush.msra.mxu1 %v9222_v6  ;;  %v9282_v6 = vld [vmem:[%s14598_s11 + $0x70] sm:$0xff] }
 0x67c   :  { %9153 = vmatpush.msrb.mxu3 %v9022_v35  ;;  %v9170_v35 = vperm.slane %v14498_v10, 1  ;;  %v9278_v10 = vld [vmem:[%s14598_s11 + $0x50] sm:$0xff] }
 0x67d   :  { %9229 = vmatpush.msra.mxu0 %v9221_v50  ;;  %9249 = vmatpush.msra.mxu1 %v9221_v50 }
 0x67e   :  { %9154 = vmatpush.msrb.mxu3 %v9019_v13 }
 0x67f   :  { %9230 = vmatpush.msra.mxu0 %v9220_v56  ;;  %9250 = vmatpush.msra.mxu1 %v9220_v56 }
 0x680   :  { %9155 = vmatpush.msrb.mxu3 %v9016_v5 }
 0x681   :  { %9231 = vmatpush.msra.mxu0 %v9219_v24  ;;  %9251 = vmatpush.msra.mxu1 %v9219_v24 }
 0x682   :  { %9156 = vmatpush.msrb.mxu3 %v9013_v60 }
 0x683   :  { %10195 = vmatmul.msk.f32.vlgmr.msrb.gmra.mxu3 %vm8602_vm8, %v9098_v29  ;;  %9232 = vmatpush.msra.mxu0 %v9218_v27 }
 0x684   :  { %9252 = vmatpush.msra.mxu1 %v9218_v27 }
 0x685   :  { %9233 = vmatpush.msra.mxu0 %v9217_v46 }
 0x686   :  { %9253 = vmatpush.msra.mxu1 %v9217_v46  ;;  %v9280_v46 = vld [vmem:[%s14598_s11 + $0x60] sm:$0xff] }
 0x687   :  { %9234 = vmatpush.msra.mxu0 %v9216_v53 }
 0x688   :  { %9254 = vmatpush.msra.mxu1 %v9216_v53 }
 0x689   :  { %9235 = vmatpush.msra.mxu0 %v9215_v16 }
 0x68a   :  { %9255 = vmatpush.msra.mxu1 %v9215_v16  ;;  %v9279_v16 = vld [vmem:[%s14598_s11 + $0x58] sm:$0xff] }
 0x68b   :  { %9236 = vmatpush.msra.mxu0 %v9214_v0 }
 0x68c   :  { %9256 = vmatpush.msra.mxu1 %v9214_v0 }
 0x68d   :  { %9237 = vmatpush.msra.mxu0 %v9213_v37 }
 0x68e   :  { %9257 = vmatpush.msra.mxu1 %v9213_v37  ;;  %v9277_v37 = vld [vmem:[%s14598_s11 + $0x48] sm:$0xff] }
 0x68f   :  { %9238 = vmatpush.msra.mxu0 %v9212_v58 }
 0x690   :  { %9258 = vmatpush.msra.mxu1 %v9212_v58  ;;  %v9275_v58 = vld [vmem:[%s14598_s11 + $0x38] sm:$0xff] }
 0x691   :  { %9239 = vmatpush.msra.mxu0 %v9211_v33 }
 0x692   :  { %9259 = vmatpush.msra.mxu1 %v9211_v33  ;;  %v9274_v33 = vld [vmem:[%s14598_s11 + $0x30] sm:$0xff] }
 0x693   :  { %9240 = vmatpush.msra.mxu0 %v9210_v32 }
 0x694   :  { %9260 = vmatpush.msra.mxu1 %v9210_v32 }
 0x695   :  { %9241 = vmatpush.msra.mxu0 %v9209_v28 }
 0x696   :  { %9261 = vmatpush.msra.mxu1 %v9209_v28 }
 0x6a9   :  { %v8622_v2 = vpop.f32.mrf.mxu0  ;;  %v14455_v30 = vpop.f32.mrf.mxu1 }
 0x6b0   :  { %v14453_v45 = vpop.f32.mrf.mxu2 }
 0x6b8   :  { %v8748_v42 = vpop.f32.mrf.mxu2  ;;  %v14457_v31 = vpop.f32.mrf.mxu0 }
 0x6b9   :  { %v14459_v11 = vpop.f32.mrf.mxu1  ;;  %v8749_v39 = vadd.f32 %v8748_v42, %v8622_v2 }
 0x6be   :  { %v14467_v17 = vpop.f32.mrf.mxu3 }
 0x6c3   :  { %v14475_v9 = vpop.f32.mrf.mxu2 }
 0x6c4   :  { %v8788_v48 = vpop.f32.mrf.mxu0  ;;  %v8810_v47 = vpop.f32.mrf.mxu1  ;;  %v8831_v42 = vadd.f32 %v14475_v9, %v14457_v31  ;;  %v9281_v31 = vld [vmem:[%s14598_s11 + $0x68] sm:$0xff] }
 0x6c5   :  { %v8789_v22 = vadd.f32 %v8788_v48, %v14453_v45  ;;  %v8811_v36 = vadd.f32 %v8810_v47, %v14467_v17  ;;  %v9283_v17 = vld [vmem:[%s14598_s11 + $0x78] sm:$0xff] }
 0x6c6   :  { %9285 = vmatpush.msra.mxu2 %v9283_v17  ;;  %9305 = vmatpush.msra.mxu3 %v9283_v17 }
 0x6c8   :  { %9286 = vmatpush.msra.mxu2 %v9282_v6  ;;  %9306 = vmatpush.msra.mxu3 %v9282_v6 }
 0x6c9   :  { %v8768_v38 = vpop.f32.mrf.mxu3 }
 0x6ca   :  { %v8769_v49 = vadd.f32 %v8768_v38, %v14455_v30  ;;  %9287 = vmatpush.msra.mxu2 %v9281_v31  ;;  %9307 = vmatpush.msra.mxu3 %v9281_v31 }
 0x6cc   :  { %9288 = vmatpush.msra.mxu2 %v9280_v46  ;;  %9308 = vmatpush.msra.mxu3 %v9280_v46 }
 0x6cd   :  { %v8898_v26 = vpop.f32.mrf.mxu0 }
 0x6ce   :  { %v8918_v63 = vpop.f32.mrf.mxu1  ;;  %v9004_v40 = vadd.f32 %v8898_v26, %v8749_v39  ;;  %9289 = vmatpush.msra.mxu2 %v9279_v16  ;;  %9309 = vmatpush.msra.mxu3 %v9279_v16 }
 0x6cf   :  { %v9005_v15 = vadd.f32 %v8918_v63, %v8769_v49  ;;  %v9270_v49 = vld [vmem:[%s14598_s11 + $0x10] sm:$0xff] }
 0x6d0   :  { %9290 = vmatpush.msra.mxu2 %v9278_v10  ;;  %9310 = vmatpush.msra.mxu3 %v9278_v10 }
 0x6d2   :  { %9291 = vmatpush.msra.mxu2 %v9277_v37  ;;  %9311 = vmatpush.msra.mxu3 %v9277_v37 }
 0x6d4   :  { %v14506_v41 = vpop.f32.mrf.mxu3 }
 0x6d5   :  { %v8938_v4 = vpop.f32.mrf.mxu2  ;;  %v8851_v24 = vadd.f32 %v14506_v41, %v14459_v11 }
 0x6d6   :  { %v9006_v12 = vadd.f32 %v8938_v4, %v8789_v22 }
 0x6e0   :  { %v8981_v52 = vpop.f32.mrf.mxu0  ;;  %v9001_v20 = vpop.f32.mrf.mxu1 }
 0x6e1   :  { %v9008_v56 = vadd.f32 %v8981_v52, %v8831_v42  ;;  %v9009_v38 = vadd.f32 %v9001_v20, %v8851_v24 }
 0x6e4   :  { %v8961_v1 = vpop.f32.mrf.mxu3 }
 0x6e5   :  { %v9007_v62 = vadd.f32 %v8961_v1, %v8811_v36  ;;  %v9271_v1 = vld [vmem:[%s14598_s11 + $0x18] sm:$0xff] }
 0x6e7   :  { %v9055_v19 = vpop.f32.mrf.mxu2 }
 0x6e8   :  { %v9161_v59 = vadd.f32 %v9055_v19, %v9004_v40  ;;  %v9276_v19 = vld [vmem:[%s14598_s11 + $0x40] sm:$0xff] }
 0x6e9   :  { %9292 = vmatpush.msra.mxu2 %v9276_v19  ;;  %9312 = vmatpush.msra.mxu3 %v9276_v19 }
 0x6ea   :  { %v9175_v25 = vadd.f32 %v9169_v54, %v9161_v59 }
 0x6eb   :  { %9293 = vmatpush.msra.mxu2 %v9275_v58  ;;  %9313 = vmatpush.msra.mxu3 %v9275_v58 }
 0x6ec   :  { %v9181_v43 = vsub.f32 0.0, %v9175_v25  ;;  %v9273_v25 = vld [vmem:[%s14598_s11 + $0x28] sm:$0xff] }
 0x6ed   :  { %9294 = vmatpush.msra.mxu2 %v9274_v33  ;;  %9314 = vmatpush.msra.mxu3 %v9274_v33 }
 0x6ee   :  { %v9183_v57 = vmul.f32 1.442695, %v9181_v43  ;;  %v9272_v43 = vld [vmem:[%s14598_s11 + $0x20] sm:$0xff] }
 0x6ef   :  { %9295 = vmatpush.msra.mxu2 %v9273_v25  ;;  %9315 = vmatpush.msra.mxu3 %v9273_v25 }
 0x6f0   :  { %10204 = vpow2.f32 %v9183_v57 }
 0x6f1   :  { %9296 = vmatpush.msra.mxu2 %v9272_v43  ;;  %9316 = vmatpush.msra.mxu3 %v9272_v43 }
 0x6f2   :  { %v9095_v55 = vpop.f32.mrf.mxu0  ;;  %v9118_v7 = vpop.f32.mrf.mxu1 }
 0x6f3   :  { %v9163_v18 = vadd.f32 %v9095_v55, %v9006_v12  ;;  %v9164_v61 = vadd.f32 %v9118_v7, %v9007_v62  ;;  %9297 = vmatpush.msra.mxu2 %v9271_v1  ;;  %9317 = vmatpush.msra.mxu3 %v9271_v1  ;;  %v9269_v12 = vld [vmem:[%s14598_s11 + $0x8] sm:$0xff]  ;;  %v9268_v62 = vld [vmem:[%s14598_s11] sm:$0xff]  ;;  %s10323_s11 = smov [#allocation5]  }
 0x6f4   :  { %s9331_s14 = sshll.u32 %s10323_s11, 4  ;;  %s9332_s14 = int_to_ptr.vmem [resolvable:$true] %s9331_s14 }
 0x6f5   :  { %v9177_v44 = vadd.f32 %v9171_v3, %v9163_v18  ;;  %v9178_v14 = vadd.f32 %v9169_v54, %v9164_v61  ;;  %9298 = vmatpush.msra.mxu2 %v9270_v49  ;;  %9318 = vmatpush.msra.mxu3 %v9270_v49 }
 0x6f6   :  { %v10205_v34 = vpop.eup %10204  ;;  %v9075_v13 = vpop.f32.mrf.mxu3 }
 0x6f7   :  { %v9187_v51 = vadd.f32 1.0, %v10205_v34  ;;  %v9193_v5 = vsub.f32 0.0, %v9177_v44  ;;  %v9182_v21 = vsub.f32 0.0, %v9178_v14  ;;  %v9162_v60 = vadd.f32 %v9075_v13, %v9005_v15  ;;  %9299 = vmatpush.msra.mxu2 %v9269_v12  ;;  %9319 = vmatpush.msra.mxu3 %v9269_v12  ;;  %v9284_v14 = vld [vmem:[%s14599_s12] sm:$0x1] }
 0x6f9   :  { %v9195_v29 = vmul.f32 1.442695, %v9193_v5  ;;  %v9185_v45 = vmul.f32 1.442695, %v9182_v21  ;;  %v9176_v2 = vadd.f32 %v9170_v35, %v9162_v60  ;;  %10206 = vrcp.f32 %v9187_v51  ;;  %v9138_v8 = vpop.f32.mrf.mxu2  ;;  %9300 = vmatpush.msra.mxu2 %v9268_v62  ;;  %9320 = vmatpush.msra.mxu3 %v9268_v62 }
 0x6fa   :  { %v9165_v27 = vadd.f32 %v9138_v8, %v9008_v56 }
 0x6fb   :  { %10208 = vpow2.f32 %v9195_v29 }
 0x6fc   :  { %10210 = vpow2.f32 %v9185_v45  ;;  %v9179_v26 = vadd.f32 %v9170_v35, %v9165_v27 }
 0x6fd   :  { %10212 = vtanh.f32 %v9176_v2 }
 0x6ff   :  { %v10207_v30 = vpop.eup %10206 }
 0x701   :  { %v10209_v23 = vpop.eup %10208 }
 0x702   :  { %v10211_v50 = vpop.eup %10210  ;;  %v9199_v48 = vadd.f32 1.0, %v10209_v23 }
 0x703   :  { %v10213_v47 = vpop.eup %10212  ;;  %v9188_v4 = vadd.f32 1.0, %v10211_v50 }
 0x704   :  { %10214 = vrcp.f32 %v9199_v48  ;;  %v9203_v9 = vmul.f32 %v10213_v47, %v10207_v30 }
 0x706   :  { %10216 = vtanh.f32 %v9203_v9  ;;  %v9158_v53 = vpop.f32.mrf.mxu3 }
 0x707   :  { %v9166_v11 = vadd.f32 %v9158_v53, %v9009_v38  ;;  %10218 = vrcp.f32 %v9188_v4 }
 0x708   :  { %10220 = vtanh.f32 %v9179_v26 }
 0x709   :  { %v9180_v63 = vadd.f32 %v9171_v3, %v9166_v11  ;;  %v9225_v3 = vld [vmem:[%s14597_s10] sm:$0x1]  ;;  %s9333_s10 = sshll.u32 %s14600_s13, 4  ;;  %s9334_s10 = int_to_ptr.hbm [resolvable:$true] %s9333_s10 }
 0x70a   :  { %v10215_v0 = vpop.eup %10214 }
 0x70b   :  { %v9194_v39 = vsub.f32 0.0, %v9180_v63 }
 0x70c   :  { %v10217_v40 = vpop.eup %10216 }
 0x70d   :  { %v9197_v41 = vmul.f32 1.442695, %v9194_v39  ;;  %v9207_v54 = vmul.f32 %v10217_v40, %v10215_v0  ;;  %v10219_v59 = vpop.eup %10218 }
 0x70e   :  { %v10221_v52 = vpop.eup %10220 }
 0x70f   :  { %10222 = vpow2.f32 %v9197_v41  ;;  %9242 = vmatmul.f32.vlgmr.msra.gmra.mxu0 %v9207_v54  ;;  %v9204_v20 = vmul.f32 %v10221_v52, %v10219_v59 }
 0x711   :  { %10224 = vtanh.f32 %v9204_v20 }
 0x715   :  { %v10223_v32 = vpop.eup %10222 }
 0x716   :  { %v9200_v28 = vadd.f32 1.0, %v10223_v32 }
 0x717   :  { %v10225_v57 = vpop.eup %10224 }
 0x718   :  { %10226 = vrcp.f32 %v9200_v28 }
 0x71e   :  { %v10227_v22 = vpop.eup %10226 }
 0x71f   :  { %v9208_v36 = vmul.f32 %v10227_v22, %v10225_v57 }
 0x721   :  { %9262 = vmatmul.f32.vlgmr.msra.gmra.mxu1 %v9208_v36 }
 0x78c   :  { %v9243_v55 = vpop.f32.mrf.mxu0 }
 0x78d   :  { %v9244_v7 = vadd.f32 %v9243_v55, %v9225_v3 }
 0x78f   :  { %v9266_v18 = vmax.f32 %v9244_v7, 0.0 }
 0x791   :  { %9301 = vmatmul.f32.vlgmr.msra.gmra.mxu2 %v9266_v18 }
 0x79e   :  { %v9263_v61 = vpop.f32.mrf.mxu1 }
 0x79f   :  { %v9264_v15 = vadd.f32 %v9263_v61, %v9225_v3 }
 0x7a1   :  { %v9267_v44 = vmax.f32 %v9264_v15, 0.0 }
 0x7a3   :  { %9321 = vmatmul.f32.vlgmr.msra.gmra.mxu3 %v9267_v44 }
 0x814   :  { %v9302_v35 = vpop.f32.mrf.mxu2 }
 0x815   :  { %v9303_v34 = vadd.f32 %v9302_v35, %v9284_v14 }
 0x817   :  { %9325 = vst [vmem:[#allocation5] sm:$0x1] %v9303_v34 }
 0x826   :  { %v9322_v13 = vpop.f32.mrf.mxu3 }
 0x827   :  { %v9323_v51 = vadd.f32 %v9322_v13, %v9284_v14 }
 0x829   :  { %9326 = vst [vmem:[#allocation5 + $0x1] sm:$0x1] %v9323_v51 }
 0x82a   :  { %9339 = dma.vmem_to_hbm [thread:$0]  %s9332_s14, 32, %s9334_s10, [#allocation4], %s10324_s3, %s10324_s3, %s10325_s17  }
 0x82b   :  { %10318 = dma.done.wait [#allocation4], 32  }
 0x82c   :  { %10319 = vsyncadd [#allocation4], 4294967264 }
 0x82d   :  { %9344 = vsyncpa [#allocation3], 1 }
 0x82e   :  { %9345 = vsyncpa [#allocation4], 1 }

</bundles_post_ra>
